<compile_context>
chip_gen: v7x
topology: tpu7x:2x2x1
jax: 0.10.0
libtpu: 0.0.40
codegen_flags: <defaults>
</compile_context>

<pallas_src>
import jax
import jax.numpy as jnp
import numpy as np
from jax.experimental import pallas as pl
from jax.experimental.pallas import tpu as pltpu

# Model dims from MyVariableRNN.__init__
FC_SIZE = 32
RNN_SIZE = 64
NUM_LAYERS = 3
NUM_CLASSES = 2

# Padded (lane-aligned) sizes used inside the kernel.
HID_PAD = 128    # hidden/input feature width carried through the kernel
GATE_PAD = 128   # per-gate column width (4 gates -> 512 columns)


def _rnn_kernel(x_ref, len_ref, fc1w_ref, fc1b_ref, wih0_ref, b0_ref, whh0_ref,
                wcat1_ref, bcat1_ref, wcat2_ref, bcat2_ref, fc2w_ref, fc2b_ref,
                out_ref, xc_ref):
    """fc1+ReLU -> wavefront 3-layer variable-length LSTM -> fc2, in one kernel."""
    T, B, Din = x_ref.shape
    HP, GP = HID_PAD, GATE_PAD
    L = NUM_LAYERS

    # ---- hoisted, non-recurrent work --------------------------------------
    # fc1 + ReLU and the layer-0 input projection as two batched (T*B)-row
    # MXU matmuls.  Dropout (p=0.5) is identity at inference.
    x_flat = x_ref[...].reshape(T * B, Din)                  # leading-dim merge (layout-free)
    y = jnp.maximum(
        jnp.dot(x_flat, fc1w_ref[...], preferred_element_type=jnp.float32)
        + fc1b_ref[...], 0.0)                                # (T*B, HP); pad lanes exactly 0
    xc_ref[...] = (jnp.dot(y, wih0_ref[...], preferred_element_type=jnp.float32)
                   + b0_ref[...]).reshape(T, B, 4 * GP)      # layer-0 x@Wih+b, all timesteps

    # Per-timestep validity masks, lane-widened ONCE and reused by every where.
    lengths = len_ref[...]                                   # (B, 1) int32
    masks = [jnp.broadcast_to(lengths > t, (B, HP)) for t in range(T)]

    # Fused [Wih; Whh] weights and hoisted bias broadcasts for layers 1..2.
    wcat = (wcat1_ref, wcat2_ref)                            # each (2*HP, 4*GP)
    bias = (jnp.broadcast_to(bcat1_ref[...], (B, 4 * GP)),
            jnp.broadcast_to(bcat2_ref[...], (B, 4 * GP)))

    def cell(gates, c_prev):
        # gate order i, f, g, o; each slice is a full lane-aligned vreg block.
        i_g = jax.nn.sigmoid(gates[:, 0 * GP:1 * GP])
        f_g = jax.nn.sigmoid(gates[:, 1 * GP:2 * GP])
        g_g = jnp.tanh(gates[:, 2 * GP:3 * GP])
        o_g = jax.nn.sigmoid(gates[:, 3 * GP:4 * GP])
        c_new = f_g * c_prev + i_g * g_g
        h_new = o_g * jnp.tanh(c_new)
        return h_new, c_new

    # ---- wavefront recurrence ----------------------------------------------
    # pack_padded_sequence semantics are reproduced by gating h/c updates with
    # (t < lengths[b]); zero-padded weight rows/cols keep padded lanes of h/c 0.
    h = [jnp.zeros((B, HP), jnp.float32) for _ in range(L)]
    c = [jnp.zeros((B, HP), jnp.float32) for _ in range(L)]

    for s in range(T + L - 1):                               # fully unrolled (static, small)
        # Layer l>0 at time t = s-l consumes the previous layer's output at
        # time t, i.e. h[l-1] as it stands at the START of this step.
        x_in = (None, h[0], h[1])                            # snapshot before updates
        h_nxt, c_nxt = list(h), list(c)
        for l in range(L):
            t = s - l
            if not (0 <= t < T):
                continue
            if l == 0:
                gates = (jnp.dot(h[0], whh0_ref[...],
                                 preferred_element_type=jnp.float32) + xc_ref[t])
            else:
                xh = jnp.concatenate([x_in[l], h[l]], axis=-1)         # (B, 2*HP)
                gates = (jnp.dot(xh, wcat[l - 1][...],
                                 preferred_element_type=jnp.float32) + bias[l - 1])
            h_new, c_new = cell(gates, c[l])
            m = masks[t]                                     # (B, HP) bool, prebuilt
            h_nxt[l] = jnp.where(m, h_new, h[l])
            c_nxt[l] = jnp.where(m, c_new, c[l])
        h, c = h_nxt, c_nxt

    # fc2 on the last layer's final hidden state (== h_n[-1] of the packed LSTM)
    out_ref[...] = (jnp.dot(h[L - 1], fc2w_ref[...],
                            preferred_element_type=jnp.float32) + fc2b_ref[...])


def my_variable_rnn_forward(seqs, lengths, params):
    """seqs: (B, T, Din) batch-first float32; lengths: (B,) int; returns (B, 2)."""
    B, T, Din = seqs.shape
    x_t = jnp.transpose(seqs, (1, 0, 2)).astype(jnp.float32)   # time-major for the kernel
    len2d = lengths.astype(jnp.int32).reshape(B, 1)

    in_arrays = (x_t, len2d) + tuple(params)
    in_specs = [pl.BlockSpec(a.shape, lambda i, nd=a.ndim: (0,) * nd) for a in in_arrays]

    return pl.pallas_call(
        _rnn_kernel,
        out_shape=jax.ShapeDtypeStruct((B, NUM_CLASSES), jnp.float32),
        grid_spec=pltpu.PrefetchScalarGridSpec(
            num_scalar_prefetch=0,
            grid=(1,),
            in_specs=in_specs,
            out_specs=pl.BlockSpec((B, NUM_CLASSES), lambda i: (0, 0)),
            scratch_shapes=[pltpu.VMEM((T, B, 4 * GATE_PAD), jnp.float32)],  # hoisted x@Wih0+b0
        ),
        compiler_params=pltpu.CompilerParams(dimension_semantics=("arbitrary",)),
    )(*in_arrays)


def reference_forward(seqs, lengths, raw):
    """Pure-JAX reference with unpadded weights (mirrors PyTorch eval forward)."""
    fc1_w, fc1_b, wih_list, whh_list, b_list, fc2_w, fc2_b = raw
    B, T, _ = seqs.shape
    H = RNN_SIZE
    inp = jnp.maximum(seqs @ fc1_w + fc1_b, 0.0)          # (B, T, FC)
    h = jnp.zeros((B, H), jnp.float32)
    for l in range(NUM_LAYERS):
        h = jnp.zeros((B, H), jnp.float32)
        c = jnp.zeros((B, H), jnp.float32)
        outs = []
        for t in range(T):
            gates = inp[:, t, :] @ wih_list[l] + h @ whh_list[l] + b_list[l]
            i_g = jax.nn.sigmoid(gates[:, :H])
            f_g = jax.nn.sigmoid(gates[:, H:2 * H])
            g_g = jnp.tanh(gates[:, 2 * H:3 * H])
            o_g = jax.nn.sigmoid(gates[:, 3 * H:])
            c_new = f_g * c + i_g * g_g
            h_new = o_g * jnp.tanh(c_new)
            valid = (t < lengths)[:, None]
            h = jnp.where(valid, h_new, h)
            c = jnp.where(valid, c_new, c)
            outs.append(h)
        inp = jnp.stack(outs, axis=1)
    return h @ fc2_w + fc2_b


def _pad_gate_cols(w):
    """(rows, 4*H) -> (rows, 4*GATE_PAD): gate g's H cols placed at g*GATE_PAD."""
    H, GP = RNN_SIZE, GATE_PAD
    out = jnp.zeros((w.shape[0], 4 * GP), jnp.float32)
    for g in range(4):
        out = out.at[:, g * GP:g * GP + H].set(w[:, g * H:(g + 1) * H])
    return out


def _pad_rows(w, rows_to):
    out = jnp.zeros((rows_to, w.shape[1]), jnp.float32)
    return out.at[:w.shape[0], :].set(w)


def pack_params(fc1_w, fc1_b, wih_list, whh_list, b_list, fc2_w, fc2_b):
    """Pad to lane-aligned kernel layout.  All padding is exact zeros."""
    HP = HID_PAD
    fc1_w_pad = jnp.zeros((fc1_w.shape[0], HP), jnp.float32).at[:, :FC_SIZE].set(fc1_w)
    fc1_b_pad = jnp.zeros((1, HP), jnp.float32).at[:, :FC_SIZE].set(fc1_b)
    wih0_pad = _pad_rows(_pad_gate_cols(wih_list[0]), HP)            # (128, 512)
    whh0_pad = _pad_rows(_pad_gate_cols(whh_list[0]), HP)            # (128, 512)
    b0_pad = _pad_gate_cols(b_list[0].reshape(1, -1))                # (1, 512)
    wcats, bcats = [], []
    for l in range(1, NUM_LAYERS):
        wih_p = _pad_rows(_pad_gate_cols(wih_list[l]), HP)           # (128, 512)
        whh_p = _pad_rows(_pad_gate_cols(whh_list[l]), HP)           # (128, 512)
        wcats.append(jnp.concatenate([wih_p, whh_p], axis=0))        # (256, 512) = [Wih; Whh]
        bcats.append(_pad_gate_cols(b_list[l].reshape(1, -1)))       # (1, 512)
    fc2_w_pad = _pad_rows(fc2_w, HP)                                 # (128, 2)
    return (fc1_w_pad, fc1_b_pad, wih0_pad, b0_pad, whh0_pad,
            wcats[0], bcats[0], wcats[1], bcats[1],
            fc2_w_pad, fc2_b.reshape(1, NUM_CLASSES))


if __name__ == "__main__":
    B, T, Din = 8, 8, 16
    H, FC = RNN_SIZE, FC_SIZE
    ks = jax.random.split(jax.random.PRNGKey(0), 20)

    def xavier(k, shape):
        fan_in, fan_out = shape
        a = float(np.sqrt(6.0 / (fan_in + fan_out)))
        return jax.random.uniform(k, shape, jnp.float32, -a, a)

    stdv = 1.0 / float(np.sqrt(H))
    fc1_w = xavier(ks[0], (Din, FC))                                   # stored (in, out)
    fc1_b = jax.random.uniform(ks[1], (FC,), jnp.float32, -stdv, stdv)
    fc2_w = xavier(ks[2], (H, NUM_CLASSES))
    fc2_b = jax.random.uniform(ks[3], (NUM_CLASSES,), jnp.float32, -stdv, stdv)

    wih_list, whh_list, b_list = [], [], []
    kidx = 4
    for l in range(NUM_LAYERS):
        in_sz = FC if l == 0 else H
        wih_list.append(jax.random.uniform(ks[kidx], (in_sz, 4 * H), jnp.float32, -stdv, stdv)); kidx += 1
        whh_list.append(jax.random.uniform(ks[kidx], (H, 4 * H), jnp.float32, -stdv, stdv)); kidx += 1
        b_ih = jax.random.uniform(ks[kidx], (4 * H,), jnp.float32, -stdv, stdv); kidx += 1
        b_hh = jax.random.uniform(ks[kidx], (4 * H,), jnp.float32, -stdv, stdv); kidx += 1
        b_list.append(b_ih + b_hh)

    params = pack_params(fc1_w, fc1_b, wih_list, whh_list, b_list, fc2_w, fc2_b)

    seqs = jax.random.normal(ks[16], (B, T, Din), jnp.float32)
    # lengths sorted descending, as required by pack_padded_sequence(enforce_sorted=True)
    lengths = jnp.array([8, 7, 6, 5, 4, 3, 3, 2], dtype=jnp.int32)

    out = jax.block_until_ready(my_variable_rnn_forward(seqs, lengths, params))

    ref = reference_forward(seqs, lengths,
                            (fc1_w, fc1_b, wih_list, whh_list, b_list, fc2_w, fc2_b))
    np.testing.assert_allclose(np.asarray(out), np.asarray(ref), rtol=1e-4, atol=1e-4)
    print("KERNEL_OK")
</pallas_src>

<mosaic_0001>
module attributes {stable_mosaic.version = 11 : i64} {
  func.func @_rnn_kernel(%arg0: i32, %arg1: memref<8x8x16xf32, #tpu.memory_space<vmem>>, %arg2: memref<8x1xi32, #tpu.memory_space<vmem>>, %arg3: memref<16x128xf32, #tpu.memory_space<vmem>>, %arg4: memref<1x128xf32, #tpu.memory_space<vmem>>, %arg5: memref<128x512xf32, #tpu.memory_space<vmem>>, %arg6: memref<1x512xf32, #tpu.memory_space<vmem>>, %arg7: memref<128x512xf32, #tpu.memory_space<vmem>>, %arg8: memref<256x512xf32, #tpu.memory_space<vmem>>, %arg9: memref<1x512xf32, #tpu.memory_space<vmem>>, %arg10: memref<256x512xf32, #tpu.memory_space<vmem>>, %arg11: memref<1x512xf32, #tpu.memory_space<vmem>>, %arg12: memref<128x2xf32, #tpu.memory_space<vmem>>, %arg13: memref<1x2xf32, #tpu.memory_space<vmem>>, %arg14: memref<8x2xf32, #tpu.memory_space<vmem>>, %arg15: memref<8x8x512xf32, #tpu.memory_space<vmem>>) attributes {dimension_semantics = [#tpu.dimension_semantics<arbitrary>], iteration_bounds = array<i64: 1>, scalar_prefetch = 0 : i64, scratch_operands = 1 : i64, tpu.core_type = #tpu.core_type<tc>, window_params = [{pipeline_mode = #tpu.pipeline_mode<synchronous>, transform_indices = @transform_0, window_bounds = array<i64: 8, 8, 16>}, {pipeline_mode = #tpu.pipeline_mode<synchronous>, transform_indices = @transform_1, window_bounds = array<i64: 8, 1>}, {pipeline_mode = #tpu.pipeline_mode<synchronous>, transform_indices = @transform_2, window_bounds = array<i64: 16, 128>}, {pipeline_mode = #tpu.pipeline_mode<synchronous>, transform_indices = @transform_3, window_bounds = array<i64: 1, 128>}, {pipeline_mode = #tpu.pipeline_mode<synchronous>, transform_indices = @transform_4, window_bounds = array<i64: 128, 512>}, {pipeline_mode = #tpu.pipeline_mode<synchronous>, transform_indices = @transform_5, window_bounds = array<i64: 1, 512>}, {pipeline_mode = #tpu.pipeline_mode<synchronous>, transform_indices = @transform_6, window_bounds = array<i64: 128, 512>}, {pipeline_mode = #tpu.pipeline_mode<synchronous>, transform_indices = @transform_7, window_bounds = array<i64: 256, 512>}, {pipeline_mode = #tpu.pipeline_mode<synchronous>, transform_indices = @transform_8, window_bounds = array<i64: 1, 512>}, {pipeline_mode = #tpu.pipeline_mode<synchronous>, transform_indices = @transform_9, window_bounds = array<i64: 256, 512>}, {pipeline_mode = #tpu.pipeline_mode<synchronous>, transform_indices = @transform_10, window_bounds = array<i64: 1, 512>}, {pipeline_mode = #tpu.pipeline_mode<synchronous>, transform_indices = @transform_11, window_bounds = array<i64: 128, 2>}, {pipeline_mode = #tpu.pipeline_mode<synchronous>, transform_indices = @transform_12, window_bounds = array<i64: 1, 2>}, {pipeline_mode = #tpu.pipeline_mode<synchronous>, transform_indices = @transform_13, window_bounds = array<i64: 8, 2>}]} {
    %c0 = arith.constant 0 : index
    %c0_0 = arith.constant 0 : index
    %c0_1 = arith.constant 0 : index
    %0 = vector.load %arg1[%c0, %c0_0, %c0_1] : memref<8x8x16xf32, #tpu.memory_space<vmem>>, vector<8x8x16xf32>
    %1 = vector.shape_cast %0 : vector<8x8x16xf32> to vector<64x16xf32>
    %c0_2 = arith.constant 0 : index
    %c0_3 = arith.constant 0 : index
    %2 = vector.load %arg3[%c0_2, %c0_3] : memref<16x128xf32, #tpu.memory_space<vmem>>, vector<16x128xf32>
    %cst = arith.constant dense<0.000000e+00> : vector<64x128xf32>
    %3 = tpu.matmul %1, %2, %cst {dimension_numbers = #tpu.dot_dimension_numbers<[1], [0], [0], [1], [0, 0, 1, 1], [], []>} : vector<64x16xf32>, vector<16x128xf32>, vector<64x128xf32> -> vector<64x128xf32>
    %c0_4 = arith.constant 0 : index
    %c0_5 = arith.constant 0 : index
    %4 = vector.load %arg4[%c0_4, %c0_5] : memref<1x128xf32, #tpu.memory_space<vmem>>, vector<1x128xf32>
    %5 = vector.broadcast %4 : vector<1x128xf32> to vector<64x128xf32>
    %6 = arith.addf %3, %5 : vector<64x128xf32>
    %cst_6 = arith.constant 0.000000e+00 : f32
    %7 = vector.broadcast %cst_6 : f32 to vector<64x128xf32>
    %8 = arith.maximumf %6, %7 : vector<64x128xf32>
    %c0_7 = arith.constant 0 : index
    %c0_8 = arith.constant 0 : index
    %9 = vector.load %arg5[%c0_7, %c0_8] : memref<128x512xf32, #tpu.memory_space<vmem>>, vector<128x512xf32>
    %cst_9 = arith.constant dense<0.000000e+00> : vector<64x512xf32>
    %10 = tpu.matmul %8, %9, %cst_9 {dimension_numbers = #tpu.dot_dimension_numbers<[1], [0], [0], [1], [0, 0, 1, 1], [], []>} : vector<64x128xf32>, vector<128x512xf32>, vector<64x512xf32> -> vector<64x512xf32>
    %c0_10 = arith.constant 0 : index
    %c0_11 = arith.constant 0 : index
    %11 = vector.load %arg6[%c0_10, %c0_11] : memref<1x512xf32, #tpu.memory_space<vmem>>, vector<1x512xf32>
    %12 = vector.broadcast %11 : vector<1x512xf32> to vector<64x512xf32>
    %13 = arith.addf %10, %12 : vector<64x512xf32>
    %14 = vector.shape_cast %13 : vector<64x512xf32> to vector<8x8x512xf32>
    %c0_12 = arith.constant 0 : index
    %c0_13 = arith.constant 0 : index
    %c0_14 = arith.constant 0 : index
    %15 = vector.load %arg15[%c0_12, %c0_13, %c0_14] : memref<8x8x512xf32, #tpu.memory_space<vmem>>, vector<8x8x512xf32>
    tpu.vector_store %arg15[%c0_12, %c0_13, %c0_14], %14 {strides = array<i32>} : memref<8x8x512xf32, #tpu.memory_space<vmem>>, vector<8x8x512xf32>,
    %c0_15 = arith.constant 0 : index
    %c0_16 = arith.constant 0 : index
    %16 = vector.load %arg2[%c0_15, %c0_16] : memref<8x1xi32, #tpu.memory_space<vmem>>, vector<8x1xi32>
    %c0_i32 = arith.constant 0 : i32
    %17 = vector.broadcast %c0_i32 : i32 to vector<8x1xi32>
    %18 = arith.cmpi sgt, %16, %17 : vector<8x1xi32>
    %19 = vector.shape_cast %18 : vector<8x1xi1> to vector<8x1xi1>
    %20 = vector.broadcast %19 : vector<8x1xi1> to vector<8x128xi1>
    %c1_i32 = arith.constant 1 : i32
    %21 = vector.broadcast %c1_i32 : i32 to vector<8x1xi32>
    %22 = arith.cmpi sgt, %16, %21 : vector<8x1xi32>
    %23 = vector.shape_cast %22 : vector<8x1xi1> to vector<8x1xi1>
    %24 = vector.broadcast %23 : vector<8x1xi1> to vector<8x128xi1>
    %c2_i32 = arith.constant 2 : i32
    %25 = vector.broadcast %c2_i32 : i32 to vector<8x1xi32>
    %26 = arith.cmpi sgt, %16, %25 : vector<8x1xi32>
    %27 = vector.shape_cast %26 : vector<8x1xi1> to vector<8x1xi1>
    %28 = vector.broadcast %27 : vector<8x1xi1> to vector<8x128xi1>
    %c3_i32 = arith.constant 3 : i32
    %29 = vector.broadcast %c3_i32 : i32 to vector<8x1xi32>
    %30 = arith.cmpi sgt, %16, %29 : vector<8x1xi32>
    %31 = vector.shape_cast %30 : vector<8x1xi1> to vector<8x1xi1>
    %32 = vector.broadcast %31 : vector<8x1xi1> to vector<8x128xi1>
    %c4_i32 = arith.constant 4 : i32
    %33 = vector.broadcast %c4_i32 : i32 to vector<8x1xi32>
    %34 = arith.cmpi sgt, %16, %33 : vector<8x1xi32>
    %35 = vector.shape_cast %34 : vector<8x1xi1> to vector<8x1xi1>
    %36 = vector.broadcast %35 : vector<8x1xi1> to vector<8x128xi1>
    %c5_i32 = arith.constant 5 : i32
    %37 = vector.broadcast %c5_i32 : i32 to vector<8x1xi32>
    %38 = arith.cmpi sgt, %16, %37 : vector<8x1xi32>
    %39 = vector.shape_cast %38 : vector<8x1xi1> to vector<8x1xi1>
    %40 = vector.broadcast %39 : vector<8x1xi1> to vector<8x128xi1>
    %c6_i32 = arith.constant 6 : i32
    %41 = vector.broadcast %c6_i32 : i32 to vector<8x1xi32>
    %42 = arith.cmpi sgt, %16, %41 : vector<8x1xi32>
    %43 = vector.shape_cast %42 : vector<8x1xi1> to vector<8x1xi1>
    %44 = vector.broadcast %43 : vector<8x1xi1> to vector<8x128xi1>
    %c7_i32 = arith.constant 7 : i32
    %45 = vector.broadcast %c7_i32 : i32 to vector<8x1xi32>
    %46 = arith.cmpi sgt, %16, %45 : vector<8x1xi32>
    %47 = vector.shape_cast %46 : vector<8x1xi1> to vector<8x1xi1>
    %48 = vector.broadcast %47 : vector<8x1xi1> to vector<8x128xi1>
    %c0_17 = arith.constant 0 : index
    %c0_18 = arith.constant 0 : index
    %49 = vector.load %arg9[%c0_17, %c0_18] : memref<1x512xf32, #tpu.memory_space<vmem>>, vector<1x512xf32>
    %50 = vector.shape_cast %49 : vector<1x512xf32> to vector<1x512xf32>
    %51 = vector.broadcast %50 : vector<1x512xf32> to vector<8x512xf32>
    %c0_19 = arith.constant 0 : index
    %c0_20 = arith.constant 0 : index
    %52 = vector.load %arg11[%c0_19, %c0_20] : memref<1x512xf32, #tpu.memory_space<vmem>>, vector<1x512xf32>
    %53 = vector.shape_cast %52 : vector<1x512xf32> to vector<1x512xf32>
    %54 = vector.broadcast %53 : vector<1x512xf32> to vector<8x512xf32>
    %cst_21 = arith.constant 0.000000e+00 : f32
    %55 = vector.broadcast %cst_21 : f32 to vector<8x128xf32>
    %cst_22 = arith.constant 0.000000e+00 : f32
    %56 = vector.broadcast %cst_22 : f32 to vector<8x128xf32>
    %cst_23 = arith.constant 0.000000e+00 : f32
    %57 = vector.broadcast %cst_23 : f32 to vector<8x128xf32>
    %cst_24 = arith.constant 0.000000e+00 : f32
    %58 = vector.broadcast %cst_24 : f32 to vector<8x128xf32>
    %cst_25 = arith.constant 0.000000e+00 : f32
    %59 = vector.broadcast %cst_25 : f32 to vector<8x128xf32>
    %cst_26 = arith.constant 0.000000e+00 : f32
    %60 = vector.broadcast %cst_26 : f32 to vector<8x128xf32>
    %c0_27 = arith.constant 0 : index
    %c0_28 = arith.constant 0 : index
    %61 = vector.load %arg7[%c0_27, %c0_28] : memref<128x512xf32, #tpu.memory_space<vmem>>, vector<128x512xf32>
    %cst_29 = arith.constant dense<0.000000e+00> : vector<8x512xf32>
    %62 = tpu.matmul %55, %61, %cst_29 {dimension_numbers = #tpu.dot_dimension_numbers<[1], [0], [0], [1], [0, 0, 1, 1], [], []>} : vector<8x128xf32>, vector<128x512xf32>, vector<8x512xf32> -> vector<8x512xf32>
    %c0_30 = arith.constant 0 : index
    %c0_31 = arith.constant 0 : index
    %c0_32 = arith.constant 0 : index
    %63 = vector.load %arg15[%c0_30, %c0_31, %c0_32] : memref<8x8x512xf32, #tpu.memory_space<vmem>>, vector<1x8x512xf32>
    %64 = vector.shape_cast %63 : vector<1x8x512xf32> to vector<8x512xf32>
    %65 = arith.addf %62, %64 : vector<8x512xf32>
    %66 = vector.extract_strided_slice %65 {offsets = [0, 0], sizes = [8, 128], strides = [1, 1]} : vector<8x512xf32> to vector<8x128xf32>
    %67 = arith.negf %66 : vector<8x128xf32>
    %68 = math.exp %67 : vector<8x128xf32>
    %cst_33 = arith.constant 1.000000e+00 : f32
    %69 = vector.broadcast %cst_33 : f32 to vector<8x128xf32>
    %70 = arith.addf %69, %68 : vector<8x128xf32>
    %71 = arith.divf %69, %70 : vector<8x128xf32>
    %72 = vector.extract_strided_slice %65 {offsets = [0, 128], sizes = [8, 128], strides = [1, 1]} : vector<8x512xf32> to vector<8x128xf32>
    %73 = arith.negf %72 : vector<8x128xf32>
    %74 = math.exp %73 : vector<8x128xf32>
    %cst_34 = arith.constant 1.000000e+00 : f32
    %75 = vector.broadcast %cst_34 : f32 to vector<8x128xf32>
    %76 = arith.addf %75, %74 : vector<8x128xf32>
    %77 = arith.divf %75, %76 : vector<8x128xf32>
    %78 = vector.extract_strided_slice %65 {offsets = [0, 256], sizes = [8, 128], strides = [1, 1]} : vector<8x512xf32> to vector<8x128xf32>
    %79 = math.tanh %78 : vector<8x128xf32>
    %80 = vector.extract_strided_slice %65 {offsets = [0, 384], sizes = [8, 128], strides = [1, 1]} : vector<8x512xf32> to vector<8x128xf32>
    %81 = arith.negf %80 : vector<8x128xf32>
    %82 = math.exp %81 : vector<8x128xf32>
    %cst_35 = arith.constant 1.000000e+00 : f32
    %83 = vector.broadcast %cst_35 : f32 to vector<8x128xf32>
    %84 = arith.addf %83, %82 : vector<8x128xf32>
    %85 = arith.divf %83, %84 : vector<8x128xf32>
    %86 = arith.mulf %77, %58 : vector<8x128xf32>
    %87 = arith.mulf %71, %79 : vector<8x128xf32>
    %88 = arith.addf %86, %87 : vector<8x128xf32>
    %89 = math.tanh %88 : vector<8x128xf32>
    %90 = arith.mulf %85, %89 : vector<8x128xf32>
    %91 = arith.select %20, %90, %55 : vector<8x128xi1>, vector<8x128xf32>
    %92 = arith.select %20, %88, %58 : vector<8x128xi1>, vector<8x128xf32>
    %c0_36 = arith.constant 0 : index
    %c0_37 = arith.constant 0 : index
    %93 = vector.load %arg7[%c0_36, %c0_37] : memref<128x512xf32, #tpu.memory_space<vmem>>, vector<128x512xf32>
    %cst_38 = arith.constant dense<0.000000e+00> : vector<8x512xf32>
    %94 = tpu.matmul %91, %93, %cst_38 {dimension_numbers = #tpu.dot_dimension_numbers<[1], [0], [0], [1], [0, 0, 1, 1], [], []>} : vector<8x128xf32>, vector<128x512xf32>, vector<8x512xf32> -> vector<8x512xf32>
    %c1 = arith.constant 1 : index
    %c0_39 = arith.constant 0 : index
    %c0_40 = arith.constant 0 : index
    %95 = vector.load %arg15[%c1, %c0_39, %c0_40] : memref<8x8x512xf32, #tpu.memory_space<vmem>>, vector<1x8x512xf32>
    %96 = vector.shape_cast %95 : vector<1x8x512xf32> to vector<8x512xf32>
    %97 = arith.addf %94, %96 : vector<8x512xf32>
    %98 = vector.extract_strided_slice %97 {offsets = [0, 0], sizes = [8, 128], strides = [1, 1]} : vector<8x512xf32> to vector<8x128xf32>
    %99 = arith.negf %98 : vector<8x128xf32>
    %100 = math.exp %99 : vector<8x128xf32>
    %cst_41 = arith.constant 1.000000e+00 : f32
    %101 = vector.broadcast %cst_41 : f32 to vector<8x128xf32>
    %102 = arith.addf %101, %100 : vector<8x128xf32>
    %103 = arith.divf %101, %102 : vector<8x128xf32>
    %104 = vector.extract_strided_slice %97 {offsets = [0, 128], sizes = [8, 128], strides = [1, 1]} : vector<8x512xf32> to vector<8x128xf32>
    %105 = arith.negf %104 : vector<8x128xf32>
    %106 = math.exp %105 : vector<8x128xf32>
    %cst_42 = arith.constant 1.000000e+00 : f32
    %107 = vector.broadcast %cst_42 : f32 to vector<8x128xf32>
    %108 = arith.addf %107, %106 : vector<8x128xf32>
    %109 = arith.divf %107, %108 : vector<8x128xf32>
    %110 = vector.extract_strided_slice %97 {offsets = [0, 256], sizes = [8, 128], strides = [1, 1]} : vector<8x512xf32> to vector<8x128xf32>
    %111 = math.tanh %110 : vector<8x128xf32>
    %112 = vector.extract_strided_slice %97 {offsets = [0, 384], sizes = [8, 128], strides = [1, 1]} : vector<8x512xf32> to vector<8x128xf32>
    %113 = arith.negf %112 : vector<8x128xf32>
    %114 = math.exp %113 : vector<8x128xf32>
    %cst_43 = arith.constant 1.000000e+00 : f32
    %115 = vector.broadcast %cst_43 : f32 to vector<8x128xf32>
    %116 = arith.addf %115, %114 : vector<8x128xf32>
    %117 = arith.divf %115, %116 : vector<8x128xf32>
    %118 = arith.mulf %109, %92 : vector<8x128xf32>
    %119 = arith.mulf %103, %111 : vector<8x128xf32>
    %120 = arith.addf %118, %119 : vector<8x128xf32>
    %121 = math.tanh %120 : vector<8x128xf32>
    %122 = arith.mulf %117, %121 : vector<8x128xf32>
    %123 = arith.select %24, %122, %91 : vector<8x128xi1>, vector<8x128xf32>
    %124 = arith.select %24, %120, %92 : vector<8x128xi1>, vector<8x128xf32>
    %125 = tpu.concatenate %91, %56 in 1 : vector<8x128xf32>, vector<8x128xf32> -> vector<8x256xf32>
    %c0_44 = arith.constant 0 : index
    %c0_45 = arith.constant 0 : index
    %126 = vector.load %arg8[%c0_44, %c0_45] : memref<256x512xf32, #tpu.memory_space<vmem>>, vector<256x512xf32>
    %cst_46 = arith.constant dense<0.000000e+00> : vector<8x512xf32>
    %127 = tpu.matmul %125, %126, %cst_46 {dimension_numbers = #tpu.dot_dimension_numbers<[1], [0], [0], [1], [0, 0, 1, 1], [], []>} : vector<8x256xf32>, vector<256x512xf32>, vector<8x512xf32> -> vector<8x512xf32>
    %128 = arith.addf %127, %51 : vector<8x512xf32>
    %129 = vector.extract_strided_slice %128 {offsets = [0, 0], sizes = [8, 128], strides = [1, 1]} : vector<8x512xf32> to vector<8x128xf32>
    %130 = arith.negf %129 : vector<8x128xf32>
    %131 = math.exp %130 : vector<8x128xf32>
    %cst_47 = arith.constant 1.000000e+00 : f32
    %132 = vector.broadcast %cst_47 : f32 to vector<8x128xf32>
    %133 = arith.addf %132, %131 : vector<8x128xf32>
    %134 = arith.divf %132, %133 : vector<8x128xf32>
    %135 = vector.extract_strided_slice %128 {offsets = [0, 128], sizes = [8, 128], strides = [1, 1]} : vector<8x512xf32> to vector<8x128xf32>
    %136 = arith.negf %135 : vector<8x128xf32>
    %137 = math.exp %136 : vector<8x128xf32>
    %cst_48 = arith.constant 1.000000e+00 : f32
    %138 = vector.broadcast %cst_48 : f32 to vector<8x128xf32>
    %139 = arith.addf %138, %137 : vector<8x128xf32>
    %140 = arith.divf %138, %139 : vector<8x128xf32>
    %141 = vector.extract_strided_slice %128 {offsets = [0, 256], sizes = [8, 128], strides = [1, 1]} : vector<8x512xf32> to vector<8x128xf32>
    %142 = math.tanh %141 : vector<8x128xf32>
    %143 = vector.extract_strided_slice %128 {offsets = [0, 384], sizes = [8, 128], strides = [1, 1]} : vector<8x512xf32> to vector<8x128xf32>
    %144 = arith.negf %143 : vector<8x128xf32>
    %145 = math.exp %144 : vector<8x128xf32>
    %cst_49 = arith.constant 1.000000e+00 : f32
    %146 = vector.broadcast %cst_49 : f32 to vector<8x128xf32>
    %147 = arith.addf %146, %145 : vector<8x128xf32>
    %148 = arith.divf %146, %147 : vector<8x128xf32>
    %149 = arith.mulf %140, %59 : vector<8x128xf32>
    %150 = arith.mulf %134, %142 : vector<8x128xf32>
    %151 = arith.addf %149, %150 : vector<8x128xf32>
    %152 = math.tanh %151 : vector<8x128xf32>
    %153 = arith.mulf %148, %152 : vector<8x128xf32>
    %154 = arith.select %20, %153, %56 : vector<8x128xi1>, vector<8x128xf32>
    %155 = arith.select %20, %151, %59 : vector<8x128xi1>, vector<8x128xf32>
    %c0_50 = arith.constant 0 : index
    %c0_51 = arith.constant 0 : index
    %156 = vector.load %arg7[%c0_50, %c0_51] : memref<128x512xf32, #tpu.memory_space<vmem>>, vector<128x512xf32>
    %cst_52 = arith.constant dense<0.000000e+00> : vector<8x512xf32>
    %157 = tpu.matmul %123, %156, %cst_52 {dimension_numbers = #tpu.dot_dimension_numbers<[1], [0], [0], [1], [0, 0, 1, 1], [], []>} : vector<8x128xf32>, vector<128x512xf32>, vector<8x512xf32> -> vector<8x512xf32>
    %c2 = arith.constant 2 : index
    %c0_53 = arith.constant 0 : index
    %c0_54 = arith.constant 0 : index
    %158 = vector.load %arg15[%c2, %c0_53, %c0_54] : memref<8x8x512xf32, #tpu.memory_space<vmem>>, vector<1x8x512xf32>
    %159 = vector.shape_cast %158 : vector<1x8x512xf32> to vector<8x512xf32>
    %160 = arith.addf %157, %159 : vector<8x512xf32>
    %161 = vector.extract_strided_slice %160 {offsets = [0, 0], sizes = [8, 128], strides = [1, 1]} : vector<8x512xf32> to vector<8x128xf32>
    %162 = arith.negf %161 : vector<8x128xf32>
    %163 = math.exp %162 : vector<8x128xf32>
    %cst_55 = arith.constant 1.000000e+00 : f32
    %164 = vector.broadcast %cst_55 : f32 to vector<8x128xf32>
    %165 = arith.addf %164, %163 : vector<8x128xf32>
    %166 = arith.divf %164, %165 : vector<8x128xf32>
    %167 = vector.extract_strided_slice %160 {offsets = [0, 128], sizes = [8, 128], strides = [1, 1]} : vector<8x512xf32> to vector<8x128xf32>
    %168 = arith.negf %167 : vector<8x128xf32>
    %169 = math.exp %168 : vector<8x128xf32>
    %cst_56 = arith.constant 1.000000e+00 : f32
    %170 = vector.broadcast %cst_56 : f32 to vector<8x128xf32>
    %171 = arith.addf %170, %169 : vector<8x128xf32>
    %172 = arith.divf %170, %171 : vector<8x128xf32>
    %173 = vector.extract_strided_slice %160 {offsets = [0, 256], sizes = [8, 128], strides = [1, 1]} : vector<8x512xf32> to vector<8x128xf32>
    %174 = math.tanh %173 : vector<8x128xf32>
    %175 = vector.extract_strided_slice %160 {offsets = [0, 384], sizes = [8, 128], strides = [1, 1]} : vector<8x512xf32> to vector<8x128xf32>
    %176 = arith.negf %175 : vector<8x128xf32>
    %177 = math.exp %176 : vector<8x128xf32>
    %cst_57 = arith.constant 1.000000e+00 : f32
    %178 = vector.broadcast %cst_57 : f32 to vector<8x128xf32>
    %179 = arith.addf %178, %177 : vector<8x128xf32>
    %180 = arith.divf %178, %179 : vector<8x128xf32>
    %181 = arith.mulf %172, %124 : vector<8x128xf32>
    %182 = arith.mulf %166, %174 : vector<8x128xf32>
    %183 = arith.addf %181, %182 : vector<8x128xf32>
    %184 = math.tanh %183 : vector<8x128xf32>
    %185 = arith.mulf %180, %184 : vector<8x128xf32>
    %186 = arith.select %28, %185, %123 : vector<8x128xi1>, vector<8x128xf32>
    %187 = arith.select %28, %183, %124 : vector<8x128xi1>, vector<8x128xf32>
    %188 = tpu.concatenate %123, %154 in 1 : vector<8x128xf32>, vector<8x128xf32> -> vector<8x256xf32>
    %c0_58 = arith.constant 0 : index
    %c0_59 = arith.constant 0 : index
    %189 = vector.load %arg8[%c0_58, %c0_59] : memref<256x512xf32, #tpu.memory_space<vmem>>, vector<256x512xf32>
    %cst_60 = arith.constant dense<0.000000e+00> : vector<8x512xf32>
    %190 = tpu.matmul %188, %189, %cst_60 {dimension_numbers = #tpu.dot_dimension_numbers<[1], [0], [0], [1], [0, 0, 1, 1], [], []>} : vector<8x256xf32>, vector<256x512xf32>, vector<8x512xf32> -> vector<8x512xf32>
    %191 = arith.addf %190, %51 : vector<8x512xf32>
    %192 = vector.extract_strided_slice %191 {offsets = [0, 0], sizes = [8, 128], strides = [1, 1]} : vector<8x512xf32> to vector<8x128xf32>
    %193 = arith.negf %192 : vector<8x128xf32>
    %194 = math.exp %193 : vector<8x128xf32>
    %cst_61 = arith.constant 1.000000e+00 : f32
    %195 = vector.broadcast %cst_61 : f32 to vector<8x128xf32>
    %196 = arith.addf %195, %194 : vector<8x128xf32>
    %197 = arith.divf %195, %196 : vector<8x128xf32>
    %198 = vector.extract_strided_slice %191 {offsets = [0, 128], sizes = [8, 128], strides = [1, 1]} : vector<8x512xf32> to vector<8x128xf32>
    %199 = arith.negf %198 : vector<8x128xf32>
    %200 = math.exp %199 : vector<8x128xf32>
    %cst_62 = arith.constant 1.000000e+00 : f32
    %201 = vector.broadcast %cst_62 : f32 to vector<8x128xf32>
    %202 = arith.addf %201, %200 : vector<8x128xf32>
    %203 = arith.divf %201, %202 : vector<8x128xf32>
    %204 = vector.extract_strided_slice %191 {offsets = [0, 256], sizes = [8, 128], strides = [1, 1]} : vector<8x512xf32> to vector<8x128xf32>
    %205 = math.tanh %204 : vector<8x128xf32>
    %206 = vector.extract_strided_slice %191 {offsets = [0, 384], sizes = [8, 128], strides = [1, 1]} : vector<8x512xf32> to vector<8x128xf32>
    %207 = arith.negf %206 : vector<8x128xf32>
    %208 = math.exp %207 : vector<8x128xf32>
    %cst_63 = arith.constant 1.000000e+00 : f32
    %209 = vector.broadcast %cst_63 : f32 to vector<8x128xf32>
    %210 = arith.addf %209, %208 : vector<8x128xf32>
    %211 = arith.divf %209, %210 : vector<8x128xf32>
    %212 = arith.mulf %203, %155 : vector<8x128xf32>
    %213 = arith.mulf %197, %205 : vector<8x128xf32>
    %214 = arith.addf %212, %213 : vector<8x128xf32>
    %215 = math.tanh %214 : vector<8x128xf32>
    %216 = arith.mulf %211, %215 : vector<8x128xf32>
    %217 = arith.select %24, %216, %154 : vector<8x128xi1>, vector<8x128xf32>
    %218 = arith.select %24, %214, %155 : vector<8x128xi1>, vector<8x128xf32>
    %219 = tpu.concatenate %154, %57 in 1 : vector<8x128xf32>, vector<8x128xf32> -> vector<8x256xf32>
    %c0_64 = arith.constant 0 : index
    %c0_65 = arith.constant 0 : index
    %220 = vector.load %arg10[%c0_64, %c0_65] : memref<256x512xf32, #tpu.memory_space<vmem>>, vector<256x512xf32>
    %cst_66 = arith.constant dense<0.000000e+00> : vector<8x512xf32>
    %221 = tpu.matmul %219, %220, %cst_66 {dimension_numbers = #tpu.dot_dimension_numbers<[1], [0], [0], [1], [0, 0, 1, 1], [], []>} : vector<8x256xf32>, vector<256x512xf32>, vector<8x512xf32> -> vector<8x512xf32>
    %222 = arith.addf %221, %54 : vector<8x512xf32>
    %223 = vector.extract_strided_slice %222 {offsets = [0, 0], sizes = [8, 128], strides = [1, 1]} : vector<8x512xf32> to vector<8x128xf32>
    %224 = arith.negf %223 : vector<8x128xf32>
    %225 = math.exp %224 : vector<8x128xf32>
    %cst_67 = arith.constant 1.000000e+00 : f32
    %226 = vector.broadcast %cst_67 : f32 to vector<8x128xf32>
    %227 = arith.addf %226, %225 : vector<8x128xf32>
    %228 = arith.divf %226, %227 : vector<8x128xf32>
    %229 = vector.extract_strided_slice %222 {offsets = [0, 128], sizes = [8, 128], strides = [1, 1]} : vector<8x512xf32> to vector<8x128xf32>
    %230 = arith.negf %229 : vector<8x128xf32>
    %231 = math.exp %230 : vector<8x128xf32>
    %cst_68 = arith.constant 1.000000e+00 : f32
    %232 = vector.broadcast %cst_68 : f32 to vector<8x128xf32>
    %233 = arith.addf %232, %231 : vector<8x128xf32>
    %234 = arith.divf %232, %233 : vector<8x128xf32>
    %235 = vector.extract_strided_slice %222 {offsets = [0, 256], sizes = [8, 128], strides = [1, 1]} : vector<8x512xf32> to vector<8x128xf32>
    %236 = math.tanh %235 : vector<8x128xf32>
    %237 = vector.extract_strided_slice %222 {offsets = [0, 384], sizes = [8, 128], strides = [1, 1]} : vector<8x512xf32> to vector<8x128xf32>
    %238 = arith.negf %237 : vector<8x128xf32>
    %239 = math.exp %238 : vector<8x128xf32>
    %cst_69 = arith.constant 1.000000e+00 : f32
    %240 = vector.broadcast %cst_69 : f32 to vector<8x128xf32>
    %241 = arith.addf %240, %239 : vector<8x128xf32>
    %242 = arith.divf %240, %241 : vector<8x128xf32>
    %243 = arith.mulf %234, %60 : vector<8x128xf32>
    %244 = arith.mulf %228, %236 : vector<8x128xf32>
    %245 = arith.addf %243, %244 : vector<8x128xf32>
    %246 = math.tanh %245 : vector<8x128xf32>
    %247 = arith.mulf %242, %246 : vector<8x128xf32>
    %248 = arith.select %20, %247, %57 : vector<8x128xi1>, vector<8x128xf32>
    %249 = arith.select %20, %245, %60 : vector<8x128xi1>, vector<8x128xf32>
    %c0_70 = arith.constant 0 : index
    %c0_71 = arith.constant 0 : index
    %250 = vector.load %arg7[%c0_70, %c0_71] : memref<128x512xf32, #tpu.memory_space<vmem>>, vector<128x512xf32>
    %cst_72 = arith.constant dense<0.000000e+00> : vector<8x512xf32>
    %251 = tpu.matmul %186, %250, %cst_72 {dimension_numbers = #tpu.dot_dimension_numbers<[1], [0], [0], [1], [0, 0, 1, 1], [], []>} : vector<8x128xf32>, vector<128x512xf32>, vector<8x512xf32> -> vector<8x512xf32>
    %c3 = arith.constant 3 : index
    %c0_73 = arith.constant 0 : index
    %c0_74 = arith.constant 0 : index
    %252 = vector.load %arg15[%c3, %c0_73, %c0_74] : memref<8x8x512xf32, #tpu.memory_space<vmem>>, vector<1x8x512xf32>
    %253 = vector.shape_cast %252 : vector<1x8x512xf32> to vector<8x512xf32>
    %254 = arith.addf %251, %253 : vector<8x512xf32>
    %255 = vector.extract_strided_slice %254 {offsets = [0, 0], sizes = [8, 128], strides = [1, 1]} : vector<8x512xf32> to vector<8x128xf32>
    %256 = arith.negf %255 : vector<8x128xf32>
    %257 = math.exp %256 : vector<8x128xf32>
    %cst_75 = arith.constant 1.000000e+00 : f32
    %258 = vector.broadcast %cst_75 : f32 to vector<8x128xf32>
    %259 = arith.addf %258, %257 : vector<8x128xf32>
    %260 = arith.divf %258, %259 : vector<8x128xf32>
    %261 = vector.extract_strided_slice %254 {offsets = [0, 128], sizes = [8, 128], strides = [1, 1]} : vector<8x512xf32> to vector<8x128xf32>
    %262 = arith.negf %261 : vector<8x128xf32>
    %263 = math.exp %262 : vector<8x128xf32>
    %cst_76 = arith.constant 1.000000e+00 : f32
    %264 = vector.broadcast %cst_76 : f32 to vector<8x128xf32>
    %265 = arith.addf %264, %263 : vector<8x128xf32>
    %266 = arith.divf %264, %265 : vector<8x128xf32>
    %267 = vector.extract_strided_slice %254 {offsets = [0, 256], sizes = [8, 128], strides = [1, 1]} : vector<8x512xf32> to vector<8x128xf32>
    %268 = math.tanh %267 : vector<8x128xf32>
    %269 = vector.extract_strided_slice %254 {offsets = [0, 384], sizes = [8, 128], strides = [1, 1]} : vector<8x512xf32> to vector<8x128xf32>
    %270 = arith.negf %269 : vector<8x128xf32>
    %271 = math.exp %270 : vector<8x128xf32>
    %cst_77 = arith.constant 1.000000e+00 : f32
    %272 = vector.broadcast %cst_77 : f32 to vector<8x128xf32>
    %273 = arith.addf %272, %271 : vector<8x128xf32>
    %274 = arith.divf %272, %273 : vector<8x128xf32>
    %275 = arith.mulf %266, %187 : vector<8x128xf32>
    %276 = arith.mulf %260, %268 : vector<8x128xf32>
    %277 = arith.addf %275, %276 : vector<8x128xf32>
    %278 = math.tanh %277 : vector<8x128xf32>
    %279 = arith.mulf %274, %278 : vector<8x128xf32>
    %280 = arith.select %32, %279, %186 : vector<8x128xi1>, vector<8x128xf32>
    %281 = arith.select %32, %277, %187 : vector<8x128xi1>, vector<8x128xf32>
    %282 = tpu.concatenate %186, %217 in 1 : vector<8x128xf32>, vector<8x128xf32> -> vector<8x256xf32>
    %c0_78 = arith.constant 0 : index
    %c0_79 = arith.constant 0 : index
    %283 = vector.load %arg8[%c0_78, %c0_79] : memref<256x512xf32, #tpu.memory_space<vmem>>, vector<256x512xf32>
    %cst_80 = arith.constant dense<0.000000e+00> : vector<8x512xf32>
    %284 = tpu.matmul %282, %283, %cst_80 {dimension_numbers = #tpu.dot_dimension_numbers<[1], [0], [0], [1], [0, 0, 1, 1], [], []>} : vector<8x256xf32>, vector<256x512xf32>, vector<8x512xf32> -> vector<8x512xf32>
    %285 = arith.addf %284, %51 : vector<8x512xf32>
    %286 = vector.extract_strided_slice %285 {offsets = [0, 0], sizes = [8, 128], strides = [1, 1]} : vector<8x512xf32> to vector<8x128xf32>
    %287 = arith.negf %286 : vector<8x128xf32>
    %288 = math.exp %287 : vector<8x128xf32>
    %cst_81 = arith.constant 1.000000e+00 : f32
    %289 = vector.broadcast %cst_81 : f32 to vector<8x128xf32>
    %290 = arith.addf %289, %288 : vector<8x128xf32>
    %291 = arith.divf %289, %290 : vector<8x128xf32>
    %292 = vector.extract_strided_slice %285 {offsets = [0, 128], sizes = [8, 128], strides = [1, 1]} : vector<8x512xf32> to vector<8x128xf32>
    %293 = arith.negf %292 : vector<8x128xf32>
    %294 = math.exp %293 : vector<8x128xf32>
    %cst_82 = arith.constant 1.000000e+00 : f32
    %295 = vector.broadcast %cst_82 : f32 to vector<8x128xf32>
    %296 = arith.addf %295, %294 : vector<8x128xf32>
    %297 = arith.divf %295, %296 : vector<8x128xf32>
    %298 = vector.extract_strided_slice %285 {offsets = [0, 256], sizes = [8, 128], strides = [1, 1]} : vector<8x512xf32> to vector<8x128xf32>
    %299 = math.tanh %298 : vector<8x128xf32>
    %300 = vector.extract_strided_slice %285 {offsets = [0, 384], sizes = [8, 128], strides = [1, 1]} : vector<8x512xf32> to vector<8x128xf32>
    %301 = arith.negf %300 : vector<8x128xf32>
    %302 = math.exp %301 : vector<8x128xf32>
    %cst_83 = arith.constant 1.000000e+00 : f32
    %303 = vector.broadcast %cst_83 : f32 to vector<8x128xf32>
    %304 = arith.addf %303, %302 : vector<8x128xf32>
    %305 = arith.divf %303, %304 : vector<8x128xf32>
    %306 = arith.mulf %297, %218 : vector<8x128xf32>
    %307 = arith.mulf %291, %299 : vector<8x128xf32>
    %308 = arith.addf %306, %307 : vector<8x128xf32>
    %309 = math.tanh %308 : vector<8x128xf32>
    %310 = arith.mulf %305, %309 : vector<8x128xf32>
    %311 = arith.select %28, %310, %217 : vector<8x128xi1>, vector<8x128xf32>
    %312 = arith.select %28, %308, %218 : vector<8x128xi1>, vector<8x128xf32>
    %313 = tpu.concatenate %217, %248 in 1 : vector<8x128xf32>, vector<8x128xf32> -> vector<8x256xf32>
    %c0_84 = arith.constant 0 : index
    %c0_85 = arith.constant 0 : index
    %314 = vector.load %arg10[%c0_84, %c0_85] : memref<256x512xf32, #tpu.memory_space<vmem>>, vector<256x512xf32>
    %cst_86 = arith.constant dense<0.000000e+00> : vector<8x512xf32>
    %315 = tpu.matmul %313, %314, %cst_86 {dimension_numbers = #tpu.dot_dimension_numbers<[1], [0], [0], [1], [0, 0, 1, 1], [], []>} : vector<8x256xf32>, vector<256x512xf32>, vector<8x512xf32> -> vector<8x512xf32>
    %316 = arith.addf %315, %54 : vector<8x512xf32>
    %317 = vector.extract_strided_slice %316 {offsets = [0, 0], sizes = [8, 128], strides = [1, 1]} : vector<8x512xf32> to vector<8x128xf32>
    %318 = arith.negf %317 : vector<8x128xf32>
    %319 = math.exp %318 : vector<8x128xf32>
    %cst_87 = arith.constant 1.000000e+00 : f32
    %320 = vector.broadcast %cst_87 : f32 to vector<8x128xf32>
    %321 = arith.addf %320, %319 : vector<8x128xf32>
    %322 = arith.divf %320, %321 : vector<8x128xf32>
    %323 = vector.extract_strided_slice %316 {offsets = [0, 128], sizes = [8, 128], strides = [1, 1]} : vector<8x512xf32> to vector<8x128xf32>
    %324 = arith.negf %323 : vector<8x128xf32>
    %325 = math.exp %324 : vector<8x128xf32>
    %cst_88 = arith.constant 1.000000e+00 : f32
    %326 = vector.broadcast %cst_88 : f32 to vector<8x128xf32>
    %327 = arith.addf %326, %325 : vector<8x128xf32>
    %328 = arith.divf %326, %327 : vector<8x128xf32>
    %329 = vector.extract_strided_slice %316 {offsets = [0, 256], sizes = [8, 128], strides = [1, 1]} : vector<8x512xf32> to vector<8x128xf32>
    %330 = math.tanh %329 : vector<8x128xf32>
    %331 = vector.extract_strided_slice %316 {offsets = [0, 384], sizes = [8, 128], strides = [1, 1]} : vector<8x512xf32> to vector<8x128xf32>
    %332 = arith.negf %331 : vector<8x128xf32>
    %333 = math.exp %332 : vector<8x128xf32>
    %cst_89 = arith.constant 1.000000e+00 : f32
    %334 = vector.broadcast %cst_89 : f32 to vector<8x128xf32>
    %335 = arith.addf %334, %333 : vector<8x128xf32>
    %336 = arith.divf %334, %335 : vector<8x128xf32>
    %337 = arith.mulf %328, %249 : vector<8x128xf32>
    %338 = arith.mulf %322, %330 : vector<8x128xf32>
    %339 = arith.addf %337, %338 : vector<8x128xf32>
    %340 = math.tanh %339 : vector<8x128xf32>
    %341 = arith.mulf %336, %340 : vector<8x128xf32>
    %342 = arith.select %24, %341, %248 : vector<8x128xi1>, vector<8x128xf32>
    %343 = arith.select %24, %339, %249 : vector<8x128xi1>, vector<8x128xf32>
    %c0_90 = arith.constant 0 : index
    %c0_91 = arith.constant 0 : index
    %344 = vector.load %arg7[%c0_90, %c0_91] : memref<128x512xf32, #tpu.memory_space<vmem>>, vector<128x512xf32>
    %cst_92 = arith.constant dense<0.000000e+00> : vector<8x512xf32>
    %345 = tpu.matmul %280, %344, %cst_92 {dimension_numbers = #tpu.dot_dimension_numbers<[1], [0], [0], [1], [0, 0, 1, 1], [], []>} : vector<8x128xf32>, vector<128x512xf32>, vector<8x512xf32> -> vector<8x512xf32>
    %c4 = arith.constant 4 : index
    %c0_93 = arith.constant 0 : index
    %c0_94 = arith.constant 0 : index
    %346 = vector.load %arg15[%c4, %c0_93, %c0_94] : memref<8x8x512xf32, #tpu.memory_space<vmem>>, vector<1x8x512xf32>
    %347 = vector.shape_cast %346 : vector<1x8x512xf32> to vector<8x512xf32>
    %348 = arith.addf %345, %347 : vector<8x512xf32>
    %349 = vector.extract_strided_slice %348 {offsets = [0, 0], sizes = [8, 128], strides = [1, 1]} : vector<8x512xf32> to vector<8x128xf32>
    %350 = arith.negf %349 : vector<8x128xf32>
    %351 = math.exp %350 : vector<8x128xf32>
    %cst_95 = arith.constant 1.000000e+00 : f32
    %352 = vector.broadcast %cst_95 : f32 to vector<8x128xf32>
    %353 = arith.addf %352, %351 : vector<8x128xf32>
    %354 = arith.divf %352, %353 : vector<8x128xf32>
    %355 = vector.extract_strided_slice %348 {offsets = [0, 128], sizes = [8, 128], strides = [1, 1]} : vector<8x512xf32> to vector<8x128xf32>
    %356 = arith.negf %355 : vector<8x128xf32>
    %357 = math.exp %356 : vector<8x128xf32>
    %cst_96 = arith.constant 1.000000e+00 : f32
    %358 = vector.broadcast %cst_96 : f32 to vector<8x128xf32>
    %359 = arith.addf %358, %357 : vector<8x128xf32>
    %360 = arith.divf %358, %359 : vector<8x128xf32>
    %361 = vector.extract_strided_slice %348 {offsets = [0, 256], sizes = [8, 128], strides = [1, 1]} : vector<8x512xf32> to vector<8x128xf32>
    %362 = math.tanh %361 : vector<8x128xf32>
    %363 = vector.extract_strided_slice %348 {offsets = [0, 384], sizes = [8, 128], strides = [1, 1]} : vector<8x512xf32> to vector<8x128xf32>
    %364 = arith.negf %363 : vector<8x128xf32>
    %365 = math.exp %364 : vector<8x128xf32>
    %cst_97 = arith.constant 1.000000e+00 : f32
    %366 = vector.broadcast %cst_97 : f32 to vector<8x128xf32>
    %367 = arith.addf %366, %365 : vector<8x128xf32>
    %368 = arith.divf %366, %367 : vector<8x128xf32>
    %369 = arith.mulf %360, %281 : vector<8x128xf32>
    %370 = arith.mulf %354, %362 : vector<8x128xf32>
    %371 = arith.addf %369, %370 : vector<8x128xf32>
    %372 = math.tanh %371 : vector<8x128xf32>
    %373 = arith.mulf %368, %372 : vector<8x128xf32>
    %374 = arith.select %36, %373, %280 : vector<8x128xi1>, vector<8x128xf32>
    %375 = arith.select %36, %371, %281 : vector<8x128xi1>, vector<8x128xf32>
    %376 = tpu.concatenate %280, %311 in 1 : vector<8x128xf32>, vector<8x128xf32> -> vector<8x256xf32>
    %c0_98 = arith.constant 0 : index
    %c0_99 = arith.constant 0 : index
    %377 = vector.load %arg8[%c0_98, %c0_99] : memref<256x512xf32, #tpu.memory_space<vmem>>, vector<256x512xf32>
    %cst_100 = arith.constant dense<0.000000e+00> : vector<8x512xf32>
    %378 = tpu.matmul %376, %377, %cst_100 {dimension_numbers = #tpu.dot_dimension_numbers<[1], [0], [0], [1], [0, 0, 1, 1], [], []>} : vector<8x256xf32>, vector<256x512xf32>, vector<8x512xf32> -> vector<8x512xf32>
    %379 = arith.addf %378, %51 : vector<8x512xf32>
    %380 = vector.extract_strided_slice %379 {offsets = [0, 0], sizes = [8, 128], strides = [1, 1]} : vector<8x512xf32> to vector<8x128xf32>
    %381 = arith.negf %380 : vector<8x128xf32>
    %382 = math.exp %381 : vector<8x128xf32>
    %cst_101 = arith.constant 1.000000e+00 : f32
    %383 = vector.broadcast %cst_101 : f32 to vector<8x128xf32>
    %384 = arith.addf %383, %382 : vector<8x128xf32>
    %385 = arith.divf %383, %384 : vector<8x128xf32>
    %386 = vector.extract_strided_slice %379 {offsets = [0, 128], sizes = [8, 128], strides = [1, 1]} : vector<8x512xf32> to vector<8x128xf32>
    %387 = arith.negf %386 : vector<8x128xf32>
    %388 = math.exp %387 : vector<8x128xf32>
    %cst_102 = arith.constant 1.000000e+00 : f32
    %389 = vector.broadcast %cst_102 : f32 to vector<8x128xf32>
    %390 = arith.addf %389, %388 : vector<8x128xf32>
    %391 = arith.divf %389, %390 : vector<8x128xf32>
    %392 = vector.extract_strided_slice %379 {offsets = [0, 256], sizes = [8, 128], strides = [1, 1]} : vector<8x512xf32> to vector<8x128xf32>
    %393 = math.tanh %392 : vector<8x128xf32>
    %394 = vector.extract_strided_slice %379 {offsets = [0, 384], sizes = [8, 128], strides = [1, 1]} : vector<8x512xf32> to vector<8x128xf32>
    %395 = arith.negf %394 : vector<8x128xf32>
    %396 = math.exp %395 : vector<8x128xf32>
    %cst_103 = arith.constant 1.000000e+00 : f32
    %397 = vector.broadcast %cst_103 : f32 to vector<8x128xf32>
    %398 = arith.addf %397, %396 : vector<8x128xf32>
    %399 = arith.divf %397, %398 : vector<8x128xf32>
    %400 = arith.mulf %391, %312 : vector<8x128xf32>
    %401 = arith.mulf %385, %393 : vector<8x128xf32>
    %402 = arith.addf %400, %401 : vector<8x128xf32>
    %403 = math.tanh %402 : vector<8x128xf32>
    %404 = arith.mulf %399, %403 : vector<8x128xf32>
    %405 = arith.select %32, %404, %311 : vector<8x128xi1>, vector<8x128xf32>
    %406 = arith.select %32, %402, %312 : vector<8x128xi1>, vector<8x128xf32>
    %407 = tpu.concatenate %311, %342 in 1 : vector<8x128xf32>, vector<8x128xf32> -> vector<8x256xf32>
    %c0_104 = arith.constant 0 : index
    %c0_105 = arith.constant 0 : index
    %408 = vector.load %arg10[%c0_104, %c0_105] : memref<256x512xf32, #tpu.memory_space<vmem>>, vector<256x512xf32>
    %cst_106 = arith.constant dense<0.000000e+00> : vector<8x512xf32>
    %409 = tpu.matmul %407, %408, %cst_106 {dimension_numbers = #tpu.dot_dimension_numbers<[1], [0], [0], [1], [0, 0, 1, 1], [], []>} : vector<8x256xf32>, vector<256x512xf32>, vector<8x512xf32> -> vector<8x512xf32>
    %410 = arith.addf %409, %54 : vector<8x512xf32>
    %411 = vector.extract_strided_slice %410 {offsets = [0, 0], sizes = [8, 128], strides = [1, 1]} : vector<8x512xf32> to vector<8x128xf32>
    %412 = arith.negf %411 : vector<8x128xf32>
    %413 = math.exp %412 : vector<8x128xf32>
    %cst_107 = arith.constant 1.000000e+00 : f32
    %414 = vector.broadcast %cst_107 : f32 to vector<8x128xf32>
    %415 = arith.addf %414, %413 : vector<8x128xf32>
    %416 = arith.divf %414, %415 : vector<8x128xf32>
    %417 = vector.extract_strided_slice %410 {offsets = [0, 128], sizes = [8, 128], strides = [1, 1]} : vector<8x512xf32> to vector<8x128xf32>
    %418 = arith.negf %417 : vector<8x128xf32>
    %419 = math.exp %418 : vector<8x128xf32>
    %cst_108 = arith.constant 1.000000e+00 : f32
    %420 = vector.broadcast %cst_108 : f32 to vector<8x128xf32>
    %421 = arith.addf %420, %419 : vector<8x128xf32>
    %422 = arith.divf %420, %421 : vector<8x128xf32>
    %423 = vector.extract_strided_slice %410 {offsets = [0, 256], sizes = [8, 128], strides = [1, 1]} : vector<8x512xf32> to vector<8x128xf32>
    %424 = math.tanh %423 : vector<8x128xf32>
    %425 = vector.extract_strided_slice %410 {offsets = [0, 384], sizes = [8, 128], strides = [1, 1]} : vector<8x512xf32> to vector<8x128xf32>
    %426 = arith.negf %425 : vector<8x128xf32>
    %427 = math.exp %426 : vector<8x128xf32>
    %cst_109 = arith.constant 1.000000e+00 : f32
    %428 = vector.broadcast %cst_109 : f32 to vector<8x128xf32>
    %429 = arith.addf %428, %427 : vector<8x128xf32>
    %430 = arith.divf %428, %429 : vector<8x128xf32>
    %431 = arith.mulf %422, %343 : vector<8x128xf32>
    %432 = arith.mulf %416, %424 : vector<8x128xf32>
    %433 = arith.addf %431, %432 : vector<8x128xf32>
    %434 = math.tanh %433 : vector<8x128xf32>
    %435 = arith.mulf %430, %434 : vector<8x128xf32>
    %436 = arith.select %28, %435, %342 : vector<8x128xi1>, vector<8x128xf32>
    %437 = arith.select %28, %433, %343 : vector<8x128xi1>, vector<8x128xf32>
    %c0_110 = arith.constant 0 : index
    %c0_111 = arith.constant 0 : index
    %438 = vector.load %arg7[%c0_110, %c0_111] : memref<128x512xf32, #tpu.memory_space<vmem>>, vector<128x512xf32>
    %cst_112 = arith.constant dense<0.000000e+00> : vector<8x512xf32>
    %439 = tpu.matmul %374, %438, %cst_112 {dimension_numbers = #tpu.dot_dimension_numbers<[1], [0], [0], [1], [0, 0, 1, 1], [], []>} : vector<8x128xf32>, vector<128x512xf32>, vector<8x512xf32> -> vector<8x512xf32>
    %c5 = arith.constant 5 : index
    %c0_113 = arith.constant 0 : index
    %c0_114 = arith.constant 0 : index
    %440 = vector.load %arg15[%c5, %c0_113, %c0_114] : memref<8x8x512xf32, #tpu.memory_space<vmem>>, vector<1x8x512xf32>
    %441 = vector.shape_cast %440 : vector<1x8x512xf32> to vector<8x512xf32>
    %442 = arith.addf %439, %441 : vector<8x512xf32>
    %443 = vector.extract_strided_slice %442 {offsets = [0, 0], sizes = [8, 128], strides = [1, 1]} : vector<8x512xf32> to vector<8x128xf32>
    %444 = arith.negf %443 : vector<8x128xf32>
    %445 = math.exp %444 : vector<8x128xf32>
    %cst_115 = arith.constant 1.000000e+00 : f32
    %446 = vector.broadcast %cst_115 : f32 to vector<8x128xf32>
    %447 = arith.addf %446, %445 : vector<8x128xf32>
    %448 = arith.divf %446, %447 : vector<8x128xf32>
    %449 = vector.extract_strided_slice %442 {offsets = [0, 128], sizes = [8, 128], strides = [1, 1]} : vector<8x512xf32> to vector<8x128xf32>
    %450 = arith.negf %449 : vector<8x128xf32>
    %451 = math.exp %450 : vector<8x128xf32>
    %cst_116 = arith.constant 1.000000e+00 : f32
    %452 = vector.broadcast %cst_116 : f32 to vector<8x128xf32>
    %453 = arith.addf %452, %451 : vector<8x128xf32>
    %454 = arith.divf %452, %453 : vector<8x128xf32>
    %455 = vector.extract_strided_slice %442 {offsets = [0, 256], sizes = [8, 128], strides = [1, 1]} : vector<8x512xf32> to vector<8x128xf32>
    %456 = math.tanh %455 : vector<8x128xf32>
    %457 = vector.extract_strided_slice %442 {offsets = [0, 384], sizes = [8, 128], strides = [1, 1]} : vector<8x512xf32> to vector<8x128xf32>
    %458 = arith.negf %457 : vector<8x128xf32>
    %459 = math.exp %458 : vector<8x128xf32>
    %cst_117 = arith.constant 1.000000e+00 : f32
    %460 = vector.broadcast %cst_117 : f32 to vector<8x128xf32>
    %461 = arith.addf %460, %459 : vector<8x128xf32>
    %462 = arith.divf %460, %461 : vector<8x128xf32>
    %463 = arith.mulf %454, %375 : vector<8x128xf32>
    %464 = arith.mulf %448, %456 : vector<8x128xf32>
    %465 = arith.addf %463, %464 : vector<8x128xf32>
    %466 = math.tanh %465 : vector<8x128xf32>
    %467 = arith.mulf %462, %466 : vector<8x128xf32>
    %468 = arith.select %40, %467, %374 : vector<8x128xi1>, vector<8x128xf32>
    %469 = arith.select %40, %465, %375 : vector<8x128xi1>, vector<8x128xf32>
    %470 = tpu.concatenate %374, %405 in 1 : vector<8x128xf32>, vector<8x128xf32> -> vector<8x256xf32>
    %c0_118 = arith.constant 0 : index
    %c0_119 = arith.constant 0 : index
    %471 = vector.load %arg8[%c0_118, %c0_119] : memref<256x512xf32, #tpu.memory_space<vmem>>, vector<256x512xf32>
    %cst_120 = arith.constant dense<0.000000e+00> : vector<8x512xf32>
    %472 = tpu.matmul %470, %471, %cst_120 {dimension_numbers = #tpu.dot_dimension_numbers<[1], [0], [0], [1], [0, 0, 1, 1], [], []>} : vector<8x256xf32>, vector<256x512xf32>, vector<8x512xf32> -> vector<8x512xf32>
    %473 = arith.addf %472, %51 : vector<8x512xf32>
    %474 = vector.extract_strided_slice %473 {offsets = [0, 0], sizes = [8, 128], strides = [1, 1]} : vector<8x512xf32> to vector<8x128xf32>
    %475 = arith.negf %474 : vector<8x128xf32>
    %476 = math.exp %475 : vector<8x128xf32>
    %cst_121 = arith.constant 1.000000e+00 : f32
    %477 = vector.broadcast %cst_121 : f32 to vector<8x128xf32>
    %478 = arith.addf %477, %476 : vector<8x128xf32>
    %479 = arith.divf %477, %478 : vector<8x128xf32>
    %480 = vector.extract_strided_slice %473 {offsets = [0, 128], sizes = [8, 128], strides = [1, 1]} : vector<8x512xf32> to vector<8x128xf32>
    %481 = arith.negf %480 : vector<8x128xf32>
    %482 = math.exp %481 : vector<8x128xf32>
    %cst_122 = arith.constant 1.000000e+00 : f32
    %483 = vector.broadcast %cst_122 : f32 to vector<8x128xf32>
    %484 = arith.addf %483, %482 : vector<8x128xf32>
    %485 = arith.divf %483, %484 : vector<8x128xf32>
    %486 = vector.extract_strided_slice %473 {offsets = [0, 256], sizes = [8, 128], strides = [1, 1]} : vector<8x512xf32> to vector<8x128xf32>
    %487 = math.tanh %486 : vector<8x128xf32>
    %488 = vector.extract_strided_slice %473 {offsets = [0, 384], sizes = [8, 128], strides = [1, 1]} : vector<8x512xf32> to vector<8x128xf32>
    %489 = arith.negf %488 : vector<8x128xf32>
    %490 = math.exp %489 : vector<8x128xf32>
    %cst_123 = arith.constant 1.000000e+00 : f32
    %491 = vector.broadcast %cst_123 : f32 to vector<8x128xf32>
    %492 = arith.addf %491, %490 : vector<8x128xf32>
    %493 = arith.divf %491, %492 : vector<8x128xf32>
    %494 = arith.mulf %485, %406 : vector<8x128xf32>
    %495 = arith.mulf %479, %487 : vector<8x128xf32>
    %496 = arith.addf %494, %495 : vector<8x128xf32>
    %497 = math.tanh %496 : vector<8x128xf32>
    %498 = arith.mulf %493, %497 : vector<8x128xf32>
    %499 = arith.select %36, %498, %405 : vector<8x128xi1>, vector<8x128xf32>
    %500 = arith.select %36, %496, %406 : vector<8x128xi1>, vector<8x128xf32>
    %501 = tpu.concatenate %405, %436 in 1 : vector<8x128xf32>, vector<8x128xf32> -> vector<8x256xf32>
    %c0_124 = arith.constant 0 : index
    %c0_125 = arith.constant 0 : index
    %502 = vector.load %arg10[%c0_124, %c0_125] : memref<256x512xf32, #tpu.memory_space<vmem>>, vector<256x512xf32>
    %cst_126 = arith.constant dense<0.000000e+00> : vector<8x512xf32>
    %503 = tpu.matmul %501, %502, %cst_126 {dimension_numbers = #tpu.dot_dimension_numbers<[1], [0], [0], [1], [0, 0, 1, 1], [], []>} : vector<8x256xf32>, vector<256x512xf32>, vector<8x512xf32> -> vector<8x512xf32>
    %504 = arith.addf %503, %54 : vector<8x512xf32>
    %505 = vector.extract_strided_slice %504 {offsets = [0, 0], sizes = [8, 128], strides = [1, 1]} : vector<8x512xf32> to vector<8x128xf32>
    %506 = arith.negf %505 : vector<8x128xf32>
    %507 = math.exp %506 : vector<8x128xf32>
    %cst_127 = arith.constant 1.000000e+00 : f32
    %508 = vector.broadcast %cst_127 : f32 to vector<8x128xf32>
    %509 = arith.addf %508, %507 : vector<8x128xf32>
    %510 = arith.divf %508, %509 : vector<8x128xf32>
    %511 = vector.extract_strided_slice %504 {offsets = [0, 128], sizes = [8, 128], strides = [1, 1]} : vector<8x512xf32> to vector<8x128xf32>
    %512 = arith.negf %511 : vector<8x128xf32>
    %513 = math.exp %512 : vector<8x128xf32>
    %cst_128 = arith.constant 1.000000e+00 : f32
    %514 = vector.broadcast %cst_128 : f32 to vector<8x128xf32>
    %515 = arith.addf %514, %513 : vector<8x128xf32>
    %516 = arith.divf %514, %515 : vector<8x128xf32>
    %517 = vector.extract_strided_slice %504 {offsets = [0, 256], sizes = [8, 128], strides = [1, 1]} : vector<8x512xf32> to vector<8x128xf32>
    %518 = math.tanh %517 : vector<8x128xf32>
    %519 = vector.extract_strided_slice %504 {offsets = [0, 384], sizes = [8, 128], strides = [1, 1]} : vector<8x512xf32> to vector<8x128xf32>
    %520 = arith.negf %519 : vector<8x128xf32>
    %521 = math.exp %520 : vector<8x128xf32>
    %cst_129 = arith.constant 1.000000e+00 : f32
    %522 = vector.broadcast %cst_129 : f32 to vector<8x128xf32>
    %523 = arith.addf %522, %521 : vector<8x128xf32>
    %524 = arith.divf %522, %523 : vector<8x128xf32>
    %525 = arith.mulf %516, %437 : vector<8x128xf32>
    %526 = arith.mulf %510, %518 : vector<8x128xf32>
    %527 = arith.addf %525, %526 : vector<8x128xf32>
    %528 = math.tanh %527 : vector<8x128xf32>
    %529 = arith.mulf %524, %528 : vector<8x128xf32>
    %530 = arith.select %32, %529, %436 : vector<8x128xi1>, vector<8x128xf32>
    %531 = arith.select %32, %527, %437 : vector<8x128xi1>, vector<8x128xf32>
    %c0_130 = arith.constant 0 : index
    %c0_131 = arith.constant 0 : index
    %532 = vector.load %arg7[%c0_130, %c0_131] : memref<128x512xf32, #tpu.memory_space<vmem>>, vector<128x512xf32>
    %cst_132 = arith.constant dense<0.000000e+00> : vector<8x512xf32>
    %533 = tpu.matmul %468, %532, %cst_132 {dimension_numbers = #tpu.dot_dimension_numbers<[1], [0], [0], [1], [0, 0, 1, 1], [], []>} : vector<8x128xf32>, vector<128x512xf32>, vector<8x512xf32> -> vector<8x512xf32>
    %c6 = arith.constant 6 : index
    %c0_133 = arith.constant 0 : index
    %c0_134 = arith.constant 0 : index
    %534 = vector.load %arg15[%c6, %c0_133, %c0_134] : memref<8x8x512xf32, #tpu.memory_space<vmem>>, vector<1x8x512xf32>
    %535 = vector.shape_cast %534 : vector<1x8x512xf32> to vector<8x512xf32>
    %536 = arith.addf %533, %535 : vector<8x512xf32>
    %537 = vector.extract_strided_slice %536 {offsets = [0, 0], sizes = [8, 128], strides = [1, 1]} : vector<8x512xf32> to vector<8x128xf32>
    %538 = arith.negf %537 : vector<8x128xf32>
    %539 = math.exp %538 : vector<8x128xf32>
    %cst_135 = arith.constant 1.000000e+00 : f32
    %540 = vector.broadcast %cst_135 : f32 to vector<8x128xf32>
    %541 = arith.addf %540, %539 : vector<8x128xf32>
    %542 = arith.divf %540, %541 : vector<8x128xf32>
    %543 = vector.extract_strided_slice %536 {offsets = [0, 128], sizes = [8, 128], strides = [1, 1]} : vector<8x512xf32> to vector<8x128xf32>
    %544 = arith.negf %543 : vector<8x128xf32>
    %545 = math.exp %544 : vector<8x128xf32>
    %cst_136 = arith.constant 1.000000e+00 : f32
    %546 = vector.broadcast %cst_136 : f32 to vector<8x128xf32>
    %547 = arith.addf %546, %545 : vector<8x128xf32>
    %548 = arith.divf %546, %547 : vector<8x128xf32>
    %549 = vector.extract_strided_slice %536 {offsets = [0, 256], sizes = [8, 128], strides = [1, 1]} : vector<8x512xf32> to vector<8x128xf32>
    %550 = math.tanh %549 : vector<8x128xf32>
    %551 = vector.extract_strided_slice %536 {offsets = [0, 384], sizes = [8, 128], strides = [1, 1]} : vector<8x512xf32> to vector<8x128xf32>
    %552 = arith.negf %551 : vector<8x128xf32>
    %553 = math.exp %552 : vector<8x128xf32>
    %cst_137 = arith.constant 1.000000e+00 : f32
    %554 = vector.broadcast %cst_137 : f32 to vector<8x128xf32>
    %555 = arith.addf %554, %553 : vector<8x128xf32>
    %556 = arith.divf %554, %555 : vector<8x128xf32>
    %557 = arith.mulf %548, %469 : vector<8x128xf32>
    %558 = arith.mulf %542, %550 : vector<8x128xf32>
    %559 = arith.addf %557, %558 : vector<8x128xf32>
    %560 = math.tanh %559 : vector<8x128xf32>
    %561 = arith.mulf %556, %560 : vector<8x128xf32>
    %562 = arith.select %44, %561, %468 : vector<8x128xi1>, vector<8x128xf32>
    %563 = arith.select %44, %559, %469 : vector<8x128xi1>, vector<8x128xf32>
    %564 = tpu.concatenate %468, %499 in 1 : vector<8x128xf32>, vector<8x128xf32> -> vector<8x256xf32>
    %c0_138 = arith.constant 0 : index
    %c0_139 = arith.constant 0 : index
    %565 = vector.load %arg8[%c0_138, %c0_139] : memref<256x512xf32, #tpu.memory_space<vmem>>, vector<256x512xf32>
    %cst_140 = arith.constant dense<0.000000e+00> : vector<8x512xf32>
    %566 = tpu.matmul %564, %565, %cst_140 {dimension_numbers = #tpu.dot_dimension_numbers<[1], [0], [0], [1], [0, 0, 1, 1], [], []>} : vector<8x256xf32>, vector<256x512xf32>, vector<8x512xf32> -> vector<8x512xf32>
    %567 = arith.addf %566, %51 : vector<8x512xf32>
    %568 = vector.extract_strided_slice %567 {offsets = [0, 0], sizes = [8, 128], strides = [1, 1]} : vector<8x512xf32> to vector<8x128xf32>
    %569 = arith.negf %568 : vector<8x128xf32>
    %570 = math.exp %569 : vector<8x128xf32>
    %cst_141 = arith.constant 1.000000e+00 : f32
    %571 = vector.broadcast %cst_141 : f32 to vector<8x128xf32>
    %572 = arith.addf %571, %570 : vector<8x128xf32>
    %573 = arith.divf %571, %572 : vector<8x128xf32>
    %574 = vector.extract_strided_slice %567 {offsets = [0, 128], sizes = [8, 128], strides = [1, 1]} : vector<8x512xf32> to vector<8x128xf32>
    %575 = arith.negf %574 : vector<8x128xf32>
    %576 = math.exp %575 : vector<8x128xf32>
    %cst_142 = arith.constant 1.000000e+00 : f32
    %577 = vector.broadcast %cst_142 : f32 to vector<8x128xf32>
    %578 = arith.addf %577, %576 : vector<8x128xf32>
    %579 = arith.divf %577, %578 : vector<8x128xf32>
    %580 = vector.extract_strided_slice %567 {offsets = [0, 256], sizes = [8, 128], strides = [1, 1]} : vector<8x512xf32> to vector<8x128xf32>
    %581 = math.tanh %580 : vector<8x128xf32>
    %582 = vector.extract_strided_slice %567 {offsets = [0, 384], sizes = [8, 128], strides = [1, 1]} : vector<8x512xf32> to vector<8x128xf32>
    %583 = arith.negf %582 : vector<8x128xf32>
    %584 = math.exp %583 : vector<8x128xf32>
    %cst_143 = arith.constant 1.000000e+00 : f32
    %585 = vector.broadcast %cst_143 : f32 to vector<8x128xf32>
    %586 = arith.addf %585, %584 : vector<8x128xf32>
    %587 = arith.divf %585, %586 : vector<8x128xf32>
    %588 = arith.mulf %579, %500 : vector<8x128xf32>
    %589 = arith.mulf %573, %581 : vector<8x128xf32>
    %590 = arith.addf %588, %589 : vector<8x128xf32>
    %591 = math.tanh %590 : vector<8x128xf32>
    %592 = arith.mulf %587, %591 : vector<8x128xf32>
    %593 = arith.select %40, %592, %499 : vector<8x128xi1>, vector<8x128xf32>
    %594 = arith.select %40, %590, %500 : vector<8x128xi1>, vector<8x128xf32>
    %595 = tpu.concatenate %499, %530 in 1 : vector<8x128xf32>, vector<8x128xf32> -> vector<8x256xf32>
    %c0_144 = arith.constant 0 : index
    %c0_145 = arith.constant 0 : index
    %596 = vector.load %arg10[%c0_144, %c0_145] : memref<256x512xf32, #tpu.memory_space<vmem>>, vector<256x512xf32>
    %cst_146 = arith.constant dense<0.000000e+00> : vector<8x512xf32>
    %597 = tpu.matmul %595, %596, %cst_146 {dimension_numbers = #tpu.dot_dimension_numbers<[1], [0], [0], [1], [0, 0, 1, 1], [], []>} : vector<8x256xf32>, vector<256x512xf32>, vector<8x512xf32> -> vector<8x512xf32>
    %598 = arith.addf %597, %54 : vector<8x512xf32>
    %599 = vector.extract_strided_slice %598 {offsets = [0, 0], sizes = [8, 128], strides = [1, 1]} : vector<8x512xf32> to vector<8x128xf32>
    %600 = arith.negf %599 : vector<8x128xf32>
    %601 = math.exp %600 : vector<8x128xf32>
    %cst_147 = arith.constant 1.000000e+00 : f32
    %602 = vector.broadcast %cst_147 : f32 to vector<8x128xf32>
    %603 = arith.addf %602, %601 : vector<8x128xf32>
    %604 = arith.divf %602, %603 : vector<8x128xf32>
    %605 = vector.extract_strided_slice %598 {offsets = [0, 128], sizes = [8, 128], strides = [1, 1]} : vector<8x512xf32> to vector<8x128xf32>
    %606 = arith.negf %605 : vector<8x128xf32>
    %607 = math.exp %606 : vector<8x128xf32>
    %cst_148 = arith.constant 1.000000e+00 : f32
    %608 = vector.broadcast %cst_148 : f32 to vector<8x128xf32>
    %609 = arith.addf %608, %607 : vector<8x128xf32>
    %610 = arith.divf %608, %609 : vector<8x128xf32>
    %611 = vector.extract_strided_slice %598 {offsets = [0, 256], sizes = [8, 128], strides = [1, 1]} : vector<8x512xf32> to vector<8x128xf32>
    %612 = math.tanh %611 : vector<8x128xf32>
    %613 = vector.extract_strided_slice %598 {offsets = [0, 384], sizes = [8, 128], strides = [1, 1]} : vector<8x512xf32> to vector<8x128xf32>
    %614 = arith.negf %613 : vector<8x128xf32>
    %615 = math.exp %614 : vector<8x128xf32>
    %cst_149 = arith.constant 1.000000e+00 : f32
    %616 = vector.broadcast %cst_149 : f32 to vector<8x128xf32>
    %617 = arith.addf %616, %615 : vector<8x128xf32>
    %618 = arith.divf %616, %617 : vector<8x128xf32>
    %619 = arith.mulf %610, %531 : vector<8x128xf32>
    %620 = arith.mulf %604, %612 : vector<8x128xf32>
    %621 = arith.addf %619, %620 : vector<8x128xf32>
    %622 = math.tanh %621 : vector<8x128xf32>
    %623 = arith.mulf %618, %622 : vector<8x128xf32>
    %624 = arith.select %36, %623, %530 : vector<8x128xi1>, vector<8x128xf32>
    %625 = arith.select %36, %621, %531 : vector<8x128xi1>, vector<8x128xf32>
    %c0_150 = arith.constant 0 : index
    %c0_151 = arith.constant 0 : index
    %626 = vector.load %arg7[%c0_150, %c0_151] : memref<128x512xf32, #tpu.memory_space<vmem>>, vector<128x512xf32>
    %cst_152 = arith.constant dense<0.000000e+00> : vector<8x512xf32>
    %627 = tpu.matmul %562, %626, %cst_152 {dimension_numbers = #tpu.dot_dimension_numbers<[1], [0], [0], [1], [0, 0, 1, 1], [], []>} : vector<8x128xf32>, vector<128x512xf32>, vector<8x512xf32> -> vector<8x512xf32>
    %c7 = arith.constant 7 : index
    %c0_153 = arith.constant 0 : index
    %c0_154 = arith.constant 0 : index
    %628 = vector.load %arg15[%c7, %c0_153, %c0_154] : memref<8x8x512xf32, #tpu.memory_space<vmem>>, vector<1x8x512xf32>
    %629 = vector.shape_cast %628 : vector<1x8x512xf32> to vector<8x512xf32>
    %630 = arith.addf %627, %629 : vector<8x512xf32>
    %631 = vector.extract_strided_slice %630 {offsets = [0, 0], sizes = [8, 128], strides = [1, 1]} : vector<8x512xf32> to vector<8x128xf32>
    %632 = arith.negf %631 : vector<8x128xf32>
    %633 = math.exp %632 : vector<8x128xf32>
    %cst_155 = arith.constant 1.000000e+00 : f32
    %634 = vector.broadcast %cst_155 : f32 to vector<8x128xf32>
    %635 = arith.addf %634, %633 : vector<8x128xf32>
    %636 = arith.divf %634, %635 : vector<8x128xf32>
    %637 = vector.extract_strided_slice %630 {offsets = [0, 128], sizes = [8, 128], strides = [1, 1]} : vector<8x512xf32> to vector<8x128xf32>
    %638 = arith.negf %637 : vector<8x128xf32>
    %639 = math.exp %638 : vector<8x128xf32>
    %cst_156 = arith.constant 1.000000e+00 : f32
    %640 = vector.broadcast %cst_156 : f32 to vector<8x128xf32>
    %641 = arith.addf %640, %639 : vector<8x128xf32>
    %642 = arith.divf %640, %641 : vector<8x128xf32>
    %643 = vector.extract_strided_slice %630 {offsets = [0, 256], sizes = [8, 128], strides = [1, 1]} : vector<8x512xf32> to vector<8x128xf32>
    %644 = math.tanh %643 : vector<8x128xf32>
    %645 = vector.extract_strided_slice %630 {offsets = [0, 384], sizes = [8, 128], strides = [1, 1]} : vector<8x512xf32> to vector<8x128xf32>
    %646 = arith.negf %645 : vector<8x128xf32>
    %647 = math.exp %646 : vector<8x128xf32>
    %cst_157 = arith.constant 1.000000e+00 : f32
    %648 = vector.broadcast %cst_157 : f32 to vector<8x128xf32>
    %649 = arith.addf %648, %647 : vector<8x128xf32>
    %650 = arith.divf %648, %649 : vector<8x128xf32>
    %651 = arith.mulf %642, %563 : vector<8x128xf32>
    %652 = arith.mulf %636, %644 : vector<8x128xf32>
    %653 = arith.addf %651, %652 : vector<8x128xf32>
    %654 = math.tanh %653 : vector<8x128xf32>
    %655 = arith.mulf %650, %654 : vector<8x128xf32>
    %656 = arith.select %48, %655, %562 : vector<8x128xi1>, vector<8x128xf32>
    %657 = tpu.concatenate %562, %593 in 1 : vector<8x128xf32>, vector<8x128xf32> -> vector<8x256xf32>
    %c0_158 = arith.constant 0 : index
    %c0_159 = arith.constant 0 : index
    %658 = vector.load %arg8[%c0_158, %c0_159] : memref<256x512xf32, #tpu.memory_space<vmem>>, vector<256x512xf32>
    %cst_160 = arith.constant dense<0.000000e+00> : vector<8x512xf32>
    %659 = tpu.matmul %657, %658, %cst_160 {dimension_numbers = #tpu.dot_dimension_numbers<[1], [0], [0], [1], [0, 0, 1, 1], [], []>} : vector<8x256xf32>, vector<256x512xf32>, vector<8x512xf32> -> vector<8x512xf32>
    %660 = arith.addf %659, %51 : vector<8x512xf32>
    %661 = vector.extract_strided_slice %660 {offsets = [0, 0], sizes = [8, 128], strides = [1, 1]} : vector<8x512xf32> to vector<8x128xf32>
    %662 = arith.negf %661 : vector<8x128xf32>
    %663 = math.exp %662 : vector<8x128xf32>
    %cst_161 = arith.constant 1.000000e+00 : f32
    %664 = vector.broadcast %cst_161 : f32 to vector<8x128xf32>
    %665 = arith.addf %664, %663 : vector<8x128xf32>
    %666 = arith.divf %664, %665 : vector<8x128xf32>
    %667 = vector.extract_strided_slice %660 {offsets = [0, 128], sizes = [8, 128], strides = [1, 1]} : vector<8x512xf32> to vector<8x128xf32>
    %668 = arith.negf %667 : vector<8x128xf32>
    %669 = math.exp %668 : vector<8x128xf32>
    %cst_162 = arith.constant 1.000000e+00 : f32
    %670 = vector.broadcast %cst_162 : f32 to vector<8x128xf32>
    %671 = arith.addf %670, %669 : vector<8x128xf32>
    %672 = arith.divf %670, %671 : vector<8x128xf32>
    %673 = vector.extract_strided_slice %660 {offsets = [0, 256], sizes = [8, 128], strides = [1, 1]} : vector<8x512xf32> to vector<8x128xf32>
    %674 = math.tanh %673 : vector<8x128xf32>
    %675 = vector.extract_strided_slice %660 {offsets = [0, 384], sizes = [8, 128], strides = [1, 1]} : vector<8x512xf32> to vector<8x128xf32>
    %676 = arith.negf %675 : vector<8x128xf32>
    %677 = math.exp %676 : vector<8x128xf32>
    %cst_163 = arith.constant 1.000000e+00 : f32
    %678 = vector.broadcast %cst_163 : f32 to vector<8x128xf32>
    %679 = arith.addf %678, %677 : vector<8x128xf32>
    %680 = arith.divf %678, %679 : vector<8x128xf32>
    %681 = arith.mulf %672, %594 : vector<8x128xf32>
    %682 = arith.mulf %666, %674 : vector<8x128xf32>
    %683 = arith.addf %681, %682 : vector<8x128xf32>
    %684 = math.tanh %683 : vector<8x128xf32>
    %685 = arith.mulf %680, %684 : vector<8x128xf32>
    %686 = arith.select %44, %685, %593 : vector<8x128xi1>, vector<8x128xf32>
    %687 = arith.select %44, %683, %594 : vector<8x128xi1>, vector<8x128xf32>
    %688 = tpu.concatenate %593, %624 in 1 : vector<8x128xf32>, vector<8x128xf32> -> vector<8x256xf32>
    %c0_164 = arith.constant 0 : index
    %c0_165 = arith.constant 0 : index
    %689 = vector.load %arg10[%c0_164, %c0_165] : memref<256x512xf32, #tpu.memory_space<vmem>>, vector<256x512xf32>
    %cst_166 = arith.constant dense<0.000000e+00> : vector<8x512xf32>
    %690 = tpu.matmul %688, %689, %cst_166 {dimension_numbers = #tpu.dot_dimension_numbers<[1], [0], [0], [1], [0, 0, 1, 1], [], []>} : vector<8x256xf32>, vector<256x512xf32>, vector<8x512xf32> -> vector<8x512xf32>
    %691 = arith.addf %690, %54 : vector<8x512xf32>
    %692 = vector.extract_strided_slice %691 {offsets = [0, 0], sizes = [8, 128], strides = [1, 1]} : vector<8x512xf32> to vector<8x128xf32>
    %693 = arith.negf %692 : vector<8x128xf32>
    %694 = math.exp %693 : vector<8x128xf32>
    %cst_167 = arith.constant 1.000000e+00 : f32
    %695 = vector.broadcast %cst_167 : f32 to vector<8x128xf32>
    %696 = arith.addf %695, %694 : vector<8x128xf32>
    %697 = arith.divf %695, %696 : vector<8x128xf32>
    %698 = vector.extract_strided_slice %691 {offsets = [0, 128], sizes = [8, 128], strides = [1, 1]} : vector<8x512xf32> to vector<8x128xf32>
    %699 = arith.negf %698 : vector<8x128xf32>
    %700 = math.exp %699 : vector<8x128xf32>
    %cst_168 = arith.constant 1.000000e+00 : f32
    %701 = vector.broadcast %cst_168 : f32 to vector<8x128xf32>
    %702 = arith.addf %701, %700 : vector<8x128xf32>
    %703 = arith.divf %701, %702 : vector<8x128xf32>
    %704 = vector.extract_strided_slice %691 {offsets = [0, 256], sizes = [8, 128], strides = [1, 1]} : vector<8x512xf32> to vector<8x128xf32>
    %705 = math.tanh %704 : vector<8x128xf32>
    %706 = vector.extract_strided_slice %691 {offsets = [0, 384], sizes = [8, 128], strides = [1, 1]} : vector<8x512xf32> to vector<8x128xf32>
    %707 = arith.negf %706 : vector<8x128xf32>
    %708 = math.exp %707 : vector<8x128xf32>
    %cst_169 = arith.constant 1.000000e+00 : f32
    %709 = vector.broadcast %cst_169 : f32 to vector<8x128xf32>
    %710 = arith.addf %709, %708 : vector<8x128xf32>
    %711 = arith.divf %709, %710 : vector<8x128xf32>
    %712 = arith.mulf %703, %625 : vector<8x128xf32>
    %713 = arith.mulf %697, %705 : vector<8x128xf32>
    %714 = arith.addf %712, %713 : vector<8x128xf32>
    %715 = math.tanh %714 : vector<8x128xf32>
    %716 = arith.mulf %711, %715 : vector<8x128xf32>
    %717 = arith.select %40, %716, %624 : vector<8x128xi1>, vector<8x128xf32>
    %718 = arith.select %40, %714, %625 : vector<8x128xi1>, vector<8x128xf32>
    %719 = tpu.concatenate %656, %686 in 1 : vector<8x128xf32>, vector<8x128xf32> -> vector<8x256xf32>
    %c0_170 = arith.constant 0 : index
    %c0_171 = arith.constant 0 : index
    %720 = vector.load %arg8[%c0_170, %c0_171] : memref<256x512xf32, #tpu.memory_space<vmem>>, vector<256x512xf32>
    %cst_172 = arith.constant dense<0.000000e+00> : vector<8x512xf32>
    %721 = tpu.matmul %719, %720, %cst_172 {dimension_numbers = #tpu.dot_dimension_numbers<[1], [0], [0], [1], [0, 0, 1, 1], [], []>} : vector<8x256xf32>, vector<256x512xf32>, vector<8x512xf32> -> vector<8x512xf32>
    %722 = arith.addf %721, %51 : vector<8x512xf32>
    %723 = vector.extract_strided_slice %722 {offsets = [0, 0], sizes = [8, 128], strides = [1, 1]} : vector<8x512xf32> to vector<8x128xf32>
    %724 = arith.negf %723 : vector<8x128xf32>
    %725 = math.exp %724 : vector<8x128xf32>
    %cst_173 = arith.constant 1.000000e+00 : f32
    %726 = vector.broadcast %cst_173 : f32 to vector<8x128xf32>
    %727 = arith.addf %726, %725 : vector<8x128xf32>
    %728 = arith.divf %726, %727 : vector<8x128xf32>
    %729 = vector.extract_strided_slice %722 {offsets = [0, 128], sizes = [8, 128], strides = [1, 1]} : vector<8x512xf32> to vector<8x128xf32>
    %730 = arith.negf %729 : vector<8x128xf32>
    %731 = math.exp %730 : vector<8x128xf32>
    %cst_174 = arith.constant 1.000000e+00 : f32
    %732 = vector.broadcast %cst_174 : f32 to vector<8x128xf32>
    %733 = arith.addf %732, %731 : vector<8x128xf32>
    %734 = arith.divf %732, %733 : vector<8x128xf32>
    %735 = vector.extract_strided_slice %722 {offsets = [0, 256], sizes = [8, 128], strides = [1, 1]} : vector<8x512xf32> to vector<8x128xf32>
    %736 = math.tanh %735 : vector<8x128xf32>
    %737 = vector.extract_strided_slice %722 {offsets = [0, 384], sizes = [8, 128], strides = [1, 1]} : vector<8x512xf32> to vector<8x128xf32>
    %738 = arith.negf %737 : vector<8x128xf32>
    %739 = math.exp %738 : vector<8x128xf32>
    %cst_175 = arith.constant 1.000000e+00 : f32
    %740 = vector.broadcast %cst_175 : f32 to vector<8x128xf32>
    %741 = arith.addf %740, %739 : vector<8x128xf32>
    %742 = arith.divf %740, %741 : vector<8x128xf32>
    %743 = arith.mulf %734, %687 : vector<8x128xf32>
    %744 = arith.mulf %728, %736 : vector<8x128xf32>
    %745 = arith.addf %743, %744 : vector<8x128xf32>
    %746 = math.tanh %745 : vector<8x128xf32>
    %747 = arith.mulf %742, %746 : vector<8x128xf32>
    %748 = arith.select %48, %747, %686 : vector<8x128xi1>, vector<8x128xf32>
    %749 = tpu.concatenate %686, %717 in 1 : vector<8x128xf32>, vector<8x128xf32> -> vector<8x256xf32>
    %c0_176 = arith.constant 0 : index
    %c0_177 = arith.constant 0 : index
    %750 = vector.load %arg10[%c0_176, %c0_177] : memref<256x512xf32, #tpu.memory_space<vmem>>, vector<256x512xf32>
    %cst_178 = arith.constant dense<0.000000e+00> : vector<8x512xf32>
    %751 = tpu.matmul %749, %750, %cst_178 {dimension_numbers = #tpu.dot_dimension_numbers<[1], [0], [0], [1], [0, 0, 1, 1], [], []>} : vector<8x256xf32>, vector<256x512xf32>, vector<8x512xf32> -> vector<8x512xf32>
    %752 = arith.addf %751, %54 : vector<8x512xf32>
    %753 = vector.extract_strided_slice %752 {offsets = [0, 0], sizes = [8, 128], strides = [1, 1]} : vector<8x512xf32> to vector<8x128xf32>
    %754 = arith.negf %753 : vector<8x128xf32>
    %755 = math.exp %754 : vector<8x128xf32>
    %cst_179 = arith.constant 1.000000e+00 : f32
    %756 = vector.broadcast %cst_179 : f32 to vector<8x128xf32>
    %757 = arith.addf %756, %755 : vector<8x128xf32>
    %758 = arith.divf %756, %757 : vector<8x128xf32>
    %759 = vector.extract_strided_slice %752 {offsets = [0, 128], sizes = [8, 128], strides = [1, 1]} : vector<8x512xf32> to vector<8x128xf32>
    %760 = arith.negf %759 : vector<8x128xf32>
    %761 = math.exp %760 : vector<8x128xf32>
    %cst_180 = arith.constant 1.000000e+00 : f32
    %762 = vector.broadcast %cst_180 : f32 to vector<8x128xf32>
    %763 = arith.addf %762, %761 : vector<8x128xf32>
    %764 = arith.divf %762, %763 : vector<8x128xf32>
    %765 = vector.extract_strided_slice %752 {offsets = [0, 256], sizes = [8, 128], strides = [1, 1]} : vector<8x512xf32> to vector<8x128xf32>
    %766 = math.tanh %765 : vector<8x128xf32>
    %767 = vector.extract_strided_slice %752 {offsets = [0, 384], sizes = [8, 128], strides = [1, 1]} : vector<8x512xf32> to vector<8x128xf32>
    %768 = arith.negf %767 : vector<8x128xf32>
    %769 = math.exp %768 : vector<8x128xf32>
    %cst_181 = arith.constant 1.000000e+00 : f32
    %770 = vector.broadcast %cst_181 : f32 to vector<8x128xf32>
    %771 = arith.addf %770, %769 : vector<8x128xf32>
    %772 = arith.divf %770, %771 : vector<8x128xf32>
    %773 = arith.mulf %764, %718 : vector<8x128xf32>
    %774 = arith.mulf %758, %766 : vector<8x128xf32>
    %775 = arith.addf %773, %774 : vector<8x128xf32>
    %776 = math.tanh %775 : vector<8x128xf32>
    %777 = arith.mulf %772, %776 : vector<8x128xf32>
    %778 = arith.select %44, %777, %717 : vector<8x128xi1>, vector<8x128xf32>
    %779 = arith.select %44, %775, %718 : vector<8x128xi1>, vector<8x128xf32>
    %780 = tpu.concatenate %748, %778 in 1 : vector<8x128xf32>, vector<8x128xf32> -> vector<8x256xf32>
    %c0_182 = arith.constant 0 : index
    %c0_183 = arith.constant 0 : index
    %781 = vector.load %arg10[%c0_182, %c0_183] : memref<256x512xf32, #tpu.memory_space<vmem>>, vector<256x512xf32>
    %cst_184 = arith.constant dense<0.000000e+00> : vector<8x512xf32>
    %782 = tpu.matmul %780, %781, %cst_184 {dimension_numbers = #tpu.dot_dimension_numbers<[1], [0], [0], [1], [0, 0, 1, 1], [], []>} : vector<8x256xf32>, vector<256x512xf32>, vector<8x512xf32> -> vector<8x512xf32>
    %783 = arith.addf %782, %54 : vector<8x512xf32>
    %784 = vector.extract_strided_slice %783 {offsets = [0, 0], sizes = [8, 128], strides = [1, 1]} : vector<8x512xf32> to vector<8x128xf32>
    %785 = arith.negf %784 : vector<8x128xf32>
    %786 = math.exp %785 : vector<8x128xf32>
    %cst_185 = arith.constant 1.000000e+00 : f32
    %787 = vector.broadcast %cst_185 : f32 to vector<8x128xf32>
    %788 = arith.addf %787, %786 : vector<8x128xf32>
    %789 = arith.divf %787, %788 : vector<8x128xf32>
    %790 = vector.extract_strided_slice %783 {offsets = [0, 128], sizes = [8, 128], strides = [1, 1]} : vector<8x512xf32> to vector<8x128xf32>
    %791 = arith.negf %790 : vector<8x128xf32>
    %792 = math.exp %791 : vector<8x128xf32>
    %cst_186 = arith.constant 1.000000e+00 : f32
    %793 = vector.broadcast %cst_186 : f32 to vector<8x128xf32>
    %794 = arith.addf %793, %792 : vector<8x128xf32>
    %795 = arith.divf %793, %794 : vector<8x128xf32>
    %796 = vector.extract_strided_slice %783 {offsets = [0, 256], sizes = [8, 128], strides = [1, 1]} : vector<8x512xf32> to vector<8x128xf32>
    %797 = math.tanh %796 : vector<8x128xf32>
    %798 = vector.extract_strided_slice %783 {offsets = [0, 384], sizes = [8, 128], strides = [1, 1]} : vector<8x512xf32> to vector<8x128xf32>
    %799 = arith.negf %798 : vector<8x128xf32>
    %800 = math.exp %799 : vector<8x128xf32>
    %cst_187 = arith.constant 1.000000e+00 : f32
    %801 = vector.broadcast %cst_187 : f32 to vector<8x128xf32>
    %802 = arith.addf %801, %800 : vector<8x128xf32>
    %803 = arith.divf %801, %802 : vector<8x128xf32>
    %804 = arith.mulf %795, %779 : vector<8x128xf32>
    %805 = arith.mulf %789, %797 : vector<8x128xf32>
    %806 = arith.addf %804, %805 : vector<8x128xf32>
    %807 = math.tanh %806 : vector<8x128xf32>
    %808 = arith.mulf %803, %807 : vector<8x128xf32>
    %809 = arith.select %48, %808, %778 : vector<8x128xi1>, vector<8x128xf32>
    %c0_188 = arith.constant 0 : index
    %c0_189 = arith.constant 0 : index
    %810 = vector.load %arg12[%c0_188, %c0_189] : memref<128x2xf32, #tpu.memory_space<vmem>>, vector<128x2xf32>
    %cst_190 = arith.constant dense<0.000000e+00> : vector<8x2xf32>
    %811 = tpu.matmul %809, %810, %cst_190 {dimension_numbers = #tpu.dot_dimension_numbers<[1], [0], [0], [1], [0, 0, 1, 1], [], []>} : vector<8x128xf32>, vector<128x2xf32>, vector<8x2xf32> -> vector<8x2xf32>
    %c0_191 = arith.constant 0 : index
    %c0_192 = arith.constant 0 : index
    %812 = vector.load %arg13[%c0_191, %c0_192] : memref<1x2xf32, #tpu.memory_space<vmem>>, vector<1x2xf32>
    %813 = vector.broadcast %812 : vector<1x2xf32> to vector<8x2xf32>
    %814 = arith.addf %811, %813 : vector<8x2xf32>
    %c0_193 = arith.constant 0 : index
    %c0_194 = arith.constant 0 : index
    %815 = vector.load %arg14[%c0_193, %c0_194] : memref<8x2xf32, #tpu.memory_space<vmem>>, vector<8x2xf32>
    tpu.vector_store %arg14[%c0_193, %c0_194], %814 {strides = array<i32>} : memref<8x2xf32, #tpu.memory_space<vmem>>, vector<8x2xf32>,
    return
  }
  func.func @transform_0(%arg0: i32) -> (i32, i32, i32) {
    %c0_i32 = arith.constant 0 : i32
    %c0_i32_0 = arith.constant 0 : i32
    %c0_i32_1 = arith.constant 0 : i32
    %c0_i32_2 = arith.constant 0 : i32
    return %c0_i32, %c0_i32_0, %c0_i32_1 : i32, i32, i32
  }
  func.func @transform_1(%arg0: i32) -> (i32, i32) {
    %c0_i32 = arith.constant 0 : i32
    %c0_i32_0 = arith.constant 0 : i32
    %c0_i32_1 = arith.constant 0 : i32
    return %c0_i32, %c0_i32_0 : i32, i32
  }
  func.func @transform_2(%arg0: i32) -> (i32, i32) {
    %c0_i32 = arith.constant 0 : i32
    %c0_i32_0 = arith.constant 0 : i32
    %c0_i32_1 = arith.constant 0 : i32
    return %c0_i32, %c0_i32_0 : i32, i32
  }
  func.func @transform_3(%arg0: i32) -> (i32, i32) {
    %c0_i32 = arith.constant 0 : i32
    %c0_i32_0 = arith.constant 0 : i32
    %c0_i32_1 = arith.constant 0 : i32
    return %c0_i32, %c0_i32_0 : i32, i32
  }
  func.func @transform_4(%arg0: i32) -> (i32, i32) {
    %c0_i32 = arith.constant 0 : i32
    %c0_i32_0 = arith.constant 0 : i32
    %c0_i32_1 = arith.constant 0 : i32
    return %c0_i32, %c0_i32_0 : i32, i32
  }
  func.func @transform_5(%arg0: i32) -> (i32, i32) {
    %c0_i32 = arith.constant 0 : i32
    %c0_i32_0 = arith.constant 0 : i32
    %c0_i32_1 = arith.constant 0 : i32
    return %c0_i32, %c0_i32_0 : i32, i32
  }
  func.func @transform_6(%arg0: i32) -> (i32, i32) {
    %c0_i32 = arith.constant 0 : i32
    %c0_i32_0 = arith.constant 0 : i32
    %c0_i32_1 = arith.constant 0 : i32
    return %c0_i32, %c0_i32_0 : i32, i32
  }
  func.func @transform_7(%arg0: i32) -> (i32, i32) {
    %c0_i32 = arith.constant 0 : i32
    %c0_i32_0 = arith.constant 0 : i32
    %c0_i32_1 = arith.constant 0 : i32
    return %c0_i32, %c0_i32_0 : i32, i32
  }
  func.func @transform_8(%arg0: i32) -> (i32, i32) {
    %c0_i32 = arith.constant 0 : i32
    %c0_i32_0 = arith.constant 0 : i32
    %c0_i32_1 = arith.constant 0 : i32
    return %c0_i32, %c0_i32_0 : i32, i32
  }
  func.func @transform_9(%arg0: i32) -> (i32, i32) {
    %c0_i32 = arith.constant 0 : i32
    %c0_i32_0 = arith.constant 0 : i32
    %c0_i32_1 = arith.constant 0 : i32
    return %c0_i32, %c0_i32_0 : i32, i32
  }
  func.func @transform_10(%arg0: i32) -> (i32, i32) {
    %c0_i32 = arith.constant 0 : i32
    %c0_i32_0 = arith.constant 0 : i32
    %c0_i32_1 = arith.constant 0 : i32
    return %c0_i32, %c0_i32_0 : i32, i32
  }
  func.func @transform_11(%arg0: i32) -> (i32, i32) {
    %c0_i32 = arith.constant 0 : i32
    %c0_i32_0 = arith.constant 0 : i32
    %c0_i32_1 = arith.constant 0 : i32
    return %c0_i32, %c0_i32_0 : i32, i32
  }
  func.func @transform_12(%arg0: i32) -> (i32, i32) {
    %c0_i32 = arith.constant 0 : i32
    %c0_i32_0 = arith.constant 0 : i32
    %c0_i32_1 = arith.constant 0 : i32
    return %c0_i32, %c0_i32_0 : i32, i32
  }
  func.func @transform_13(%arg0: i32) -> (i32, i32) {
    %c0_i32 = arith.constant 0 : i32
    %c0_i32_0 = arith.constant 0 : i32
    %c0_i32_1 = arith.constant 0 : i32
    return %c0_i32, %c0_i32_0 : i32, i32
  }
}

</mosaic_0001>

<bundles_post_ra>
// kernel: tpu_custom_call.1
= control target key start
LH: loop header
LB: loop body
LE: loop exit
PB: predicated region body
PF: predicated region fallthrough
CT: control target
= control target key end

     0   :  { %18 = vsyncpa [#allocation4], 0  ;;  %s10975_s0 = inlined_call_operand.vmem [shape: f32[8,8,16], index: 0, kind: input, shape index: {}]   ;;  %s10976_s1 = inlined_call_operand.vmem [shape: s32[8,1], index: 1, kind: input, shape index: {}]   ;;  %s10977_s2 = inlined_call_operand.vmem [shape: f32[16,128], index: 2, kind: input, shape index: {}]   ;;  %s10978_s3 = inlined_call_operand.vmem [shape: f32[1,128], index: 3, kind: input, shape index: {}]   ;;  %s10979_s4 = inlined_call_operand.hbm [shape: f32[128,512], index: 4, kind: input, shape index: {}]   ;;  %s10980_s5 = inlined_call_operand.vmem [shape: f32[1,512], index: 5, kind: input, shape index: {}]   ;;  %s10981_s6 = inlined_call_operand.hbm [shape: f32[128,512], index: 6, kind: input, shape index: {}]   ;;  %s10982_s7 = inlined_call_operand.hbm [shape: f32[256,512], index: 7, kind: input, shape index: {}]   ;;  %s10983_s8 = inlined_call_operand.vmem [shape: f32[1,512], index: 8, kind: input, shape index: {}]   ;;  %s10984_s9 = inlined_call_operand.hbm [shape: f32[256,512], index: 9, kind: input, shape index: {}]   ;;  %s10985_s10 = inlined_call_operand.vmem [shape: f32[1,512], index: 10, kind: input, shape index: {}]   ;;  %s10986_s11 = inlined_call_operand.vmem [shape: f32[128,2], index: 11, kind: input, shape index: {}]   ;;  %s10987_s12 = inlined_call_operand.vmem [shape: f32[1,2], index: 12, kind: input, shape index: {}]   ;;  %s10988_s13 = inlined_call_operand.vmem [shape: f32[8,2], index: 13, kind: output, shape index: {}]  }
   0x1   :  { %19 = vsyncpa [#allocation6], 0 }
   0x2   :  { %20 = vsyncpa [#allocation9], 0  ;;  %s8558_s25 = smov [#allocation5]   ;;  %s8559_s27 = smov [#allocation3]  }
   0x3   :  { %s48_s26 = sshll.u32 %s8558_s25, 4  ;;  %s34_s28 = sshll.u32 %s8559_s27, 4  ;;  %s49_s26 = int_to_ptr.vmem [resolvable:$true] %s48_s26  ;;  %s8638_s28 = int_to_ptr.vmem [resolvable:$true] %s34_s28 }
   0x4   :  { %s8464_s14 = scalar_lea.hbm %s10981_s6, 8192 }
   0x5   :  { %p8465_p0 = scmp.ne.s32.totalorder %s10981_s6, %s8464_s14  ;;  %p8468_p1 = scmp.lt.u32.totalorder %s8464_s14, %s10981_s6 }
   0x7   :  { %p8470_p2 = pnand %p8468_p1, %p8465_p0 }
   0x9   :  { %8473 = shalt.err (!%p8470_p2)
}
   0xa   :  { %s8474_s19 = scalar_lea.vmem %s49_s26, 8192  ;;  %p8479_p4 = scmp.lt.s32.totalorder %s49_s26, %s49_s26 }
   0xb   :  { %p8475_p3 = scmp.ne.s32.totalorder %s49_s26, %s8474_s19  ;;  %p8480_p5 = scmp.lt.s32.totalorder %s8474_s19, %s8474_s19 }
   0xd   :  { %p8481_p6 = por %p8480_p5, %p8479_p4 }
   0xf   :  { %p8482_p7 = pnand %p8481_p6, %p8475_p3 }
  0x11   :  { %8485 = shalt.err (!%p8482_p7)
}
  0x12   :  { %s8560_s20 = smov 512   ;;  %s8561_s21 = smov 32  }
  0x13   :  { %54 = dma.hbm_to_vmem [thread:$0]  %s10981_s6, 8192, %s49_s26, [#allocation6], %s8560_s20, %s8560_s20, %s8561_s21  }
  0x14   :  { %s8486_s27 = scalar_lea.hbm %s10979_s4, 8192 }
  0x15   :  { %p8487_p8 = scmp.ne.s32.totalorder %s10979_s4, %s8486_s27  ;;  %p8490_p9 = scmp.lt.u32.totalorder %s8486_s27, %s10979_s4 }
  0x17   :  { %p8492_p10 = pnand %p8490_p9, %p8487_p8 }
  0x19   :  { %8495 = shalt.err (!%p8492_p10)
}
  0x1a   :  { %s8496_s16 = scalar_lea.vmem %s8638_s28, 8192  ;;  %p8501_p12 = scmp.lt.s32.totalorder %s8638_s28, %s8638_s28 }
  0x1b   :  { %p8497_p11 = scmp.ne.s32.totalorder %s8638_s28, %s8496_s16  ;;  %p8502_p13 = scmp.lt.s32.totalorder %s8496_s16, %s8496_s16 }
  0x1d   :  { %p8503_p0 = por %p8502_p13, %p8501_p12 }
  0x1f   :  { %p8504_p1 = pnand %p8503_p0, %p8497_p11 }
  0x21   :  { %8507 = shalt.err (!%p8504_p1)
}
  0x22   :  { %40 = dma.hbm_to_vmem [thread:$0]  %s10979_s4, 8192, %s8638_s28, [#allocation4], %s8560_s20, %s8560_s20, %s8561_s21  }
  0x23   :  { %s8562_s17 = smov [#allocation7]   ;;  %s8563_s19 = smov [#allocation8]  }
  0x24   :  { %s60_s18 = sshll.u32 %s8562_s17, 4  ;;  %s74_s22 = sshll.u32 %s8563_s19, 4  ;;  %s61_s18 = int_to_ptr.vmem [resolvable:$true] %s60_s18  ;;  %s8675_s22 = int_to_ptr.vmem [resolvable:$true] %s74_s22 }
  0x25   :  { %s8508_s25 = scalar_lea.hbm %s10982_s7, 16384 }
  0x26   :  { %p8509_p2 = scmp.ne.s32.totalorder %s10982_s7, %s8508_s25  ;;  %p8512_p3 = scmp.lt.u32.totalorder %s8508_s25, %s10982_s7 }
  0x28   :  { %p8514_p4 = pnand %p8512_p3, %p8509_p2 }
  0x2a   :  { %8517 = shalt.err (!%p8514_p4)
}
  0x2b   :  { %s8518_s4 = scalar_lea.vmem %s61_s18, 16384  ;;  %p8523_p6 = scmp.lt.s32.totalorder %s61_s18, %s61_s18 }
  0x2c   :  { %p8519_p5 = scmp.ne.s32.totalorder %s61_s18, %s8518_s4  ;;  %p8524_p7 = scmp.lt.s32.totalorder %s8518_s4, %s8518_s4 }
  0x2e   :  { %p8525_p8 = por %p8524_p7, %p8523_p6 }
  0x30   :  { %p8526_p9 = pnand %p8525_p8, %p8519_p5 }
  0x32   :  { %8529 = shalt.err (!%p8526_p9)
}
  0x33   :  { %66 = dma.hbm_to_vmem [thread:$0]  %s10982_s7, 16384, %s61_s18, [#allocation6], %s8560_s20, %s8560_s20, %s8561_s21  }
  0x34   :  { %s8530_s26 = scalar_lea.hbm %s10984_s9, 16384 }
  0x35   :  { %p8531_p10 = scmp.ne.s32.totalorder %s10984_s9, %s8530_s26  ;;  %p8534_p11 = scmp.lt.u32.totalorder %s8530_s26, %s10984_s9 }
  0x37   :  { %p8536_p12 = pnand %p8534_p11, %p8531_p10 }
  0x39   :  { %8539 = shalt.err (!%p8536_p12)
}
  0x3a   :  { %s8540_s25 = scalar_lea.vmem %s8675_s22, 16384  ;;  %p8545_p0 = scmp.lt.s32.totalorder %s8675_s22, %s8675_s22 }
  0x3b   :  { %p8541_p13 = scmp.ne.s32.totalorder %s8675_s22, %s8540_s25  ;;  %p8546_p1 = scmp.lt.s32.totalorder %s8540_s25, %s8540_s25 }
  0x3d   :  { %p8547_p2 = por %p8546_p1, %p8545_p0 }
  0x3f   :  { %p8548_p3 = pnand %p8547_p2, %p8541_p13 }
  0x41   :  { %8551 = shalt.err (!%p8548_p3)
}
  0x42   :  { %80 = dma.hbm_to_vmem [thread:$0]  %s10984_s9, 16384, %s8675_s22, [#allocation9], %s8560_s20, %s8560_s20, %s8561_s21  }
  0x43   :  { %8552 = dma.done.wait [#allocation4], 8192  }
  0x44   :  { %8553 = vsyncadd [#allocation4], 4294959104 }
  0x45   :  { %8554 = dma.done.wait [#allocation6], 24576  }
  0x46   :  { %8555 = vsyncadd [#allocation6], 4294942720 }
  0x47   :  { %8556 = dma.done.wait [#allocation9], 16384  }
  0x48   :  { %8557 = vsyncadd [#allocation9], 4294950912  ;;  %vm116_vm0 = vcmask 130048   ;;  %v107_v0 = vld [vmem:[%s10977_s2] sm:$0xff]  ;;  %v108_v1 = vld [vmem:[%s10977_s2 + $0x8] sm:$0xff] }
  0x49   :  { %v99_v2 = vld [vmem:[%s10975_s0] sm:$0xff]  ;;  %v5351_v3 = vpack.c.bf16 %v108_v1, %v107_v0  ;;  %v100_v4 = vld [vmem:[%s10975_s0 + $0x8] sm:$0xff]  ;;  %v101_v5 = vld [vmem:[%s10975_s0 + $0x10] sm:$0xff] }
  0x4a   :  { %5304 = vmatprep.mubr.msk.f32.mxu0 %vm116_vm0, %v99_v2  ;;  %v255_v6 = vld [vmem:[#allocation3 + $0x8] sm:$0xff]  ;;  %v254_v9 = vld [vmem:[#allocation3] sm:$0xff]  ;;  %v257_v11 = vld [vmem:[#allocation3 + $0x18] sm:$0xff] }
  0x4b   :  { %5352 = vmatprep.subr.bf16.mxu0 %v5351_v3  ;;  %v259_v7 = vld [vmem:[#allocation3 + $0x28] sm:$0xff]  ;;  %v258_v10 = vld [vmem:[#allocation3 + $0x20] sm:$0xff]  ;;  %v261_v13 = vld [vmem:[#allocation3 + $0x38] sm:$0xff] }
  0x4c   :  { %5354 = vmatpush3.bf16.msra.mxu0 %v5351_v3  ;;  %v5355_v8 = vpack.c.bf16 %v259_v7, %v255_v6  ;;  %v5357_v12 = vpack.c.bf16 %v258_v10, %v254_v9  ;;  %v256_v14 = vld [vmem:[#allocation3 + $0x10] sm:$0xff]  ;;  %v102_v16 = vld [vmem:[%s10975_s0 + $0x18] sm:$0xff]  ;;  %v5387_v17 = vpack.c.bf16 %v261_v13, %v257_v11  ;;  %v263_v19 = vld [vmem:[#allocation3 + $0x48] sm:$0xff] }
  0x4d   :  { %v260_v15 = vld [vmem:[#allocation3 + $0x30] sm:$0xff]  ;;  %v267_v20 = vld [vmem:[#allocation3 + $0x68] sm:$0xff]  ;;  %v262_v21 = vld [vmem:[#allocation3 + $0x40] sm:$0xff] }
  0x4e   :  { %5356 = vmatprep.subr.bf16.mxu1 %v5355_v8  ;;  %v5389_v18 = vpack.c.bf16 %v260_v15, %v256_v14  ;;  %v103_v22 = vld [vmem:[%s10975_s0 + $0x20] sm:$0xff]  ;;  %v5359_v23 = vpack.c.bf16 %v267_v20, %v263_v19  ;;  %v265_v25 = vld [vmem:[#allocation3 + $0x58] sm:$0xff]  ;;  %5388 = vmatprep.subr.bf16.mxu0 %v5387_v17  ;;  %v264_v29 = vld [vmem:[#allocation3 + $0x50] sm:$0xff] }
  0x4f   :  { %5305 = vmatmul.mubr.msk.f32.vlgmr.msra.gmra.mrb[0].mxu0 %vm116_vm0, %v100_v4  ;;  %5358 = vmatpush1.bf16.msra.mxu1 %v5357_v12  ;;  %v266_v24 = vld [vmem:[#allocation3 + $0x60] sm:$0xff]  ;;  %v269_v26 = vld [vmem:[#allocation3 + $0x78] sm:$0xff]  ;;  %v268_v30 = vld [vmem:[#allocation3 + $0x70] sm:$0xff] }
  0x50   :  { %5307 = vmatprep.mubr.msk.f32.mxu0 %vm116_vm0, %v101_v5  ;;  %v5361_v27 = vpack.c.bf16 %v266_v24, %v262_v21  ;;  %v5391_v28 = vpack.c.bf16 %v269_v26, %v265_v25  ;;  %v271_v31 = vld [vmem:[#allocation3 + $0x88] sm:$0xff]  ;;  %5390 = vmatpush1.bf16.msra.mxu0 %v5389_v18  ;;  %v5393_v32 = vpack.c.bf16 %v268_v30, %v264_v29  ;;  %v270_v34 = vld [vmem:[#allocation3 + $0x80] sm:$0xff]  ;;  %v273_v38 = vld [vmem:[#allocation3 + $0x98] sm:$0xff] }
  0x51   :  { %5360 = vmatprep.subr.bf16.mxu1 %v5359_v23  ;;  %v275_v33 = vld [vmem:[#allocation3 + $0xa8] sm:$0xff]  ;;  %v274_v35 = vld [vmem:[#allocation3 + $0xa0] sm:$0xff]  ;;  %v277_v39 = vld [vmem:[#allocation3 + $0xb8] sm:$0xff] }
  0x52   :  { %v104_v36 = vld [vmem:[%s10975_s0 + $0x28] sm:$0xff]  ;;  %5392 = vmatprep.subr.bf16.mxu0 %v5391_v28  ;;  %v5363_v37 = vpack.c.bf16 %v275_v33, %v271_v31  ;;  %v272_v40 = vld [vmem:[#allocation3 + $0x90] sm:$0xff]  ;;  %v5365_v41 = vpack.c.bf16 %v274_v35, %v270_v34  ;;  %v5395_v42 = vpack.c.bf16 %v277_v39, %v273_v38  ;;  %v278_v47 = vld [vmem:[#allocation3 + $0xc0] sm:$0xff] }
  0x53   :  { %5308 = vmatmul.mubr.msk.f32.gmra.mrb[2].mxu0 %vm116_vm0, %v102_v16  ;;  %5362 = vmatpush1.bf16.msra.mxu1 %v5361_v27  ;;  %v276_v43 = vld [vmem:[#allocation3 + $0xb0] sm:$0xff]  ;;  %v279_v44 = vld [vmem:[#allocation3 + $0xc8] sm:$0xff]  ;;  %v282_v48 = vld [vmem:[#allocation3 + $0xe0] sm:$0xff] }
  0x54   :  { %v283_v45 = vld [vmem:[#allocation3 + $0xe8] sm:$0xff]  ;;  %5310 = vmatprep.mubr.msk.f32.mxu0 %vm116_vm0, %v103_v22  ;;  %5364 = vmatprep.subr.bf16.mxu1 %v5363_v37  ;;  %v281_v49 = vld [vmem:[#allocation3 + $0xd8] sm:$0xff]  ;;  %v105_v50 = vld [vmem:[%s10975_s0 + $0x30] sm:$0xff]  ;;  %v5397_v51 = vpack.c.bf16 %v276_v43, %v272_v40  ;;  %v5369_v58 = vpack.c.bf16 %v282_v48, %v278_v47  ;;  %v10991_v48 = vmov 0.0  }
  0x55   :  { %v5367_v46 = vpack.c.bf16 %v283_v45, %v279_v44  ;;  %5394 = vmatpush1.bf16.msra.mxu0 %v5393_v32  ;;  %v285_v52 = vld [vmem:[#allocation3 + $0xf8] sm:$0xff]  ;;  %v280_v53 = vld [vmem:[#allocation3 + $0xd0] sm:$0xff]  ;;  %v287_v56 = vld [vmem:[#allocation3 + $0x108] sm:$0xff]  ;;  %404 = vmatprep.mubr.f32.mxu1 %v10991_v48 }
  0x56   :  { %5396 = vmatprep.subr.bf16.mxu0 %v5395_v42  ;;  %v5399_v54 = vpack.c.bf16 %v285_v52, %v281_v49  ;;  %v284_v55 = vld [vmem:[#allocation3 + $0xf0] sm:$0xff]  ;;  %v291_v57 = vld [vmem:[#allocation3 + $0x128] sm:$0xff]  ;;  %v289_v59 = vld [vmem:[#allocation3 + $0x118] sm:$0xff] }
  0x57   :  { %5311 = vmatmul.mubr.msk.f32.gmra.mrb[4].mxu0 %vm116_vm0, %v104_v36  ;;  %5366 = vmatpush1.bf16.msra.mxu1 %v5365_v41  ;;  %v293_v60 = vld [vmem:[#allocation3 + $0x138] sm:$0xff]  ;;  %v5371_v62 = vpack.c.bf16 %v291_v57, %v287_v56  ;;  %v286_v63 = vld [vmem:[#allocation3 + $0x100] sm:$0xff]  ;;  %v5401_v1 = vpack.c.bf16 %v284_v55, %v280_v53  ;;  %v295_v2 = vld [vmem:[#allocation3 + $0x148] sm:$0xff] }
  0x58   :  { %5313 = vmatprep.mubr.msk.f32.mxu0 %vm116_vm0, %v105_v50  ;;  %v106_v61 = vld [vmem:[%s10975_s0 + $0x38] sm:$0xff]  ;;  %5368 = vmatprep.subr.bf16.mxu1 %v5367_v46  ;;  %v290_v0 = vld [vmem:[#allocation3 + $0x120] sm:$0xff]  ;;  %v299_v3 = vld [vmem:[#allocation3 + $0x168] sm:$0xff]  ;;  %v5403_v4 = vpack.c.bf16 %v293_v60, %v289_v59 }
  0x59   :  { %5398 = vmatpush1.bf16.msra.mxu0 %v5397_v51  ;;  %v288_v5 = vld [vmem:[#allocation3 + $0x110] sm:$0xff]  ;;  %v5373_v7 = vpack.c.bf16 %v290_v0, %v286_v63  ;;  %v297_v8 = vld [vmem:[#allocation3 + $0x158] sm:$0xff]  ;;  %v5375_v10 = vpack.c.bf16 %v299_v3, %v295_v2  ;;  %v294_v11 = vld [vmem:[#allocation3 + $0x140] sm:$0xff]  ;;  %v10989_v51 = vmov 0  }
  0x5a   :  { %5400 = vmatprep.subr.bf16.mxu0 %v5399_v54  ;;  %v292_v6 = vld [vmem:[#allocation3 + $0x130] sm:$0xff]  ;;  %v301_v9 = vld [vmem:[#allocation3 + $0x178] sm:$0xff]  ;;  %v298_v12 = vld [vmem:[#allocation3 + $0x160] sm:$0xff]  ;;  %8077 = vset.pattern.permute.xlu0 %v10989_v51 }
  0x5b   :  { %5314 = vmatmul.mubr.msk.f32.gmra.mrb[6].mxu0 %vm116_vm0, %v106_v61  ;;  %5370 = vmatpush1.bf16.msra.mxu1 %v5369_v58  ;;  %v5405_v13 = vpack.c.bf16 %v292_v6, %v288_v5  ;;  %v303_v14 = vld [vmem:[#allocation3 + $0x188] sm:$0xff]  ;;  %v5407_v16 = vpack.c.bf16 %v301_v9, %v297_v8  ;;  %v296_v17 = vld [vmem:[#allocation3 + $0x150] sm:$0xff]  ;;  %v5377_v19 = vpack.c.bf16 %v298_v12, %v294_v11  ;;  %v305_v20 = vld [vmem:[#allocation3 + $0x198] sm:$0xff] }
  0x5c   :  { %5372 = vmatprep.subr.bf16.mxu1 %v5371_v62  ;;  %v307_v15 = vld [vmem:[#allocation3 + $0x1a8] sm:$0xff]  ;;  %v300_v18 = vld [vmem:[#allocation3 + $0x170] sm:$0xff]  ;;  %v309_v21 = vld [vmem:[#allocation3 + $0x1b8] sm:$0xff]  ;;  %517 = vmatprep.mubr.f32.mxu0 %v10991_v48 }
  0x5d   :  { %5402 = vmatpush1.bf16.msra.mxu0 %v5401_v1  ;;  %v5379_v22 = vpack.c.bf16 %v307_v15, %v303_v14  ;;  %v302_v23 = vld [vmem:[#allocation3 + $0x180] sm:$0xff]  ;;  %v5409_v25 = vpack.c.bf16 %v300_v18, %v296_v17  ;;  %v5411_v26 = vpack.c.bf16 %v309_v21, %v305_v20  ;;  %v304_v27 = vld [vmem:[#allocation3 + $0x190] sm:$0xff]  ;;  %v311_v31 = vld [vmem:[#allocation3 + $0x1c8] sm:$0xff]  ;;  %8078 = vset.pattern.permute.xlu1 %v10989_v51 }
  0x5e   :  { %5404 = vmatprep.subr.bf16.mxu0 %v5403_v4  ;;  %v306_v24 = vld [vmem:[#allocation3 + $0x1a0] sm:$0xff]  ;;  %v308_v28 = vld [vmem:[#allocation3 + $0x1b0] sm:$0xff]  ;;  %v315_v32 = vld [vmem:[#allocation3 + $0x1e8] sm:$0xff] }
  0x5f   :  { %5374 = vmatpush1.bf16.msra.mxu1 %v5373_v7  ;;  %v5381_v29 = vpack.c.bf16 %v306_v24, %v302_v23  ;;  %v5413_v30 = vpack.c.bf16 %v308_v28, %v304_v27  ;;  %v313_v33 = vld [vmem:[#allocation3 + $0x1d8] sm:$0xff]  ;;  %v5383_v34 = vpack.c.bf16 %v315_v32, %v311_v31  ;;  %v310_v35 = vld [vmem:[#allocation3 + $0x1c0] sm:$0xff]  ;;  %v312_v39 = vld [vmem:[#allocation3 + $0x1d0] sm:$0xff] }
  0x60   :  { %5376 = vmatprep.subr.bf16.mxu1 %v5375_v10  ;;  %v314_v36 = vld [vmem:[#allocation3 + $0x1e0] sm:$0xff]  ;;  %v317_v38 = vld [vmem:[#allocation3 + $0x1f8] sm:$0xff]  ;;  %v316_v40 = vld [vmem:[#allocation3 + $0x1f0] sm:$0xff] }
  0x61   :  { %5406 = vmatpush1.bf16.msra.mxu0 %v5405_v13  ;;  %v5385_v37 = vpack.c.bf16 %v314_v36, %v310_v35  ;;  %v5415_v41 = vpack.c.bf16 %v317_v38, %v313_v33  ;;  %v5417_v42 = vpack.c.bf16 %v316_v40, %v312_v39  ;;  %v692_v43 = vld [vmem:[#allocation5 + $0x8] sm:$0xff]  ;;  %v694_v45 = vld [vmem:[#allocation5 + $0x18] sm:$0xff]  ;;  %v598_v50 = vld [vmem:[%s10976_s1] sm:$0xff] }
  0x62   :  { %5408 = vmatprep.subr.bf16.mxu0 %v5407_v16  ;;  %v696_v44 = vld [vmem:[#allocation5 + $0x28] sm:$0xff]  ;;  %v698_v47 = vld [vmem:[#allocation5 + $0x38] sm:$0xff]  ;;  %vm599_vm1 = vcmp.gt.s32.totalorder %v598_v50, 0  ;;  %vm605_vm2 = vcmp.gt.s32.totalorder %v598_v50, 1  ;;  %vm623_vm3 = vcmp.gt.s32.totalorder %v598_v50, 4  ;;  %vm635_vm4 = vcmp.gt.s32.totalorder %v598_v50, 6 }
  0x63   :  { %5378 = vmatpush1.bf16.msra.mxu1 %v5377_v19  ;;  %v8750_v46 = vpack.c.bf16 %v696_v44, %v692_v43  ;;  %v8753_v49 = vpack.c.bf16 %v698_v47, %v694_v45  ;;  %v600_v52 = vsel %vm599_vm1, 1, %v10989_v51  ;;  %v606_v53 = vsel %vm605_vm2, 1, %v10989_v51  ;;  %v8770_v56 = vld [vmem:[%s10978_s3] ss:$0 sm:$0xff]  ;;  %v693_v60 = vld [vmem:[#allocation5 + $0x10] sm:$0xff]  ;;  %v700_v63 = vld [vmem:[#allocation5 + $0x48] sm:$0xff] }
  0x64   :  { %5380 = vmatprep.subr.bf16.mxu1 %v5379_v22  ;;  %602 = vperm.xlu0 %8077, %v600_v52   ;;  %v624_v54 = vsel %vm623_vm3, 1, %v10989_v51  ;;  %v636_v55 = vsel %vm635_vm4, 1, %v10989_v51  ;;  %v691_v57 = vld [vmem:[#allocation5] sm:$0xff]  ;;  %v697_v61 = vld [vmem:[#allocation5 + $0x30] sm:$0xff]  ;;  %v704_v1 = vld [vmem:[#allocation5 + $0x68] sm:$0xff]  ;;  %vm8567_vm1 = vmmov 0  }
  0x65   :  { %5410 = vmatpush1.bf16.msra.mxu0 %v5409_v25  ;;  %11386 = vst [vmem:[#allocation13_spill] sm:$0xff] %v8750_v46  ;;  %11387 = vst [vmem:[#allocation14_spill] sm:$0xff] %v8753_v49  ;;  %v695_v59 = vld [vmem:[#allocation5 + $0x20] sm:$0xff]  ;;  %v702_v2 = vld [vmem:[#allocation5 + $0x58] sm:$0xff]  ;;  %v8775_v5 = vpack.c.bf16 %v697_v61, %v693_v60  ;;  %v8778_v14 = vpack.c.bf16 %v704_v1, %v700_v63  ;;  %vm5172_vm2 = vcmask 15360  }
  0x66   :  { %5412 = vmatprep.subr.bf16.mxu0 %v5411_v26  ;;  %v706_v3 = vld [vmem:[#allocation5 + $0x78] sm:$0xff]  ;;  %v8773_v4 = vpack.c.bf16 %v695_v59, %v691_v57  ;;  %v699_v6 = vld [vmem:[#allocation5 + $0x40] sm:$0xff]  ;;  %v701_v11 = vld [vmem:[#allocation5 + $0x50] sm:$0xff] }
  0x67   :  { %5382 = vmatpush1.bf16.msra.mxu1 %v5381_v29  ;;  %11389 = vst [vmem:[#allocation16_spill] sm:$0xff] %v8775_v5  ;;  %v703_v10 = vld [vmem:[#allocation5 + $0x60] sm:$0xff]  ;;  %v705_v12 = vld [vmem:[#allocation5 + $0x70] sm:$0xff]  ;;  %11390 = vst [vmem:[#allocation17_spill] sm:$0xff] %v8778_v14  ;;  %v8780_v15 = vpack.c.bf16 %v706_v3, %v702_v2 }
  0x68   :  { %5384 = vmatprep.subr.bf16.mxu1 %v5383_v34  ;;  %608 = vperm.xlu0 %8077, %v606_v53   ;;  %11388 = vst [vmem:[#allocation15_spill] sm:$0xff] %v8773_v4  ;;  %v708_v16 = vld [vmem:[#allocation5 + $0x88] sm:$0xff]  ;;  %v710_v19 = vld [vmem:[#allocation5 + $0x98] sm:$0xff]  ;;  %v8785_v21 = vpack.c.bf16 %v703_v10, %v699_v6  ;;  %v8787_v22 = vpack.c.bf16 %v705_v12, %v701_v11  ;;  %v707_v23 = vld [vmem:[#allocation5 + $0x80] sm:$0xff] }
  0x69   :  { %5414 = vmatpush1.bf16.msra.mxu0 %v5413_v30  ;;  %11391 = vst [vmem:[#allocation18_spill] sm:$0xff] %v8780_v15  ;;  %v712_v18 = vld [vmem:[#allocation5 + $0xa8] sm:$0xff]  ;;  %v714_v20 = vld [vmem:[#allocation5 + $0xb8] sm:$0xff]  ;;  %v711_v25 = vld [vmem:[#allocation5 + $0xa0] sm:$0xff] }
  0x6a   :  { %5416 = vmatprep.subr.bf16.mxu0 %v5415_v41  ;;  %11392 = vst [vmem:[#allocation19_spill] sm:$0xff] %v8785_v21  ;;  %11393 = vst [vmem:[#allocation20_spill] sm:$0xff] %v8787_v22  ;;  %v709_v27 = vld [vmem:[#allocation5 + $0x90] sm:$0xff]  ;;  %v8795_v29 = vpack.c.bf16 %v712_v18, %v708_v16  ;;  %v8797_v30 = vpack.c.bf16 %v714_v20, %v710_v19  ;;  %v716_v32 = vld [vmem:[#allocation5 + $0xc8] sm:$0xff] }
  0x6b   :  { %5386 = vmatpush1.bf16.msra.mxu1 %v5385_v37  ;;  %v713_v28 = vld [vmem:[#allocation5 + $0xb0] sm:$0xff]  ;;  %v720_v34 = vld [vmem:[#allocation5 + $0xe8] sm:$0xff]  ;;  %v718_v35 = vld [vmem:[#allocation5 + $0xd8] sm:$0xff]  ;;  %v8801_v37 = vpack.c.bf16 %v711_v25, %v707_v23 }
  0x6c   :  { %5420 = vmatprep.subr.bf16.mxu1 %v8750_v46  ;;  %626 = vperm.xlu0 %8077, %v624_v54   ;;  %11394 = vst [vmem:[#allocation21_spill] sm:$0xff] %v8795_v29  ;;  %11395 = vst [vmem:[#allocation22_spill] sm:$0xff] %v8797_v30  ;;  %v722_v36 = vld [vmem:[#allocation5 + $0xf8] sm:$0xff]  ;;  %v8803_v38 = vpack.c.bf16 %v713_v28, %v709_v27  ;;  %v715_v39 = vld [vmem:[#allocation5 + $0xc0] sm:$0xff]  ;;  %v8812_v45 = vpack.c.bf16 %v720_v34, %v716_v32 }
  0x6d   :  { %5418 = vmatpush1.bf16.msra.mxu0 %v5417_v42  ;;  %11396 = vst [vmem:[#allocation23_spill] sm:$0xff] %v8801_v37  ;;  %v719_v41 = vld [vmem:[#allocation5 + $0xe0] sm:$0xff]  ;;  %v717_v42 = vld [vmem:[#allocation5 + $0xd0] sm:$0xff]  ;;  %v8814_v47 = vpack.c.bf16 %v722_v36, %v718_v35  ;;  %v724_v50 = vld [vmem:[#allocation5 + $0x108] sm:$0xff] }
  0x6e   :  { %5452 = vmatprep.subr.bf16.mxu0 %v8753_v49  ;;  %11397 = vst [vmem:[#allocation24_spill] sm:$0xff] %v8803_v38  ;;  %v721_v43 = vld [vmem:[#allocation5 + $0xf0] sm:$0xff]  ;;  %11398 = vst [vmem:[#allocation25_spill] sm:$0xff] %v8812_v45  ;;  %v728_v54 = vld [vmem:[#allocation5 + $0x128] sm:$0xff] }
  0x6f   :  { %11399 = vst [vmem:[#allocation26_spill] sm:$0xff] %v8814_v47  ;;  %v730_v57 = vld [vmem:[#allocation5 + $0x138] sm:$0xff]  ;;  %v8821_v59 = vpack.c.bf16 %v721_v43, %v717_v42  ;;  %v723_v60 = vld [vmem:[#allocation5 + $0x100] sm:$0xff]  ;;  %v725_v63 = vld [vmem:[#allocation5 + $0x110] sm:$0xff]  ;;  %v8827_v1 = vpack.c.bf16 %v728_v54, %v724_v50 }
  0x70   :  { %638 = vperm.xlu0 %8077, %v636_v55   ;;  %v726_v55 = vld [vmem:[#allocation5 + $0x118] sm:$0xff]  ;;  %v732_v3 = vld [vmem:[#allocation5 + $0x148] sm:$0xff]  ;;  %v731_v12 = vld [vmem:[#allocation5 + $0x140] sm:$0xff] }
  0x71   :  { %11401 = vst [vmem:[#allocation28_spill] sm:$0xff] %v8821_v59  ;;  %11402 = vst [vmem:[#allocation29_spill] sm:$0xff] %v8827_v1  ;;  %v8829_v2 = vpack.c.bf16 %v730_v57, %v726_v55  ;;  %v735_v16 = vld [vmem:[#allocation5 + $0x160] sm:$0xff]  ;;  %v737_v18 = vld [vmem:[#allocation5 + $0x170] sm:$0xff] }
  0x72   :  { %v740_v23 = vld [vmem:[#allocation5 + $0x188] sm:$0xff]  ;;  %v746_v27 = vld [vmem:[#allocation5 + $0x1b8] sm:$0xff]  ;;  %v8850_v28 = vpack.c.bf16 %v735_v16, %v731_v12  ;;  %v739_v32 = vld [vmem:[#allocation5 + $0x180] sm:$0xff]  ;;  %v320_v16 = vlaneseq }
  0x73   :  { %11403 = vst [vmem:[#allocation30_spill] sm:$0xff] %v8829_v2  ;;  %v744_v25 = vld [vmem:[#allocation5 + $0x1a8] sm:$0xff]  ;;  %v743_v34 = vld [vmem:[#allocation5 + $0x1a0] sm:$0xff]  ;;  %v741_v35 = vld [vmem:[#allocation5 + $0x190] sm:$0xff] }
  0x74   :  { %11408 = vst [vmem:[#allocation35_spill] sm:$0xff] %v8850_v28  ;;  %v745_v36 = vld [vmem:[#allocation5 + $0x1b0] sm:$0xff]  ;;  %v752_v43 = vld [vmem:[#allocation5 + $0x1e8] sm:$0xff]  ;;  %v750_v50 = vld [vmem:[#allocation5 + $0x1d8] sm:$0xff] }
  0x75   :  { %v8866_v54 = vpack.c.bf16 %v745_v36, %v741_v35  ;;  %v747_v55 = vld [vmem:[#allocation5 + $0x1c0] sm:$0xff]  ;;  %v1107_v12 = vld [vmem:[#allocation7 + $0x38] sm:$0xff]  ;;  %v1114_v51 = vld [vmem:[#allocation7 + $0x70] sm:$0xff] }
  0x77   :  { %11413 = vst [vmem:[#allocation40_spill] sm:$0xff] %v8866_v54 }
 0x122   :  { %v5306_v58 = vpop.f32.mrb[0].mxu0 }
 0x123   :  { %v207_v62 = vpop.f32.mrb[1].mxu0  ;;  %v213_v7 = vadd.f32 %v5306_v58, %v8770_v56  ;;  %v8819_v58 = vpack.c.bf16 %v719_v41, %v715_v39  ;;  %v8858_v39 = vpack.c.bf16 %v744_v25, %v740_v23  ;;  %v748_v41 = vld [vmem:[#allocation5 + $0x1c8] sm:$0xff]  ;;  %v318_v23 = vld [vmem:[%s10980_s5] sm:$0xf] }
 0x124   :  { %v208_v0 = vadd.f32 %v8770_v56, %v207_v62  ;;  %v727_v62 = vld [vmem:[#allocation5 + $0x120] sm:$0xff] }
 0x125   :  { %v247_v24 = vmax.f32 %v213_v7, 0.0  ;;  %11400 = vst [vmem:[#allocation27_spill] sm:$0xff] %v8819_v58  ;;  %v736_v7 = vld [vmem:[#allocation5 + $0x168] sm:$0xff]  ;;  %v8833_v10 = vpack.c.bf16 %v727_v62, %v723_v60  ;;  %11410 = vst [vmem:[#allocation37_spill] sm:$0xff] %v8858_v39  ;;  %v751_v60 = vld [vmem:[#allocation5 + $0x1e0] sm:$0xff] }
 0x126   :  { %v246_v8 = vmax.f32 %v208_v0, 0.0  ;;  %v5309_v9 = vpop.f32.mrb[2].mxu0  ;;  %v729_v0 = vld [vmem:[#allocation5 + $0x130] sm:$0xff]  ;;  %v8843_v19 = vpack.c.bf16 %v736_v7, %v732_v3  ;;  %v1105_v7 = vld [vmem:[#allocation7 + $0x28] sm:$0xff] }
 0x127   :  { %v217_v13 = vpop.f32.mrb[3].mxu0  ;;  %v223_v40 = vadd.f32 %v5309_v9, %v8770_v56  ;;  %v738_v9 = vld [vmem:[#allocation5 + $0x178] sm:$0xff]  ;;  %11404 = vst [vmem:[#allocation31_spill] sm:$0xff] %v8833_v10  ;;  %v8835_v11 = vpack.c.bf16 %v729_v0, %v725_v63  ;;  %v753_v62 = vld [vmem:[#allocation5 + $0x1f0] sm:$0xff]  ;;  %v8874_v63 = vpack.c.bf16 %v752_v43, %v748_v41 }
 0x128   :  { %405 = vmatmul.mubr.f32.vlgmr.msra.gmra.mrb[0].mxu1 %v246_v8  ;;  %518 = vmatmul.mubr.f32.vlgmr.msra.gmra.mrb[8].mxu0 %v246_v8  ;;  %v218_v17 = vadd.f32 %v8770_v56, %v217_v13  ;;  %v734_v8 = vld [vmem:[#allocation5 + $0x158] sm:$0xff]  ;;  %11406 = vst [vmem:[#allocation33_spill] sm:$0xff] %v8843_v19 }
 0x129   :  { %5422 = vmatpush1.bf16.msra.mxu1 %v8773_v4  ;;  %5454 = vmatpush1.bf16.msra.mxu0 %v8775_v5  ;;  %v249_v61 = vmax.f32 %v223_v40, 0.0  ;;  %11405 = vst [vmem:[#allocation32_spill] sm:$0xff] %v8835_v11  ;;  %v8845_v20 = vpack.c.bf16 %v738_v9, %v734_v8  ;;  %11414 = vst [vmem:[#allocation41_spill] sm:$0xff] %v8874_v63  ;;  %v1103_v8 = vld [vmem:[#allocation7 + $0x18] sm:$0xff] }
 0x12a   :  { %410 = vmatprep.mubr.f32.mxu1 %v10991_v48  ;;  %523 = vmatprep.mubr.f32.mxu0 %v10991_v48  ;;  %v8791_v26 = vpop.f32.mrb[4].mxu0  ;;  %v248_v33 = vmax.f32 %v218_v17, 0.0  ;;  %v733_v17 = vld [vmem:[#allocation5 + $0x150] sm:$0xff] }
 0x12b   :  { %5424 = vmatprep.subr.bf16.mxu1 %v8778_v14  ;;  %5456 = vmatprep.subr.bf16.mxu0 %v8780_v15  ;;  %v227_v31 = vpop.f32.mrb[5].mxu0  ;;  %v233_v13 = vadd.f32 %v8791_v26, %v8770_v56  ;;  %11407 = vst [vmem:[#allocation34_spill] sm:$0xff] %v8845_v20  ;;  %v742_v26 = vld [vmem:[#allocation5 + $0x198] sm:$0xff] }
 0x12c   :  { %411 = vmatmul.mubr.f32.gmra.mrb[2].mxu1 %v247_v24  ;;  %524 = vmatmul.mubr.f32.gmra.mrb[10].mxu0 %v247_v24  ;;  %v228_v53 = vadd.f32 %v8770_v56, %v227_v31  ;;  %v8852_v31 = vpack.c.bf16 %v737_v18, %v733_v17  ;;  %v8860_v40 = vpack.c.bf16 %v746_v27, %v742_v26  ;;  %v321_v17 = vshrl.u32 %v320_v16, 7 }
 0x12d   :  { %5426 = vmatpush1.bf16.msra.mxu1 %v8785_v21  ;;  %5458 = vmatpush1.bf16.msra.mxu0 %v8787_v22 }
 0x12e   :  { %416 = vmatprep.mubr.f32.mxu1 %v10991_v48  ;;  %529 = vmatprep.mubr.f32.mxu0 %v10991_v48  ;;  %v8808_v44 = vpop.f32.mrb[6].mxu0  ;;  %v250_v6 = vmax.f32 %v228_v53, 0.0  ;;  %11409 = vst [vmem:[#allocation36_spill] sm:$0xff] %v8852_v31  ;;  %11411 = vst [vmem:[#allocation38_spill] sm:$0xff] %v8860_v40  ;;  %v8864_v53 = vpack.c.bf16 %v743_v34, %v739_v32  ;;  %v8934_v18 = vsub.s32 0, %v321_v17 }
 0x12f   :  { %5428 = vmatprep.subr.bf16.mxu1 %v8795_v29  ;;  %5460 = vmatprep.subr.bf16.mxu0 %v8797_v30  ;;  %v237_v52 = vpop.f32.mrb[7].mxu0  ;;  %v243_v57 = vadd.f32 %v8808_v44, %v8770_v56 }
 0x130   :  { %417 = vmatmul.mubr.f32.gmra.mrb[4].mxu1 %v248_v33  ;;  %530 = vmatmul.mubr.f32.gmra.mrb[12].mxu0 %v248_v33  ;;  %v238_v24 = vadd.f32 %v8770_v56, %v237_v52  ;;  %v251_v33 = vmax.f32 %v233_v13, 0.0  ;;  %v754_v52 = vld [vmem:[#allocation5 + $0x1f8] sm:$0xff]  ;;  %11412 = vst [vmem:[#allocation39_spill] sm:$0xff] %v8864_v53  ;;  %v8880_v56 = vpack.c.bf16 %v751_v60, %v747_v55  ;;  %11420 = vst [vmem:[#allocation47_spill] sm:$0xff] %v8934_v18 }
 0x131   :  { %5430 = vmatpush1.bf16.msra.mxu1 %v8801_v37  ;;  %5462 = vmatpush1.bf16.msra.mxu0 %v8803_v38  ;;  %v8876_v0 = vpack.c.bf16 %v754_v52, %v750_v50  ;;  %v253_v3 = vmax.f32 %v243_v57, 0.0  ;;  %v8930_v13 = vpack.c.bf16 %v1107_v12, %v1103_v8  ;;  %v8942_v25 = vrot.slane %v318_v23, %v8934_v18  ;;  %v1127_v18 = vld [vmem:[#allocation7 + $0xd8] sm:$0xff] }
 0x132   :  { %422 = vmatprep.mubr.f32.mxu1 %v10991_v48  ;;  %535 = vmatprep.mubr.f32.mxu0 %v10991_v48  ;;  %v252_v42 = vmax.f32 %v238_v24, 0.0  ;;  %11416 = vst [vmem:[#allocation43_spill] sm:$0xff] %v8880_v56  ;;  %v8939_v24 = vsub.s32 1, %v321_v17  ;;  %v8954_v52 = vsub.s32 2, %v321_v17 }
 0x133   :  { %5432 = vmatprep.subr.bf16.mxu1 %v8812_v45  ;;  %5464 = vmatprep.subr.bf16.mxu0 %v8814_v47  ;;  %11415 = vst [vmem:[#allocation42_spill] sm:$0xff] %v8876_v0  ;;  %11419 = vst [vmem:[#allocation46_spill] sm:$0xff] %v8930_v13 }
 0x134   :  { %423 = vmatmul.mubr.f32.gmra.mrb[6].mxu1 %v249_v61  ;;  %536 = vmatmul.mubr.f32.gmra.mrb[14].mxu0 %v249_v61  ;;  %v749_v61 = vld [vmem:[#allocation5 + $0x1d0] sm:$0xff]  ;;  %11421 = vst [vmem:[#allocation48_spill] sm:$0xff] %v8939_v24  ;;  %11422 = vst [vmem:[#allocation49_spill] sm:$0xff] %v8942_v25  ;;  %v8945_v26 = vrot.slane %v318_v23, %v8939_v24  ;;  %v8958_v57 = vrot.slane %v318_v23, %v8954_v52  ;;  %v1123_v24 = vld [vmem:[#allocation7 + $0xb8] sm:$0xff] }
 0x135   :  { %5434 = vmatpush1.bf16.msra.mxu1 %v8819_v58  ;;  %5466 = vmatpush1.bf16.msra.mxu0 %v8821_v59  ;;  %v8882_v44 = vpack.c.bf16 %v753_v62, %v749_v61  ;;  %11426 = vst [vmem:[#allocation53_spill] sm:$0xff] %v8954_v52  ;;  %v1121_v52 = vld [vmem:[#allocation7 + $0xa8] sm:$0xff] }
 0x136   :  { %428 = vmatprep.mubr.f32.mxu1 %v10991_v48  ;;  %541 = vmatprep.mubr.f32.mxu0 %v10991_v48  ;;  %11423 = vst [vmem:[#allocation50_spill] sm:$0xff] %v8945_v26  ;;  %11427 = vst [vmem:[#allocation54_spill] sm:$0xff] %v8958_v57 }
 0x137   :  { %5436 = vmatprep.subr.bf16.mxu1 %v8827_v1  ;;  %5468 = vmatprep.subr.bf16.mxu0 %v8829_v2  ;;  %11417 = vst [vmem:[#allocation44_spill] sm:$0xff] %v8882_v44 }
 0x138   :  { %429 = vmatmul.mubr.f32.gmra.mrb[8].mxu1 %v250_v6  ;;  %542 = vmatmul.mubr.f32.gmra.mrb[16].mxu0 %v250_v6  ;;  %v1101_v6 = vld [vmem:[#allocation7 + $0x8] sm:$0xff] }
 0x139   :  { %5438 = vmatpush1.bf16.msra.mxu1 %v8833_v10  ;;  %5470 = vmatpush1.bf16.msra.mxu0 %v8835_v11  ;;  %v8928_v9 = vpack.c.bf16 %v1105_v7, %v1101_v6 }
 0x13a   :  { %434 = vmatprep.mubr.f32.mxu1 %v10991_v48  ;;  %547 = vmatprep.mubr.f32.mxu0 %v10991_v48 }
 0x13b   :  { %5440 = vmatprep.subr.bf16.mxu1 %v8843_v19  ;;  %5472 = vmatprep.subr.bf16.mxu0 %v8845_v20  ;;  %11418 = vst [vmem:[#allocation45_spill] sm:$0xff] %v8928_v9 }
 0x13c   :  { %435 = vmatmul.mubr.f32.gmra.mrb[10].mxu1 %v251_v33  ;;  %548 = vmatmul.mubr.f32.gmra.mrb[18].mxu0 %v251_v33  ;;  %v8947_v33 = vsub.s32 3, %v321_v17 }
 0x13d   :  { %5442 = vmatpush1.bf16.msra.mxu1 %v8850_v28  ;;  %5474 = vmatpush1.bf16.msra.mxu0 %v8852_v31 }
 0x13e   :  { %440 = vmatprep.mubr.f32.mxu1 %v10991_v48  ;;  %553 = vmatprep.mubr.f32.mxu0 %v10991_v48  ;;  %11424 = vst [vmem:[#allocation51_spill] sm:$0xff] %v8947_v33  ;;  %v8952_v50 = vrot.slane %v318_v23, %v8947_v33  ;;  %v1119_v33 = vld [vmem:[#allocation7 + $0x98] sm:$0xff] }
 0x13f   :  { %5444 = vmatprep.subr.bf16.mxu1 %v8858_v39  ;;  %5476 = vmatprep.subr.bf16.mxu0 %v8860_v40 }
 0x140   :  { %441 = vmatmul.mubr.f32.gmra.mrb[12].mxu1 %v252_v42  ;;  %554 = vmatmul.mubr.f32.gmra.mrb[20].mxu0 %v252_v42  ;;  %11425 = vst [vmem:[#allocation52_spill] sm:$0xff] %v8952_v50 }
 0x141   :  { %5446 = vmatpush1.bf16.msra.mxu1 %v8864_v53  ;;  %5478 = vmatpush1.bf16.msra.mxu0 %v8866_v54 }
 0x142   :  { %446 = vmatprep.mubr.f32.mxu1 %v10991_v48  ;;  %559 = vmatprep.mubr.f32.mxu0 %v10991_v48 }
 0x143   :  { %5448 = vmatprep.subr.bf16.mxu1 %v8874_v63  ;;  %5480 = vmatprep.subr.bf16.mxu0 %v8876_v0 }
 0x144   :  { %447 = vmatmul.mubr.f32.gmra.mrb[14].mxu1 %v253_v3  ;;  %560 = vmatmul.mubr.f32.gmra.mrb[22].mxu0 %v253_v3 }
 0x145   :  { %5450 = vmatpush1.bf16.msra.mxu1 %v8880_v56  ;;  %5482 = vmatpush1.bf16.msra.mxu0 %v8882_v44 }
 0x146   :  { %823 = vmatprep.mubr.f32.mxu1 %v10991_v48  ;;  %894 = vmatprep.mubr.f32.mxu0 %v10991_v48 }
 0x147   :  { %5484 = vmatprep.subr.bf16.mxu1 %v8750_v46  ;;  %5516 = vmatprep.subr.bf16.mxu0 %v8753_v49 }
 0x148   :  { %824 = vmatmul.mubr.f32.vlgmr.msra.gmra.mrb[0].mxu1 %v10991_v48  ;;  %895 = vmatmul.mubr.f32.vlgmr.msra.gmra.mrb[8].mxu0 %v10991_v48 }
 0x149   :  { %5486 = vmatpush1.bf16.msra.mxu1 %v8773_v4  ;;  %5518 = vmatpush1.bf16.msra.mxu0 %v8775_v5 }
 0x14a   :  { %5488 = vmatprep.subr.bf16.mxu1 %v8778_v14  ;;  %5520 = vmatprep.subr.bf16.mxu0 %v8780_v15 }
 0x14b   :  { %996 = vmatprep.mubr.f32.mxu1 %v10991_v48  ;;  %1067 = vmatprep.mubr.f32.mxu0 %v10991_v48  ;;  %v1117_v48 = vld [vmem:[#allocation7 + $0x88] sm:$0xff] }
 0x14d   :  { %5490 = vmatpush1.bf16.msra.mxu1 %v8785_v21  ;;  %5522 = vmatpush1.bf16.msra.mxu0 %v8787_v22 }
 0x14e   :  { %5492 = vmatprep.subr.bf16.mxu1 %v8795_v29  ;;  %5524 = vmatprep.subr.bf16.mxu0 %v8797_v30 }
 0x151   :  { %5494 = vmatpush1.bf16.msra.mxu1 %v8801_v37  ;;  %5526 = vmatpush1.bf16.msra.mxu0 %v8803_v38 }
 0x152   :  { %5496 = vmatprep.subr.bf16.mxu1 %v8812_v45  ;;  %5528 = vmatprep.subr.bf16.mxu0 %v8814_v47 }
 0x155   :  { %5498 = vmatpush1.bf16.msra.mxu1 %v8819_v58  ;;  %5530 = vmatpush1.bf16.msra.mxu0 %v8821_v59 }
 0x156   :  { %5500 = vmatprep.subr.bf16.mxu1 %v8827_v1  ;;  %5532 = vmatprep.subr.bf16.mxu0 %v8829_v2 }
 0x159   :  { %5502 = vmatpush1.bf16.msra.mxu1 %v8833_v10  ;;  %5534 = vmatpush1.bf16.msra.mxu0 %v8835_v11 }
 0x15a   :  { %5504 = vmatprep.subr.bf16.mxu1 %v8843_v19  ;;  %5536 = vmatprep.subr.bf16.mxu0 %v8845_v20 }
 0x15d   :  { %5506 = vmatpush1.bf16.msra.mxu1 %v8850_v28  ;;  %5538 = vmatpush1.bf16.msra.mxu0 %v8852_v31 }
 0x15e   :  { %5508 = vmatprep.subr.bf16.mxu1 %v8858_v39  ;;  %5540 = vmatprep.subr.bf16.mxu0 %v8860_v40 }
 0x161   :  { %5510 = vmatpush1.bf16.msra.mxu1 %v8864_v53  ;;  %5542 = vmatpush1.bf16.msra.mxu0 %v8866_v54 }
 0x162   :  { %5512 = vmatprep.subr.bf16.mxu1 %v8874_v63  ;;  %5544 = vmatprep.subr.bf16.mxu0 %v8876_v0 }
 0x165   :  { %5514 = vmatpush1.bf16.msra.mxu1 %v8880_v56  ;;  %5546 = vmatpush1.bf16.msra.mxu0 %v8882_v44 }
 0x166   :  { %5548 = vmatprep.subr.bf16.mxu1 %v8928_v9  ;;  %5612 = vmatprep.subr.bf16.mxu0 %v8930_v13 }
 0x21b   :  { %v825_v27 = vpop.f32.mrb[0].mxu1  ;;  %v896_v32 = vpop.f32.mrb[8].mxu0 }
 0x21c   :  { %v8003_v34 = vadd.f32 %v825_v27, %v8942_v25  ;;  %v827_v35 = vpop.f32.mrb[1].mxu1  ;;  %v898_v36 = vpop.f32.mrb[9].mxu0  ;;  %v8019_v61 = vadd.f32 %v896_v32, %v8958_v57  ;;  %v1100_v32 = vld [vmem:[#allocation7] sm:$0xff] }
 0x21d   :  { %v8004_v41 = vadd.f32 %v827_v35, %v8945_v26  ;;  %v8020_v55 = vadd.f32 %v898_v36, %v8952_v50  ;;  %v1104_v36 = vld [vmem:[#allocation7 + $0x20] sm:$0xff] }
 0x21e   :  { %v5190_v42 = vmul.f32 -1.442695, %v8003_v34 }
 0x21f   :  { %v5191_v43 = vmul.f32 -1.442695, %v8004_v41  ;;  %v5192_v60 = vmul.f32 -1.442695, %v8020_v55  ;;  %v1102_v41 = vld [vmem:[#allocation7 + $0x10] sm:$0xff]  ;;  %v1113_v55 = vld [vmem:[#allocation7 + $0x68] sm:$0xff] }
 0x220   :  { %8079 = vpow2.f32 %v5190_v42  ;;  %v1106_v42 = vld [vmem:[#allocation7 + $0x30] sm:$0xff] }
 0x221   :  { %8081 = vpow2.f32 %v5191_v43  ;;  %v1109_v43 = vld [vmem:[#allocation7 + $0x48] sm:$0xff] }
 0x222   :  { %8083 = vpow2.f32 %v5192_v60  ;;  %v1111_v60 = vld [vmem:[#allocation7 + $0x58] sm:$0xff] }
 0x223   :  { %8085 = vtanh.f32 %v8019_v61  ;;  %v1115_v61 = vld [vmem:[#allocation7 + $0x78] sm:$0xff] }
 0x22a   :  { %v8080_v62 = vpop.eup %8079 }
 0x22b   :  { %v8082_v3 = vpop.eup %8081  ;;  %v904_v6 = vadd.f32 1.0, %v8080_v62 }
 0x22c   :  { %v910_v7 = vadd.f32 1.0, %v8082_v3  ;;  %v8084_v8 = vpop.eup %8083  ;;  %v8964_v3 = vpop.permute.xlu0 %602 }
 0x22d   :  { %8087 = vrcp.f32 %v904_v6  ;;  %v8086_v12 = vpop.eup %8085  ;;  %v917_v34 = vadd.f32 1.0, %v8084_v8  ;;  %v8968_v8 = vpack.c.bf16 %v1106_v42, %v1102_v41  ;;  %vm604_vm5 = vcmp.eq.s32.totalorder %v8964_v3, 1  ;;  %v1116_v41 = vld [vmem:[#allocation7 + $0x80] sm:$0xff] }
 0x22e   :  { %8089 = vrcp.f32 %v910_v7  ;;  %v8966_v7 = vpack.c.bf16 %v1104_v36, %v1100_v32  ;;  %v1120_v42 = vld [vmem:[#allocation7 + $0xa0] sm:$0xff] }
 0x22f   :  { %8091 = vrcp.f32 %v917_v34  ;;  %11429 = vst [vmem:[#allocation56_spill] sm:$0xff] %v8968_v8  ;;  %v8974_v34 = vpack.c.bf16 %v1115_v61, %v1111_v60  ;;  %v1118_v60 = vld [vmem:[#allocation7 + $0x90] sm:$0xff]  ;;  %v11873_v3 = vld [vmem:[#allocation25_spill] sm:$0xff] }
 0x230   :  { %11428 = vst [vmem:[#allocation55_spill] sm:$0xff] %v8966_v7  ;;  %v1122_v61 = vld [vmem:[#allocation7 + $0xb0] sm:$0xff] }
 0x231   :  { %11431 = vst [vmem:[#allocation58_spill] sm:$0xff] %v8974_v34 }
 0x237   :  { %v8088_v16 = vpop.eup %8087 }
 0x238   :  { %v8090_v17 = vpop.eup %8089  ;;  %v921_v27 = vmul.f32 %v8088_v16, %v8086_v12  ;;  %v1108_v12 = vld [vmem:[#allocation7 + $0x40] sm:$0xff] }
 0x239   :  { %v920_v35 = vmul.f32 0.0, %v8090_v17  ;;  %v8092_v62 = vpop.eup %8091  ;;  %v1112_v16 = vld [vmem:[#allocation7 + $0x60] sm:$0xff] }
 0x23a   :  { %v8985_v32 = vpack.c.bf16 %v1112_v16, %v1108_v12  ;;  %v11436_v12 = vmov 0.0  }
 0x23b   :  { %v8961_v23 = vadd.f32 %v921_v27, %v920_v35  ;;  %v8972_v27 = vpack.c.bf16 %v1113_v55, %v1109_v43  ;;  %v1110_v35 = vld [vmem:[#allocation7 + $0x50] sm:$0xff]  ;;  %v8991_v43 = vpack.c.bf16 %v1121_v52, %v1117_v48  ;;  %v8993_v55 = vpack.c.bf16 %v1123_v24, %v1119_v33  ;;  %v1124_v24 = vld [vmem:[#allocation7 + $0xc0] sm:$0xff] }
 0x23c   :  { %11432 = vst [vmem:[#allocation59_spill] sm:$0xff] %v8985_v32  ;;  %v8987_v36 = vpack.c.bf16 %v1114_v51, %v1110_v35  ;;  %v8999_v51 = vpack.c.bf16 %v1120_v42, %v1116_v41  ;;  %v9001_v48 = vpack.c.bf16 %v1122_v61, %v1118_v60  ;;  %v1128_v33 = vld [vmem:[#allocation7 + $0xe0] sm:$0xff]  ;;  %v1126_v35 = vld [vmem:[#allocation7 + $0xd0] sm:$0xff] }
 0x23d   :  { %8093 = vtanh.f32 %v8961_v23  ;;  %11430 = vst [vmem:[#allocation57_spill] sm:$0xff] %v8972_v27  ;;  %11434 = vst [vmem:[#allocation61_spill] sm:$0xff] %v8991_v43  ;;  %v9011_v41 = vpack.c.bf16 %v1128_v33, %v1124_v24  ;;  %v1132_v60 = vld [vmem:[#allocation7 + $0x100] sm:$0xff] }
 0x23e   :  { %11433 = vst [vmem:[#allocation60_spill] sm:$0xff] %v8987_v36  ;;  %11435 = vst [vmem:[#allocation62_spill] sm:$0xff] %v8993_v55  ;;  %v1136_v61 = vld [vmem:[#allocation7 + $0x120] sm:$0xff] }
 0x23f   :  { %11437 = vst [vmem:[#allocation63_spill] sm:$0xff] %v8999_v51  ;;  %11438 = vst [vmem:[#allocation64_spill] sm:$0xff] %v9001_v48  ;;  %v1140_v33 = vld [vmem:[#allocation7 + $0x140] sm:$0xff] }
 0x240   :  { %11441 = vst [vmem:[#allocation67_spill] sm:$0xff] %v9011_v41 }
 0x247   :  { %v8094_v6 = vpop.eup %8093 }
 0x248   :  { %v8970_v17 = vmul.f32 %v8094_v6, %v8092_v62  ;;  %v1125_v62 = vld [vmem:[#allocation7 + $0xc8] sm:$0xff] }
 0x249   :  { %v1129_v6 = vld [vmem:[#allocation7 + $0xe8] sm:$0xff] }
 0x24a   :  { %5193 = vmatmul.mubr.msk.f32.vlgmr.msra.gmra.mrb[2].mxu1 %vm604_vm5, %v8970_v17  ;;  %5194 = vmatmul.mubr.msk.f32.vlgmr.msra.gmra.mrb[10].mxu0 %vm604_vm5, %v8970_v17  ;;  %v9005_v52 = vpack.c.bf16 %v1129_v6, %v1125_v62  ;;  %v1134_v62 = vld [vmem:[#allocation7 + $0x110] sm:$0xff] }
 0x24b   :  { %5550 = vmatpush1.bf16.msra.mxu1 %v8966_v7  ;;  %5614 = vmatpush1.bf16.msra.mxu0 %v8968_v8  ;;  %v1131_v8 = vld [vmem:[#allocation7 + $0xf8] sm:$0xff]  ;;  %v1138_v6 = vld [vmem:[#allocation7 + $0x130] sm:$0xff] }
 0x24c   :  { %5552 = vmatprep.subr.bf16.mxu1 %v8972_v27  ;;  %5616 = vmatprep.subr.bf16.mxu0 %v8974_v34  ;;  %11439 = vst [vmem:[#allocation65_spill] sm:$0xff] %v9005_v52  ;;  %v9007_v16 = vpack.c.bf16 %v1131_v8, %v1127_v18  ;;  %v1130_v34 = vld [vmem:[#allocation7 + $0xf0] sm:$0xff]  ;;  %v1133_v27 = vld [vmem:[#allocation7 + $0x108] sm:$0xff]  ;;  %v1135_v7 = vld [vmem:[#allocation7 + $0x118] sm:$0xff]  ;;  %v9025_v24 = vpack.c.bf16 %v1138_v6, %v1134_v62 }
 0x24d   :  { %1292 = vmatprep.mubr.f32.mxu1 %v11436_v12  ;;  %1363 = vmatprep.mubr.f32.mxu0 %v11436_v12  ;;  %v9013_v42 = vpack.c.bf16 %v1130_v34, %v1126_v35  ;;  %v9023_v34 = vpack.c.bf16 %v1136_v61, %v1132_v60  ;;  %v1144_v35 = vld [vmem:[#allocation7 + $0x160] sm:$0xff] }
 0x24e   :  { %11440 = vst [vmem:[#allocation66_spill] sm:$0xff] %v9007_v16  ;;  %11446 = vst [vmem:[#allocation72_spill] sm:$0xff] %v9025_v24  ;;  %v9035_v60 = vpack.c.bf16 %v1144_v35, %v1140_v33  ;;  %v1148_v62 = vld [vmem:[#allocation7 + $0x180] sm:$0xff] }
 0x24f   :  { %5554 = vmatpush1.bf16.msra.mxu1 %v8985_v32  ;;  %5618 = vmatpush1.bf16.msra.mxu0 %v8987_v36  ;;  %v1137_v32 = vld [vmem:[#allocation7 + $0x128] sm:$0xff]  ;;  %v1139_v36 = vld [vmem:[#allocation7 + $0x138] sm:$0xff]  ;;  %11442 = vst [vmem:[#allocation68_spill] sm:$0xff] %v9013_v42  ;;  %11445 = vst [vmem:[#allocation71_spill] sm:$0xff] %v9023_v34 }
 0x250   :  { %5556 = vmatprep.subr.bf16.mxu1 %v8991_v43  ;;  %5620 = vmatprep.subr.bf16.mxu0 %v8993_v55  ;;  %v9017_v18 = vpack.c.bf16 %v1137_v32, %v1133_v27  ;;  %v9019_v8 = vpack.c.bf16 %v1139_v36, %v1135_v7  ;;  %v1141_v55 = vld [vmem:[#allocation7 + $0x148] sm:$0xff]  ;;  %v1143_v43 = vld [vmem:[#allocation7 + $0x158] sm:$0xff]  ;;  %v1142_v32 = vld [vmem:[#allocation7 + $0x150] sm:$0xff]  ;;  %11449 = vst [vmem:[#allocation75_spill] sm:$0xff] %v9035_v60 }
 0x251   :  { %v1146_v36 = vld [vmem:[#allocation7 + $0x170] sm:$0xff]  ;;  %v1152_v6 = vld [vmem:[#allocation7 + $0x1a0] sm:$0xff] }
 0x252   :  { %11443 = vst [vmem:[#allocation69_spill] sm:$0xff] %v9017_v18  ;;  %11444 = vst [vmem:[#allocation70_spill] sm:$0xff] %v9019_v8  ;;  %v9037_v61 = vpack.c.bf16 %v1146_v36, %v1142_v32  ;;  %v9047_v33 = vpack.c.bf16 %v1152_v6, %v1148_v62  ;;  %v1156_v32 = vld [vmem:[#allocation7 + $0x1c0] sm:$0xff] }
 0x253   :  { %5558 = vmatpush1.bf16.msra.mxu1 %v8999_v51  ;;  %5622 = vmatpush1.bf16.msra.mxu0 %v9001_v48  ;;  %v1145_v51 = vld [vmem:[#allocation7 + $0x168] sm:$0xff]  ;;  %v1147_v48 = vld [vmem:[#allocation7 + $0x178] sm:$0xff]  ;;  %v1160_v36 = vld [vmem:[#allocation7 + $0x1e0] sm:$0xff] }
 0x254   :  { %5560 = vmatprep.subr.bf16.mxu1 %v9005_v52  ;;  %5624 = vmatprep.subr.bf16.mxu0 %v9007_v16  ;;  %v9029_v7 = vpack.c.bf16 %v1145_v51, %v1141_v55  ;;  %v9031_v27 = vpack.c.bf16 %v1147_v48, %v1143_v43  ;;  %v1149_v16 = vld [vmem:[#allocation7 + $0x188] sm:$0xff]  ;;  %v1151_v52 = vld [vmem:[#allocation7 + $0x198] sm:$0xff]  ;;  %11450 = vst [vmem:[#allocation76_spill] sm:$0xff] %v9037_v61  ;;  %v1150_v51 = vld [vmem:[#allocation7 + $0x190] sm:$0xff] }
 0x255   :  { %v1154_v48 = vld [vmem:[#allocation7 + $0x1b0] sm:$0xff]  ;;  %11453 = vst [vmem:[#allocation79_spill] sm:$0xff] %v9047_v33  ;;  %v9059_v62 = vpack.c.bf16 %v1160_v36, %v1156_v32 }
 0x256   :  { %11447 = vst [vmem:[#allocation73_spill] sm:$0xff] %v9029_v7  ;;  %11448 = vst [vmem:[#allocation74_spill] sm:$0xff] %v9031_v27  ;;  %v9049_v35 = vpack.c.bf16 %v1154_v48, %v1150_v51  ;;  %v1164_v51 = vld [vmem:[#allocation7 + $0x200] sm:$0xff] }
 0x257   :  { %5562 = vmatpush1.bf16.msra.mxu1 %v9011_v41  ;;  %5626 = vmatpush1.bf16.msra.mxu0 %v9013_v42  ;;  %v1153_v41 = vld [vmem:[#allocation7 + $0x1a8] sm:$0xff]  ;;  %v1155_v42 = vld [vmem:[#allocation7 + $0x1b8] sm:$0xff]  ;;  %11457 = vst [vmem:[#allocation83_spill] sm:$0xff] %v9059_v62  ;;  %v1168_v48 = vld [vmem:[#allocation7 + $0x220] sm:$0xff] }
 0x258   :  { %5564 = vmatprep.subr.bf16.mxu1 %v9017_v18  ;;  %5628 = vmatprep.subr.bf16.mxu0 %v9019_v8  ;;  %v9041_v43 = vpack.c.bf16 %v1153_v41, %v1149_v16  ;;  %v9043_v55 = vpack.c.bf16 %v1155_v42, %v1151_v52  ;;  %v1157_v8 = vld [vmem:[#allocation7 + $0x1c8] sm:$0xff]  ;;  %v1159_v18 = vld [vmem:[#allocation7 + $0x1d8] sm:$0xff]  ;;  %11454 = vst [vmem:[#allocation80_spill] sm:$0xff] %v9049_v35  ;;  %v1158_v41 = vld [vmem:[#allocation7 + $0x1d0] sm:$0xff] }
 0x259   :  { %v1162_v42 = vld [vmem:[#allocation7 + $0x1f0] sm:$0xff]  ;;  %v9071_v32 = vpack.c.bf16 %v1168_v48, %v1164_v51 }
 0x25a   :  { %11451 = vst [vmem:[#allocation77_spill] sm:$0xff] %v9041_v43  ;;  %11452 = vst [vmem:[#allocation78_spill] sm:$0xff] %v9043_v55  ;;  %v9061_v6 = vpack.c.bf16 %v1162_v42, %v1158_v41  ;;  %v1172_v41 = vld [vmem:[#allocation7 + $0x240] sm:$0xff] }
 0x25b   :  { %5566 = vmatpush1.bf16.msra.mxu1 %v9023_v34  ;;  %5630 = vmatpush1.bf16.msra.mxu0 %v9025_v24  ;;  %v1161_v34 = vld [vmem:[#allocation7 + $0x1e8] sm:$0xff]  ;;  %v1163_v24 = vld [vmem:[#allocation7 + $0x1f8] sm:$0xff]  ;;  %11461 = vst [vmem:[#allocation87_spill] sm:$0xff] %v9071_v32  ;;  %v1176_v42 = vld [vmem:[#allocation7 + $0x260] sm:$0xff] }
 0x25c   :  { %5568 = vmatprep.subr.bf16.mxu1 %v9029_v7  ;;  %5632 = vmatprep.subr.bf16.mxu0 %v9031_v27  ;;  %v9053_v52 = vpack.c.bf16 %v1161_v34, %v1157_v8  ;;  %v9055_v16 = vpack.c.bf16 %v1163_v24, %v1159_v18  ;;  %v1165_v27 = vld [vmem:[#allocation7 + $0x208] sm:$0xff]  ;;  %v1167_v7 = vld [vmem:[#allocation7 + $0x218] sm:$0xff]  ;;  %11458 = vst [vmem:[#allocation84_spill] sm:$0xff] %v9061_v6  ;;  %v1166_v34 = vld [vmem:[#allocation7 + $0x210] sm:$0xff] }
 0x25d   :  { %v1170_v24 = vld [vmem:[#allocation7 + $0x230] sm:$0xff]  ;;  %v9083_v51 = vpack.c.bf16 %v1176_v42, %v1172_v41 }
 0x25e   :  { %11455 = vst [vmem:[#allocation81_spill] sm:$0xff] %v9053_v52  ;;  %11456 = vst [vmem:[#allocation82_spill] sm:$0xff] %v9055_v16  ;;  %v9073_v36 = vpack.c.bf16 %v1170_v24, %v1166_v34  ;;  %v1180_v34 = vld [vmem:[#allocation7 + $0x280] sm:$0xff] }
 0x25f   :  { %5570 = vmatpush1.bf16.msra.mxu1 %v9035_v60  ;;  %5634 = vmatpush1.bf16.msra.mxu0 %v9037_v61  ;;  %v1169_v60 = vld [vmem:[#allocation7 + $0x228] sm:$0xff]  ;;  %v1171_v61 = vld [vmem:[#allocation7 + $0x238] sm:$0xff]  ;;  %11465 = vst [vmem:[#allocation91_spill] sm:$0xff] %v9083_v51  ;;  %v1184_v24 = vld [vmem:[#allocation7 + $0x2a0] sm:$0xff] }
 0x260   :  { %5572 = vmatprep.subr.bf16.mxu1 %v9041_v43  ;;  %5636 = vmatprep.subr.bf16.mxu0 %v9043_v55  ;;  %v9065_v18 = vpack.c.bf16 %v1169_v60, %v1165_v27  ;;  %v9067_v8 = vpack.c.bf16 %v1171_v61, %v1167_v7  ;;  %v1173_v55 = vld [vmem:[#allocation7 + $0x248] sm:$0xff]  ;;  %v1175_v43 = vld [vmem:[#allocation7 + $0x258] sm:$0xff]  ;;  %11462 = vst [vmem:[#allocation88_spill] sm:$0xff] %v9073_v36  ;;  %v1174_v60 = vld [vmem:[#allocation7 + $0x250] sm:$0xff] }
 0x261   :  { %v1178_v61 = vld [vmem:[#allocation7 + $0x270] sm:$0xff]  ;;  %v9095_v41 = vpack.c.bf16 %v1184_v24, %v1180_v34 }
 0x262   :  { %11459 = vst [vmem:[#allocation85_spill] sm:$0xff] %v9065_v18  ;;  %11460 = vst [vmem:[#allocation86_spill] sm:$0xff] %v9067_v8  ;;  %v9085_v48 = vpack.c.bf16 %v1178_v61, %v1174_v60  ;;  %v1188_v60 = vld [vmem:[#allocation7 + $0x2c0] sm:$0xff] }
 0x263   :  { %5574 = vmatpush1.bf16.msra.mxu1 %v9047_v33  ;;  %5638 = vmatpush1.bf16.msra.mxu0 %v9049_v35  ;;  %v1177_v33 = vld [vmem:[#allocation7 + $0x268] sm:$0xff]  ;;  %v1179_v35 = vld [vmem:[#allocation7 + $0x278] sm:$0xff]  ;;  %11469 = vst [vmem:[#allocation95_spill] sm:$0xff] %v9095_v41  ;;  %v1192_v61 = vld [vmem:[#allocation7 + $0x2e0] sm:$0xff] }
 0x264   :  { %5576 = vmatprep.subr.bf16.mxu1 %v9053_v52  ;;  %5640 = vmatprep.subr.bf16.mxu0 %v9055_v16  ;;  %v9077_v7 = vpack.c.bf16 %v1177_v33, %v1173_v55  ;;  %v9079_v27 = vpack.c.bf16 %v1179_v35, %v1175_v43  ;;  %v1181_v16 = vld [vmem:[#allocation7 + $0x288] sm:$0xff]  ;;  %v1183_v52 = vld [vmem:[#allocation7 + $0x298] sm:$0xff]  ;;  %11466 = vst [vmem:[#allocation92_spill] sm:$0xff] %v9085_v48  ;;  %v1182_v33 = vld [vmem:[#allocation7 + $0x290] sm:$0xff] }
 0x265   :  { %v1186_v35 = vld [vmem:[#allocation7 + $0x2b0] sm:$0xff]  ;;  %v9107_v34 = vpack.c.bf16 %v1192_v61, %v1188_v60 }
 0x266   :  { %11463 = vst [vmem:[#allocation89_spill] sm:$0xff] %v9077_v7  ;;  %11464 = vst [vmem:[#allocation90_spill] sm:$0xff] %v9079_v27  ;;  %v9097_v42 = vpack.c.bf16 %v1186_v35, %v1182_v33  ;;  %v1196_v33 = vld [vmem:[#allocation7 + $0x300] sm:$0xff] }
 0x267   :  { %5578 = vmatpush1.bf16.msra.mxu1 %v9059_v62  ;;  %5642 = vmatpush1.bf16.msra.mxu0 %v9061_v6  ;;  %v1185_v62 = vld [vmem:[#allocation7 + $0x2a8] sm:$0xff]  ;;  %v1187_v6 = vld [vmem:[#allocation7 + $0x2b8] sm:$0xff]  ;;  %11473 = vst [vmem:[#allocation99_spill] sm:$0xff] %v9107_v34  ;;  %v1200_v35 = vld [vmem:[#allocation7 + $0x320] sm:$0xff] }
 0x268   :  { %5580 = vmatprep.subr.bf16.mxu1 %v9065_v18  ;;  %5644 = vmatprep.subr.bf16.mxu0 %v9067_v8  ;;  %v9089_v43 = vpack.c.bf16 %v1185_v62, %v1181_v16  ;;  %v9091_v55 = vpack.c.bf16 %v1187_v6, %v1183_v52  ;;  %v1189_v8 = vld [vmem:[#allocation7 + $0x2c8] sm:$0xff]  ;;  %v1191_v18 = vld [vmem:[#allocation7 + $0x2d8] sm:$0xff]  ;;  %11470 = vst [vmem:[#allocation96_spill] sm:$0xff] %v9097_v42  ;;  %v1190_v62 = vld [vmem:[#allocation7 + $0x2d0] sm:$0xff] }
 0x269   :  { %v1194_v6 = vld [vmem:[#allocation7 + $0x2f0] sm:$0xff]  ;;  %v9119_v60 = vpack.c.bf16 %v1200_v35, %v1196_v33 }
 0x26a   :  { %11467 = vst [vmem:[#allocation93_spill] sm:$0xff] %v9089_v43  ;;  %11468 = vst [vmem:[#allocation94_spill] sm:$0xff] %v9091_v55  ;;  %v9109_v24 = vpack.c.bf16 %v1194_v6, %v1190_v62  ;;  %v1204_v62 = vld [vmem:[#allocation7 + $0x340] sm:$0xff] }
 0x26b   :  { %5582 = vmatpush1.bf16.msra.mxu1 %v9071_v32  ;;  %5646 = vmatpush1.bf16.msra.mxu0 %v9073_v36  ;;  %v1193_v32 = vld [vmem:[#allocation7 + $0x2e8] sm:$0xff]  ;;  %v1195_v36 = vld [vmem:[#allocation7 + $0x2f8] sm:$0xff]  ;;  %11477 = vst [vmem:[#allocation103_spill] sm:$0xff] %v9119_v60  ;;  %v1208_v6 = vld [vmem:[#allocation7 + $0x360] sm:$0xff] }
 0x26c   :  { %5584 = vmatprep.subr.bf16.mxu1 %v9077_v7  ;;  %5648 = vmatprep.subr.bf16.mxu0 %v9079_v27  ;;  %v9101_v52 = vpack.c.bf16 %v1193_v32, %v1189_v8  ;;  %v9103_v16 = vpack.c.bf16 %v1195_v36, %v1191_v18  ;;  %v1197_v27 = vld [vmem:[#allocation7 + $0x308] sm:$0xff]  ;;  %v1199_v7 = vld [vmem:[#allocation7 + $0x318] sm:$0xff]  ;;  %11474 = vst [vmem:[#allocation100_spill] sm:$0xff] %v9109_v24  ;;  %v1198_v32 = vld [vmem:[#allocation7 + $0x310] sm:$0xff] }
 0x26d   :  { %v1202_v36 = vld [vmem:[#allocation7 + $0x330] sm:$0xff]  ;;  %v9131_v33 = vpack.c.bf16 %v1208_v6, %v1204_v62 }
 0x26e   :  { %11471 = vst [vmem:[#allocation97_spill] sm:$0xff] %v9101_v52  ;;  %11472 = vst [vmem:[#allocation98_spill] sm:$0xff] %v9103_v16  ;;  %v9121_v61 = vpack.c.bf16 %v1202_v36, %v1198_v32  ;;  %v1212_v32 = vld [vmem:[#allocation7 + $0x380] sm:$0xff] }
 0x26f   :  { %5586 = vmatpush1.bf16.msra.mxu1 %v9083_v51  ;;  %5650 = vmatpush1.bf16.msra.mxu0 %v9085_v48  ;;  %v1201_v51 = vld [vmem:[#allocation7 + $0x328] sm:$0xff]  ;;  %v1203_v48 = vld [vmem:[#allocation7 + $0x338] sm:$0xff]  ;;  %11481 = vst [vmem:[#allocation107_spill] sm:$0xff] %v9131_v33  ;;  %v1216_v36 = vld [vmem:[#allocation7 + $0x3a0] sm:$0xff] }
 0x270   :  { %5588 = vmatprep.subr.bf16.mxu1 %v9089_v43  ;;  %5652 = vmatprep.subr.bf16.mxu0 %v9091_v55  ;;  %v9113_v18 = vpack.c.bf16 %v1201_v51, %v1197_v27  ;;  %v9115_v8 = vpack.c.bf16 %v1203_v48, %v1199_v7  ;;  %v1205_v55 = vld [vmem:[#allocation7 + $0x348] sm:$0xff]  ;;  %v1207_v43 = vld [vmem:[#allocation7 + $0x358] sm:$0xff]  ;;  %11478 = vst [vmem:[#allocation104_spill] sm:$0xff] %v9121_v61  ;;  %v1206_v51 = vld [vmem:[#allocation7 + $0x350] sm:$0xff] }
 0x271   :  { %v1210_v48 = vld [vmem:[#allocation7 + $0x370] sm:$0xff]  ;;  %v9143_v62 = vpack.c.bf16 %v1216_v36, %v1212_v32 }
 0x272   :  { %11475 = vst [vmem:[#allocation101_spill] sm:$0xff] %v9113_v18  ;;  %11476 = vst [vmem:[#allocation102_spill] sm:$0xff] %v9115_v8  ;;  %v9133_v35 = vpack.c.bf16 %v1210_v48, %v1206_v51  ;;  %v1220_v51 = vld [vmem:[#allocation7 + $0x3c0] sm:$0xff]  ;;  %v1226_v48 = vld [vmem:[#allocation7 + $0x3f0] sm:$0xff] }
 0x273   :  { %5590 = vmatpush1.bf16.msra.mxu1 %v9095_v41  ;;  %5654 = vmatpush1.bf16.msra.mxu0 %v9097_v42  ;;  %v1209_v41 = vld [vmem:[#allocation7 + $0x368] sm:$0xff]  ;;  %v1211_v42 = vld [vmem:[#allocation7 + $0x378] sm:$0xff]  ;;  %11485 = vst [vmem:[#allocation111_spill] sm:$0xff] %v9143_v62 }
 0x274   :  { %5592 = vmatprep.subr.bf16.mxu1 %v9101_v52  ;;  %5656 = vmatprep.subr.bf16.mxu0 %v9103_v16  ;;  %v9125_v7 = vpack.c.bf16 %v1209_v41, %v1205_v55  ;;  %v9127_v27 = vpack.c.bf16 %v1211_v42, %v1207_v43  ;;  %v1213_v16 = vld [vmem:[#allocation7 + $0x388] sm:$0xff]  ;;  %v1215_v52 = vld [vmem:[#allocation7 + $0x398] sm:$0xff]  ;;  %11482 = vst [vmem:[#allocation108_spill] sm:$0xff] %v9133_v35  ;;  %v1214_v41 = vld [vmem:[#allocation7 + $0x390] sm:$0xff] }
 0x275   :  { %v1218_v42 = vld [vmem:[#allocation7 + $0x3b0] sm:$0xff] }
 0x276   :  { %11479 = vst [vmem:[#allocation105_spill] sm:$0xff] %v9125_v7  ;;  %11480 = vst [vmem:[#allocation106_spill] sm:$0xff] %v9127_v27  ;;  %v9145_v6 = vpack.c.bf16 %v1218_v42, %v1214_v41 }
 0x277   :  { %5594 = vmatpush1.bf16.msra.mxu1 %v9107_v34  ;;  %5658 = vmatpush1.bf16.msra.mxu0 %v9109_v24  ;;  %v1217_v34 = vld [vmem:[#allocation7 + $0x3a8] sm:$0xff]  ;;  %v1219_v24 = vld [vmem:[#allocation7 + $0x3b8] sm:$0xff] }
 0x278   :  { %5596 = vmatprep.subr.bf16.mxu1 %v9113_v18  ;;  %5660 = vmatprep.subr.bf16.mxu0 %v9115_v8  ;;  %v9137_v43 = vpack.c.bf16 %v1217_v34, %v1213_v16  ;;  %v9139_v55 = vpack.c.bf16 %v1219_v24, %v1215_v52  ;;  %v1221_v8 = vld [vmem:[#allocation7 + $0x3c8] sm:$0xff]  ;;  %v1223_v18 = vld [vmem:[#allocation7 + $0x3d8] sm:$0xff]  ;;  %11486 = vst [vmem:[#allocation112_spill] sm:$0xff] %v9145_v6  ;;  %v1224_v34 = vld [vmem:[#allocation7 + $0x3e0] sm:$0xff] }
 0x279   :  { %v1222_v24 = vld [vmem:[#allocation7 + $0x3d0] sm:$0xff]  ;;  %v9155_v32 = vpack.c.bf16 %v1224_v34, %v1220_v51 }
 0x27a   :  { %11483 = vst [vmem:[#allocation109_spill] sm:$0xff] %v9137_v43  ;;  %11484 = vst [vmem:[#allocation110_spill] sm:$0xff] %v9139_v55  ;;  %v9157_v36 = vpack.c.bf16 %v1226_v48, %v1222_v24 }
 0x27b   :  { %5598 = vmatpush1.bf16.msra.mxu1 %v9119_v60  ;;  %5662 = vmatpush1.bf16.msra.mxu0 %v9121_v61  ;;  %v1225_v60 = vld [vmem:[#allocation7 + $0x3e8] sm:$0xff]  ;;  %v1227_v61 = vld [vmem:[#allocation7 + $0x3f8] sm:$0xff]  ;;  %11489 = vst [vmem:[#allocation115_spill] sm:$0xff] %v9155_v32 }
 0x27c   :  { %5600 = vmatprep.subr.bf16.mxu1 %v9125_v7  ;;  %5664 = vmatprep.subr.bf16.mxu0 %v9127_v27  ;;  %v9149_v52 = vpack.c.bf16 %v1225_v60, %v1221_v8  ;;  %v9151_v16 = vpack.c.bf16 %v1227_v61, %v1223_v18  ;;  %11490 = vst [vmem:[#allocation116_spill] sm:$0xff] %v9157_v36 }
 0x27e   :  { %11487 = vst [vmem:[#allocation113_spill] sm:$0xff] %v9149_v52  ;;  %11488 = vst [vmem:[#allocation114_spill] sm:$0xff] %v9151_v16 }
 0x27f   :  { %5602 = vmatpush1.bf16.msra.mxu1 %v9131_v33  ;;  %5666 = vmatpush1.bf16.msra.mxu0 %v9133_v35 }
 0x280   :  { %5604 = vmatprep.subr.bf16.mxu1 %v9137_v43  ;;  %5668 = vmatprep.subr.bf16.mxu0 %v9139_v55 }
 0x283   :  { %5606 = vmatpush1.bf16.msra.mxu1 %v9143_v62  ;;  %5670 = vmatpush1.bf16.msra.mxu0 %v9145_v6 }
 0x284   :  { %5608 = vmatprep.subr.bf16.mxu1 %v9149_v52  ;;  %5672 = vmatprep.subr.bf16.mxu0 %v9151_v16 }
 0x287   :  { %5610 = vmatpush1.bf16.msra.mxu1 %v9155_v32  ;;  %5674 = vmatpush1.bf16.msra.mxu0 %v9157_v36 }
 0x288   :  { %5676 = vmatprep.subr.bf16.mxu1 %v8750_v46  ;;  %5708 = vmatprep.subr.bf16.mxu0 %v8753_v49 }
 0x28a   :  { %5198 = vmatmul.mubr.msk.f32.vlgmr.msra.gmra.mrb[16].mxu1 %vm604_vm5, %v8970_v17  ;;  %5199 = vmatmul.mubr.msk.f32.vlgmr.msra.gmra.mrb[24].mxu0 %vm604_vm5, %v8970_v17 }
 0x28b   :  { %5678 = vmatpush1.bf16.msra.mxu1 %v8773_v4  ;;  %5710 = vmatpush1.bf16.msra.mxu0 %v8775_v5 }
 0x28c   :  { %5680 = vmatprep.subr.bf16.mxu1 %v8778_v14  ;;  %5712 = vmatprep.subr.bf16.mxu0 %v8780_v15 }
 0x28d   :  { %1465 = vmatprep.mubr.f32.mxu1 %v11436_v12  ;;  %1536 = vmatprep.mubr.f32.mxu0 %v11436_v12 }
 0x28f   :  { %5682 = vmatpush1.bf16.msra.mxu1 %v8785_v21  ;;  %5714 = vmatpush1.bf16.msra.mxu0 %v8787_v22 }
 0x290   :  { %5684 = vmatprep.subr.bf16.mxu1 %v8795_v29  ;;  %5716 = vmatprep.subr.bf16.mxu0 %v8797_v30 }
 0x293   :  { %5686 = vmatpush1.bf16.msra.mxu1 %v8801_v37  ;;  %5718 = vmatpush1.bf16.msra.mxu0 %v8803_v38 }
 0x294   :  { %5688 = vmatprep.subr.bf16.mxu1 %v8812_v45  ;;  %5720 = vmatprep.subr.bf16.mxu0 %v8814_v47 }
 0x297   :  { %5690 = vmatpush1.bf16.msra.mxu1 %v8819_v58  ;;  %5722 = vmatpush1.bf16.msra.mxu0 %v8821_v59 }
 0x298   :  { %5692 = vmatprep.subr.bf16.mxu1 %v8827_v1  ;;  %5724 = vmatprep.subr.bf16.mxu0 %v8829_v2 }
 0x29b   :  { %5694 = vmatpush1.bf16.msra.mxu1 %v8833_v10  ;;  %5726 = vmatpush1.bf16.msra.mxu0 %v8835_v11 }
 0x29c   :  { %5696 = vmatprep.subr.bf16.mxu1 %v8843_v19  ;;  %5728 = vmatprep.subr.bf16.mxu0 %v8845_v20 }
 0x29f   :  { %5698 = vmatpush1.bf16.msra.mxu1 %v8850_v28  ;;  %5730 = vmatpush1.bf16.msra.mxu0 %v8852_v31 }
 0x2a0   :  { %5700 = vmatprep.subr.bf16.mxu1 %v8858_v39  ;;  %5732 = vmatprep.subr.bf16.mxu0 %v8860_v40 }
 0x2a3   :  { %5702 = vmatpush1.bf16.msra.mxu1 %v8864_v53  ;;  %5734 = vmatpush1.bf16.msra.mxu0 %v8866_v54 }
 0x2a4   :  { %5704 = vmatprep.subr.bf16.mxu1 %v8874_v63  ;;  %5736 = vmatprep.subr.bf16.mxu0 %v8876_v0 }
 0x2a7   :  { %5706 = vmatpush1.bf16.msra.mxu1 %v8880_v56  ;;  %5738 = vmatpush1.bf16.msra.mxu0 %v8882_v44 }
 0x2a8   :  { %5740 = vmatprep.subr.bf16.mxu1 %v8928_v9  ;;  %5804 = vmatprep.subr.bf16.mxu0 %v8930_v13 }
 0x31d   :  { %v998_v18 = vpop.f32.mrb[2].mxu1  ;;  %v1069_v8 = vpop.f32.mrb[10].mxu0 }
 0x31e   :  { %v8005_v60 = vadd.f32 %v998_v18, %v8942_v25  ;;  %v1000_v61 = vpop.f32.mrb[3].mxu1  ;;  %v1071_v41 = vpop.f32.mrb[11].mxu0  ;;  %v8021_v44 = vadd.f32 %v1069_v8, %v8958_v57  ;;  %v11520_v57 = vld [vmem:[#allocation75_spill] sm:$0xff] }
 0x31f   :  { %v8006_v42 = vadd.f32 %v1000_v61, %v8945_v26  ;;  %v8022_v24 = vadd.f32 %v1071_v41, %v8952_v50  ;;  %v926_v41 = vsel %vm604_vm5, %v8961_v23, 0.0  ;;  %v9212_v8 = vpop.permute.xlu0 %608 }
 0x320   :  { %v5195_v51 = vmul.f32 -1.442695, %v8005_v60  ;;  %11491 = vst [vmem:[#allocation117_spill] sm:$0xff] %v9212_v8  ;;  %vm610_vm6 = vcmp.eq.s32.totalorder %v9212_v8, 1  ;;  %v11508_v8 = vld [vmem:[#allocation47_spill] sm:$0xff] }
 0x321   :  { %v5196_v34 = vmul.f32 -1.442695, %v8006_v42  ;;  %v5197_v48 = vmul.f32 -1.442695, %v8022_v24 }
 0x322   :  { %8095 = vpow2.f32 %v5195_v51 }
 0x323   :  { %8097 = vpow2.f32 %v5196_v34 }
 0x324   :  { %8099 = vpow2.f32 %v5197_v48 }
 0x325   :  { %8101 = vtanh.f32 %v8021_v44  ;;  %v11493_v44 = vmov 0  }
 0x32c   :  { %v8096_v9 = vpop.eup %8095 }
 0x32d   :  { %v8098_v56 = vpop.eup %8097  ;;  %v1077_v13 = vadd.f32 1.0, %v8096_v9 }
 0x32e   :  { %v1083_v0 = vadd.f32 1.0, %v8098_v56  ;;  %v8100_v18 = vpop.eup %8099 }
 0x32f   :  { %8103 = vrcp.f32 %v1077_v13  ;;  %v8102_v25 = vpop.eup %8101  ;;  %v1090_v51 = vadd.f32 1.0, %v8100_v18  ;;  %v925_v18 = vsel %vm604_vm5, %v8970_v17, 0.0  ;;  %v11497_v17 = vld [vmem:[#allocation58_spill] sm:$0xff] }
 0x330   :  { %8105 = vrcp.f32 %v1083_v0  ;;  %v8463_v0 = vld [vmem:[%s10976_s1] sm:$0xff] }
 0x331   :  { %8107 = vrcp.f32 %v1090_v51  ;;  %vm611_vm7 = vcmp.gt.s32.totalorder %v8463_v0, 2  ;;  %vm617_vm8 = vcmp.gt.s32.totalorder %v8463_v0, 3  ;;  %vm629_vm9 = vcmp.gt.s32.totalorder %v8463_v0, 5 }
 0x332   :  { %v612_v9 = vsel %vm611_vm7, 1, %v11493_v44  ;;  %v618_v13 = vsel %vm617_vm8, 1, %v11493_v44  ;;  %vm641_vm10 = vcmp.gt.s32.totalorder %v8463_v0, 7  ;;  %v11502_v0 = vld [vmem:[#allocation63_spill] sm:$0xff] }
 0x333   :  { %614 = vperm.xlu1 %8078, %v612_v9   ;;  %v642_v51 = vsel %vm641_vm10, 1, %v11493_v44  ;;  %v11499_v9 = vld [vmem:[#allocation60_spill] sm:$0xff] }
 0x337   :  { %620 = vperm.xlu1 %8078, %v618_v13   ;;  %v11500_v13 = vld [vmem:[#allocation61_spill] sm:$0xff] }
 0x339   :  { %v8104_v61 = vpop.eup %8103 }
 0x33a   :  { %v8106_v60 = vpop.eup %8105  ;;  %v1094_v42 = vmul.f32 %v8104_v61, %v8102_v25  ;;  %v630_v61 = vsel %vm629_vm9, 1, %v11493_v44  ;;  %v11505_v44 = vld [vmem:[#allocation66_spill] sm:$0xff] }
 0x33b   :  { %v1093_v34 = vmul.f32 %v8106_v60, %v926_v41  ;;  %v8108_v25 = vpop.eup %8107  ;;  %632 = vperm.xlu1 %8078, %v630_v61   ;;  %v11506_v61 = vld [vmem:[#allocation67_spill] sm:$0xff] }
 0x33d   :  { %v1095_v24 = vadd.f32 %v1094_v42, %v1093_v34  ;;  %v11494_v42 = vld [vmem:[#allocation55_spill] sm:$0xff]  ;;  %v11496_v34 = vld [vmem:[#allocation57_spill] sm:$0xff] }
 0x33f   :  { %8109 = vtanh.f32 %v1095_v24  ;;  %v9220_v56 = vsel %vm610_vm6, %v1095_v24, %v926_v41  ;;  %v11495_v41 = vld [vmem:[#allocation56_spill] sm:$0xff]  ;;  %644 = vperm.xlu1 %8078, %v642_v51   ;;  %v11498_v24 = vld [vmem:[#allocation59_spill] sm:$0xff] }
 0x340   :  { %11492 = vst [vmem:[#allocation118_spill] sm:$0xff] %v9220_v56  ;;  %v11507_v51 = vld [vmem:[#allocation68_spill] sm:$0xff] }
 0x349   :  { %v8110_v23 = vpop.eup %8109 }
 0x34a   :  { %v1097_v48 = vmul.f32 %v8110_v23, %v8108_v25  ;;  %v11501_v25 = vld [vmem:[#allocation62_spill] sm:$0xff]  ;;  %v11503_v23 = vld [vmem:[#allocation64_spill] sm:$0xff] }
 0x34c   :  { %v9230_v60 = vsel %vm610_vm6, %v1097_v48, %v925_v18  ;;  %v11504_v48 = vld [vmem:[#allocation65_spill] sm:$0xff] }
 0x34d   :  { %1466 = vmatmul.mubr.f32.vlgmr.msra.gmra.mrb[4].mxu1 %v9230_v60  ;;  %1537 = vmatmul.mubr.f32.vlgmr.msra.gmra.mrb[12].mxu0 %v9230_v60  ;;  %v647_v18 = vld [vmem:[%s10983_s8] sm:$0xf] }
 0x34e   :  { %5742 = vmatpush1.bf16.msra.mxu1 %v11494_v42  ;;  %5806 = vmatpush1.bf16.msra.mxu0 %v11495_v41  ;;  %v11514_v41 = vld [vmem:[#allocation71_spill] sm:$0xff] }
 0x34f   :  { %5744 = vmatprep.subr.bf16.mxu1 %v11496_v34  ;;  %5808 = vmatprep.subr.bf16.mxu0 %v11497_v17 }
 0x352   :  { %5746 = vmatpush1.bf16.msra.mxu1 %v11498_v24  ;;  %5810 = vmatpush1.bf16.msra.mxu0 %v11499_v9 }
 0x353   :  { %5748 = vmatprep.subr.bf16.mxu1 %v11500_v13  ;;  %5812 = vmatprep.subr.bf16.mxu0 %v11501_v25  ;;  %v9253_v13 = vrot.slane %v647_v18, %v11508_v8  ;;  %v11510_v25 = vld [vmem:[#allocation69_spill] sm:$0xff] }
 0x355   :  { %11509 = vst [vmem:[#allocation119_spill] sm:$0xff] %v9253_v13 }
 0x356   :  { %5750 = vmatpush1.bf16.msra.mxu1 %v11502_v0  ;;  %5814 = vmatpush1.bf16.msra.mxu0 %v11503_v23  ;;  %v11511_v0 = vld [vmem:[#allocation70_spill] sm:$0xff]  ;;  %v11512_v23 = vld [vmem:[#allocation48_spill] sm:$0xff] }
 0x357   :  { %5752 = vmatprep.subr.bf16.mxu1 %v11504_v48  ;;  %5816 = vmatprep.subr.bf16.mxu0 %v11505_v44  ;;  %v9258_v9 = vrot.slane %v647_v18, %v11512_v23  ;;  %v11518_v23 = vld [vmem:[#allocation51_spill] sm:$0xff] }
 0x358   :  { %v9267_v56 = vrot.slane %v647_v18, %v11518_v23  ;;  %v11528_v23 = vld [vmem:[#allocation81_spill] sm:$0xff] }
 0x359   :  { %11513 = vst [vmem:[#allocation120_spill] sm:$0xff] %v9258_v9 }
 0x35a   :  { %5754 = vmatpush1.bf16.msra.mxu1 %v11506_v61  ;;  %5818 = vmatpush1.bf16.msra.mxu0 %v11507_v51  ;;  %v11515_v61 = vld [vmem:[#allocation72_spill] sm:$0xff]  ;;  %v11516_v51 = vld [vmem:[#allocation73_spill] sm:$0xff]  ;;  %11519 = vst [vmem:[#allocation121_spill] sm:$0xff] %v9267_v56 }
 0x35b   :  { %5756 = vmatprep.subr.bf16.mxu1 %v11510_v25  ;;  %5820 = vmatprep.subr.bf16.mxu0 %v11511_v0  ;;  %v11517_v25 = vld [vmem:[#allocation74_spill] sm:$0xff] }
 0x35d   :  { %v1294_v48 = vpop.f32.mrb[16].mxu1  ;;  %v1365_v44 = vpop.f32.mrb[24].mxu0 }
 0x35e   :  { %v1295_v24 = vadd.f32 %v1294_v48, %v9253_v13  ;;  %v1296_v17 = vpop.f32.mrb[17].mxu1  ;;  %v1367_v34 = vpop.f32.mrb[25].mxu0  ;;  %5758 = vmatpush1.bf16.msra.mxu1 %v11514_v41  ;;  %5822 = vmatpush1.bf16.msra.mxu0 %v11515_v61  ;;  %v11521_v48 = vld [vmem:[#allocation76_spill] sm:$0xff]  ;;  %v11522_v41 = vld [vmem:[#allocation77_spill] sm:$0xff]  ;;  %v11523_v61 = vld [vmem:[#allocation78_spill] sm:$0xff] }
 0x35f   :  { %v1297_v8 = vadd.f32 %v1296_v17, %v9258_v9  ;;  %5760 = vmatprep.subr.bf16.mxu1 %v11516_v51  ;;  %5824 = vmatprep.subr.bf16.mxu0 %v11517_v25  ;;  %v1368_v17 = vadd.f32 %v1367_v34, %v9267_v56  ;;  %v11524_v51 = vld [vmem:[#allocation53_spill] sm:$0xff]  ;;  %v11533_v34 = vld [vmem:[#allocation86_spill] sm:$0xff] }
 0x360   :  { %v5200_v0 = vmul.f32 -1.442695, %v1295_v24  ;;  %v9275_v9 = vrot.slane %v647_v18, %v11524_v51  ;;  %v11526_v24 = vld [vmem:[#allocation79_spill] sm:$0xff] }
 0x361   :  { %v5201_v42 = vmul.f32 -1.442695, %v1297_v8  ;;  %v11527_v8 = vld [vmem:[#allocation80_spill] sm:$0xff] }
 0x362   :  { %8111 = vpow2.f32 %v5200_v0  ;;  %5762 = vmatpush1.bf16.msra.mxu1 %v11520_v57  ;;  %5826 = vmatpush1.bf16.msra.mxu0 %v11521_v48  ;;  %11525 = vst [vmem:[#allocation122_spill] sm:$0xff] %v9275_v9  ;;  %v11529_v0 = vld [vmem:[#allocation82_spill] sm:$0xff]  ;;  %v5202_v57 = vmul.f32 -1.442695, %v1368_v17  ;;  %v11530_v48 = vld [vmem:[#allocation83_spill] sm:$0xff] }
 0x363   :  { %8113 = vpow2.f32 %v5201_v42  ;;  %5764 = vmatprep.subr.bf16.mxu1 %v11522_v41  ;;  %5828 = vmatprep.subr.bf16.mxu0 %v11523_v61  ;;  %v1366_v42 = vadd.f32 %v1365_v44, %v9275_v9  ;;  %v11531_v41 = vld [vmem:[#allocation84_spill] sm:$0xff]  ;;  %v11532_v61 = vld [vmem:[#allocation85_spill] sm:$0xff]  ;;  %v11537_v17 = vld [vmem:[#allocation90_spill] sm:$0xff] }
 0x364   :  { %8115 = vpow2.f32 %v5202_v57  ;;  %v11536_v44 = vld [vmem:[#allocation89_spill] sm:$0xff]  ;;  %v11542_v57 = vld [vmem:[#allocation95_spill] sm:$0xff] }
 0x365   :  { %8117 = vtanh.f32 %v1366_v42 }
 0x366   :  { %5766 = vmatpush1.bf16.msra.mxu1 %v11526_v24  ;;  %5830 = vmatpush1.bf16.msra.mxu0 %v11527_v8 }
 0x367   :  { %5768 = vmatprep.subr.bf16.mxu1 %v11528_v23  ;;  %5832 = vmatprep.subr.bf16.mxu0 %v11529_v0  ;;  %v11534_v23 = vld [vmem:[#allocation87_spill] sm:$0xff]  ;;  %v11535_v0 = vld [vmem:[#allocation88_spill] sm:$0xff] }
 0x36a   :  { %5770 = vmatpush1.bf16.msra.mxu1 %v11530_v48  ;;  %5834 = vmatpush1.bf16.msra.mxu0 %v11531_v41  ;;  %v11538_v41 = vld [vmem:[#allocation91_spill] sm:$0xff] }
 0x36b   :  { %5772 = vmatprep.subr.bf16.mxu1 %v11532_v61  ;;  %5836 = vmatprep.subr.bf16.mxu0 %v11533_v34  ;;  %v11539_v61 = vld [vmem:[#allocation92_spill] sm:$0xff]  ;;  %v11540_v34 = vld [vmem:[#allocation93_spill] sm:$0xff]  ;;  %v11546_v48 = vld [vmem:[#allocation99_spill] sm:$0xff] }
 0x36c   :  { %v8112_v18 = vpop.eup %8111 }
 0x36d   :  { %v8114_v51 = vpop.eup %8113  ;;  %v1373_v24 = vadd.f32 1.0, %v8112_v18  ;;  %v11541_v18 = vld [vmem:[#allocation94_spill] sm:$0xff] }
 0x36e   :  { %v1379_v8 = vadd.f32 1.0, %v8114_v51  ;;  %5774 = vmatpush1.bf16.msra.mxu1 %v11534_v23  ;;  %5838 = vmatpush1.bf16.msra.mxu0 %v11535_v0  ;;  %v11543_v51 = vld [vmem:[#allocation96_spill] sm:$0xff]  ;;  %v8116_v42 = vpop.eup %8115  ;;  %v11544_v0 = vld [vmem:[#allocation97_spill] sm:$0xff] }
 0x36f   :  { %8119 = vrcp.f32 %v1373_v24  ;;  %5776 = vmatprep.subr.bf16.mxu1 %v11536_v44  ;;  %5840 = vmatprep.subr.bf16.mxu0 %v11537_v17  ;;  %v11545_v24 = vld [vmem:[#allocation98_spill] sm:$0xff]  ;;  %v8118_v44 = vpop.eup %8117 }
 0x370   :  { %8121 = vrcp.f32 %v1379_v8 }
 0x372   :  { %5778 = vmatpush1.bf16.msra.mxu1 %v11538_v41  ;;  %5842 = vmatpush1.bf16.msra.mxu0 %v11539_v61  ;;  %v1386_v41 = vadd.f32 1.0, %v8116_v42  ;;  %v11547_v61 = vld [vmem:[#allocation100_spill] sm:$0xff]  ;;  %v1741_v42 = vld [vmem:[#allocation8 + $0x20] sm:$0xff] }
 0x373   :  { %5780 = vmatprep.subr.bf16.mxu1 %v11540_v34  ;;  %5844 = vmatprep.subr.bf16.mxu0 %v11541_v18  ;;  %v11548_v18 = vld [vmem:[#allocation101_spill] sm:$0xff] }
 0x374   :  { %8123 = vrcp.f32 %v1386_v41  ;;  %v1742_v41 = vld [vmem:[#allocation8 + $0x28] sm:$0xff] }
 0x376   :  { %5782 = vmatpush1.bf16.msra.mxu1 %v11542_v57  ;;  %5846 = vmatpush1.bf16.msra.mxu0 %v11543_v51  ;;  %v11549_v57 = vld [vmem:[#allocation102_spill] sm:$0xff] }
 0x377   :  { %5784 = vmatprep.subr.bf16.mxu1 %v11544_v0  ;;  %5848 = vmatprep.subr.bf16.mxu0 %v11545_v24  ;;  %v11550_v0 = vld [vmem:[#allocation103_spill] sm:$0xff]  ;;  %v11551_v24 = vld [vmem:[#allocation104_spill] sm:$0xff] }
 0x379   :  { %v8120_v17 = vpop.eup %8119 }
 0x37a   :  { %v8122_v8 = vpop.eup %8121  ;;  %v1390_v23 = vmul.f32 %v8120_v17, %v8118_v44  ;;  %5786 = vmatpush1.bf16.msra.mxu1 %v11546_v48  ;;  %5850 = vmatpush1.bf16.msra.mxu0 %v11547_v61  ;;  %v1744_v44 = vld [vmem:[#allocation8 + $0x38] sm:$0xff]  ;;  %v1737_v17 = vld [vmem:[#allocation8] sm:$0xff] }
 0x37b   :  { %v1389_v34 = vmul.f32 0.0, %v8122_v8  ;;  %5788 = vmatprep.subr.bf16.mxu1 %v11548_v18  ;;  %5852 = vmatprep.subr.bf16.mxu0 %v11549_v57  ;;  %v1747_v57 = vld [vmem:[#allocation8 + $0x50] sm:$0xff]  ;;  %v1754_v18 = vld [vmem:[#allocation8 + $0x88] sm:$0xff] }
 0x37d   :  { %v9302_v51 = vadd.f32 %v1390_v23, %v1389_v34  ;;  %v1738_v23 = vld [vmem:[#allocation8 + $0x8] sm:$0xff]  ;;  %v1740_v34 = vld [vmem:[#allocation8 + $0x18] sm:$0xff] }
 0x37e   :  { %5790 = vmatpush1.bf16.msra.mxu1 %v11550_v0  ;;  %5854 = vmatpush1.bf16.msra.mxu0 %v11551_v24  ;;  %v9317_v8 = vpack.c.bf16 %v1742_v41, %v1738_v23  ;;  %v1748_v24 = vld [vmem:[#allocation8 + $0x58] sm:$0xff]  ;;  %v1745_v41 = vld [vmem:[#allocation8 + $0x40] sm:$0xff] }
 0x37f   :  { %8125 = vtanh.f32 %v9302_v51  ;;  %5792 = vmatprep.subr.bf16.mxu1 %v9125_v7  ;;  %5856 = vmatprep.subr.bf16.mxu0 %v9127_v27  ;;  %v8124_v27 = vpop.eup %8123  ;;  %v1750_v7 = vld [vmem:[#allocation8 + $0x68] sm:$0xff]  ;;  %v1752_v0 = vld [vmem:[#allocation8 + $0x78] sm:$0xff] }
 0x380   :  { %11552 = vst [vmem:[#allocation123_spill] sm:$0xff] %v9317_v8 }
 0x382   :  { %5794 = vmatpush1.bf16.msra.mxu1 %v9131_v33  ;;  %5858 = vmatpush1.bf16.msra.mxu0 %v9133_v35  ;;  %v9319_v35 = vpack.c.bf16 %v1744_v44, %v1740_v34  ;;  %v1746_v33 = vld [vmem:[#allocation8 + $0x48] sm:$0xff]  ;;  %v1749_v34 = vld [vmem:[#allocation8 + $0x60] sm:$0xff] }
 0x383   :  { %5796 = vmatprep.subr.bf16.mxu1 %v9137_v43  ;;  %5860 = vmatprep.subr.bf16.mxu0 %v9139_v55  ;;  %v1739_v43 = vld [vmem:[#allocation8 + $0x10] sm:$0xff]  ;;  %v9331_v44 = vpack.c.bf16 %v1750_v7, %v1746_v33  ;;  %v9345_v7 = vpack.c.bf16 %v1749_v34, %v1745_v41  ;;  %v1765_v41 = vld [vmem:[#allocation8 + $0xe0] sm:$0xff] }
 0x384   :  { %11553 = vst [vmem:[#allocation124_spill] sm:$0xff] %v9319_v35  ;;  %v1743_v55 = vld [vmem:[#allocation8 + $0x30] sm:$0xff] }
 0x385   :  { %v9327_v23 = vpack.c.bf16 %v1743_v55, %v1739_v43  ;;  %11556 = vst [vmem:[#allocation127_spill] sm:$0xff] %v9331_v44  ;;  %v1756_v43 = vld [vmem:[#allocation8 + $0x98] sm:$0xff]  ;;  %11558 = vst [vmem:[#allocation129_spill] sm:$0xff] %v9345_v7 }
 0x386   :  { %5798 = vmatpush1.bf16.msra.mxu1 %v9143_v62  ;;  %5862 = vmatpush1.bf16.msra.mxu0 %v9145_v6  ;;  %v1760_v55 = vld [vmem:[#allocation8 + $0xb8] sm:$0xff] }
 0x387   :  { %5800 = vmatprep.subr.bf16.mxu1 %v9149_v52  ;;  %5864 = vmatprep.subr.bf16.mxu0 %v9151_v16  ;;  %v9325_v52 = vpack.c.bf16 %v1741_v42, %v1737_v17  ;;  %11555 = vst [vmem:[#allocation126_spill] sm:$0xff] %v9327_v23  ;;  %v9333_v16 = vpack.c.bf16 %v1752_v0, %v1748_v24  ;;  %v1757_v0 = vld [vmem:[#allocation8 + $0xa0] sm:$0xff]  ;;  %v1755_v42 = vld [vmem:[#allocation8 + $0x90] sm:$0xff] }
 0x388   :  { %v9353_v17 = vpack.c.bf16 %v1760_v55, %v1756_v43  ;;  %v1763_v43 = vld [vmem:[#allocation8 + $0xd0] sm:$0xff] }
 0x389   :  { %v8126_v62 = vpop.eup %8125  ;;  %11554 = vst [vmem:[#allocation125_spill] sm:$0xff] %v9325_v52  ;;  %11557 = vst [vmem:[#allocation128_spill] sm:$0xff] %v9333_v16  ;;  %v1767_v55 = vld [vmem:[#allocation8 + $0xf0] sm:$0xff] }
 0x38a   :  { %5802 = vmatpush1.bf16.msra.mxu1 %v9155_v32  ;;  %5866 = vmatpush1.bf16.msra.mxu0 %v9157_v36  ;;  %v9323_v6 = vmul.f32 %v8126_v62, %v8124_v27  ;;  %v1751_v32 = vld [vmem:[#allocation8 + $0x70] sm:$0xff]  ;;  %v1758_v27 = vld [vmem:[#allocation8 + $0xa8] sm:$0xff]  ;;  %v1753_v62 = vld [vmem:[#allocation8 + $0x80] sm:$0xff]  ;;  %11561 = vst [vmem:[#allocation132_spill] sm:$0xff] %v9353_v17 }
 0x38b   :  { %5868 = vmatprep.subr.bf16.mxu1 %v9317_v8  ;;  %5932 = vmatprep.subr.bf16.mxu0 %v9319_v35  ;;  %v9347_v33 = vpack.c.bf16 %v1751_v32, %v1747_v57  ;;  %v9351_v24 = vpack.c.bf16 %v1758_v27, %v1754_v18  ;;  %v1759_v35 = vld [vmem:[#allocation8 + $0xb0] sm:$0xff]  ;;  %v1762_v8 = vld [vmem:[#allocation8 + $0xc8] sm:$0xff]  ;;  %v1764_v36 = vld [vmem:[#allocation8 + $0xd8] sm:$0xff]  ;;  %v9359_v32 = vpack.c.bf16 %v1757_v0, %v1753_v62 }
 0x38c   :  { %5206 = vmatprep.mubr.msk.f32.mxu1 %vm604_vm5, %v9323_v6  ;;  %5207 = vmatprep.mubr.msk.f32.mxu0 %vm604_vm5, %v9323_v6  ;;  %v9361_v18 = vpack.c.bf16 %v1759_v35, %v1755_v42  ;;  %v1761_v57 = vld [vmem:[#allocation8 + $0xc0] sm:$0xff]  ;;  %v9373_v62 = vpack.c.bf16 %v1767_v55, %v1763_v43 }
 0x38d   :  { %1634 = vmatmul.mubr.f32.vlgmr.msra.gmra.mrb[18].mxu1 %v9230_v60  ;;  %1705 = vmatmul.mubr.f32.vlgmr.msra.gmra.mrb[26].mxu0 %v9230_v60  ;;  %11559 = vst [vmem:[#allocation130_spill] sm:$0xff] %v9347_v33  ;;  %11560 = vst [vmem:[#allocation131_spill] sm:$0xff] %v9351_v24  ;;  %v9371_v35 = vpack.c.bf16 %v1765_v41, %v1761_v57  ;;  %v1769_v0 = vld [vmem:[#allocation8 + $0x100] sm:$0xff] }
 0x38e   :  { %5870 = vmatpush1.bf16.msra.mxu1 %v9325_v52  ;;  %5934 = vmatpush1.bf16.msra.mxu0 %v9327_v23  ;;  %v1766_v52 = vld [vmem:[#allocation8 + $0xe8] sm:$0xff]  ;;  %v1768_v23 = vld [vmem:[#allocation8 + $0xf8] sm:$0xff]  ;;  %11562 = vst [vmem:[#allocation133_spill] sm:$0xff] %v9359_v32  ;;  %11563 = vst [vmem:[#allocation134_spill] sm:$0xff] %v9361_v18 }
 0x38f   :  { %5872 = vmatprep.subr.bf16.mxu1 %v9331_v44  ;;  %5936 = vmatprep.subr.bf16.mxu0 %v9333_v16  ;;  %v9365_v34 = vpack.c.bf16 %v1766_v52, %v1762_v8  ;;  %v9367_v27 = vpack.c.bf16 %v1768_v23, %v1764_v36  ;;  %v1770_v16 = vld [vmem:[#allocation8 + $0x108] sm:$0xff]  ;;  %v1772_v44 = vld [vmem:[#allocation8 + $0x118] sm:$0xff]  ;;  %11566 = vst [vmem:[#allocation137_spill] sm:$0xff] %v9371_v35  ;;  %11567 = vst [vmem:[#allocation138_spill] sm:$0xff] %v9373_v62 }
 0x390   :  { %1929 = vmatprep.mubr.f32.mxu1 %v11436_v12  ;;  %2000 = vmatprep.mubr.f32.mxu0 %v11436_v12  ;;  %v1773_v42 = vld [vmem:[#allocation8 + $0x120] sm:$0xff]  ;;  %v1771_v8 = vld [vmem:[#allocation8 + $0x110] sm:$0xff] }
 0x391   :  { %11564 = vst [vmem:[#allocation135_spill] sm:$0xff] %v9365_v34  ;;  %11565 = vst [vmem:[#allocation136_spill] sm:$0xff] %v9367_v27  ;;  %v1775_v23 = vld [vmem:[#allocation8 + $0x130] sm:$0xff]  ;;  %v9383_v57 = vpack.c.bf16 %v1773_v42, %v1769_v0  ;;  %v1777_v43 = vld [vmem:[#allocation8 + $0x140] sm:$0xff] }
 0x392   :  { %5874 = vmatpush1.bf16.msra.mxu1 %v9345_v7  ;;  %5938 = vmatpush1.bf16.msra.mxu0 %v9347_v33  ;;  %v1774_v7 = vld [vmem:[#allocation8 + $0x128] sm:$0xff]  ;;  %v1776_v33 = vld [vmem:[#allocation8 + $0x138] sm:$0xff]  ;;  %v9385_v41 = vpack.c.bf16 %v1775_v23, %v1771_v8  ;;  %v1781_v55 = vld [vmem:[#allocation8 + $0x160] sm:$0xff] }
 0x393   :  { %5876 = vmatprep.subr.bf16.mxu1 %v9351_v24  ;;  %5940 = vmatprep.subr.bf16.mxu0 %v9353_v17  ;;  %v9377_v52 = vpack.c.bf16 %v1774_v7, %v1770_v16  ;;  %v9379_v36 = vpack.c.bf16 %v1776_v33, %v1772_v44  ;;  %v1778_v17 = vld [vmem:[#allocation8 + $0x148] sm:$0xff]  ;;  %v1780_v24 = vld [vmem:[#allocation8 + $0x158] sm:$0xff]  ;;  %11570 = vst [vmem:[#allocation141_spill] sm:$0xff] %v9383_v57  ;;  %v1779_v7 = vld [vmem:[#allocation8 + $0x150] sm:$0xff] }
 0x394   :  { %11571 = vst [vmem:[#allocation142_spill] sm:$0xff] %v9385_v41  ;;  %v1783_v33 = vld [vmem:[#allocation8 + $0x170] sm:$0xff]  ;;  %v9395_v0 = vpack.c.bf16 %v1781_v55, %v1777_v43  ;;  %v1785_v8 = vld [vmem:[#allocation8 + $0x180] sm:$0xff] }
 0x395   :  { %11568 = vst [vmem:[#allocation139_spill] sm:$0xff] %v9377_v52  ;;  %11569 = vst [vmem:[#allocation140_spill] sm:$0xff] %v9379_v36  ;;  %v9397_v42 = vpack.c.bf16 %v1783_v33, %v1779_v7  ;;  %v1789_v23 = vld [vmem:[#allocation8 + $0x1a0] sm:$0xff] }
 0x396   :  { %5878 = vmatpush1.bf16.msra.mxu1 %v9359_v32  ;;  %5942 = vmatpush1.bf16.msra.mxu0 %v9361_v18  ;;  %v1782_v32 = vld [vmem:[#allocation8 + $0x168] sm:$0xff]  ;;  %v1784_v18 = vld [vmem:[#allocation8 + $0x178] sm:$0xff]  ;;  %11574 = vst [vmem:[#allocation145_spill] sm:$0xff] %v9395_v0  ;;  %v9407_v43 = vpack.c.bf16 %v1789_v23, %v1785_v8  ;;  %v1793_v7 = vld [vmem:[#allocation8 + $0x1c0] sm:$0xff] }
 0x397   :  { %5880 = vmatprep.subr.bf16.mxu1 %v9365_v34  ;;  %5944 = vmatprep.subr.bf16.mxu0 %v9367_v27  ;;  %v9389_v16 = vpack.c.bf16 %v1782_v32, %v1778_v17  ;;  %v9391_v44 = vpack.c.bf16 %v1784_v18, %v1780_v24  ;;  %v1786_v27 = vld [vmem:[#allocation8 + $0x188] sm:$0xff]  ;;  %v1788_v34 = vld [vmem:[#allocation8 + $0x198] sm:$0xff]  ;;  %11575 = vst [vmem:[#allocation146_spill] sm:$0xff] %v9397_v42  ;;  %v1787_v32 = vld [vmem:[#allocation8 + $0x190] sm:$0xff] }
 0x398   :  { %v1791_v18 = vld [vmem:[#allocation8 + $0x1b0] sm:$0xff]  ;;  %11578 = vst [vmem:[#allocation149_spill] sm:$0xff] %v9407_v43  ;;  %v1797_v33 = vld [vmem:[#allocation8 + $0x1e0] sm:$0xff] }
 0x399   :  { %11572 = vst [vmem:[#allocation143_spill] sm:$0xff] %v9389_v16  ;;  %11573 = vst [vmem:[#allocation144_spill] sm:$0xff] %v9391_v44  ;;  %v9409_v55 = vpack.c.bf16 %v1791_v18, %v1787_v32  ;;  %v9419_v8 = vpack.c.bf16 %v1797_v33, %v1793_v7  ;;  %v1801_v32 = vld [vmem:[#allocation8 + $0x200] sm:$0xff] }
 0x39a   :  { %5882 = vmatpush1.bf16.msra.mxu1 %v9371_v35  ;;  %5946 = vmatpush1.bf16.msra.mxu0 %v9373_v62  ;;  %v1790_v35 = vld [vmem:[#allocation8 + $0x1a8] sm:$0xff]  ;;  %v1792_v62 = vld [vmem:[#allocation8 + $0x1b8] sm:$0xff]  ;;  %v1805_v18 = vld [vmem:[#allocation8 + $0x220] sm:$0xff] }
 0x39b   :  { %5884 = vmatprep.subr.bf16.mxu1 %v9377_v52  ;;  %5948 = vmatprep.subr.bf16.mxu0 %v9379_v36  ;;  %v9401_v24 = vpack.c.bf16 %v1790_v35, %v1786_v27  ;;  %v9403_v17 = vpack.c.bf16 %v1792_v62, %v1788_v34  ;;  %v1794_v36 = vld [vmem:[#allocation8 + $0x1c8] sm:$0xff]  ;;  %v1796_v52 = vld [vmem:[#allocation8 + $0x1d8] sm:$0xff]  ;;  %11579 = vst [vmem:[#allocation150_spill] sm:$0xff] %v9409_v55  ;;  %v1795_v35 = vld [vmem:[#allocation8 + $0x1d0] sm:$0xff] }
 0x39c   :  { %v1799_v62 = vld [vmem:[#allocation8 + $0x1f0] sm:$0xff]  ;;  %11582 = vst [vmem:[#allocation153_spill] sm:$0xff] %v9419_v8  ;;  %v9431_v7 = vpack.c.bf16 %v1805_v18, %v1801_v32 }
 0x39d   :  { %11576 = vst [vmem:[#allocation147_spill] sm:$0xff] %v9401_v24  ;;  %11577 = vst [vmem:[#allocation148_spill] sm:$0xff] %v9403_v17  ;;  %v9421_v23 = vpack.c.bf16 %v1799_v62, %v1795_v35  ;;  %v1809_v35 = vld [vmem:[#allocation8 + $0x240] sm:$0xff] }
 0x39e   :  { %5886 = vmatpush1.bf16.msra.mxu1 %v9383_v57  ;;  %5950 = vmatpush1.bf16.msra.mxu0 %v9385_v41  ;;  %v1798_v57 = vld [vmem:[#allocation8 + $0x1e8] sm:$0xff]  ;;  %v1800_v41 = vld [vmem:[#allocation8 + $0x1f8] sm:$0xff]  ;;  %11586 = vst [vmem:[#allocation157_spill] sm:$0xff] %v9431_v7  ;;  %v1813_v62 = vld [vmem:[#allocation8 + $0x260] sm:$0xff] }
 0x39f   :  { %5888 = vmatprep.subr.bf16.mxu1 %v9389_v16  ;;  %5952 = vmatprep.subr.bf16.mxu0 %v9391_v44  ;;  %v9413_v34 = vpack.c.bf16 %v1798_v57, %v1794_v36  ;;  %v9415_v27 = vpack.c.bf16 %v1800_v41, %v1796_v52  ;;  %v1802_v44 = vld [vmem:[#allocation8 + $0x208] sm:$0xff]  ;;  %v1804_v16 = vld [vmem:[#allocation8 + $0x218] sm:$0xff]  ;;  %11583 = vst [vmem:[#allocation154_spill] sm:$0xff] %v9421_v23  ;;  %v1803_v57 = vld [vmem:[#allocation8 + $0x210] sm:$0xff] }
 0x3a0   :  { %v1807_v41 = vld [vmem:[#allocation8 + $0x230] sm:$0xff]  ;;  %v9443_v32 = vpack.c.bf16 %v1813_v62, %v1809_v35 }
 0x3a1   :  { %11580 = vst [vmem:[#allocation151_spill] sm:$0xff] %v9413_v34  ;;  %11581 = vst [vmem:[#allocation152_spill] sm:$0xff] %v9415_v27  ;;  %v9433_v33 = vpack.c.bf16 %v1807_v41, %v1803_v57  ;;  %v1817_v57 = vld [vmem:[#allocation8 + $0x280] sm:$0xff] }
 0x3a2   :  { %5890 = vmatpush1.bf16.msra.mxu1 %v9395_v0  ;;  %5954 = vmatpush1.bf16.msra.mxu0 %v9397_v42  ;;  %v1806_v0 = vld [vmem:[#allocation8 + $0x228] sm:$0xff]  ;;  %v1808_v42 = vld [vmem:[#allocation8 + $0x238] sm:$0xff]  ;;  %11590 = vst [vmem:[#allocation161_spill] sm:$0xff] %v9443_v32  ;;  %v1821_v41 = vld [vmem:[#allocation8 + $0x2a0] sm:$0xff] }
 0x3a3   :  { %5892 = vmatprep.subr.bf16.mxu1 %v9401_v24  ;;  %5956 = vmatprep.subr.bf16.mxu0 %v9403_v17  ;;  %v9425_v52 = vpack.c.bf16 %v1806_v0, %v1802_v44  ;;  %v9427_v36 = vpack.c.bf16 %v1808_v42, %v1804_v16  ;;  %v1810_v17 = vld [vmem:[#allocation8 + $0x248] sm:$0xff]  ;;  %v1812_v24 = vld [vmem:[#allocation8 + $0x258] sm:$0xff]  ;;  %11587 = vst [vmem:[#allocation158_spill] sm:$0xff] %v9433_v33  ;;  %v1811_v0 = vld [vmem:[#allocation8 + $0x250] sm:$0xff] }
 0x3a4   :  { %v1815_v42 = vld [vmem:[#allocation8 + $0x270] sm:$0xff]  ;;  %v9455_v35 = vpack.c.bf16 %v1821_v41, %v1817_v57 }
 0x3a5   :  { %11584 = vst [vmem:[#allocation155_spill] sm:$0xff] %v9425_v52  ;;  %11585 = vst [vmem:[#allocation156_spill] sm:$0xff] %v9427_v36  ;;  %v9445_v18 = vpack.c.bf16 %v1815_v42, %v1811_v0  ;;  %v1825_v0 = vld [vmem:[#allocation8 + $0x2c0] sm:$0xff] }
 0x3a6   :  { %5894 = vmatpush1.bf16.msra.mxu1 %v9407_v43  ;;  %5958 = vmatpush1.bf16.msra.mxu0 %v9409_v55  ;;  %v1814_v43 = vld [vmem:[#allocation8 + $0x268] sm:$0xff]  ;;  %v1816_v55 = vld [vmem:[#allocation8 + $0x278] sm:$0xff]  ;;  %11594 = vst [vmem:[#allocation165_spill] sm:$0xff] %v9455_v35  ;;  %v1829_v42 = vld [vmem:[#allocation8 + $0x2e0] sm:$0xff] }
 0x3a7   :  { %5896 = vmatprep.subr.bf16.mxu1 %v9413_v34  ;;  %5960 = vmatprep.subr.bf16.mxu0 %v9415_v27  ;;  %v9437_v16 = vpack.c.bf16 %v1814_v43, %v1810_v17  ;;  %v9439_v44 = vpack.c.bf16 %v1816_v55, %v1812_v24  ;;  %v1818_v27 = vld [vmem:[#allocation8 + $0x288] sm:$0xff]  ;;  %v1820_v34 = vld [vmem:[#allocation8 + $0x298] sm:$0xff]  ;;  %11591 = vst [vmem:[#allocation162_spill] sm:$0xff] %v9445_v18  ;;  %v1819_v43 = vld [vmem:[#allocation8 + $0x290] sm:$0xff] }
 0x3a8   :  { %v1823_v55 = vld [vmem:[#allocation8 + $0x2b0] sm:$0xff]  ;;  %v9467_v57 = vpack.c.bf16 %v1829_v42, %v1825_v0 }
 0x3a9   :  { %11588 = vst [vmem:[#allocation159_spill] sm:$0xff] %v9437_v16  ;;  %11589 = vst [vmem:[#allocation160_spill] sm:$0xff] %v9439_v44  ;;  %v9457_v62 = vpack.c.bf16 %v1823_v55, %v1819_v43  ;;  %v1833_v43 = vld [vmem:[#allocation8 + $0x300] sm:$0xff] }
 0x3aa   :  { %5898 = vmatpush1.bf16.msra.mxu1 %v9419_v8  ;;  %5962 = vmatpush1.bf16.msra.mxu0 %v9421_v23  ;;  %v1822_v8 = vld [vmem:[#allocation8 + $0x2a8] sm:$0xff]  ;;  %v1824_v23 = vld [vmem:[#allocation8 + $0x2b8] sm:$0xff]  ;;  %11598 = vst [vmem:[#allocation169_spill] sm:$0xff] %v9467_v57  ;;  %v1837_v55 = vld [vmem:[#allocation8 + $0x320] sm:$0xff] }
 0x3ab   :  { %5900 = vmatprep.subr.bf16.mxu1 %v9425_v52  ;;  %5964 = vmatprep.subr.bf16.mxu0 %v9427_v36  ;;  %v9449_v24 = vpack.c.bf16 %v1822_v8, %v1818_v27  ;;  %v9451_v17 = vpack.c.bf16 %v1824_v23, %v1820_v34  ;;  %v1826_v36 = vld [vmem:[#allocation8 + $0x2c8] sm:$0xff]  ;;  %v1828_v52 = vld [vmem:[#allocation8 + $0x2d8] sm:$0xff]  ;;  %11595 = vst [vmem:[#allocation166_spill] sm:$0xff] %v9457_v62  ;;  %v1827_v8 = vld [vmem:[#allocation8 + $0x2d0] sm:$0xff] }
 0x3ac   :  { %v1831_v23 = vld [vmem:[#allocation8 + $0x2f0] sm:$0xff]  ;;  %v9479_v0 = vpack.c.bf16 %v1837_v55, %v1833_v43 }
 0x3ad   :  { %11592 = vst [vmem:[#allocation163_spill] sm:$0xff] %v9449_v24  ;;  %11593 = vst [vmem:[#allocation164_spill] sm:$0xff] %v9451_v17  ;;  %v9469_v41 = vpack.c.bf16 %v1831_v23, %v1827_v8  ;;  %v1841_v8 = vld [vmem:[#allocation8 + $0x340] sm:$0xff] }
 0x3ae   :  { %5902 = vmatpush1.bf16.msra.mxu1 %v9431_v7  ;;  %5966 = vmatpush1.bf16.msra.mxu0 %v9433_v33  ;;  %v1830_v7 = vld [vmem:[#allocation8 + $0x2e8] sm:$0xff]  ;;  %v1832_v33 = vld [vmem:[#allocation8 + $0x2f8] sm:$0xff]  ;;  %11602 = vst [vmem:[#allocation173_spill] sm:$0xff] %v9479_v0  ;;  %v1845_v23 = vld [vmem:[#allocation8 + $0x360] sm:$0xff] }
 0x3af   :  { %5904 = vmatprep.subr.bf16.mxu1 %v9437_v16  ;;  %5968 = vmatprep.subr.bf16.mxu0 %v9439_v44  ;;  %v9461_v34 = vpack.c.bf16 %v1830_v7, %v1826_v36  ;;  %v9463_v27 = vpack.c.bf16 %v1832_v33, %v1828_v52  ;;  %v1834_v44 = vld [vmem:[#allocation8 + $0x308] sm:$0xff]  ;;  %v1836_v16 = vld [vmem:[#allocation8 + $0x318] sm:$0xff]  ;;  %11599 = vst [vmem:[#allocation170_spill] sm:$0xff] %v9469_v41  ;;  %v1835_v7 = vld [vmem:[#allocation8 + $0x310] sm:$0xff] }
 0x3b0   :  { %v1839_v33 = vld [vmem:[#allocation8 + $0x330] sm:$0xff]  ;;  %v9491_v43 = vpack.c.bf16 %v1845_v23, %v1841_v8 }
 0x3b1   :  { %11596 = vst [vmem:[#allocation167_spill] sm:$0xff] %v9461_v34  ;;  %11597 = vst [vmem:[#allocation168_spill] sm:$0xff] %v9463_v27  ;;  %v9481_v42 = vpack.c.bf16 %v1839_v33, %v1835_v7  ;;  %v1849_v7 = vld [vmem:[#allocation8 + $0x380] sm:$0xff] }
 0x3b2   :  { %5906 = vmatpush1.bf16.msra.mxu1 %v9443_v32  ;;  %5970 = vmatpush1.bf16.msra.mxu0 %v9445_v18  ;;  %v1838_v32 = vld [vmem:[#allocation8 + $0x328] sm:$0xff]  ;;  %v1840_v18 = vld [vmem:[#allocation8 + $0x338] sm:$0xff]  ;;  %11606 = vst [vmem:[#allocation177_spill] sm:$0xff] %v9491_v43  ;;  %v1853_v33 = vld [vmem:[#allocation8 + $0x3a0] sm:$0xff] }
 0x3b3   :  { %5908 = vmatprep.subr.bf16.mxu1 %v9449_v24  ;;  %5972 = vmatprep.subr.bf16.mxu0 %v9451_v17  ;;  %v9473_v52 = vpack.c.bf16 %v1838_v32, %v1834_v44  ;;  %v9475_v36 = vpack.c.bf16 %v1840_v18, %v1836_v16  ;;  %v1842_v17 = vld [vmem:[#allocation8 + $0x348] sm:$0xff]  ;;  %v1844_v24 = vld [vmem:[#allocation8 + $0x358] sm:$0xff]  ;;  %11603 = vst [vmem:[#allocation174_spill] sm:$0xff] %v9481_v42  ;;  %v1843_v32 = vld [vmem:[#allocation8 + $0x350] sm:$0xff] }
 0x3b4   :  { %v1847_v18 = vld [vmem:[#allocation8 + $0x370] sm:$0xff]  ;;  %v9503_v8 = vpack.c.bf16 %v1853_v33, %v1849_v7 }
 0x3b5   :  { %11600 = vst [vmem:[#allocation171_spill] sm:$0xff] %v9473_v52  ;;  %11601 = vst [vmem:[#allocation172_spill] sm:$0xff] %v9475_v36  ;;  %v9493_v55 = vpack.c.bf16 %v1847_v18, %v1843_v32  ;;  %v1857_v32 = vld [vmem:[#allocation8 + $0x3c0] sm:$0xff]  ;;  %v1863_v18 = vld [vmem:[#allocation8 + $0x3f0] sm:$0xff] }
 0x3b6   :  { %5910 = vmatpush1.bf16.msra.mxu1 %v9455_v35  ;;  %5974 = vmatpush1.bf16.msra.mxu0 %v9457_v62  ;;  %v1846_v35 = vld [vmem:[#allocation8 + $0x368] sm:$0xff]  ;;  %v1848_v62 = vld [vmem:[#allocation8 + $0x378] sm:$0xff]  ;;  %11610 = vst [vmem:[#allocation181_spill] sm:$0xff] %v9503_v8 }
 0x3b7   :  { %5912 = vmatprep.subr.bf16.mxu1 %v9461_v34  ;;  %5976 = vmatprep.subr.bf16.mxu0 %v9463_v27  ;;  %v9485_v16 = vpack.c.bf16 %v1846_v35, %v1842_v17  ;;  %v9487_v44 = vpack.c.bf16 %v1848_v62, %v1844_v24  ;;  %v1850_v27 = vld [vmem:[#allocation8 + $0x388] sm:$0xff]  ;;  %v1852_v34 = vld [vmem:[#allocation8 + $0x398] sm:$0xff]  ;;  %11607 = vst [vmem:[#allocation178_spill] sm:$0xff] %v9493_v55  ;;  %v1851_v35 = vld [vmem:[#allocation8 + $0x390] sm:$0xff] }
 0x3b8   :  { %v1855_v62 = vld [vmem:[#allocation8 + $0x3b0] sm:$0xff] }
 0x3b9   :  { %11604 = vst [vmem:[#allocation175_spill] sm:$0xff] %v9485_v16  ;;  %11605 = vst [vmem:[#allocation176_spill] sm:$0xff] %v9487_v44  ;;  %v9505_v23 = vpack.c.bf16 %v1855_v62, %v1851_v35  ;;  %v11620_v35 = vld [vmem:[#allocation46_spill] sm:$0xff] }
 0x3ba   :  { %5914 = vmatpush1.bf16.msra.mxu1 %v9467_v57  ;;  %5978 = vmatpush1.bf16.msra.mxu0 %v9469_v41  ;;  %v1854_v57 = vld [vmem:[#allocation8 + $0x3a8] sm:$0xff]  ;;  %v1856_v41 = vld [vmem:[#allocation8 + $0x3b8] sm:$0xff] }
 0x3bb   :  { %5916 = vmatprep.subr.bf16.mxu1 %v9473_v52  ;;  %5980 = vmatprep.subr.bf16.mxu0 %v9475_v36  ;;  %v9497_v24 = vpack.c.bf16 %v1854_v57, %v1850_v27  ;;  %v9499_v17 = vpack.c.bf16 %v1856_v41, %v1852_v34  ;;  %v1858_v36 = vld [vmem:[#allocation8 + $0x3c8] sm:$0xff]  ;;  %v1860_v52 = vld [vmem:[#allocation8 + $0x3d8] sm:$0xff]  ;;  %11611 = vst [vmem:[#allocation182_spill] sm:$0xff] %v9505_v23  ;;  %v1861_v57 = vld [vmem:[#allocation8 + $0x3e0] sm:$0xff] }
 0x3bc   :  { %v1859_v41 = vld [vmem:[#allocation8 + $0x3d0] sm:$0xff]  ;;  %v9515_v7 = vpack.c.bf16 %v1861_v57, %v1857_v32  ;;  %v11621_v57 = vld [vmem:[#allocation49_spill] sm:$0xff] }
 0x3bd   :  { %11608 = vst [vmem:[#allocation179_spill] sm:$0xff] %v9497_v24  ;;  %11609 = vst [vmem:[#allocation180_spill] sm:$0xff] %v9499_v17  ;;  %v9517_v33 = vpack.c.bf16 %v1863_v18, %v1859_v41 }
 0x3be   :  { %5918 = vmatpush1.bf16.msra.mxu1 %v9479_v0  ;;  %5982 = vmatpush1.bf16.msra.mxu0 %v9481_v42  ;;  %v1862_v0 = vld [vmem:[#allocation8 + $0x3e8] sm:$0xff]  ;;  %v1864_v42 = vld [vmem:[#allocation8 + $0x3f8] sm:$0xff]  ;;  %11614 = vst [vmem:[#allocation185_spill] sm:$0xff] %v9515_v7 }
 0x3bf   :  { %5920 = vmatprep.subr.bf16.mxu1 %v9485_v16  ;;  %5984 = vmatprep.subr.bf16.mxu0 %v9487_v44  ;;  %v9509_v34 = vpack.c.bf16 %v1862_v0, %v1858_v36  ;;  %v9511_v27 = vpack.c.bf16 %v1864_v42, %v1860_v52  ;;  %11615 = vst [vmem:[#allocation186_spill] sm:$0xff] %v9517_v33  ;;  %v11616_v52 = vld [vmem:[#allocation42_spill] sm:$0xff]  ;;  %v11617_v36 = vld [vmem:[#allocation43_spill] sm:$0xff]  ;;  %v11618_v0 = vld [vmem:[#allocation44_spill] sm:$0xff] }
 0x3c0   :  { %v11619_v42 = vld [vmem:[#allocation45_spill] sm:$0xff] }
 0x3c1   :  { %11612 = vst [vmem:[#allocation183_spill] sm:$0xff] %v9509_v34  ;;  %11613 = vst [vmem:[#allocation184_spill] sm:$0xff] %v9511_v27 }
 0x3c2   :  { %5922 = vmatpush1.bf16.msra.mxu1 %v9491_v43  ;;  %5986 = vmatpush1.bf16.msra.mxu0 %v9493_v55 }
 0x3c3   :  { %5924 = vmatprep.subr.bf16.mxu1 %v9497_v24  ;;  %5988 = vmatprep.subr.bf16.mxu0 %v9499_v17 }
 0x3c6   :  { %5926 = vmatpush1.bf16.msra.mxu1 %v9503_v8  ;;  %5990 = vmatpush1.bf16.msra.mxu0 %v9505_v23 }
 0x3c7   :  { %5928 = vmatprep.subr.bf16.mxu1 %v9509_v34  ;;  %5992 = vmatprep.subr.bf16.mxu0 %v9511_v27 }
 0x3ca   :  { %5930 = vmatpush1.bf16.msra.mxu1 %v9515_v7  ;;  %5994 = vmatpush1.bf16.msra.mxu0 %v9517_v33 }
 0x3cb   :  { %5996 = vmatprep.subr.bf16.mxu1 %v8750_v46  ;;  %6028 = vmatprep.subr.bf16.mxu0 %v8753_v49 }
 0x3cd   :  { %5211 = vmatmul.mubr.msk.f32.vlgmr.msra.gmra.mrb[20].mxu1 %vm604_vm5, %v9323_v6  ;;  %5212 = vmatmul.mubr.msk.f32.vlgmr.msra.gmra.mrb[28].mxu0 %vm604_vm5, %v9323_v6 }
 0x3ce   :  { %5998 = vmatpush1.bf16.msra.mxu1 %v8773_v4  ;;  %6030 = vmatpush1.bf16.msra.mxu0 %v8775_v5 }
 0x3cf   :  { %6000 = vmatprep.subr.bf16.mxu1 %v8778_v14  ;;  %6032 = vmatprep.subr.bf16.mxu0 %v8780_v15 }
 0x3d0   :  { %2102 = vmatprep.mubr.f32.mxu1 %v11436_v12  ;;  %2173 = vmatprep.mubr.f32.mxu0 %v11436_v12 }
 0x3d2   :  { %6002 = vmatpush1.bf16.msra.mxu1 %v8785_v21  ;;  %6034 = vmatpush1.bf16.msra.mxu0 %v8787_v22 }
 0x3d3   :  { %6004 = vmatprep.subr.bf16.mxu1 %v8795_v29  ;;  %6036 = vmatprep.subr.bf16.mxu0 %v8797_v30 }
 0x3d6   :  { %6006 = vmatpush1.bf16.msra.mxu1 %v8801_v37  ;;  %6038 = vmatpush1.bf16.msra.mxu0 %v8803_v38 }
 0x3d7   :  { %6008 = vmatprep.subr.bf16.mxu1 %v8812_v45  ;;  %6040 = vmatprep.subr.bf16.mxu0 %v8814_v47 }
 0x3da   :  { %6010 = vmatpush1.bf16.msra.mxu1 %v8819_v58  ;;  %6042 = vmatpush1.bf16.msra.mxu0 %v8821_v59 }
 0x3db   :  { %6012 = vmatprep.subr.bf16.mxu1 %v8827_v1  ;;  %6044 = vmatprep.subr.bf16.mxu0 %v8829_v2 }
 0x3de   :  { %6014 = vmatpush1.bf16.msra.mxu1 %v8833_v10  ;;  %6046 = vmatpush1.bf16.msra.mxu0 %v8835_v11 }
 0x3df   :  { %6016 = vmatprep.subr.bf16.mxu1 %v8843_v19  ;;  %6048 = vmatprep.subr.bf16.mxu0 %v8845_v20 }
 0x3e2   :  { %6018 = vmatpush1.bf16.msra.mxu1 %v8850_v28  ;;  %6050 = vmatpush1.bf16.msra.mxu0 %v8852_v31 }
 0x3e3   :  { %6020 = vmatprep.subr.bf16.mxu1 %v8858_v39  ;;  %6052 = vmatprep.subr.bf16.mxu0 %v8860_v40 }
 0x3e6   :  { %6022 = vmatpush1.bf16.msra.mxu1 %v8864_v53  ;;  %6054 = vmatpush1.bf16.msra.mxu0 %v8866_v54 }
 0x3e7   :  { %6024 = vmatprep.subr.bf16.mxu1 %v8874_v63  ;;  %6056 = vmatprep.subr.bf16.mxu0 %v11616_v52 }
 0x3ea   :  { %6026 = vmatpush1.bf16.msra.mxu1 %v11617_v36  ;;  %6058 = vmatpush1.bf16.msra.mxu0 %v11618_v0  ;;  %v11622_v0 = vld [vmem:[#allocation54_spill] sm:$0xff] }
 0x3eb   :  { %6060 = vmatprep.subr.bf16.mxu1 %v11619_v42  ;;  %6124 = vmatprep.subr.bf16.mxu0 %v11620_v35 }
 0x420   :  { %v1467_v62 = vpop.f32.mrb[4].mxu1  ;;  %v1538_v32 = vpop.f32.mrb[12].mxu0 }
 0x421   :  { %v8007_v41 = vadd.f32 %v1467_v62, %v11621_v57  ;;  %v1469_v18 = vpop.f32.mrb[5].mxu1  ;;  %v1540_v53 = vpop.f32.mrb[13].mxu0  ;;  %v8023_v39 = vadd.f32 %v1538_v32, %v11622_v0 }
 0x422   :  { %v8008_v54 = vadd.f32 %v1469_v18, %v8945_v26  ;;  %v8024_v36 = vadd.f32 %v1540_v53, %v8952_v50  ;;  %v11624_v53 = vld [vmem:[#allocation118_spill] sm:$0xff] }
 0x423   :  { %v5203_v40 = vmul.f32 -1.442695, %v8007_v41  ;;  %v9569_v41 = vpop.permute.xlu1 %614 }
 0x424   :  { %v5204_v63 = vmul.f32 -1.442695, %v8008_v54  ;;  %v5205_v52 = vmul.f32 -1.442695, %v8024_v36  ;;  %11623 = vst [vmem:[#allocation187_spill] sm:$0xff] %v9569_v41  ;;  %vm616_vm11 = vcmp.eq.s32.totalorder %v9569_v41, 1 }
 0x425   :  { %8127 = vpow2.f32 %v5203_v40  ;;  %v11639_v41 = vld [vmem:[#allocation69_spill] sm:$0xff] }
 0x426   :  { %8129 = vpow2.f32 %v5204_v63 }
 0x427   :  { %8131 = vpow2.f32 %v5205_v52 }
 0x428   :  { %8133 = vtanh.f32 %v8023_v39 }
 0x42f   :  { %v8128_v42 = vpop.eup %8127 }
 0x430   :  { %v8130_v31 = vpop.eup %8129  ;;  %v1546_v35 = vadd.f32 1.0, %v8128_v42 }
 0x431   :  { %v1552_v28 = vadd.f32 1.0, %v8130_v31  ;;  %v8132_v62 = vpop.eup %8131 }
 0x432   :  { %8135 = vrcp.f32 %v1546_v35  ;;  %v8134_v57 = vpop.eup %8133  ;;  %v1559_v63 = vadd.f32 1.0, %v8132_v62  ;;  %v11625_v35 = vld [vmem:[#allocation55_spill] sm:$0xff]  ;;  %v11627_v62 = vld [vmem:[#allocation57_spill] sm:$0xff] }
 0x433   :  { %8137 = vrcp.f32 %v1552_v28 }
 0x434   :  { %8139 = vrcp.f32 %v1559_v63  ;;  %v11631_v63 = vld [vmem:[#allocation61_spill] sm:$0xff] }
 0x43c   :  { %v8136_v18 = vpop.eup %8135 }
 0x43d   :  { %v8138_v40 = vpop.eup %8137  ;;  %v1563_v54 = vmul.f32 %v8136_v18, %v8134_v57  ;;  %v11626_v57 = vld [vmem:[#allocation56_spill] sm:$0xff]  ;;  %v11628_v18 = vld [vmem:[#allocation58_spill] sm:$0xff] }
 0x43e   :  { %v1562_v36 = vmul.f32 %v8138_v40, %v11624_v53  ;;  %v8140_v28 = vpop.eup %8139  ;;  %v11629_v40 = vld [vmem:[#allocation59_spill] sm:$0xff] }
 0x440   :  { %v1564_v32 = vadd.f32 %v1563_v54, %v1562_v36  ;;  %v11630_v54 = vld [vmem:[#allocation60_spill] sm:$0xff] }
 0x441   :  { %v11634_v36 = vld [vmem:[#allocation64_spill] sm:$0xff] }
 0x442   :  { %8141 = vtanh.f32 %v1564_v32  ;;  %v9576_v31 = vsel %vm616_vm11, %v1564_v32, %v11624_v53  ;;  %v11633_v53 = vld [vmem:[#allocation63_spill] sm:$0xff]  ;;  %v11635_v32 = vld [vmem:[#allocation65_spill] sm:$0xff] }
 0x44c   :  { %v8142_v39 = vpop.eup %8141 }
 0x44d   :  { %v1566_v52 = vmul.f32 %v8142_v39, %v8140_v28  ;;  %v11636_v28 = vld [vmem:[#allocation66_spill] sm:$0xff]  ;;  %v11637_v39 = vld [vmem:[#allocation67_spill] sm:$0xff] }
 0x44f   :  { %v9581_v42 = vsel %vm616_vm11, %v1566_v52, %v9230_v60  ;;  %v11632_v60 = vld [vmem:[#allocation62_spill] sm:$0xff]  ;;  %v11638_v52 = vld [vmem:[#allocation68_spill] sm:$0xff] }
 0x450   :  { %2103 = vmatmul.mubr.f32.vlgmr.msra.gmra.mrb[6].mxu1 %v9581_v42  ;;  %2174 = vmatmul.mubr.f32.vlgmr.msra.gmra.mrb[14].mxu0 %v9581_v42 }
 0x451   :  { %6062 = vmatpush1.bf16.msra.mxu1 %v11625_v35  ;;  %6126 = vmatpush1.bf16.msra.mxu0 %v11626_v57  ;;  %v11644_v57 = vld [vmem:[#allocation73_spill] sm:$0xff] }
 0x452   :  { %6064 = vmatprep.subr.bf16.mxu1 %v11627_v62  ;;  %6128 = vmatprep.subr.bf16.mxu0 %v11628_v18  ;;  %v11641_v62 = vld [vmem:[#allocation71_spill] sm:$0xff] }
 0x455   :  { %6066 = vmatpush1.bf16.msra.mxu1 %v11629_v40  ;;  %6130 = vmatpush1.bf16.msra.mxu0 %v11630_v54  ;;  %v11640_v40 = vld [vmem:[#allocation70_spill] sm:$0xff] }
 0x456   :  { %6068 = vmatprep.subr.bf16.mxu1 %v11631_v63  ;;  %6132 = vmatprep.subr.bf16.mxu0 %v11632_v60 }
 0x459   :  { %6070 = vmatpush1.bf16.msra.mxu1 %v11633_v53  ;;  %6134 = vmatpush1.bf16.msra.mxu0 %v11634_v36  ;;  %v11642_v36 = vld [vmem:[#allocation72_spill] sm:$0xff] }
 0x45a   :  { %6072 = vmatprep.subr.bf16.mxu1 %v11635_v32  ;;  %6136 = vmatprep.subr.bf16.mxu0 %v11636_v28  ;;  %v11643_v32 = vld [vmem:[#allocation120_spill] sm:$0xff] }
 0x45d   :  { %6074 = vmatpush1.bf16.msra.mxu1 %v11637_v39  ;;  %6138 = vmatpush1.bf16.msra.mxu0 %v11638_v52  ;;  %v11646_v39 = vld [vmem:[#allocation76_spill] sm:$0xff] }
 0x45e   :  { %6076 = vmatprep.subr.bf16.mxu1 %v11639_v41  ;;  %6140 = vmatprep.subr.bf16.mxu0 %v11640_v40  ;;  %v11645_v40 = vld [vmem:[#allocation75_spill] sm:$0xff] }
 0x460   :  { %v1635_v54 = vpop.f32.mrb[18].mxu1  ;;  %v1706_v63 = vpop.f32.mrb[26].mxu0 }
 0x461   :  { %v1636_v60 = vadd.f32 %v1635_v54, %v9253_v13  ;;  %v1637_v18 = vpop.f32.mrb[19].mxu1  ;;  %v1708_v53 = vpop.f32.mrb[27].mxu0  ;;  %6078 = vmatpush1.bf16.msra.mxu1 %v11641_v62  ;;  %6142 = vmatpush1.bf16.msra.mxu0 %v11642_v36  ;;  %v11647_v54 = vld [vmem:[#allocation77_spill] sm:$0xff]  ;;  %v11648_v13 = vld [vmem:[#allocation78_spill] sm:$0xff]  ;;  %v11649_v62 = vld [vmem:[#allocation79_spill] sm:$0xff] }
 0x462   :  { %v1638_v28 = vadd.f32 %v1637_v18, %v11643_v32  ;;  %6080 = vmatprep.subr.bf16.mxu1 %v11644_v57  ;;  %6144 = vmatprep.subr.bf16.mxu0 %v11517_v25  ;;  %v1709_v36 = vadd.f32 %v1708_v53, %v9267_v56  ;;  %v11650_v18 = vld [vmem:[#allocation80_spill] sm:$0xff]  ;;  %v11651_v32 = vld [vmem:[#allocation81_spill] sm:$0xff] }
 0x463   :  { %v5208_v52 = vmul.f32 -1.442695, %v1636_v60  ;;  %v11652_v60 = vld [vmem:[#allocation82_spill] sm:$0xff] }
 0x464   :  { %v5209_v41 = vmul.f32 -1.442695, %v1638_v28  ;;  %v5210_v28 = vmul.f32 -1.442695, %v1709_v36  ;;  %v11660_v36 = vld [vmem:[#allocation90_spill] sm:$0xff] }
 0x465   :  { %8143 = vpow2.f32 %v5208_v52  ;;  %6082 = vmatpush1.bf16.msra.mxu1 %v11645_v40  ;;  %6146 = vmatpush1.bf16.msra.mxu0 %v11646_v39  ;;  %v1707_v52 = vadd.f32 %v1706_v63, %v9275_v9  ;;  %v11653_v40 = vld [vmem:[#allocation83_spill] sm:$0xff]  ;;  %v11659_v63 = vld [vmem:[#allocation89_spill] sm:$0xff] }
 0x466   :  { %8145 = vpow2.f32 %v5209_v41  ;;  %6084 = vmatprep.subr.bf16.mxu1 %v11647_v54  ;;  %6148 = vmatprep.subr.bf16.mxu0 %v11648_v13  ;;  %v11654_v41 = vld [vmem:[#allocation84_spill] sm:$0xff]  ;;  %v11655_v54 = vld [vmem:[#allocation85_spill] sm:$0xff]  ;;  %v11656_v13 = vld [vmem:[#allocation86_spill] sm:$0xff] }
 0x467   :  { %8147 = vpow2.f32 %v5210_v28  ;;  %v11661_v9 = vld [vmem:[#allocation91_spill] sm:$0xff] }
 0x468   :  { %8149 = vtanh.f32 %v1707_v52  ;;  %v11665_v28 = vld [vmem:[#allocation95_spill] sm:$0xff] }
 0x469   :  { %6086 = vmatpush1.bf16.msra.mxu1 %v11649_v62  ;;  %6150 = vmatpush1.bf16.msra.mxu0 %v11650_v18 }
 0x46a   :  { %6088 = vmatprep.subr.bf16.mxu1 %v11651_v32  ;;  %6152 = vmatprep.subr.bf16.mxu0 %v11652_v60  ;;  %v11657_v32 = vld [vmem:[#allocation87_spill] sm:$0xff]  ;;  %v11658_v60 = vld [vmem:[#allocation88_spill] sm:$0xff] }
 0x46d   :  { %6090 = vmatpush1.bf16.msra.mxu1 %v11653_v40  ;;  %6154 = vmatpush1.bf16.msra.mxu0 %v11654_v41  ;;  %v11673_v41 = vld [vmem:[#allocation105_spill] sm:$0xff] }
 0x46e   :  { %6092 = vmatprep.subr.bf16.mxu1 %v11655_v54  ;;  %6156 = vmatprep.subr.bf16.mxu0 %v11656_v13  ;;  %v11662_v54 = vld [vmem:[#allocation92_spill] sm:$0xff]  ;;  %v11663_v13 = vld [vmem:[#allocation93_spill] sm:$0xff] }
 0x46f   :  { %v8144_v53 = vpop.eup %8143 }
 0x470   :  { %v8146_v56 = vpop.eup %8145  ;;  %v1714_v62 = vadd.f32 1.0, %v8144_v53  ;;  %v11664_v53 = vld [vmem:[#allocation94_spill] sm:$0xff] }
 0x471   :  { %v1720_v18 = vadd.f32 1.0, %v8146_v56  ;;  %6094 = vmatpush1.bf16.msra.mxu1 %v11657_v32  ;;  %6158 = vmatpush1.bf16.msra.mxu0 %v11658_v60  ;;  %v11666_v56 = vld [vmem:[#allocation96_spill] sm:$0xff]  ;;  %v8148_v52 = vpop.eup %8147  ;;  %v11667_v60 = vld [vmem:[#allocation97_spill] sm:$0xff] }
 0x472   :  { %8151 = vrcp.f32 %v1714_v62  ;;  %6096 = vmatprep.subr.bf16.mxu1 %v11659_v63  ;;  %6160 = vmatprep.subr.bf16.mxu0 %v11660_v36  ;;  %v11668_v62 = vld [vmem:[#allocation98_spill] sm:$0xff]  ;;  %v8150_v63 = vpop.eup %8149  ;;  %v11672_v32 = vld [vmem:[#allocation104_spill] sm:$0xff] }
 0x473   :  { %8153 = vrcp.f32 %v1720_v18 }
 0x475   :  { %6098 = vmatpush1.bf16.msra.mxu1 %v11661_v9  ;;  %6162 = vmatpush1.bf16.msra.mxu0 %v11662_v54  ;;  %v1395_v54 = vsel %vm604_vm5, %v9302_v51, 0.0  ;;  %v11674_v51 = vld [vmem:[#allocation106_spill] sm:$0xff] }
 0x476   :  { %6100 = vmatprep.subr.bf16.mxu1 %v11663_v13  ;;  %6164 = vmatprep.subr.bf16.mxu0 %v11664_v53  ;;  %v1727_v13 = vadd.f32 1.0, %v8148_v52  ;;  %v11670_v53 = vld [vmem:[#allocation102_spill] sm:$0xff]  ;;  %v11677_v52 = vld [vmem:[#allocation107_spill] sm:$0xff] }
 0x478   :  { %8155 = vrcp.f32 %v1727_v13  ;;  %v11681_v13 = vld [vmem:[#allocation111_spill] sm:$0xff] }
 0x479   :  { %6102 = vmatpush1.bf16.msra.mxu1 %v11665_v28  ;;  %6166 = vmatpush1.bf16.msra.mxu0 %v11666_v56  ;;  %v11669_v56 = vld [vmem:[#allocation101_spill] sm:$0xff] }
 0x47a   :  { %6104 = vmatprep.subr.bf16.mxu1 %v11667_v60  ;;  %6168 = vmatprep.subr.bf16.mxu0 %v11668_v62  ;;  %v11671_v62 = vld [vmem:[#allocation103_spill] sm:$0xff] }
 0x47c   :  { %v8152_v36 = vpop.eup %8151 }
 0x47d   :  { %v8154_v18 = vpop.eup %8153  ;;  %v1731_v9 = vmul.f32 %v8152_v36, %v8150_v63  ;;  %6106 = vmatpush1.bf16.msra.mxu1 %v11546_v48  ;;  %6170 = vmatpush1.bf16.msra.mxu0 %v11547_v61  ;;  %v11696_v63 = vld [vmem:[#allocation132_spill] sm:$0xff]  ;;  %v11711_v61 = vld [vmem:[#allocation143_spill] sm:$0xff] }
 0x47e   :  { %v1730_v28 = vmul.f32 %v8154_v18, %v1395_v54  ;;  %6108 = vmatprep.subr.bf16.mxu1 %v11669_v56  ;;  %6172 = vmatprep.subr.bf16.mxu0 %v11670_v53  ;;  %v11678_v18 = vld [vmem:[#allocation108_spill] sm:$0xff]  ;;  %v11679_v53 = vld [vmem:[#allocation109_spill] sm:$0xff]  ;;  %v11713_v48 = vld [vmem:[#allocation51_spill] sm:$0xff] }
 0x47f   :  { %v11709_v56 = vld [vmem:[#allocation141_spill] sm:$0xff] }
 0x480   :  { %v1732_v60 = vadd.f32 %v1731_v9, %v1730_v28  ;;  %v11680_v9 = vld [vmem:[#allocation110_spill] sm:$0xff]  ;;  %v11682_v28 = vld [vmem:[#allocation112_spill] sm:$0xff] }
 0x481   :  { %6110 = vmatpush1.bf16.msra.mxu1 %v11671_v62  ;;  %6174 = vmatpush1.bf16.msra.mxu0 %v11672_v32  ;;  %v11683_v32 = vld [vmem:[#allocation113_spill] sm:$0xff] }
 0x482   :  { %8157 = vtanh.f32 %v1732_v60  ;;  %6112 = vmatprep.subr.bf16.mxu1 %v11673_v41  ;;  %6176 = vmatprep.subr.bf16.mxu0 %v11674_v51  ;;  %v9646_v36 = vsel %vm610_vm6, %v1732_v60, %v1395_v54  ;;  %v11684_v41 = vld [vmem:[#allocation114_spill] sm:$0xff]  ;;  %v8156_v51 = vpop.eup %8155  ;;  %v11685_v54 = vld [vmem:[#allocation115_spill] sm:$0xff]  ;;  %v11686_v60 = vld [vmem:[#allocation116_spill] sm:$0xff] }
 0x483   :  { %11676 = vst [vmem:[#allocation118_spill] sm:$0xff] %v9646_v36 }
 0x485   :  { %6114 = vmatpush1.bf16.msra.mxu1 %v11677_v52  ;;  %6178 = vmatpush1.bf16.msra.mxu0 %v11678_v18 }
 0x486   :  { %6116 = vmatprep.subr.bf16.mxu1 %v11679_v53  ;;  %6180 = vmatprep.subr.bf16.mxu0 %v11680_v9  ;;  %v1394_v53 = vsel %vm604_vm5, %v9323_v6, 0.0  ;;  %v11687_v9 = vld [vmem:[#allocation123_spill] sm:$0xff] }
 0x487   :  { %v11691_v6 = vld [vmem:[#allocation127_spill] sm:$0xff] }
 0x489   :  { %6118 = vmatpush1.bf16.msra.mxu1 %v11681_v13  ;;  %6182 = vmatpush1.bf16.msra.mxu0 %v11682_v28  ;;  %v11688_v13 = vld [vmem:[#allocation124_spill] sm:$0xff] }
 0x48a   :  { %6120 = vmatprep.subr.bf16.mxu1 %v11683_v32  ;;  %6184 = vmatprep.subr.bf16.mxu0 %v11684_v41 }
 0x48c   :  { %v8158_v62 = vpop.eup %8157 }
 0x48d   :  { %6122 = vmatpush1.bf16.msra.mxu1 %v11685_v54  ;;  %6186 = vmatpush1.bf16.msra.mxu0 %v11686_v60  ;;  %v1734_v52 = vmul.f32 %v8158_v62, %v8156_v51  ;;  %v11689_v62 = vld [vmem:[#allocation125_spill] sm:$0xff]  ;;  %v11690_v51 = vld [vmem:[#allocation126_spill] sm:$0xff] }
 0x48e   :  { %6188 = vmatprep.subr.bf16.mxu1 %v11687_v9  ;;  %6252 = vmatprep.subr.bf16.mxu0 %v11688_v13  ;;  %v11692_v9 = vld [vmem:[#allocation128_spill] sm:$0xff]  ;;  %v11693_v13 = vld [vmem:[#allocation129_spill] sm:$0xff]  ;;  %v11698_v54 = vld [vmem:[#allocation134_spill] sm:$0xff] }
 0x48f   :  { %v9665_v32 = vsel %vm610_vm6, %v1734_v52, %v1394_v53  ;;  %v11694_v53 = vld [vmem:[#allocation130_spill] sm:$0xff]  ;;  %v11695_v52 = vld [vmem:[#allocation131_spill] sm:$0xff]  ;;  %v11697_v60 = vld [vmem:[#allocation133_spill] sm:$0xff] }
 0x490   :  { %2270 = vmatprep.mubr.f32.mxu1 %v9665_v32  ;;  %2341 = vmatprep.mubr.f32.mxu0 %v9665_v32 }
 0x491   :  { %2271 = vmatmul.mubr.f32.vlgmr.msra.gmra.mrb[22].mxu1 %v9581_v42  ;;  %2342 = vmatmul.mubr.f32.vlgmr.msra.gmra.mrb[30].mxu0 %v9581_v42 }
 0x492   :  { %6190 = vmatpush1.bf16.msra.mxu1 %v11689_v62  ;;  %6254 = vmatpush1.bf16.msra.mxu0 %v11690_v51  ;;  %v669_v51 = vld [vmem:[%s10985_s10] sm:$0xf]  ;;  %v11699_v62 = vld [vmem:[#allocation135_spill] sm:$0xff] }
 0x493   :  { %6192 = vmatprep.subr.bf16.mxu1 %v11691_v6  ;;  %6256 = vmatprep.subr.bf16.mxu0 %v11692_v9  ;;  %v11700_v6 = vld [vmem:[#allocation136_spill] sm:$0xff]  ;;  %v11701_v9 = vld [vmem:[#allocation47_spill] sm:$0xff] }
 0x496   :  { %6194 = vmatpush1.bf16.msra.mxu1 %v11693_v13  ;;  %6258 = vmatpush1.bf16.msra.mxu0 %v11694_v53  ;;  %v9687_v13 = vrot.slane %v669_v51, %v11701_v9  ;;  %v11703_v53 = vld [vmem:[#allocation137_spill] sm:$0xff] }
 0x497   :  { %6196 = vmatprep.subr.bf16.mxu1 %v11695_v52  ;;  %6260 = vmatprep.subr.bf16.mxu0 %v11696_v63  ;;  %v11704_v52 = vld [vmem:[#allocation138_spill] sm:$0xff]  ;;  %v11705_v63 = vld [vmem:[#allocation48_spill] sm:$0xff] }
 0x498   :  { %11702 = vst [vmem:[#allocation55_spill] sm:$0xff] %v9687_v13  ;;  %v9692_v41 = vrot.slane %v669_v51, %v11705_v63  ;;  %v11712_v63 = vld [vmem:[#allocation144_spill] sm:$0xff] }
 0x49a   :  { %6198 = vmatpush1.bf16.msra.mxu1 %v11697_v60  ;;  %6262 = vmatpush1.bf16.msra.mxu0 %v11698_v54  ;;  %11706 = vst [vmem:[#allocation47_spill] sm:$0xff] %v9692_v41  ;;  %v11707_v60 = vld [vmem:[#allocation139_spill] sm:$0xff]  ;;  %v11708_v54 = vld [vmem:[#allocation140_spill] sm:$0xff] }
 0x49b   :  { %6200 = vmatprep.subr.bf16.mxu1 %v11699_v62  ;;  %6264 = vmatprep.subr.bf16.mxu0 %v11700_v6 }
 0x49e   :  { %6202 = vmatpush1.bf16.msra.mxu1 %v11703_v53  ;;  %6266 = vmatpush1.bf16.msra.mxu0 %v11704_v52  ;;  %v11710_v53 = vld [vmem:[#allocation142_spill] sm:$0xff] }
 0x49f   :  { %6204 = vmatprep.subr.bf16.mxu1 %v11707_v60  ;;  %6268 = vmatprep.subr.bf16.mxu0 %v11708_v54  ;;  %v9703_v54 = vrot.slane %v669_v51, %v11713_v48  ;;  %v11723_v48 = vld [vmem:[#allocation151_spill] sm:$0xff] }
 0x4a0   :  { %v1931_v28 = vpop.f32.mrb[20].mxu1  ;;  %v2002_v18 = vpop.f32.mrb[28].mxu0 }
 0x4a1   :  { %v1932_v62 = vadd.f32 %v1931_v28, %v9687_v13  ;;  %v1933_v36 = vpop.f32.mrb[21].mxu1  ;;  %v2004_v6 = vpop.f32.mrb[29].mxu0  ;;  %11714 = vst [vmem:[#allocation48_spill] sm:$0xff] %v9703_v54  ;;  %v11715_v28 = vld [vmem:[#allocation145_spill] sm:$0xff]  ;;  %v11716_v13 = vld [vmem:[#allocation146_spill] sm:$0xff] }
 0x4a2   :  { %v1934_v9 = vadd.f32 %v1933_v36, %v9692_v41  ;;  %6206 = vmatpush1.bf16.msra.mxu1 %v11709_v56  ;;  %6270 = vmatpush1.bf16.msra.mxu0 %v11710_v53  ;;  %v11717_v36 = vld [vmem:[#allocation147_spill] sm:$0xff]  ;;  %v11718_v56 = vld [vmem:[#allocation148_spill] sm:$0xff]  ;;  %v11719_v53 = vld [vmem:[#allocation53_spill] sm:$0xff] }
 0x4a3   :  { %v5213_v52 = vmul.f32 -1.442695, %v1932_v62  ;;  %6208 = vmatprep.subr.bf16.mxu1 %v11711_v61  ;;  %6272 = vmatprep.subr.bf16.mxu0 %v11712_v63  ;;  %v2005_v62 = vadd.f32 %v2004_v6, %v9703_v54  ;;  %v9711_v61 = vrot.slane %v669_v51, %v11719_v53  ;;  %v11721_v63 = vld [vmem:[#allocation149_spill] sm:$0xff]  ;;  %v11727_v6 = vld [vmem:[#allocation155_spill] sm:$0xff]  ;;  %v11728_v51 = vld [vmem:[#allocation156_spill] sm:$0xff] }
 0x4a4   :  { %v5214_v60 = vmul.f32 -1.442695, %v1934_v9  ;;  %v11722_v9 = vld [vmem:[#allocation150_spill] sm:$0xff] }
 0x4a5   :  { %8159 = vpow2.f32 %v5213_v52  ;;  %11720 = vst [vmem:[#allocation51_spill] sm:$0xff] %v9711_v61  ;;  %v5215_v52 = vmul.f32 -1.442695, %v2005_v62  ;;  %v11730_v62 = vld [vmem:[#allocation158_spill] sm:$0xff] }
 0x4a6   :  { %8161 = vpow2.f32 %v5214_v60  ;;  %6210 = vmatpush1.bf16.msra.mxu1 %v11715_v28  ;;  %6274 = vmatpush1.bf16.msra.mxu0 %v11716_v13  ;;  %v11724_v60 = vld [vmem:[#allocation152_spill] sm:$0xff]  ;;  %v2003_v13 = vadd.f32 %v2002_v18, %v9711_v61  ;;  %v11725_v28 = vld [vmem:[#allocation153_spill] sm:$0xff]  ;;  %v11731_v18 = vld [vmem:[#allocation159_spill] sm:$0xff] }
 0x4a7   :  { %6212 = vmatprep.subr.bf16.mxu1 %v11717_v36  ;;  %6276 = vmatprep.subr.bf16.mxu0 %v11718_v56  ;;  %v11726_v36 = vld [vmem:[#allocation154_spill] sm:$0xff]  ;;  %8163 = vpow2.f32 %v5215_v52  ;;  %v11737_v52 = vld [vmem:[#allocation165_spill] sm:$0xff] }
 0x4a8   :  { %8165 = vtanh.f32 %v2003_v13 }
 0x4aa   :  { %6214 = vmatpush1.bf16.msra.mxu1 %v11721_v63  ;;  %6278 = vmatpush1.bf16.msra.mxu0 %v11722_v9 }
 0x4ab   :  { %6216 = vmatprep.subr.bf16.mxu1 %v11723_v48  ;;  %6280 = vmatprep.subr.bf16.mxu0 %v11724_v60  ;;  %v11729_v48 = vld [vmem:[#allocation157_spill] sm:$0xff]  ;;  %v11744_v60 = vld [vmem:[#allocation172_spill] sm:$0xff] }
 0x4ae   :  { %6218 = vmatpush1.bf16.msra.mxu1 %v11725_v28  ;;  %6282 = vmatpush1.bf16.msra.mxu0 %v11726_v36  ;;  %v11732_v28 = vld [vmem:[#allocation160_spill] sm:$0xff]  ;;  %v11733_v36 = vld [vmem:[#allocation161_spill] sm:$0xff] }
 0x4af   :  { %v8160_v56 = vpop.eup %8159  ;;  %6220 = vmatprep.subr.bf16.mxu1 %v11727_v6  ;;  %6284 = vmatprep.subr.bf16.mxu0 %v11728_v51  ;;  %v11734_v6 = vld [vmem:[#allocation162_spill] sm:$0xff]  ;;  %v11735_v51 = vld [vmem:[#allocation163_spill] sm:$0xff] }
 0x4b0   :  { %v8162_v53 = vpop.eup %8161  ;;  %v2010_v63 = vadd.f32 1.0, %v8160_v56  ;;  %v11736_v56 = vld [vmem:[#allocation164_spill] sm:$0xff] }
 0x4b1   :  { %v2016_v9 = vadd.f32 1.0, %v8162_v53  ;;  %v8164_v13 = vpop.eup %8163 }
 0x4b2   :  { %8167 = vrcp.f32 %v2010_v63  ;;  %6222 = vmatpush1.bf16.msra.mxu1 %v11729_v48  ;;  %6286 = vmatpush1.bf16.msra.mxu0 %v11730_v62  ;;  %v11738_v63 = vld [vmem:[#allocation166_spill] sm:$0xff]  ;;  %v8166_v53 = vpop.eup %8165  ;;  %v11739_v62 = vld [vmem:[#allocation167_spill] sm:$0xff] }
 0x4b3   :  { %8169 = vrcp.f32 %v2016_v9  ;;  %6224 = vmatprep.subr.bf16.mxu1 %v11731_v18  ;;  %6288 = vmatprep.subr.bf16.mxu0 %v11732_v28  ;;  %v11740_v9 = vld [vmem:[#allocation168_spill] sm:$0xff] }
 0x4b6   :  { %6226 = vmatpush1.bf16.msra.mxu1 %v11733_v36  ;;  %6290 = vmatpush1.bf16.msra.mxu0 %v11734_v6  ;;  %v2023_v36 = vadd.f32 1.0, %v8164_v13  ;;  %v11741_v6 = vld [vmem:[#allocation169_spill] sm:$0xff] }
 0x4b7   :  { %6228 = vmatprep.subr.bf16.mxu1 %v11735_v51  ;;  %6292 = vmatprep.subr.bf16.mxu0 %v11736_v56  ;;  %v11742_v51 = vld [vmem:[#allocation170_spill] sm:$0xff]  ;;  %v11743_v56 = vld [vmem:[#allocation171_spill] sm:$0xff]  ;;  %v11749_v13 = vld [vmem:[#allocation37_spill] sm:$0xff] }
 0x4b8   :  { %8171 = vrcp.f32 %v2023_v36 }
 0x4ba   :  { %6230 = vmatpush1.bf16.msra.mxu1 %v11737_v52  ;;  %6294 = vmatpush1.bf16.msra.mxu0 %v11738_v63 }
 0x4bb   :  { %6232 = vmatprep.subr.bf16.mxu1 %v11739_v62  ;;  %6296 = vmatprep.subr.bf16.mxu0 %v11740_v9  ;;  %v11745_v62 = vld [vmem:[#allocation173_spill] sm:$0xff]  ;;  %v11746_v9 = vld [vmem:[#allocation174_spill] sm:$0xff] }
 0x4bc   :  { %v8168_v18 = vpop.eup %8167 }
 0x4bd   :  { %v8170_v28 = vpop.eup %8169  ;;  %v2027_v48 = vmul.f32 %v8168_v18, %v8166_v53  ;;  %v11748_v18 = vld [vmem:[#allocation36_spill] sm:$0xff]  ;;  %v11750_v53 = vld [vmem:[#allocation38_spill] sm:$0xff] }
 0x4be   :  { %v2026_v61 = vmul.f32 0.0, %v8170_v28  ;;  %6234 = vmatpush1.bf16.msra.mxu1 %v11741_v6  ;;  %6298 = vmatpush1.bf16.msra.mxu0 %v11742_v51 }
 0x4bf   :  { %6236 = vmatprep.subr.bf16.mxu1 %v11743_v56  ;;  %6300 = vmatprep.subr.bf16.mxu0 %v11744_v60 }
 0x4c0   :  { %v9738_v52 = vadd.f32 %v2027_v48, %v2026_v61  ;;  %v11747_v48 = vld [vmem:[#allocation35_spill] sm:$0xff] }
 0x4c2   :  { %8173 = vtanh.f32 %v9738_v52  ;;  %6238 = vmatpush1.bf16.msra.mxu1 %v11745_v62  ;;  %6302 = vmatpush1.bf16.msra.mxu0 %v11746_v9  ;;  %v8172_v61 = vpop.eup %8171 }
 0x4c3   :  { %6240 = vmatprep.subr.bf16.mxu1 %v9485_v16  ;;  %6304 = vmatprep.subr.bf16.mxu0 %v9487_v44 }
 0x4c6   :  { %6242 = vmatpush1.bf16.msra.mxu1 %v9491_v43  ;;  %6306 = vmatpush1.bf16.msra.mxu0 %v9493_v55 }
 0x4c7   :  { %6244 = vmatprep.subr.bf16.mxu1 %v9497_v24  ;;  %6308 = vmatprep.subr.bf16.mxu0 %v9499_v17 }
 0x4ca   :  { %6246 = vmatpush1.bf16.msra.mxu1 %v9503_v8  ;;  %6310 = vmatpush1.bf16.msra.mxu0 %v9505_v23 }
 0x4cb   :  { %6248 = vmatprep.subr.bf16.mxu1 %v9509_v34  ;;  %6312 = vmatprep.subr.bf16.mxu0 %v9511_v27 }
 0x4cc   :  { %v8174_v28 = vpop.eup %8173 }
 0x4cd   :  { %v9753_v36 = vmul.f32 %v8174_v28, %v8172_v61  ;;  %v11751_v61 = vld [vmem:[#allocation39_spill] sm:$0xff]  ;;  %v11752_v28 = vld [vmem:[#allocation40_spill] sm:$0xff] }
 0x4ce   :  { %6250 = vmatpush1.bf16.msra.mxu1 %v9515_v7  ;;  %6314 = vmatpush1.bf16.msra.mxu0 %v9517_v33 }
 0x4cf   :  { %5222 = vmatprep.mubr.msk.f32.mxu1 %vm604_vm5, %v9753_v36  ;;  %5223 = vmatprep.mubr.msk.f32.mxu0 %vm604_vm5, %v9753_v36 }
 0x4d0   :  { %6316 = vmatprep.subr.bf16.mxu1 %v8750_v46  ;;  %6348 = vmatprep.subr.bf16.mxu0 %v8753_v49 }
 0x4d1   :  { %2439 = vmatmul.mubr.f32.vlgmr.msra.gmra.mrb[24].mxu1 %v9665_v32  ;;  %2510 = vmatmul.mubr.f32.vlgmr.msra.gmra.mrb[32].mxu0 %v9665_v32 }
 0x4d2   :  { %6318 = vmatpush1.bf16.msra.mxu1 %v8773_v4  ;;  %6350 = vmatpush1.bf16.msra.mxu0 %v8775_v5 }
 0x4d3   :  { %6320 = vmatprep.subr.bf16.mxu1 %v8778_v14  ;;  %6352 = vmatprep.subr.bf16.mxu0 %v8780_v15 }
 0x4d4   :  { %2611 = vmatprep.mubr.f32.mxu1 %v11436_v12  ;;  %2682 = vmatprep.mubr.f32.mxu0 %v11436_v12 }
 0x4d6   :  { %6322 = vmatpush1.bf16.msra.mxu1 %v8785_v21  ;;  %6354 = vmatpush1.bf16.msra.mxu0 %v8787_v22 }
 0x4d7   :  { %6324 = vmatprep.subr.bf16.mxu1 %v8795_v29  ;;  %6356 = vmatprep.subr.bf16.mxu0 %v8797_v30 }
 0x4da   :  { %6326 = vmatpush1.bf16.msra.mxu1 %v8801_v37  ;;  %6358 = vmatpush1.bf16.msra.mxu0 %v8803_v38 }
 0x4db   :  { %6328 = vmatprep.subr.bf16.mxu1 %v8812_v45  ;;  %6360 = vmatprep.subr.bf16.mxu0 %v8814_v47 }
 0x4de   :  { %6330 = vmatpush1.bf16.msra.mxu1 %v8819_v58  ;;  %6362 = vmatpush1.bf16.msra.mxu0 %v8821_v59 }
 0x4df   :  { %6332 = vmatprep.subr.bf16.mxu1 %v8827_v1  ;;  %6364 = vmatprep.subr.bf16.mxu0 %v8829_v2  ;;  %v11753_v2 = vld [vmem:[#allocation41_spill] sm:$0xff] }
 0x4e0   :  { %v11759_v1 = vld [vmem:[#allocation49_spill] sm:$0xff] }
 0x4e2   :  { %6334 = vmatpush1.bf16.msra.mxu1 %v8833_v10  ;;  %6366 = vmatpush1.bf16.msra.mxu0 %v8835_v11  ;;  %v11754_v10 = vld [vmem:[#allocation42_spill] sm:$0xff]  ;;  %v11755_v11 = vld [vmem:[#allocation43_spill] sm:$0xff] }
 0x4e3   :  { %6336 = vmatprep.subr.bf16.mxu1 %v8843_v19  ;;  %6368 = vmatprep.subr.bf16.mxu0 %v8845_v20  ;;  %v11756_v19 = vld [vmem:[#allocation44_spill] sm:$0xff]  ;;  %v11757_v20 = vld [vmem:[#allocation45_spill] sm:$0xff] }
 0x4e6   :  { %6338 = vmatpush1.bf16.msra.mxu1 %v11747_v48  ;;  %6370 = vmatpush1.bf16.msra.mxu0 %v11748_v18  ;;  %v11758_v48 = vld [vmem:[#allocation46_spill] sm:$0xff] }
 0x4e7   :  { %6340 = vmatprep.subr.bf16.mxu1 %v11749_v13  ;;  %6372 = vmatprep.subr.bf16.mxu0 %v11750_v53 }
 0x4ea   :  { %6342 = vmatpush1.bf16.msra.mxu1 %v11751_v61  ;;  %6374 = vmatpush1.bf16.msra.mxu0 %v11752_v28 }
 0x4eb   :  { %6344 = vmatprep.subr.bf16.mxu1 %v11753_v2  ;;  %6376 = vmatprep.subr.bf16.mxu0 %v11754_v10 }
 0x4ee   :  { %6346 = vmatpush1.bf16.msra.mxu1 %v11755_v11  ;;  %6378 = vmatpush1.bf16.msra.mxu0 %v11756_v19 }
 0x4ef   :  { %6380 = vmatprep.subr.bf16.mxu1 %v11757_v20  ;;  %6444 = vmatprep.subr.bf16.mxu0 %v11758_v48 }
 0x523   :  { %v2104_v18 = vpop.f32.mrb[6].mxu1  ;;  %v2175_v13 = vpop.f32.mrb[14].mxu0 }
 0x524   :  { %v8009_v53 = vadd.f32 %v2104_v18, %v11759_v1  ;;  %v2106_v59 = vpop.f32.mrb[7].mxu1  ;;  %v2177_v61 = vpop.f32.mrb[15].mxu0  ;;  %v8025_v19 = vadd.f32 %v2175_v13, %v11622_v0  ;;  %v11764_v13 = vld [vmem:[#allocation59_spill] sm:$0xff] }
 0x525   :  { %v8010_v28 = vadd.f32 %v2106_v59, %v8945_v26  ;;  %v8026_v11 = vadd.f32 %v2177_v61, %v8952_v50  ;;  %v9806_v61 = vpop.permute.xlu1 %620 }
 0x526   :  { %v5216_v58 = vmul.f32 -1.442695, %v8009_v53  ;;  %11760 = vst [vmem:[#allocation53_spill] sm:$0xff] %v9806_v61  ;;  %vm622_vm12 = vcmp.eq.s32.totalorder %v9806_v61, 1 }
 0x527   :  { %v5217_v2 = vmul.f32 -1.442695, %v8010_v28  ;;  %v5218_v10 = vmul.f32 -1.442695, %v8026_v11 }
 0x528   :  { %8175 = vpow2.f32 %v5216_v58 }
 0x529   :  { %8177 = vpow2.f32 %v5217_v2 }
 0x52a   :  { %8179 = vpow2.f32 %v5218_v10 }
 0x52b   :  { %8181 = vtanh.f32 %v8025_v19 }
 0x532   :  { %v8176_v20 = vpop.eup %8175 }
 0x533   :  { %v8178_v47 = vpop.eup %8177  ;;  %v2183_v48 = vadd.f32 1.0, %v8176_v20  ;;  %v11761_v20 = vld [vmem:[#allocation56_spill] sm:$0xff] }
 0x534   :  { %v2189_v45 = vadd.f32 1.0, %v8178_v47  ;;  %v8180_v18 = vpop.eup %8179 }
 0x535   :  { %8183 = vrcp.f32 %v2183_v48  ;;  %v8182_v1 = vpop.eup %8181  ;;  %v2196_v58 = vadd.f32 1.0, %v8180_v18  ;;  %v11762_v48 = vld [vmem:[#allocation57_spill] sm:$0xff]  ;;  %v11765_v18 = vld [vmem:[#allocation60_spill] sm:$0xff] }
 0x536   :  { %8185 = vrcp.f32 %v2189_v45 }
 0x537   :  { %8187 = vrcp.f32 %v2196_v58  ;;  %v11770_v58 = vld [vmem:[#allocation65_spill] sm:$0xff] }
 0x53f   :  { %v8184_v59 = vpop.eup %8183 }
 0x540   :  { %v8186_v53 = vpop.eup %8185  ;;  %v2200_v28 = vmul.f32 %v8184_v59, %v8182_v1  ;;  %v11766_v59 = vld [vmem:[#allocation61_spill] sm:$0xff] }
 0x541   :  { %v2199_v2 = vmul.f32 %v8186_v53, %v9576_v31  ;;  %v8188_v45 = vpop.eup %8187  ;;  %v11768_v53 = vld [vmem:[#allocation63_spill] sm:$0xff] }
 0x543   :  { %v2201_v11 = vadd.f32 %v2200_v28, %v2199_v2  ;;  %v11769_v28 = vld [vmem:[#allocation64_spill] sm:$0xff]  ;;  %v11771_v2 = vld [vmem:[#allocation66_spill] sm:$0xff] }
 0x545   :  { %8189 = vtanh.f32 %v2201_v11  ;;  %v9812_v47 = vsel %vm622_vm12, %v2201_v11, %v9576_v31  ;;  %v11763_v31 = vld [vmem:[#allocation58_spill] sm:$0xff]  ;;  %v11772_v11 = vld [vmem:[#allocation67_spill] sm:$0xff] }
 0x54f   :  { %v8190_v10 = vpop.eup %8189 }
 0x550   :  { %v2203_v19 = vmul.f32 %v8190_v10, %v8188_v45  ;;  %v11773_v45 = vld [vmem:[#allocation68_spill] sm:$0xff]  ;;  %v11774_v10 = vld [vmem:[#allocation69_spill] sm:$0xff] }
 0x552   :  { %v9817_v1 = vsel %vm622_vm12, %v2203_v19, %v9581_v42  ;;  %v11767_v42 = vld [vmem:[#allocation62_spill] sm:$0xff] }
 0x553   :  { %2612 = vmatmul.mubr.f32.vlgmr.msra.gmra.mrb[8].mxu1 %v9817_v1  ;;  %2683 = vmatmul.mubr.f32.vlgmr.msra.gmra.mrb[16].mxu0 %v9817_v1  ;;  %v11775_v19 = vld [vmem:[#allocation70_spill] sm:$0xff] }
 0x554   :  { %6382 = vmatpush1.bf16.msra.mxu1 %v11625_v35  ;;  %6446 = vmatpush1.bf16.msra.mxu0 %v11761_v20 }
 0x555   :  { %6384 = vmatprep.subr.bf16.mxu1 %v11762_v48  ;;  %6448 = vmatprep.subr.bf16.mxu0 %v11763_v31  ;;  %v11780_v31 = vld [vmem:[#allocation75_spill] sm:$0xff] }
 0x558   :  { %6386 = vmatpush1.bf16.msra.mxu1 %v11764_v13  ;;  %6450 = vmatpush1.bf16.msra.mxu0 %v11765_v18  ;;  %v11776_v18 = vld [vmem:[#allocation71_spill] sm:$0xff] }
 0x559   :  { %6388 = vmatprep.subr.bf16.mxu1 %v11766_v59  ;;  %6452 = vmatprep.subr.bf16.mxu0 %v11767_v42  ;;  %v11777_v42 = vld [vmem:[#allocation72_spill] sm:$0xff] }
 0x55c   :  { %6390 = vmatpush1.bf16.msra.mxu1 %v11768_v53  ;;  %6454 = vmatpush1.bf16.msra.mxu0 %v11769_v28  ;;  %v11778_v53 = vld [vmem:[#allocation119_spill] sm:$0xff] }
 0x55d   :  { %6392 = vmatprep.subr.bf16.mxu1 %v11770_v58  ;;  %6456 = vmatprep.subr.bf16.mxu0 %v11771_v2 }
 0x560   :  { %6394 = vmatpush1.bf16.msra.mxu1 %v11772_v11  ;;  %6458 = vmatpush1.bf16.msra.mxu0 %v11773_v45  ;;  %v11779_v11 = vld [vmem:[#allocation120_spill] sm:$0xff] }
 0x561   :  { %6396 = vmatprep.subr.bf16.mxu1 %v11774_v10  ;;  %6460 = vmatprep.subr.bf16.mxu0 %v11775_v19  ;;  %v11784_v19 = vld [vmem:[#allocation79_spill] sm:$0xff] }
 0x564   :  { %v2272_v61 = vpop.f32.mrb[22].mxu1  ;;  %v2343_v59 = vpop.f32.mrb[30].mxu0  ;;  %6398 = vmatpush1.bf16.msra.mxu1 %v11776_v18  ;;  %6462 = vmatpush1.bf16.msra.mxu0 %v11777_v42  ;;  %v11781_v18 = vld [vmem:[#allocation77_spill] sm:$0xff]  ;;  %v11782_v42 = vld [vmem:[#allocation78_spill] sm:$0xff] }
 0x565   :  { %v2273_v28 = vadd.f32 %v2272_v61, %v11778_v53  ;;  %v2274_v13 = vpop.f32.mrb[23].mxu1  ;;  %v2345_v58 = vpop.f32.mrb[31].mxu0  ;;  %6400 = vmatprep.subr.bf16.mxu1 %v11644_v57  ;;  %6464 = vmatprep.subr.bf16.mxu0 %v11517_v25  ;;  %v11783_v61 = vld [vmem:[#allocation121_spill] sm:$0xff]  ;;  %v11785_v57 = vld [vmem:[#allocation80_spill] sm:$0xff] }
 0x566   :  { %v2275_v45 = vadd.f32 %v2274_v13, %v11779_v11  ;;  %v2346_v53 = vadd.f32 %v2345_v58, %v11783_v61  ;;  %v11786_v25 = vld [vmem:[#allocation81_spill] sm:$0xff]  ;;  %v11787_v13 = vld [vmem:[#allocation82_spill] sm:$0xff] }
 0x567   :  { %v5219_v2 = vmul.f32 -1.442695, %v2273_v28 }
 0x568   :  { %v5220_v10 = vmul.f32 -1.442695, %v2275_v45  ;;  %6402 = vmatpush1.bf16.msra.mxu1 %v11780_v31  ;;  %6466 = vmatpush1.bf16.msra.mxu0 %v11646_v39  ;;  %v5221_v28 = vmul.f32 -1.442695, %v2346_v53  ;;  %v11788_v45 = vld [vmem:[#allocation84_spill] sm:$0xff]  ;;  %v11790_v39 = vld [vmem:[#allocation85_spill] sm:$0xff] }
 0x569   :  { %8191 = vpow2.f32 %v5219_v2  ;;  %6404 = vmatprep.subr.bf16.mxu1 %v11781_v18  ;;  %6468 = vmatprep.subr.bf16.mxu0 %v11782_v42  ;;  %v11789_v2 = vld [vmem:[#allocation122_spill] sm:$0xff]  ;;  %v11811_v42 = vld [vmem:[#allocation105_spill] sm:$0xff] }
 0x56a   :  { %8193 = vpow2.f32 %v5220_v10  ;;  %v2344_v18 = vadd.f32 %v2343_v59, %v11789_v2  ;;  %v11791_v10 = vld [vmem:[#allocation86_spill] sm:$0xff]  ;;  %v11796_v59 = vld [vmem:[#allocation91_spill] sm:$0xff]  ;;  %v11797_v2 = vld [vmem:[#allocation92_spill] sm:$0xff] }
 0x56b   :  { %8195 = vpow2.f32 %v5221_v28  ;;  %v11800_v28 = vld [vmem:[#allocation95_spill] sm:$0xff] }
 0x56c   :  { %6406 = vmatpush1.bf16.msra.mxu1 %v11784_v19  ;;  %6470 = vmatpush1.bf16.msra.mxu0 %v11785_v57  ;;  %v11792_v57 = vld [vmem:[#allocation87_spill] sm:$0xff]  ;;  %8197 = vtanh.f32 %v2344_v18  ;;  %v11802_v18 = vld [vmem:[#allocation97_spill] sm:$0xff] }
 0x56d   :  { %6408 = vmatprep.subr.bf16.mxu1 %v11786_v25  ;;  %6472 = vmatprep.subr.bf16.mxu0 %v11787_v13  ;;  %v11793_v25 = vld [vmem:[#allocation88_spill] sm:$0xff]  ;;  %v11794_v13 = vld [vmem:[#allocation89_spill] sm:$0xff] }
 0x570   :  { %6410 = vmatpush1.bf16.msra.mxu1 %v11653_v40  ;;  %6474 = vmatpush1.bf16.msra.mxu0 %v11788_v45  ;;  %v11795_v40 = vld [vmem:[#allocation90_spill] sm:$0xff] }
 0x571   :  { %6412 = vmatprep.subr.bf16.mxu1 %v11790_v39  ;;  %6476 = vmatprep.subr.bf16.mxu0 %v11791_v10  ;;  %v11798_v10 = vld [vmem:[#allocation93_spill] sm:$0xff] }
 0x572   :  { %v11806_v39 = vld [vmem:[#allocation101_spill] sm:$0xff] }
 0x573   :  { %v8192_v58 = vpop.eup %8191 }
 0x574   :  { %v8194_v61 = vpop.eup %8193  ;;  %v2351_v19 = vadd.f32 1.0, %v8192_v58  ;;  %6414 = vmatpush1.bf16.msra.mxu1 %v11792_v57  ;;  %6478 = vmatpush1.bf16.msra.mxu0 %v11793_v25  ;;  %v11799_v58 = vld [vmem:[#allocation94_spill] sm:$0xff]  ;;  %v11801_v57 = vld [vmem:[#allocation96_spill] sm:$0xff] }
 0x575   :  { %v2357_v53 = vadd.f32 1.0, %v8194_v61  ;;  %6416 = vmatprep.subr.bf16.mxu1 %v11794_v13  ;;  %6480 = vmatprep.subr.bf16.mxu0 %v11795_v40  ;;  %v11803_v61 = vld [vmem:[#allocation98_spill] sm:$0xff]  ;;  %v8196_v13 = vpop.eup %8195 }
 0x576   :  { %8199 = vrcp.f32 %v2351_v19  ;;  %v8198_v40 = vpop.eup %8197 }
 0x577   :  { %8201 = vrcp.f32 %v2357_v53  ;;  %v11804_v53 = vld [vmem:[#allocation99_spill] sm:$0xff] }
 0x578   :  { %6418 = vmatpush1.bf16.msra.mxu1 %v11796_v59  ;;  %6482 = vmatpush1.bf16.msra.mxu0 %v11797_v2  ;;  %v11805_v59 = vld [vmem:[#allocation100_spill] sm:$0xff] }
 0x579   :  { %6420 = vmatprep.subr.bf16.mxu1 %v11798_v10  ;;  %6484 = vmatprep.subr.bf16.mxu0 %v11799_v58  ;;  %v2364_v10 = vadd.f32 1.0, %v8196_v13  ;;  %v11807_v58 = vld [vmem:[#allocation102_spill] sm:$0xff] }
 0x57b   :  { %8203 = vrcp.f32 %v2364_v10  ;;  %v11820_v10 = vld [vmem:[#allocation112_spill] sm:$0xff] }
 0x57c   :  { %6422 = vmatpush1.bf16.msra.mxu1 %v11800_v28  ;;  %6486 = vmatpush1.bf16.msra.mxu0 %v11801_v57  ;;  %v11808_v28 = vld [vmem:[#allocation118_spill] sm:$0xff] }
 0x57d   :  { %6424 = vmatprep.subr.bf16.mxu1 %v11802_v18  ;;  %6488 = vmatprep.subr.bf16.mxu0 %v11803_v61  ;;  %v11809_v18 = vld [vmem:[#allocation103_spill] sm:$0xff]  ;;  %v11810_v61 = vld [vmem:[#allocation104_spill] sm:$0xff] }
 0x580   :  { %v8200_v19 = vpop.eup %8199  ;;  %6426 = vmatpush1.bf16.msra.mxu1 %v11804_v53  ;;  %6490 = vmatpush1.bf16.msra.mxu0 %v11805_v59  ;;  %v11812_v53 = vld [vmem:[#allocation106_spill] sm:$0xff] }
 0x581   :  { %v8202_v2 = vpop.eup %8201  ;;  %v2368_v25 = vmul.f32 %v8200_v19, %v8198_v40  ;;  %6428 = vmatprep.subr.bf16.mxu1 %v11806_v39  ;;  %6492 = vmatprep.subr.bf16.mxu0 %v11807_v58  ;;  %v11815_v19 = vld [vmem:[#allocation107_spill] sm:$0xff]  ;;  %v11816_v58 = vld [vmem:[#allocation108_spill] sm:$0xff]  ;;  %v11849_v39 = vld [vmem:[#allocation146_spill] sm:$0xff] }
 0x582   :  { %v2367_v57 = vmul.f32 %v8202_v2, %v11808_v28  ;;  %v11819_v2 = vld [vmem:[#allocation111_spill] sm:$0xff]  ;;  %v11834_v40 = vld [vmem:[#allocation132_spill] sm:$0xff] }
 0x584   :  { %v2369_v45 = vadd.f32 %v2368_v25, %v2367_v57  ;;  %6430 = vmatpush1.bf16.msra.mxu1 %v11809_v18  ;;  %6494 = vmatpush1.bf16.msra.mxu0 %v11810_v61  ;;  %v11817_v25 = vld [vmem:[#allocation109_spill] sm:$0xff]  ;;  %v11818_v57 = vld [vmem:[#allocation110_spill] sm:$0xff] }
 0x585   :  { %6432 = vmatprep.subr.bf16.mxu1 %v11811_v42  ;;  %6496 = vmatprep.subr.bf16.mxu0 %v11812_v53  ;;  %v11821_v42 = vld [vmem:[#allocation113_spill] sm:$0xff]  ;;  %v11822_v53 = vld [vmem:[#allocation114_spill] sm:$0xff]  ;;  %v8204_v61 = vpop.eup %8203 }
 0x586   :  { %8205 = vtanh.f32 %v2369_v45  ;;  %v9881_v13 = vsel %vm616_vm11, %v2369_v45, %v11808_v28  ;;  %v11823_v45 = vld [vmem:[#allocation115_spill] sm:$0xff]  ;;  %v11824_v28 = vld [vmem:[#allocation116_spill] sm:$0xff] }
 0x587   :  { %11814 = vst [vmem:[#allocation169_spill] sm:$0xff] %v9881_v13  ;;  %v11844_v13 = vld [vmem:[#allocation141_spill] sm:$0xff] }
 0x588   :  { %6434 = vmatpush1.bf16.msra.mxu1 %v11815_v19  ;;  %6498 = vmatpush1.bf16.msra.mxu0 %v11816_v58  ;;  %v11825_v58 = vld [vmem:[#allocation123_spill] sm:$0xff] }
 0x589   :  { %6436 = vmatprep.subr.bf16.mxu1 %v11817_v25  ;;  %6500 = vmatprep.subr.bf16.mxu0 %v11818_v57  ;;  %v11826_v25 = vld [vmem:[#allocation124_spill] sm:$0xff] }
 0x58c   :  { %6438 = vmatpush1.bf16.msra.mxu1 %v11819_v2  ;;  %6502 = vmatpush1.bf16.msra.mxu0 %v11820_v10  ;;  %v11843_v10 = vld [vmem:[#allocation55_spill] sm:$0xff] }
 0x58d   :  { %6440 = vmatprep.subr.bf16.mxu1 %v11821_v42  ;;  %6504 = vmatprep.subr.bf16.mxu0 %v11822_v53  ;;  %v11836_v53 = vld [vmem:[#allocation134_spill] sm:$0xff]  ;;  %v11837_v42 = vld [vmem:[#allocation135_spill] sm:$0xff] }
 0x590   :  { %v8206_v18 = vpop.eup %8205  ;;  %6442 = vmatpush1.bf16.msra.mxu1 %v11823_v45  ;;  %6506 = vmatpush1.bf16.msra.mxu0 %v11824_v28  ;;  %v11827_v45 = vld [vmem:[#allocation125_spill] sm:$0xff] }
 0x591   :  { %v2371_v19 = vmul.f32 %v8206_v18, %v8204_v61  ;;  %6508 = vmatprep.subr.bf16.mxu1 %v11825_v58  ;;  %6572 = vmatprep.subr.bf16.mxu0 %v11826_v25  ;;  %v11828_v18 = vld [vmem:[#allocation126_spill] sm:$0xff]  ;;  %v11829_v61 = vld [vmem:[#allocation127_spill] sm:$0xff]  ;;  %v11830_v25 = vld [vmem:[#allocation128_spill] sm:$0xff] }
 0x592   :  { %v11831_v58 = vld [vmem:[#allocation129_spill] sm:$0xff] }
 0x593   :  { %v9898_v2 = vsel %vm616_vm11, %v2371_v19, %v9665_v32  ;;  %v11832_v32 = vld [vmem:[#allocation130_spill] sm:$0xff]  ;;  %v11833_v19 = vld [vmem:[#allocation131_spill] sm:$0xff]  ;;  %v11835_v28 = vld [vmem:[#allocation133_spill] sm:$0xff] }
 0x594   :  { %2779 = vmatprep.mubr.f32.mxu1 %v9898_v2  ;;  %2850 = vmatprep.mubr.f32.mxu0 %v9898_v2 }
 0x595   :  { %2780 = vmatmul.mubr.f32.vlgmr.msra.gmra.mrb[26].mxu1 %v9817_v1  ;;  %2851 = vmatmul.mubr.f32.vlgmr.msra.gmra.mrb[34].mxu0 %v9817_v1 }
 0x596   :  { %6510 = vmatpush1.bf16.msra.mxu1 %v11827_v45  ;;  %6574 = vmatpush1.bf16.msra.mxu0 %v11828_v18  ;;  %v11838_v45 = vld [vmem:[#allocation136_spill] sm:$0xff]  ;;  %v11839_v18 = vld [vmem:[#allocation137_spill] sm:$0xff] }
 0x597   :  { %6512 = vmatprep.subr.bf16.mxu1 %v11829_v61  ;;  %6576 = vmatprep.subr.bf16.mxu0 %v11830_v25  ;;  %v11840_v61 = vld [vmem:[#allocation138_spill] sm:$0xff]  ;;  %v11841_v25 = vld [vmem:[#allocation139_spill] sm:$0xff] }
 0x59a   :  { %6514 = vmatpush1.bf16.msra.mxu1 %v11831_v58  ;;  %6578 = vmatpush1.bf16.msra.mxu0 %v11832_v32  ;;  %v11842_v58 = vld [vmem:[#allocation140_spill] sm:$0xff] }
 0x59b   :  { %6516 = vmatprep.subr.bf16.mxu1 %v11833_v19  ;;  %6580 = vmatprep.subr.bf16.mxu0 %v11834_v40 }
 0x59e   :  { %6518 = vmatpush1.bf16.msra.mxu1 %v11835_v28  ;;  %6582 = vmatpush1.bf16.msra.mxu0 %v11836_v53 }
 0x59f   :  { %6520 = vmatprep.subr.bf16.mxu1 %v11837_v42  ;;  %6584 = vmatprep.subr.bf16.mxu0 %v11838_v45  ;;  %v11845_v42 = vld [vmem:[#allocation142_spill] sm:$0xff] }
 0x5a2   :  { %6522 = vmatpush1.bf16.msra.mxu1 %v11839_v18  ;;  %6586 = vmatpush1.bf16.msra.mxu0 %v11840_v61  ;;  %v11846_v18 = vld [vmem:[#allocation143_spill] sm:$0xff]  ;;  %v11847_v61 = vld [vmem:[#allocation144_spill] sm:$0xff] }
 0x5a3   :  { %6524 = vmatprep.subr.bf16.mxu1 %v11841_v25  ;;  %6588 = vmatprep.subr.bf16.mxu0 %v11842_v58  ;;  %v11848_v58 = vld [vmem:[#allocation145_spill] sm:$0xff] }
 0x5a4   :  { %v2440_v32 = vpop.f32.mrb[24].mxu1  ;;  %v2511_v19 = vpop.f32.mrb[32].mxu0 }
 0x5a5   :  { %v2441_v40 = vadd.f32 %v2440_v32, %v11843_v10  ;;  %v2442_v57 = vpop.f32.mrb[25].mxu1  ;;  %v2513_v28 = vpop.f32.mrb[33].mxu0  ;;  %v11850_v32 = vld [vmem:[#allocation147_spill] sm:$0xff]  ;;  %v11851_v10 = vld [vmem:[#allocation148_spill] sm:$0xff] }
 0x5a6   :  { %v2443_v53 = vadd.f32 %v2442_v57, %v9692_v41  ;;  %6526 = vmatpush1.bf16.msra.mxu1 %v11844_v13  ;;  %6590 = vmatpush1.bf16.msra.mxu0 %v11845_v42  ;;  %v2514_v57 = vadd.f32 %v2513_v28, %v9703_v54  ;;  %v11852_v13 = vld [vmem:[#allocation149_spill] sm:$0xff]  ;;  %v11859_v42 = vld [vmem:[#allocation155_spill] sm:$0xff] }
 0x5a7   :  { %v5224_v45 = vmul.f32 -1.442695, %v2441_v40  ;;  %6528 = vmatprep.subr.bf16.mxu1 %v11846_v18  ;;  %6592 = vmatprep.subr.bf16.mxu0 %v11847_v61  ;;  %v11853_v40 = vld [vmem:[#allocation150_spill] sm:$0xff]  ;;  %v11854_v18 = vld [vmem:[#allocation151_spill] sm:$0xff]  ;;  %v11855_v61 = vld [vmem:[#allocation152_spill] sm:$0xff] }
 0x5a8   :  { %v5225_v25 = vmul.f32 -1.442695, %v2443_v53  ;;  %v5226_v53 = vmul.f32 -1.442695, %v2514_v57  ;;  %v11862_v57 = vld [vmem:[#allocation158_spill] sm:$0xff] }
 0x5a9   :  { %8207 = vpow2.f32 %v5224_v45 }
 0x5aa   :  { %8209 = vpow2.f32 %v5225_v25  ;;  %6530 = vmatpush1.bf16.msra.mxu1 %v11848_v58  ;;  %6594 = vmatpush1.bf16.msra.mxu0 %v11849_v39  ;;  %v11856_v25 = vld [vmem:[#allocation51_spill] sm:$0xff]  ;;  %v11857_v58 = vld [vmem:[#allocation153_spill] sm:$0xff]  ;;  %v11858_v39 = vld [vmem:[#allocation154_spill] sm:$0xff] }
 0x5ab   :  { %6532 = vmatprep.subr.bf16.mxu1 %v11850_v32  ;;  %6596 = vmatprep.subr.bf16.mxu0 %v11851_v10  ;;  %v2512_v45 = vadd.f32 %v2511_v19, %v11856_v25  ;;  %v11860_v10 = vld [vmem:[#allocation156_spill] sm:$0xff]  ;;  %8211 = vpow2.f32 %v5226_v53  ;;  %v11863_v19 = vld [vmem:[#allocation159_spill] sm:$0xff] }
 0x5ad   :  { %8213 = vtanh.f32 %v2512_v45  ;;  %v11869_v45 = vld [vmem:[#allocation165_spill] sm:$0xff] }
 0x5ae   :  { %6534 = vmatpush1.bf16.msra.mxu1 %v11852_v13  ;;  %6598 = vmatpush1.bf16.msra.mxu0 %v11853_v40 }
 0x5af   :  { %6536 = vmatprep.subr.bf16.mxu1 %v11854_v18  ;;  %6600 = vmatprep.subr.bf16.mxu0 %v11855_v61  ;;  %v11861_v18 = vld [vmem:[#allocation157_spill] sm:$0xff] }
 0x5b2   :  { %6538 = vmatpush1.bf16.msra.mxu1 %v11857_v58  ;;  %6602 = vmatpush1.bf16.msra.mxu0 %v11858_v39  ;;  %v11864_v58 = vld [vmem:[#allocation160_spill] sm:$0xff]  ;;  %v11865_v39 = vld [vmem:[#allocation161_spill] sm:$0xff] }
 0x5b3   :  { %v8208_v32 = vpop.eup %8207  ;;  %6540 = vmatprep.subr.bf16.mxu1 %v11859_v42  ;;  %6604 = vmatprep.subr.bf16.mxu0 %v11860_v10  ;;  %v11866_v42 = vld [vmem:[#allocation162_spill] sm:$0xff]  ;;  %v11867_v10 = vld [vmem:[#allocation163_spill] sm:$0xff] }
 0x5b4   :  { %v8210_v28 = vpop.eup %8209  ;;  %v2519_v13 = vadd.f32 1.0, %v8208_v32  ;;  %v11868_v32 = vld [vmem:[#allocation164_spill] sm:$0xff] }
 0x5b5   :  { %v2525_v40 = vadd.f32 1.0, %v8210_v28  ;;  %v8212_v53 = vpop.eup %8211  ;;  %v11870_v28 = vld [vmem:[#allocation167_spill] sm:$0xff] }
 0x5b6   :  { %8215 = vrcp.f32 %v2519_v13  ;;  %6542 = vmatpush1.bf16.msra.mxu1 %v11861_v18  ;;  %6606 = vmatpush1.bf16.msra.mxu0 %v11862_v57 }
 0x5b7   :  { %8217 = vrcp.f32 %v2525_v40  ;;  %6544 = vmatprep.subr.bf16.mxu1 %v11863_v19  ;;  %6608 = vmatprep.subr.bf16.mxu0 %v11864_v58  ;;  %v8214_v13 = vpop.eup %8213  ;;  %v11871_v40 = vld [vmem:[#allocation168_spill] sm:$0xff] }
 0x5ba   :  { %6546 = vmatpush1.bf16.msra.mxu1 %v11865_v39  ;;  %6610 = vmatpush1.bf16.msra.mxu0 %v11866_v42  ;;  %v2032_v42 = vsel %vm604_vm5, %v9738_v52, 0.0 }
 0x5bb   :  { %6548 = vmatprep.subr.bf16.mxu1 %v11867_v10  ;;  %6612 = vmatprep.subr.bf16.mxu0 %v11868_v32  ;;  %v2532_v10 = vadd.f32 1.0, %v8212_v53  ;;  %v11876_v53 = vld [vmem:[#allocation28_spill] sm:$0xff] }
 0x5bd   :  { %8219 = vrcp.f32 %v2532_v10  ;;  %v2031_v10 = vsel %vm604_vm5, %v9753_v36, 0.0  ;;  %v11874_v36 = vld [vmem:[#allocation26_spill] sm:$0xff] }
 0x5be   :  { %6550 = vmatpush1.bf16.msra.mxu1 %v11869_v45  ;;  %6614 = vmatpush1.bf16.msra.mxu0 %v11738_v63 }
 0x5bf   :  { %6552 = vmatprep.subr.bf16.mxu1 %v11870_v28  ;;  %6616 = vmatprep.subr.bf16.mxu0 %v11871_v40  ;;  %v11879_v40 = vld [vmem:[#allocation31_spill] sm:$0xff] }
 0x5c0   :  { %v8216_v19 = vpop.eup %8215 }
 0x5c1   :  { %v8218_v58 = vpop.eup %8217  ;;  %v2536_v39 = vmul.f32 %v8216_v19, %v8214_v13  ;;  %v11875_v19 = vld [vmem:[#allocation27_spill] sm:$0xff]  ;;  %v11877_v13 = vld [vmem:[#allocation29_spill] sm:$0xff] }
 0x5c2   :  { %v2535_v57 = vmul.f32 %v8218_v58, %v2032_v42  ;;  %6554 = vmatpush1.bf16.msra.mxu1 %v11741_v6  ;;  %6618 = vmatpush1.bf16.msra.mxu0 %v11742_v51 }
 0x5c3   :  { %6556 = vmatprep.subr.bf16.mxu1 %v11743_v56  ;;  %6620 = vmatprep.subr.bf16.mxu0 %v11744_v60 }
 0x5c4   :  { %v2537_v28 = vadd.f32 %v2536_v39, %v2535_v57 }
 0x5c6   :  { %6558 = vmatpush1.bf16.msra.mxu1 %v11745_v62  ;;  %6622 = vmatpush1.bf16.msra.mxu0 %v11746_v9  ;;  %8221 = vtanh.f32 %v2537_v28  ;;  %v9963_v52 = vsel %vm610_vm6, %v2537_v28, %v2032_v42  ;;  %v11878_v28 = vld [vmem:[#allocation30_spill] sm:$0xff] }
 0x5c7   :  { %6560 = vmatprep.subr.bf16.mxu1 %v9485_v16  ;;  %6624 = vmatprep.subr.bf16.mxu0 %v9487_v44  ;;  %v8220_v39 = vpop.eup %8219 }
 0x5ca   :  { %6562 = vmatpush1.bf16.msra.mxu1 %v9491_v43  ;;  %6626 = vmatpush1.bf16.msra.mxu0 %v9493_v55 }
 0x5cb   :  { %6564 = vmatprep.subr.bf16.mxu1 %v9497_v24  ;;  %6628 = vmatprep.subr.bf16.mxu0 %v9499_v17 }
 0x5ce   :  { %6566 = vmatpush1.bf16.msra.mxu1 %v9503_v8  ;;  %6630 = vmatpush1.bf16.msra.mxu0 %v9505_v23 }
 0x5cf   :  { %6568 = vmatprep.subr.bf16.mxu1 %v9509_v34  ;;  %6632 = vmatprep.subr.bf16.mxu0 %v9511_v27 }
 0x5d0   :  { %v8222_v42 = vpop.eup %8221 }
 0x5d1   :  { %v2539_v58 = vmul.f32 %v8222_v42, %v8220_v39  ;;  %v11880_v39 = vld [vmem:[#allocation32_spill] sm:$0xff]  ;;  %v11881_v42 = vld [vmem:[#allocation33_spill] sm:$0xff] }
 0x5d2   :  { %6570 = vmatpush1.bf16.msra.mxu1 %v9515_v7  ;;  %6634 = vmatpush1.bf16.msra.mxu0 %v9517_v33 }
 0x5d3   :  { %v9982_v57 = vsel %vm610_vm6, %v2539_v58, %v2031_v10  ;;  %6636 = vmatprep.subr.bf16.mxu1 %v8750_v46  ;;  %6668 = vmatprep.subr.bf16.mxu0 %v8753_v49  ;;  %v11882_v58 = vld [vmem:[#allocation34_spill] sm:$0xff]  ;;  %v11883_v10 = vld [vmem:[#allocation35_spill] sm:$0xff] }
 0x5d4   :  { %2947 = vmatprep.mubr.f32.mxu1 %v9982_v57  ;;  %3018 = vmatprep.mubr.f32.mxu0 %v9982_v57 }
 0x5d5   :  { %2948 = vmatmul.mubr.f32.vlgmr.msra.gmra.mrb[28].mxu1 %v9898_v2  ;;  %3019 = vmatmul.mubr.f32.vlgmr.msra.gmra.mrb[36].mxu0 %v9898_v2 }
 0x5d6   :  { %6638 = vmatpush1.bf16.msra.mxu1 %v8773_v4  ;;  %6670 = vmatpush1.bf16.msra.mxu0 %v8775_v5 }
 0x5d7   :  { %6640 = vmatprep.subr.bf16.mxu1 %v8778_v14  ;;  %6672 = vmatprep.subr.bf16.mxu0 %v8780_v15 }
 0x5d8   :  { %3120 = vmatprep.mubr.f32.mxu1 %v11436_v12  ;;  %3191 = vmatprep.mubr.f32.mxu0 %v11436_v12 }
 0x5da   :  { %6642 = vmatpush1.bf16.msra.mxu1 %v8785_v21  ;;  %6674 = vmatpush1.bf16.msra.mxu0 %v8787_v22 }
 0x5db   :  { %6644 = vmatprep.subr.bf16.mxu1 %v8795_v29  ;;  %6676 = vmatprep.subr.bf16.mxu0 %v8797_v30 }
 0x5de   :  { %6646 = vmatpush1.bf16.msra.mxu1 %v8801_v37  ;;  %6678 = vmatpush1.bf16.msra.mxu0 %v8803_v38  ;;  %v11895_v38 = vld [vmem:[#allocation49_spill] sm:$0xff] }
 0x5df   :  { %6648 = vmatprep.subr.bf16.mxu1 %v11873_v3  ;;  %6680 = vmatprep.subr.bf16.mxu0 %v11874_v36  ;;  %v11884_v3 = vld [vmem:[#allocation36_spill] sm:$0xff]  ;;  %v11885_v36 = vld [vmem:[#allocation37_spill] sm:$0xff] }
 0x5e2   :  { %6650 = vmatpush1.bf16.msra.mxu1 %v11875_v19  ;;  %6682 = vmatpush1.bf16.msra.mxu0 %v11876_v53  ;;  %v11886_v19 = vld [vmem:[#allocation38_spill] sm:$0xff]  ;;  %v11887_v53 = vld [vmem:[#allocation39_spill] sm:$0xff] }
 0x5e3   :  { %6652 = vmatprep.subr.bf16.mxu1 %v11877_v13  ;;  %6684 = vmatprep.subr.bf16.mxu0 %v11878_v28  ;;  %v11888_v13 = vld [vmem:[#allocation40_spill] sm:$0xff]  ;;  %v11889_v28 = vld [vmem:[#allocation41_spill] sm:$0xff] }
 0x5e6   :  { %6654 = vmatpush1.bf16.msra.mxu1 %v11879_v40  ;;  %6686 = vmatpush1.bf16.msra.mxu0 %v11880_v39  ;;  %v11890_v40 = vld [vmem:[#allocation42_spill] sm:$0xff]  ;;  %v11891_v39 = vld [vmem:[#allocation43_spill] sm:$0xff] }
 0x5e7   :  { %6656 = vmatprep.subr.bf16.mxu1 %v11881_v42  ;;  %6688 = vmatprep.subr.bf16.mxu0 %v11882_v58  ;;  %v11892_v42 = vld [vmem:[#allocation44_spill] sm:$0xff]  ;;  %v11893_v58 = vld [vmem:[#allocation45_spill] sm:$0xff] }
 0x5ea   :  { %6658 = vmatpush1.bf16.msra.mxu1 %v11883_v10  ;;  %6690 = vmatpush1.bf16.msra.mxu0 %v11884_v3  ;;  %v11894_v10 = vld [vmem:[#allocation46_spill] sm:$0xff] }
 0x5eb   :  { %6660 = vmatprep.subr.bf16.mxu1 %v11885_v36  ;;  %6692 = vmatprep.subr.bf16.mxu0 %v11886_v19 }
 0x5ee   :  { %6662 = vmatpush1.bf16.msra.mxu1 %v11887_v53  ;;  %6694 = vmatpush1.bf16.msra.mxu0 %v11888_v13 }
 0x5ef   :  { %6664 = vmatprep.subr.bf16.mxu1 %v11889_v28  ;;  %6696 = vmatprep.subr.bf16.mxu0 %v11890_v40 }
 0x5f2   :  { %6666 = vmatpush1.bf16.msra.mxu1 %v11891_v39  ;;  %6698 = vmatpush1.bf16.msra.mxu0 %v11892_v42 }
 0x5f3   :  { %6700 = vmatprep.subr.bf16.mxu1 %v11893_v58  ;;  %6764 = vmatprep.subr.bf16.mxu0 %v11894_v10 }
 0x626   :  { %v2613_v3 = vpop.f32.mrb[8].mxu1  ;;  %v2684_v36 = vpop.f32.mrb[16].mxu0 }
 0x627   :  { %v8011_v19 = vadd.f32 %v2613_v3, %v11895_v38  ;;  %v2615_v37 = vpop.f32.mrb[9].mxu1  ;;  %v2686_v53 = vpop.f32.mrb[17].mxu0  ;;  %v8027_v42 = vadd.f32 %v2684_v36, %v11622_v0 }
 0x628   :  { %v8012_v13 = vadd.f32 %v2615_v37, %v8945_v26  ;;  %v8028_v39 = vadd.f32 %v2686_v53, %v8952_v50  ;;  %v10029_v53 = vpop.permute.xlu0 %626 }
 0x629   :  { %v5227_v30 = vmul.f32 -1.442695, %v8011_v19  ;;  %11896 = vst [vmem:[#allocation172_spill] sm:$0xff] %v10029_v53  ;;  %vm628_vm13 = vcmp.eq.s32.totalorder %v10029_v53, 1 }
 0x62a   :  { %v5228_v28 = vmul.f32 -1.442695, %v8012_v13  ;;  %v5229_v40 = vmul.f32 -1.442695, %v8028_v39 }
 0x62b   :  { %8223 = vpow2.f32 %v5227_v30 }
 0x62c   :  { %8225 = vpow2.f32 %v5228_v28 }
 0x62d   :  { %8227 = vpow2.f32 %v5229_v40 }
 0x62e   :  { %8229 = vtanh.f32 %v8027_v42  ;;  %v11898_v42 = vld [vmem:[#allocation59_spill] sm:$0xff] }
 0x635   :  { %v8224_v58 = vpop.eup %8223 }
 0x636   :  { %v8226_v29 = vpop.eup %8225  ;;  %v2692_v10 = vadd.f32 1.0, %v8224_v58  ;;  %v11899_v58 = vld [vmem:[#allocation60_spill] sm:$0xff] }
 0x637   :  { %v2698_v22 = vadd.f32 1.0, %v8226_v29  ;;  %v8228_v3 = vpop.eup %8227 }
 0x638   :  { %8231 = vrcp.f32 %v2692_v10  ;;  %v8230_v38 = vpop.eup %8229  ;;  %v2705_v30 = vadd.f32 1.0, %v8228_v3  ;;  %v11900_v10 = vld [vmem:[#allocation61_spill] sm:$0xff]  ;;  %v11902_v3 = vld [vmem:[#allocation63_spill] sm:$0xff] }
 0x639   :  { %8233 = vrcp.f32 %v2698_v22 }
 0x63a   :  { %8235 = vrcp.f32 %v2705_v30  ;;  %v11906_v30 = vld [vmem:[#allocation67_spill] sm:$0xff] }
 0x642   :  { %v8232_v37 = vpop.eup %8231 }
 0x643   :  { %v8234_v19 = vpop.eup %8233  ;;  %v2709_v13 = vmul.f32 %v8232_v37, %v8230_v38  ;;  %v11903_v37 = vld [vmem:[#allocation64_spill] sm:$0xff] }
 0x644   :  { %v2708_v28 = vmul.f32 %v8234_v19, %v9812_v47  ;;  %v8236_v22 = vpop.eup %8235  ;;  %v11904_v19 = vld [vmem:[#allocation65_spill] sm:$0xff] }
 0x646   :  { %v2710_v39 = vadd.f32 %v2709_v13, %v2708_v28  ;;  %v11905_v13 = vld [vmem:[#allocation66_spill] sm:$0xff]  ;;  %v11907_v28 = vld [vmem:[#allocation68_spill] sm:$0xff] }
 0x648   :  { %8237 = vtanh.f32 %v2710_v39  ;;  %v10035_v29 = vsel %vm628_vm13, %v2710_v39, %v9812_v47  ;;  %v11897_v47 = vld [vmem:[#allocation58_spill] sm:$0xff]  ;;  %v11908_v39 = vld [vmem:[#allocation69_spill] sm:$0xff] }
 0x652   :  { %v8238_v36 = vpop.eup %8237 }
 0x653   :  { %v2712_v40 = vmul.f32 %v8238_v36, %v8236_v22  ;;  %v11909_v22 = vld [vmem:[#allocation70_spill] sm:$0xff]  ;;  %v11910_v36 = vld [vmem:[#allocation71_spill] sm:$0xff] }
 0x655   :  { %v10040_v38 = vsel %vm628_vm13, %v2712_v40, %v9817_v1  ;;  %v11901_v1 = vld [vmem:[#allocation62_spill] sm:$0xff]  ;;  %v11911_v40 = vld [vmem:[#allocation72_spill] sm:$0xff] }
 0x656   :  { %3121 = vmatmul.mubr.f32.vlgmr.msra.gmra.mrb[10].mxu1 %v10040_v38  ;;  %3192 = vmatmul.mubr.f32.vlgmr.msra.gmra.mrb[18].mxu0 %v10040_v38 }
 0x657   :  { %6702 = vmatpush1.bf16.msra.mxu1 %v11625_v35  ;;  %6766 = vmatpush1.bf16.msra.mxu0 %v11761_v20 }
 0x658   :  { %6704 = vmatprep.subr.bf16.mxu1 %v11762_v48  ;;  %6768 = vmatprep.subr.bf16.mxu0 %v11897_v47 }
 0x65b   :  { %6706 = vmatpush1.bf16.msra.mxu1 %v11898_v42  ;;  %6770 = vmatpush1.bf16.msra.mxu0 %v11899_v58  ;;  %v11921_v42 = vld [vmem:[#allocation81_spill] sm:$0xff] }
 0x65c   :  { %6708 = vmatprep.subr.bf16.mxu1 %v11900_v10  ;;  %6772 = vmatprep.subr.bf16.mxu0 %v11901_v1  ;;  %v11912_v1 = vld [vmem:[#allocation73_spill] sm:$0xff] }
 0x65f   :  { %6710 = vmatpush1.bf16.msra.mxu1 %v11902_v3  ;;  %6774 = vmatpush1.bf16.msra.mxu0 %v11903_v37  ;;  %v11913_v37 = vld [vmem:[#allocation74_spill] sm:$0xff] }
 0x660   :  { %6712 = vmatprep.subr.bf16.mxu1 %v11904_v19  ;;  %6776 = vmatprep.subr.bf16.mxu0 %v11905_v13  ;;  %v11914_v19 = vld [vmem:[#allocation119_spill] sm:$0xff] }
 0x663   :  { %6714 = vmatpush1.bf16.msra.mxu1 %v11906_v30  ;;  %6778 = vmatpush1.bf16.msra.mxu0 %v11907_v28 }
 0x664   :  { %6716 = vmatprep.subr.bf16.mxu1 %v11908_v39  ;;  %6780 = vmatprep.subr.bf16.mxu0 %v11909_v22  ;;  %v11915_v22 = vld [vmem:[#allocation76_spill] sm:$0xff]  ;;  %v11916_v39 = vld [vmem:[#allocation77_spill] sm:$0xff] }
 0x667   :  { %6718 = vmatpush1.bf16.msra.mxu1 %v11910_v36  ;;  %6782 = vmatpush1.bf16.msra.mxu0 %v11911_v40  ;;  %v11917_v40 = vld [vmem:[#allocation78_spill] sm:$0xff] }
 0x668   :  { %v2781_v53 = vpop.f32.mrb[26].mxu1  ;;  %v2852_v3 = vpop.f32.mrb[34].mxu0  ;;  %6720 = vmatprep.subr.bf16.mxu1 %v11912_v1  ;;  %6784 = vmatprep.subr.bf16.mxu0 %v11913_v37  ;;  %v11918_v1 = vld [vmem:[#allocation79_spill] sm:$0xff]  ;;  %v11919_v37 = vld [vmem:[#allocation80_spill] sm:$0xff] }
 0x669   :  { %v2782_v13 = vadd.f32 %v2781_v53, %v11914_v19  ;;  %v2783_v10 = vpop.f32.mrb[27].mxu1  ;;  %v2854_v30 = vpop.f32.mrb[35].mxu0  ;;  %v11920_v53 = vld [vmem:[#allocation121_spill] sm:$0xff] }
 0x66a   :  { %v2784_v28 = vadd.f32 %v2783_v10, %v11779_v11  ;;  %v2855_v19 = vadd.f32 %v2854_v30, %v11920_v53  ;;  %v11922_v10 = vld [vmem:[#allocation82_spill] sm:$0xff] }
 0x66b   :  { %v5230_v58 = vmul.f32 -1.442695, %v2782_v13  ;;  %6722 = vmatpush1.bf16.msra.mxu1 %v11780_v31  ;;  %6786 = vmatpush1.bf16.msra.mxu0 %v11915_v22  ;;  %v11923_v13 = vld [vmem:[#allocation83_spill] sm:$0xff]  ;;  %v11924_v22 = vld [vmem:[#allocation84_spill] sm:$0xff] }
 0x66c   :  { %v5231_v36 = vmul.f32 -1.442695, %v2784_v28  ;;  %6724 = vmatprep.subr.bf16.mxu1 %v11916_v39  ;;  %6788 = vmatprep.subr.bf16.mxu0 %v11917_v40  ;;  %v5232_v28 = vmul.f32 -1.442695, %v2855_v19  ;;  %v11925_v39 = vld [vmem:[#allocation85_spill] sm:$0xff]  ;;  %v11926_v40 = vld [vmem:[#allocation86_spill] sm:$0xff] }
 0x66d   :  { %8239 = vpow2.f32 %v5230_v58  ;;  %v11927_v58 = vld [vmem:[#allocation122_spill] sm:$0xff]  ;;  %v11928_v31 = vld [vmem:[#allocation87_spill] sm:$0xff] }
 0x66e   :  { %8241 = vpow2.f32 %v5231_v36  ;;  %v2853_v36 = vadd.f32 %v2852_v3, %v11927_v58  ;;  %v11934_v3 = vld [vmem:[#allocation93_spill] sm:$0xff]  ;;  %v11944_v58 = vld [vmem:[#allocation103_spill] sm:$0xff] }
 0x66f   :  { %6726 = vmatpush1.bf16.msra.mxu1 %v11918_v1  ;;  %6790 = vmatpush1.bf16.msra.mxu0 %v11919_v37  ;;  %v11929_v37 = vld [vmem:[#allocation88_spill] sm:$0xff]  ;;  %8243 = vpow2.f32 %v5232_v28  ;;  %v11938_v28 = vld [vmem:[#allocation97_spill] sm:$0xff] }
 0x670   :  { %6728 = vmatprep.subr.bf16.mxu1 %v11921_v42  ;;  %6792 = vmatprep.subr.bf16.mxu0 %v11922_v10  ;;  %v11930_v10 = vld [vmem:[#allocation89_spill] sm:$0xff]  ;;  %8245 = vtanh.f32 %v2853_v36 }
 0x673   :  { %6730 = vmatpush1.bf16.msra.mxu1 %v11923_v13  ;;  %6794 = vmatpush1.bf16.msra.mxu0 %v11924_v22  ;;  %v11931_v13 = vld [vmem:[#allocation90_spill] sm:$0xff]  ;;  %v11946_v22 = vld [vmem:[#allocation105_spill] sm:$0xff] }
 0x674   :  { %6732 = vmatprep.subr.bf16.mxu1 %v11925_v39  ;;  %6796 = vmatprep.subr.bf16.mxu0 %v11926_v40  ;;  %v11932_v39 = vld [vmem:[#allocation91_spill] sm:$0xff]  ;;  %v11933_v40 = vld [vmem:[#allocation92_spill] sm:$0xff] }
 0x677   :  { %v8240_v1 = vpop.eup %8239  ;;  %6734 = vmatpush1.bf16.msra.mxu1 %v11928_v31  ;;  %6798 = vmatpush1.bf16.msra.mxu0 %v11929_v37  ;;  %v11935_v31 = vld [vmem:[#allocation94_spill] sm:$0xff]  ;;  %v11936_v37 = vld [vmem:[#allocation95_spill] sm:$0xff] }
 0x678   :  { %v8242_v30 = vpop.eup %8241  ;;  %v2860_v53 = vadd.f32 1.0, %v8240_v1  ;;  %6736 = vmatprep.subr.bf16.mxu1 %v11930_v10  ;;  %6800 = vmatprep.subr.bf16.mxu0 %v11931_v13  ;;  %v11937_v1 = vld [vmem:[#allocation96_spill] sm:$0xff]  ;;  %v11939_v10 = vld [vmem:[#allocation98_spill] sm:$0xff]  ;;  %v11943_v13 = vld [vmem:[#allocation169_spill] sm:$0xff] }
 0x679   :  { %v2866_v19 = vadd.f32 1.0, %v8242_v30  ;;  %v8244_v36 = vpop.eup %8243 }
 0x67a   :  { %8247 = vrcp.f32 %v2860_v53  ;;  %v8246_v30 = vpop.eup %8245  ;;  %v11940_v53 = vld [vmem:[#allocation99_spill] sm:$0xff] }
 0x67b   :  { %8249 = vrcp.f32 %v2866_v19  ;;  %6738 = vmatpush1.bf16.msra.mxu1 %v11932_v39  ;;  %6802 = vmatpush1.bf16.msra.mxu0 %v11933_v40  ;;  %v11941_v40 = vld [vmem:[#allocation101_spill] sm:$0xff] }
 0x67c   :  { %6740 = vmatprep.subr.bf16.mxu1 %v11934_v3  ;;  %6804 = vmatprep.subr.bf16.mxu0 %v11935_v31  ;;  %v11942_v3 = vld [vmem:[#allocation102_spill] sm:$0xff] }
 0x67f   :  { %6742 = vmatpush1.bf16.msra.mxu1 %v11936_v37  ;;  %6806 = vmatpush1.bf16.msra.mxu0 %v11937_v1  ;;  %v2873_v37 = vadd.f32 1.0, %v8244_v36  ;;  %v11951_v36 = vld [vmem:[#allocation108_spill] sm:$0xff] }
 0x680   :  { %6744 = vmatprep.subr.bf16.mxu1 %v11938_v28  ;;  %6808 = vmatprep.subr.bf16.mxu0 %v11939_v10  ;;  %v11945_v28 = vld [vmem:[#allocation104_spill] sm:$0xff] }
 0x681   :  { %8251 = vrcp.f32 %v2873_v37  ;;  %v11957_v37 = vld [vmem:[#allocation114_spill] sm:$0xff] }
 0x683   :  { %6746 = vmatpush1.bf16.msra.mxu1 %v11940_v53  ;;  %6810 = vmatpush1.bf16.msra.mxu0 %v11805_v59  ;;  %v11947_v53 = vld [vmem:[#allocation106_spill] sm:$0xff] }
 0x684   :  { %v8248_v19 = vpop.eup %8247  ;;  %6748 = vmatprep.subr.bf16.mxu1 %v11941_v40  ;;  %6812 = vmatprep.subr.bf16.mxu0 %v11942_v3  ;;  %v11969_v40 = vld [vmem:[#allocation132_spill] sm:$0xff] }
 0x685   :  { %v8250_v31 = vpop.eup %8249  ;;  %v2877_v39 = vmul.f32 %v8248_v19, %v8246_v30  ;;  %v11950_v30 = vld [vmem:[#allocation107_spill] sm:$0xff]  ;;  %v11953_v19 = vld [vmem:[#allocation110_spill] sm:$0xff] }
 0x686   :  { %v2876_v1 = vmul.f32 %v8250_v31, %v11943_v13  ;;  %v11952_v31 = vld [vmem:[#allocation109_spill] sm:$0xff] }
 0x687   :  { %6750 = vmatpush1.bf16.msra.mxu1 %v11944_v58  ;;  %6814 = vmatpush1.bf16.msra.mxu0 %v11945_v28  ;;  %v11958_v28 = vld [vmem:[#allocation115_spill] sm:$0xff]  ;;  %v11979_v58 = vld [vmem:[#allocation141_spill] sm:$0xff] }
 0x688   :  { %v2878_v10 = vadd.f32 %v2877_v39, %v2876_v1  ;;  %6752 = vmatprep.subr.bf16.mxu1 %v11946_v22  ;;  %6816 = vmatprep.subr.bf16.mxu0 %v11947_v53  ;;  %v11954_v39 = vld [vmem:[#allocation111_spill] sm:$0xff]  ;;  %v11955_v1 = vld [vmem:[#allocation112_spill] sm:$0xff]  ;;  %v11956_v53 = vld [vmem:[#allocation113_spill] sm:$0xff] }
 0x68a   :  { %8253 = vtanh.f32 %v2878_v10  ;;  %v10104_v3 = vsel %vm622_vm12, %v2878_v10, %v11943_v13  ;;  %v11959_v10 = vld [vmem:[#allocation116_spill] sm:$0xff] }
 0x68b   :  { %11949 = vst [vmem:[#allocation173_spill] sm:$0xff] %v10104_v3  ;;  %6754 = vmatpush1.bf16.msra.mxu1 %v11950_v30  ;;  %6818 = vmatpush1.bf16.msra.mxu0 %v11951_v36  ;;  %v8252_v22 = vpop.eup %8251  ;;  %v11960_v30 = vld [vmem:[#allocation123_spill] sm:$0xff]  ;;  %v11961_v36 = vld [vmem:[#allocation124_spill] sm:$0xff]  ;;  %v11984_v3 = vld [vmem:[#allocation146_spill] sm:$0xff] }
 0x68c   :  { %6756 = vmatprep.subr.bf16.mxu1 %v11952_v31  ;;  %6820 = vmatprep.subr.bf16.mxu0 %v11953_v19 }
 0x68f   :  { %6758 = vmatpush1.bf16.msra.mxu1 %v11954_v39  ;;  %6822 = vmatpush1.bf16.msra.mxu0 %v11955_v1  ;;  %v11978_v1 = vld [vmem:[#allocation55_spill] sm:$0xff] }
 0x690   :  { %6760 = vmatprep.subr.bf16.mxu1 %v11956_v53  ;;  %6824 = vmatprep.subr.bf16.mxu0 %v11957_v37  ;;  %v11971_v37 = vld [vmem:[#allocation134_spill] sm:$0xff]  ;;  %v11972_v53 = vld [vmem:[#allocation135_spill] sm:$0xff] }
 0x693   :  { %6762 = vmatpush1.bf16.msra.mxu1 %v11958_v28  ;;  %6826 = vmatpush1.bf16.msra.mxu0 %v11959_v10  ;;  %v11962_v10 = vld [vmem:[#allocation125_spill] sm:$0xff]  ;;  %v11963_v28 = vld [vmem:[#allocation126_spill] sm:$0xff] }
 0x694   :  { %v8254_v13 = vpop.eup %8253  ;;  %6828 = vmatprep.subr.bf16.mxu1 %v11960_v30  ;;  %6892 = vmatprep.subr.bf16.mxu0 %v11961_v36  ;;  %v11964_v30 = vld [vmem:[#allocation127_spill] sm:$0xff]  ;;  %v11970_v36 = vld [vmem:[#allocation133_spill] sm:$0xff] }
 0x695   :  { %v2880_v31 = vmul.f32 %v8254_v13, %v8252_v22  ;;  %v11965_v22 = vld [vmem:[#allocation128_spill] sm:$0xff]  ;;  %v11966_v13 = vld [vmem:[#allocation129_spill] sm:$0xff] }
 0x697   :  { %v10121_v39 = vsel %vm622_vm12, %v2880_v31, %v9898_v2  ;;  %v11967_v2 = vld [vmem:[#allocation130_spill] sm:$0xff]  ;;  %v11968_v31 = vld [vmem:[#allocation131_spill] sm:$0xff] }
 0x698   :  { %3288 = vmatprep.mubr.f32.mxu1 %v10121_v39  ;;  %3359 = vmatprep.mubr.f32.mxu0 %v10121_v39 }
 0x699   :  { %3289 = vmatmul.mubr.f32.vlgmr.msra.gmra.mrb[30].mxu1 %v10040_v38  ;;  %3360 = vmatmul.mubr.f32.vlgmr.msra.gmra.mrb[38].mxu0 %v10040_v38 }
 0x69a   :  { %6830 = vmatpush1.bf16.msra.mxu1 %v11962_v10  ;;  %6894 = vmatpush1.bf16.msra.mxu0 %v11963_v28  ;;  %v11973_v10 = vld [vmem:[#allocation136_spill] sm:$0xff]  ;;  %v11974_v28 = vld [vmem:[#allocation137_spill] sm:$0xff] }
 0x69b   :  { %6832 = vmatprep.subr.bf16.mxu1 %v11964_v30  ;;  %6896 = vmatprep.subr.bf16.mxu0 %v11965_v22  ;;  %v11975_v30 = vld [vmem:[#allocation138_spill] sm:$0xff]  ;;  %v11976_v22 = vld [vmem:[#allocation139_spill] sm:$0xff] }
 0x69e   :  { %6834 = vmatpush1.bf16.msra.mxu1 %v11966_v13  ;;  %6898 = vmatpush1.bf16.msra.mxu0 %v11967_v2  ;;  %v11977_v13 = vld [vmem:[#allocation140_spill] sm:$0xff] }
 0x69f   :  { %6836 = vmatprep.subr.bf16.mxu1 %v11968_v31  ;;  %6900 = vmatprep.subr.bf16.mxu0 %v11969_v40 }
 0x6a2   :  { %6838 = vmatpush1.bf16.msra.mxu1 %v11970_v36  ;;  %6902 = vmatpush1.bf16.msra.mxu0 %v11971_v37 }
 0x6a3   :  { %6840 = vmatprep.subr.bf16.mxu1 %v11972_v53  ;;  %6904 = vmatprep.subr.bf16.mxu0 %v11973_v10  ;;  %v11980_v53 = vld [vmem:[#allocation142_spill] sm:$0xff] }
 0x6a6   :  { %6842 = vmatpush1.bf16.msra.mxu1 %v11974_v28  ;;  %6906 = vmatpush1.bf16.msra.mxu0 %v11975_v30  ;;  %v11981_v28 = vld [vmem:[#allocation143_spill] sm:$0xff]  ;;  %v11982_v30 = vld [vmem:[#allocation144_spill] sm:$0xff] }
 0x6a7   :  { %6844 = vmatprep.subr.bf16.mxu1 %v11976_v22  ;;  %6908 = vmatprep.subr.bf16.mxu0 %v11977_v13  ;;  %v11983_v13 = vld [vmem:[#allocation145_spill] sm:$0xff] }
 0x6a8   :  { %v2949_v2 = vpop.f32.mrb[28].mxu1  ;;  %v3020_v31 = vpop.f32.mrb[36].mxu0 }
 0x6a9   :  { %v2950_v40 = vadd.f32 %v2949_v2, %v11978_v1  ;;  %v2951_v19 = vpop.f32.mrb[29].mxu1  ;;  %v3022_v36 = vpop.f32.mrb[37].mxu0  ;;  %v11985_v2 = vld [vmem:[#allocation147_spill] sm:$0xff]  ;;  %v11986_v1 = vld [vmem:[#allocation148_spill] sm:$0xff] }
 0x6aa   :  { %v2952_v37 = vadd.f32 %v2951_v19, %v9692_v41  ;;  %6846 = vmatpush1.bf16.msra.mxu1 %v11979_v58  ;;  %6910 = vmatpush1.bf16.msra.mxu0 %v11980_v53  ;;  %v3023_v19 = vadd.f32 %v3022_v36, %v9703_v54  ;;  %v11987_v58 = vld [vmem:[#allocation149_spill] sm:$0xff] }
 0x6ab   :  { %v5233_v10 = vmul.f32 -1.442695, %v2950_v40  ;;  %6848 = vmatprep.subr.bf16.mxu1 %v11981_v28  ;;  %6912 = vmatprep.subr.bf16.mxu0 %v11982_v30  ;;  %v11988_v40 = vld [vmem:[#allocation150_spill] sm:$0xff]  ;;  %v11989_v28 = vld [vmem:[#allocation151_spill] sm:$0xff] }
 0x6ac   :  { %v5234_v22 = vmul.f32 -1.442695, %v2952_v37  ;;  %v5235_v37 = vmul.f32 -1.442695, %v3023_v19  ;;  %v11994_v19 = vld [vmem:[#allocation158_spill] sm:$0xff] }
 0x6ad   :  { %8255 = vpow2.f32 %v5233_v10  ;;  %v3021_v10 = vadd.f32 %v3020_v31, %v11856_v25  ;;  %v11995_v31 = vld [vmem:[#allocation159_spill] sm:$0xff] }
 0x6ae   :  { %8257 = vpow2.f32 %v5234_v22  ;;  %6850 = vmatpush1.bf16.msra.mxu1 %v11983_v13  ;;  %6914 = vmatpush1.bf16.msra.mxu0 %v11984_v3  ;;  %v11990_v22 = vld [vmem:[#allocation153_spill] sm:$0xff]  ;;  %v11991_v3 = vld [vmem:[#allocation154_spill] sm:$0xff]  ;;  %v11992_v13 = vld [vmem:[#allocation155_spill] sm:$0xff] }
 0x6af   :  { %6852 = vmatprep.subr.bf16.mxu1 %v11985_v2  ;;  %6916 = vmatprep.subr.bf16.mxu0 %v11986_v1  ;;  %v11993_v1 = vld [vmem:[#allocation156_spill] sm:$0xff]  ;;  %8259 = vpow2.f32 %v5235_v37  ;;  %v12000_v37 = vld [vmem:[#allocation167_spill] sm:$0xff] }
 0x6b0   :  { %8261 = vtanh.f32 %v3021_v10 }
 0x6b2   :  { %6854 = vmatpush1.bf16.msra.mxu1 %v11987_v58  ;;  %6918 = vmatpush1.bf16.msra.mxu0 %v11988_v40 }
 0x6b3   :  { %6856 = vmatprep.subr.bf16.mxu1 %v11989_v28  ;;  %6920 = vmatprep.subr.bf16.mxu0 %v11855_v61 }
 0x6b6   :  { %6858 = vmatpush1.bf16.msra.mxu1 %v11990_v22  ;;  %6922 = vmatpush1.bf16.msra.mxu0 %v11991_v3  ;;  %v11996_v22 = vld [vmem:[#allocation160_spill] sm:$0xff]  ;;  %v11997_v3 = vld [vmem:[#allocation161_spill] sm:$0xff] }
 0x6b7   :  { %v8256_v2 = vpop.eup %8255  ;;  %6860 = vmatprep.subr.bf16.mxu1 %v11992_v13  ;;  %6924 = vmatprep.subr.bf16.mxu0 %v11993_v1  ;;  %v11998_v13 = vld [vmem:[#allocation162_spill] sm:$0xff]  ;;  %v11999_v1 = vld [vmem:[#allocation163_spill] sm:$0xff] }
 0x6b8   :  { %v8258_v36 = vpop.eup %8257  ;;  %v3028_v58 = vadd.f32 1.0, %v8256_v2 }
 0x6b9   :  { %v3034_v40 = vadd.f32 1.0, %v8258_v36  ;;  %v8260_v2 = vpop.eup %8259 }
 0x6ba   :  { %8263 = vrcp.f32 %v3028_v58  ;;  %6862 = vmatpush1.bf16.msra.mxu1 %v11861_v18  ;;  %6926 = vmatpush1.bf16.msra.mxu0 %v11994_v19  ;;  %v8262_v58 = vpop.eup %8261 }
 0x6bb   :  { %8265 = vrcp.f32 %v3034_v40  ;;  %6864 = vmatprep.subr.bf16.mxu1 %v11995_v31  ;;  %6928 = vmatprep.subr.bf16.mxu0 %v11996_v22  ;;  %v12001_v40 = vld [vmem:[#allocation168_spill] sm:$0xff] }
 0x6be   :  { %6866 = vmatpush1.bf16.msra.mxu1 %v11997_v3  ;;  %6930 = vmatpush1.bf16.msra.mxu0 %v11998_v13  ;;  %v3041_v3 = vadd.f32 1.0, %v8260_v2 }
 0x6bf   :  { %6868 = vmatprep.subr.bf16.mxu1 %v11999_v1  ;;  %6932 = vmatprep.subr.bf16.mxu0 %v11868_v32 }
 0x6c0   :  { %8267 = vrcp.f32 %v3041_v3 }
 0x6c2   :  { %6870 = vmatpush1.bf16.msra.mxu1 %v11869_v45  ;;  %6934 = vmatpush1.bf16.msra.mxu0 %v11738_v63 }
 0x6c3   :  { %6872 = vmatprep.subr.bf16.mxu1 %v12000_v37  ;;  %6936 = vmatprep.subr.bf16.mxu0 %v12001_v40 }
 0x6c4   :  { %v8264_v10 = vpop.eup %8263 }
 0x6c5   :  { %v8266_v36 = vpop.eup %8265  ;;  %v3045_v22 = vmul.f32 %v8264_v10, %v8262_v58  ;;  %v12005_v10 = vld [vmem:[#allocation22_spill] sm:$0xff]  ;;  %v12007_v58 = vld [vmem:[#allocation24_spill] sm:$0xff] }
 0x6c6   :  { %v3044_v13 = vmul.f32 %v8266_v36, %v9963_v52  ;;  %6874 = vmatpush1.bf16.msra.mxu1 %v11741_v6  ;;  %6938 = vmatpush1.bf16.msra.mxu0 %v11742_v51  ;;  %v12006_v36 = vld [vmem:[#allocation23_spill] sm:$0xff] }
 0x6c7   :  { %6876 = vmatprep.subr.bf16.mxu1 %v11743_v56  ;;  %6940 = vmatprep.subr.bf16.mxu0 %v11744_v60 }
 0x6c8   :  { %v3046_v63 = vadd.f32 %v3045_v22, %v3044_v13  ;;  %v12004_v22 = vld [vmem:[#allocation21_spill] sm:$0xff] }
 0x6ca   :  { %6878 = vmatpush1.bf16.msra.mxu1 %v11745_v62  ;;  %6942 = vmatpush1.bf16.msra.mxu0 %v11746_v9  ;;  %8269 = vtanh.f32 %v3046_v63  ;;  %v10185_v2 = vsel %vm616_vm11, %v3046_v63, %v9963_v52  ;;  %v8268_v3 = vpop.eup %8267 }
 0x6cb   :  { %6880 = vmatprep.subr.bf16.mxu1 %v9485_v16  ;;  %6944 = vmatprep.subr.bf16.mxu0 %v9487_v44 }
 0x6ce   :  { %6882 = vmatpush1.bf16.msra.mxu1 %v9491_v43  ;;  %6946 = vmatpush1.bf16.msra.mxu0 %v9493_v55 }
 0x6cf   :  { %6884 = vmatprep.subr.bf16.mxu1 %v9497_v24  ;;  %6948 = vmatprep.subr.bf16.mxu0 %v9499_v17 }
 0x6d2   :  { %6886 = vmatpush1.bf16.msra.mxu1 %v9503_v8  ;;  %6950 = vmatpush1.bf16.msra.mxu0 %v9505_v23 }
 0x6d3   :  { %6888 = vmatprep.subr.bf16.mxu1 %v9509_v34  ;;  %6952 = vmatprep.subr.bf16.mxu0 %v9511_v27 }
 0x6d4   :  { %v8270_v63 = vpop.eup %8269 }
 0x6d5   :  { %v3048_v52 = vmul.f32 %v8270_v63, %v8268_v3  ;;  %v12008_v3 = vld [vmem:[#allocation25_spill] sm:$0xff]  ;;  %v12009_v63 = vld [vmem:[#allocation26_spill] sm:$0xff] }
 0x6d6   :  { %6890 = vmatpush1.bf16.msra.mxu1 %v9515_v7  ;;  %6954 = vmatpush1.bf16.msra.mxu0 %v9517_v33 }
 0x6d7   :  { %v10202_v13 = vsel %vm616_vm11, %v3048_v52, %v9982_v57  ;;  %6956 = vmatprep.subr.bf16.mxu1 %v8750_v46  ;;  %6988 = vmatprep.subr.bf16.mxu0 %v8753_v49  ;;  %v12003_v57 = vld [vmem:[#allocation20_spill] sm:$0xff]  ;;  %v12010_v52 = vld [vmem:[#allocation27_spill] sm:$0xff] }
 0x6d8   :  { %3456 = vmatprep.mubr.f32.mxu1 %v10202_v13  ;;  %3527 = vmatprep.mubr.f32.mxu0 %v10202_v13 }
 0x6d9   :  { %3457 = vmatmul.mubr.f32.vlgmr.msra.gmra.mrb[32].mxu1 %v10121_v39  ;;  %3528 = vmatmul.mubr.f32.vlgmr.msra.gmra.mrb[40].mxu0 %v10121_v39 }
 0x6da   :  { %6958 = vmatpush1.bf16.msra.mxu1 %v8773_v4  ;;  %6990 = vmatpush1.bf16.msra.mxu0 %v8775_v5 }
 0x6db   :  { %6960 = vmatprep.subr.bf16.mxu1 %v8778_v14  ;;  %6992 = vmatprep.subr.bf16.mxu0 %v8780_v15  ;;  %v12011_v15 = vld [vmem:[#allocation28_spill] sm:$0xff]  ;;  %v12030_v14 = vld [vmem:[#allocation49_spill] sm:$0xff] }
 0x6dc   :  { %3629 = vmatprep.mubr.f32.mxu1 %v11436_v12  ;;  %3700 = vmatprep.mubr.f32.mxu0 %v11436_v12  ;;  %v12012_v12 = vld [vmem:[#allocation29_spill] sm:$0xff] }
 0x6de   :  { %6962 = vmatpush1.bf16.msra.mxu1 %v8785_v21  ;;  %6994 = vmatpush1.bf16.msra.mxu0 %v12003_v57  ;;  %v12013_v21 = vld [vmem:[#allocation30_spill] sm:$0xff]  ;;  %v12014_v57 = vld [vmem:[#allocation31_spill] sm:$0xff] }
 0x6df   :  { %6964 = vmatprep.subr.bf16.mxu1 %v12004_v22  ;;  %6996 = vmatprep.subr.bf16.mxu0 %v12005_v10  ;;  %v12015_v22 = vld [vmem:[#allocation32_spill] sm:$0xff]  ;;  %v12016_v10 = vld [vmem:[#allocation33_spill] sm:$0xff] }
 0x6e2   :  { %6966 = vmatpush1.bf16.msra.mxu1 %v12006_v36  ;;  %6998 = vmatpush1.bf16.msra.mxu0 %v12007_v58  ;;  %v12017_v36 = vld [vmem:[#allocation34_spill] sm:$0xff]  ;;  %v12018_v58 = vld [vmem:[#allocation35_spill] sm:$0xff] }
 0x6e3   :  { %6968 = vmatprep.subr.bf16.mxu1 %v12008_v3  ;;  %7000 = vmatprep.subr.bf16.mxu0 %v12009_v63  ;;  %v12019_v3 = vld [vmem:[#allocation36_spill] sm:$0xff]  ;;  %v12020_v63 = vld [vmem:[#allocation37_spill] sm:$0xff] }
 0x6e6   :  { %6970 = vmatpush1.bf16.msra.mxu1 %v12010_v52  ;;  %7002 = vmatpush1.bf16.msra.mxu0 %v12011_v15  ;;  %v12021_v52 = vld [vmem:[#allocation38_spill] sm:$0xff]  ;;  %v12022_v15 = vld [vmem:[#allocation39_spill] sm:$0xff] }
 0x6e7   :  { %6972 = vmatprep.subr.bf16.mxu1 %v12012_v12  ;;  %7004 = vmatprep.subr.bf16.mxu0 %v12013_v21  ;;  %v12023_v12 = vld [vmem:[#allocation40_spill] sm:$0xff]  ;;  %v12024_v21 = vld [vmem:[#allocation41_spill] sm:$0xff] }
 0x6ea   :  { %6974 = vmatpush1.bf16.msra.mxu1 %v12014_v57  ;;  %7006 = vmatpush1.bf16.msra.mxu0 %v12015_v22  ;;  %v12025_v57 = vld [vmem:[#allocation42_spill] sm:$0xff]  ;;  %v12026_v22 = vld [vmem:[#allocation43_spill] sm:$0xff] }
 0x6eb   :  { %6976 = vmatprep.subr.bf16.mxu1 %v12016_v10  ;;  %7008 = vmatprep.subr.bf16.mxu0 %v12017_v36  ;;  %v12027_v10 = vld [vmem:[#allocation44_spill] sm:$0xff]  ;;  %v12028_v36 = vld [vmem:[#allocation45_spill] sm:$0xff] }
 0x6ee   :  { %6978 = vmatpush1.bf16.msra.mxu1 %v12018_v58  ;;  %7010 = vmatpush1.bf16.msra.mxu0 %v12019_v3  ;;  %v12029_v58 = vld [vmem:[#allocation46_spill] sm:$0xff] }
 0x6ef   :  { %6980 = vmatprep.subr.bf16.mxu1 %v12020_v63  ;;  %7012 = vmatprep.subr.bf16.mxu0 %v12021_v52 }
 0x6f2   :  { %6982 = vmatpush1.bf16.msra.mxu1 %v12022_v15  ;;  %7014 = vmatpush1.bf16.msra.mxu0 %v12023_v12 }
 0x6f3   :  { %6984 = vmatprep.subr.bf16.mxu1 %v12024_v21  ;;  %7016 = vmatprep.subr.bf16.mxu0 %v12025_v57 }
 0x6f6   :  { %6986 = vmatpush1.bf16.msra.mxu1 %v12026_v22  ;;  %7018 = vmatpush1.bf16.msra.mxu0 %v12027_v10 }
 0x6f7   :  { %7020 = vmatprep.subr.bf16.mxu1 %v12028_v36  ;;  %7084 = vmatprep.subr.bf16.mxu0 %v12029_v58 }
 0x729   :  { %v3122_v3 = vpop.f32.mrb[10].mxu1  ;;  %v3193_v63 = vpop.f32.mrb[18].mxu0 }
 0x72a   :  { %v8013_v52 = vadd.f32 %v3122_v3, %v12030_v14  ;;  %v3124_v5 = vpop.f32.mrb[11].mxu1  ;;  %v3195_v15 = vpop.f32.mrb[19].mxu0  ;;  %v8029_v10 = vadd.f32 %v3193_v63, %v11622_v0  ;;  %v12036_v63 = vld [vmem:[#allocation63_spill] sm:$0xff] }
 0x72b   :  { %v8014_v12 = vadd.f32 %v3124_v5, %v8945_v26  ;;  %v8030_v22 = vadd.f32 %v3195_v15, %v8952_v50  ;;  %v10249_v15 = vpop.permute.xlu1 %632 }
 0x72c   :  { %v5236_v4 = vmul.f32 -1.442695, %v8013_v52  ;;  %12031 = vst [vmem:[#allocation56_spill] sm:$0xff] %v10249_v15  ;;  %vm634_vm14 = vcmp.eq.s32.totalorder %v10249_v15, 1  ;;  %v12047_v15 = vld [vmem:[#allocation74_spill] sm:$0xff] }
 0x72d   :  { %v5237_v21 = vmul.f32 -1.442695, %v8014_v12  ;;  %v5238_v57 = vmul.f32 -1.442695, %v8030_v22 }
 0x72e   :  { %8271 = vpow2.f32 %v5236_v4 }
 0x72f   :  { %8273 = vpow2.f32 %v5237_v21 }
 0x730   :  { %8275 = vpow2.f32 %v5238_v57 }
 0x731   :  { %8277 = vtanh.f32 %v8029_v10 }
 0x738   :  { %v8272_v36 = vpop.eup %8271 }
 0x739   :  { %v8274_v49 = vpop.eup %8273  ;;  %v3201_v58 = vadd.f32 1.0, %v8272_v36  ;;  %v12033_v36 = vld [vmem:[#allocation60_spill] sm:$0xff] }
 0x73a   :  { %v3207_v46 = vadd.f32 1.0, %v8274_v49  ;;  %v8276_v3 = vpop.eup %8275 }
 0x73b   :  { %8279 = vrcp.f32 %v3201_v58  ;;  %v8278_v14 = vpop.eup %8277  ;;  %v3214_v4 = vadd.f32 1.0, %v8276_v3  ;;  %v12034_v58 = vld [vmem:[#allocation61_spill] sm:$0xff]  ;;  %v12037_v3 = vld [vmem:[#allocation64_spill] sm:$0xff] }
 0x73c   :  { %8281 = vrcp.f32 %v3207_v46 }
 0x73d   :  { %8283 = vrcp.f32 %v3214_v4  ;;  %v12041_v4 = vld [vmem:[#allocation68_spill] sm:$0xff] }
 0x745   :  { %v8280_v5 = vpop.eup %8279 }
 0x746   :  { %v8282_v52 = vpop.eup %8281  ;;  %v3218_v12 = vmul.f32 %v8280_v5, %v8278_v14  ;;  %v12038_v5 = vld [vmem:[#allocation65_spill] sm:$0xff] }
 0x747   :  { %v3217_v21 = vmul.f32 %v8282_v52, %v10035_v29  ;;  %v8284_v46 = vpop.eup %8283  ;;  %v12039_v52 = vld [vmem:[#allocation66_spill] sm:$0xff] }
 0x749   :  { %v3219_v22 = vadd.f32 %v3218_v12, %v3217_v21  ;;  %v12040_v12 = vld [vmem:[#allocation67_spill] sm:$0xff]  ;;  %v12042_v21 = vld [vmem:[#allocation69_spill] sm:$0xff] }
 0x74b   :  { %8285 = vtanh.f32 %v3219_v22  ;;  %v10255_v49 = vsel %vm634_vm14, %v3219_v22, %v10035_v29  ;;  %v12032_v29 = vld [vmem:[#allocation59_spill] sm:$0xff]  ;;  %v12043_v22 = vld [vmem:[#allocation70_spill] sm:$0xff] }
 0x755   :  { %v8286_v57 = vpop.eup %8285 }
 0x756   :  { %v3221_v10 = vmul.f32 %v8286_v57, %v8284_v46  ;;  %v12044_v46 = vld [vmem:[#allocation71_spill] sm:$0xff]  ;;  %v12045_v57 = vld [vmem:[#allocation72_spill] sm:$0xff] }
 0x758   :  { %v10260_v14 = vsel %vm634_vm14, %v3221_v10, %v10040_v38  ;;  %v12035_v38 = vld [vmem:[#allocation62_spill] sm:$0xff]  ;;  %v12046_v10 = vld [vmem:[#allocation73_spill] sm:$0xff] }
 0x759   :  { %3630 = vmatmul.mubr.f32.vlgmr.msra.gmra.mrb[12].mxu1 %v10260_v14  ;;  %3701 = vmatmul.mubr.f32.vlgmr.msra.gmra.mrb[20].mxu0 %v10260_v14 }
 0x75a   :  { %7022 = vmatpush1.bf16.msra.mxu1 %v11625_v35  ;;  %7086 = vmatpush1.bf16.msra.mxu0 %v11761_v20 }
 0x75b   :  { %7024 = vmatprep.subr.bf16.mxu1 %v11762_v48  ;;  %7088 = vmatprep.subr.bf16.mxu0 %v11897_v47 }
 0x75e   :  { %7026 = vmatpush1.bf16.msra.mxu1 %v12032_v29  ;;  %7090 = vmatpush1.bf16.msra.mxu0 %v12033_v36  ;;  %v12054_v36 = vld [vmem:[#allocation80_spill] sm:$0xff] }
 0x75f   :  { %7028 = vmatprep.subr.bf16.mxu1 %v12034_v58  ;;  %7092 = vmatprep.subr.bf16.mxu0 %v12035_v38  ;;  %v12049_v58 = vld [vmem:[#allocation75_spill] sm:$0xff] }
 0x762   :  { %7030 = vmatpush1.bf16.msra.mxu1 %v12036_v63  ;;  %7094 = vmatpush1.bf16.msra.mxu0 %v12037_v3  ;;  %v12048_v63 = vld [vmem:[#allocation119_spill] sm:$0xff] }
 0x763   :  { %7032 = vmatprep.subr.bf16.mxu1 %v12038_v5  ;;  %7096 = vmatprep.subr.bf16.mxu0 %v12039_v52 }
 0x766   :  { %7034 = vmatpush1.bf16.msra.mxu1 %v12040_v12  ;;  %7098 = vmatpush1.bf16.msra.mxu0 %v12041_v4 }
 0x767   :  { %7036 = vmatprep.subr.bf16.mxu1 %v12042_v21  ;;  %7100 = vmatprep.subr.bf16.mxu0 %v12043_v22  ;;  %v12050_v21 = vld [vmem:[#allocation76_spill] sm:$0xff] }
 0x76a   :  { %7038 = vmatpush1.bf16.msra.mxu1 %v12044_v46  ;;  %7102 = vmatpush1.bf16.msra.mxu0 %v12045_v57  ;;  %v12051_v46 = vld [vmem:[#allocation77_spill] sm:$0xff]  ;;  %v12052_v57 = vld [vmem:[#allocation78_spill] sm:$0xff] }
 0x76b   :  { %7040 = vmatprep.subr.bf16.mxu1 %v12046_v10  ;;  %7104 = vmatprep.subr.bf16.mxu0 %v12047_v15  ;;  %v12053_v15 = vld [vmem:[#allocation79_spill] sm:$0xff] }
 0x76c   :  { %v3290_v3 = vpop.f32.mrb[30].mxu1  ;;  %v3361_v5 = vpop.f32.mrb[38].mxu0 }
 0x76d   :  { %v3291_v52 = vadd.f32 %v3290_v3, %v12048_v63  ;;  %v3292_v38 = vpop.f32.mrb[31].mxu1  ;;  %v3363_v12 = vpop.f32.mrb[39].mxu0  ;;  %v12055_v3 = vld [vmem:[#allocation82_spill] sm:$0xff] }
 0x76e   :  { %v3293_v4 = vadd.f32 %v3292_v38, %v11779_v11  ;;  %7042 = vmatpush1.bf16.msra.mxu1 %v12049_v58  ;;  %7106 = vmatpush1.bf16.msra.mxu0 %v12050_v21  ;;  %v12056_v38 = vld [vmem:[#allocation121_spill] sm:$0xff]  ;;  %v12057_v58 = vld [vmem:[#allocation83_spill] sm:$0xff] }
 0x76f   :  { %v5239_v22 = vmul.f32 -1.442695, %v3291_v52  ;;  %7044 = vmatprep.subr.bf16.mxu1 %v12051_v46  ;;  %7108 = vmatprep.subr.bf16.mxu0 %v12052_v57  ;;  %v3364_v11 = vadd.f32 %v3363_v12, %v12056_v38  ;;  %v12058_v52 = vld [vmem:[#allocation84_spill] sm:$0xff]  ;;  %v12059_v46 = vld [vmem:[#allocation85_spill] sm:$0xff]  ;;  %v12060_v57 = vld [vmem:[#allocation86_spill] sm:$0xff] }
 0x770   :  { %v5240_v10 = vmul.f32 -1.442695, %v3293_v4  ;;  %v12064_v21 = vld [vmem:[#allocation89_spill] sm:$0xff] }
 0x771   :  { %8287 = vpow2.f32 %v5239_v22  ;;  %v5241_v4 = vmul.f32 -1.442695, %v3364_v11  ;;  %v12061_v22 = vld [vmem:[#allocation122_spill] sm:$0xff]  ;;  %v12067_v11 = vld [vmem:[#allocation92_spill] sm:$0xff] }
 0x772   :  { %8289 = vpow2.f32 %v5240_v10  ;;  %7046 = vmatpush1.bf16.msra.mxu1 %v12053_v15  ;;  %7110 = vmatpush1.bf16.msra.mxu0 %v12054_v36  ;;  %v3362_v10 = vadd.f32 %v3361_v5, %v12061_v22  ;;  %v12062_v15 = vld [vmem:[#allocation87_spill] sm:$0xff]  ;;  %v12063_v36 = vld [vmem:[#allocation88_spill] sm:$0xff]  ;;  %v12068_v5 = vld [vmem:[#allocation93_spill] sm:$0xff] }
 0x773   :  { %7048 = vmatprep.subr.bf16.mxu1 %v11921_v42  ;;  %7112 = vmatprep.subr.bf16.mxu0 %v12055_v3  ;;  %v12065_v3 = vld [vmem:[#allocation90_spill] sm:$0xff]  ;;  %8291 = vpow2.f32 %v5241_v4  ;;  %v12078_v22 = vld [vmem:[#allocation103_spill] sm:$0xff] }
 0x774   :  { %8293 = vtanh.f32 %v3362_v10  ;;  %v12074_v10 = vld [vmem:[#allocation99_spill] sm:$0xff] }
 0x776   :  { %7050 = vmatpush1.bf16.msra.mxu1 %v12057_v58  ;;  %7114 = vmatpush1.bf16.msra.mxu0 %v12058_v52 }
 0x777   :  { %7052 = vmatprep.subr.bf16.mxu1 %v12059_v46  ;;  %7116 = vmatprep.subr.bf16.mxu0 %v12060_v57  ;;  %v12066_v46 = vld [vmem:[#allocation91_spill] sm:$0xff] }
 0x77a   :  { %7054 = vmatpush1.bf16.msra.mxu1 %v12062_v15  ;;  %7118 = vmatpush1.bf16.msra.mxu0 %v12063_v36  ;;  %v12069_v15 = vld [vmem:[#allocation94_spill] sm:$0xff]  ;;  %v12070_v36 = vld [vmem:[#allocation95_spill] sm:$0xff] }
 0x77b   :  { %v8288_v42 = vpop.eup %8287  ;;  %7056 = vmatprep.subr.bf16.mxu1 %v12064_v21  ;;  %7120 = vmatprep.subr.bf16.mxu0 %v12065_v3  ;;  %v12071_v21 = vld [vmem:[#allocation96_spill] sm:$0xff]  ;;  %v12072_v3 = vld [vmem:[#allocation97_spill] sm:$0xff] }
 0x77c   :  { %v8290_v12 = vpop.eup %8289  ;;  %v3369_v58 = vadd.f32 1.0, %v8288_v42  ;;  %v12073_v42 = vld [vmem:[#allocation98_spill] sm:$0xff] }
 0x77d   :  { %v3375_v52 = vadd.f32 1.0, %v8290_v12  ;;  %v8292_v4 = vpop.eup %8291  ;;  %v12075_v12 = vld [vmem:[#allocation101_spill] sm:$0xff] }
 0x77e   :  { %8295 = vrcp.f32 %v3369_v58  ;;  %7058 = vmatpush1.bf16.msra.mxu1 %v12066_v46  ;;  %7122 = vmatpush1.bf16.msra.mxu0 %v12067_v11  ;;  %v8294_v58 = vpop.eup %8293  ;;  %v12077_v46 = vld [vmem:[#allocation173_spill] sm:$0xff] }
 0x77f   :  { %8297 = vrcp.f32 %v3375_v52  ;;  %7060 = vmatprep.subr.bf16.mxu1 %v12068_v5  ;;  %7124 = vmatprep.subr.bf16.mxu0 %v12069_v15  ;;  %v12076_v52 = vld [vmem:[#allocation102_spill] sm:$0xff] }
 0x782   :  { %7062 = vmatpush1.bf16.msra.mxu1 %v12070_v36  ;;  %7126 = vmatpush1.bf16.msra.mxu0 %v12071_v21  ;;  %v3382_v36 = vadd.f32 1.0, %v8292_v4 }
 0x783   :  { %7064 = vmatprep.subr.bf16.mxu1 %v12072_v3  ;;  %7128 = vmatprep.subr.bf16.mxu0 %v12073_v42  ;;  %v12079_v3 = vld [vmem:[#allocation104_spill] sm:$0xff]  ;;  %v12080_v42 = vld [vmem:[#allocation105_spill] sm:$0xff] }
 0x784   :  { %8299 = vrcp.f32 %v3382_v36  ;;  %v12091_v36 = vld [vmem:[#allocation114_spill] sm:$0xff] }
 0x786   :  { %7066 = vmatpush1.bf16.msra.mxu1 %v12074_v10  ;;  %7130 = vmatpush1.bf16.msra.mxu0 %v11805_v59  ;;  %v12081_v10 = vld [vmem:[#allocation106_spill] sm:$0xff] }
 0x787   :  { %7068 = vmatprep.subr.bf16.mxu1 %v12075_v12  ;;  %7132 = vmatprep.subr.bf16.mxu0 %v12076_v52  ;;  %v12082_v12 = vld [vmem:[#allocation107_spill] sm:$0xff]  ;;  %v12083_v52 = vld [vmem:[#allocation108_spill] sm:$0xff] }
 0x788   :  { %v8296_v5 = vpop.eup %8295 }
 0x789   :  { %v8298_v15 = vpop.eup %8297  ;;  %v3386_v11 = vmul.f32 %v8296_v5, %v8294_v58  ;;  %v12087_v58 = vld [vmem:[#allocation110_spill] sm:$0xff]  ;;  %v12103_v5 = vld [vmem:[#allocation132_spill] sm:$0xff] }
 0x78a   :  { %v3385_v21 = vmul.f32 %v8298_v15, %v12077_v46  ;;  %7070 = vmatpush1.bf16.msra.mxu1 %v12078_v22  ;;  %7134 = vmatpush1.bf16.msra.mxu0 %v12079_v3  ;;  %v12086_v15 = vld [vmem:[#allocation109_spill] sm:$0xff]  ;;  %v12088_v3 = vld [vmem:[#allocation111_spill] sm:$0xff] }
 0x78b   :  { %7072 = vmatprep.subr.bf16.mxu1 %v12080_v42  ;;  %7136 = vmatprep.subr.bf16.mxu0 %v12081_v10  ;;  %v12089_v42 = vld [vmem:[#allocation112_spill] sm:$0xff]  ;;  %v12094_v10 = vld [vmem:[#allocation123_spill] sm:$0xff] }
 0x78c   :  { %v3387_v59 = vadd.f32 %v3386_v11, %v3385_v21  ;;  %v12090_v21 = vld [vmem:[#allocation113_spill] sm:$0xff]  ;;  %v12092_v11 = vld [vmem:[#allocation115_spill] sm:$0xff] }
 0x78e   :  { %8301 = vtanh.f32 %v3387_v59  ;;  %7074 = vmatpush1.bf16.msra.mxu1 %v12082_v12  ;;  %7138 = vmatpush1.bf16.msra.mxu0 %v12083_v52  ;;  %v10326_v4 = vsel %vm628_vm13, %v3387_v59, %v12077_v46  ;;  %v12093_v52 = vld [vmem:[#allocation116_spill] sm:$0xff]  ;;  %v8300_v12 = vpop.eup %8299 }
 0x78f   :  { %12085 = vst [vmem:[#allocation57_spill] sm:$0xff] %v10326_v4  ;;  %7076 = vmatprep.subr.bf16.mxu1 %v12086_v15  ;;  %7140 = vmatprep.subr.bf16.mxu0 %v12087_v58  ;;  %v12095_v59 = vld [vmem:[#allocation124_spill] sm:$0xff]  ;;  %v12113_v4 = vld [vmem:[#allocation141_spill] sm:$0xff] }
 0x792   :  { %7078 = vmatpush1.bf16.msra.mxu1 %v12088_v3  ;;  %7142 = vmatpush1.bf16.msra.mxu0 %v12089_v42  ;;  %v12112_v42 = vld [vmem:[#allocation55_spill] sm:$0xff] }
 0x793   :  { %7080 = vmatprep.subr.bf16.mxu1 %v12090_v21  ;;  %7144 = vmatprep.subr.bf16.mxu0 %v12091_v36  ;;  %v12105_v36 = vld [vmem:[#allocation134_spill] sm:$0xff]  ;;  %v12106_v21 = vld [vmem:[#allocation135_spill] sm:$0xff] }
 0x796   :  { %7082 = vmatpush1.bf16.msra.mxu1 %v12092_v11  ;;  %7146 = vmatpush1.bf16.msra.mxu0 %v12093_v52  ;;  %v12096_v52 = vld [vmem:[#allocation125_spill] sm:$0xff] }
 0x797   :  { %7148 = vmatprep.subr.bf16.mxu1 %v12094_v10  ;;  %7212 = vmatprep.subr.bf16.mxu0 %v12095_v59  ;;  %v12097_v10 = vld [vmem:[#allocation126_spill] sm:$0xff]  ;;  %v12098_v59 = vld [vmem:[#allocation127_spill] sm:$0xff]  ;;  %v12104_v11 = vld [vmem:[#allocation133_spill] sm:$0xff] }
 0x798   :  { %v8302_v46 = vpop.eup %8301 }
 0x799   :  { %v3389_v15 = vmul.f32 %v8302_v46, %v8300_v12  ;;  %v12099_v12 = vld [vmem:[#allocation128_spill] sm:$0xff]  ;;  %v12100_v46 = vld [vmem:[#allocation129_spill] sm:$0xff] }
 0x79b   :  { %v10341_v3 = vsel %vm628_vm13, %v3389_v15, %v10121_v39  ;;  %v12101_v39 = vld [vmem:[#allocation130_spill] sm:$0xff]  ;;  %v12102_v15 = vld [vmem:[#allocation131_spill] sm:$0xff] }
 0x79c   :  { %3797 = vmatprep.mubr.f32.mxu1 %v10341_v3  ;;  %3868 = vmatprep.mubr.f32.mxu0 %v10341_v3 }
 0x79d   :  { %3798 = vmatmul.mubr.f32.vlgmr.msra.gmra.mrb[34].mxu1 %v10260_v14  ;;  %3869 = vmatmul.mubr.f32.vlgmr.msra.gmra.mrb[42].mxu0 %v10260_v14 }
 0x79e   :  { %7150 = vmatpush1.bf16.msra.mxu1 %v12096_v52  ;;  %7214 = vmatpush1.bf16.msra.mxu0 %v12097_v10  ;;  %v12107_v52 = vld [vmem:[#allocation136_spill] sm:$0xff]  ;;  %v12108_v10 = vld [vmem:[#allocation137_spill] sm:$0xff] }
 0x79f   :  { %7152 = vmatprep.subr.bf16.mxu1 %v12098_v59  ;;  %7216 = vmatprep.subr.bf16.mxu0 %v12099_v12  ;;  %v12109_v59 = vld [vmem:[#allocation138_spill] sm:$0xff]  ;;  %v12110_v12 = vld [vmem:[#allocation139_spill] sm:$0xff] }
 0x7a2   :  { %7154 = vmatpush1.bf16.msra.mxu1 %v12100_v46  ;;  %7218 = vmatpush1.bf16.msra.mxu0 %v12101_v39  ;;  %v12111_v46 = vld [vmem:[#allocation140_spill] sm:$0xff] }
 0x7a3   :  { %7156 = vmatprep.subr.bf16.mxu1 %v12102_v15  ;;  %7220 = vmatprep.subr.bf16.mxu0 %v12103_v5 }
 0x7a6   :  { %7158 = vmatpush1.bf16.msra.mxu1 %v12104_v11  ;;  %7222 = vmatpush1.bf16.msra.mxu0 %v12105_v36 }
 0x7a7   :  { %7160 = vmatprep.subr.bf16.mxu1 %v12106_v21  ;;  %7224 = vmatprep.subr.bf16.mxu0 %v12107_v52 }
 0x7aa   :  { %7162 = vmatpush1.bf16.msra.mxu1 %v12108_v10  ;;  %7226 = vmatpush1.bf16.msra.mxu0 %v12109_v59  ;;  %v12114_v10 = vld [vmem:[#allocation143_spill] sm:$0xff]  ;;  %v12116_v59 = vld [vmem:[#allocation146_spill] sm:$0xff] }
 0x7ab   :  { %7164 = vmatprep.subr.bf16.mxu1 %v12110_v12  ;;  %7228 = vmatprep.subr.bf16.mxu0 %v12111_v46  ;;  %v12115_v46 = vld [vmem:[#allocation145_spill] sm:$0xff] }
 0x7ac   :  { %v3458_v39 = vpop.f32.mrb[32].mxu1  ;;  %v3529_v15 = vpop.f32.mrb[40].mxu0 }
 0x7ad   :  { %v3459_v5 = vadd.f32 %v3458_v39, %v12112_v42  ;;  %v3460_v58 = vpop.f32.mrb[33].mxu1  ;;  %v3531_v11 = vpop.f32.mrb[41].mxu0  ;;  %v12117_v39 = vld [vmem:[#allocation147_spill] sm:$0xff]  ;;  %v12118_v42 = vld [vmem:[#allocation148_spill] sm:$0xff] }
 0x7ae   :  { %v3461_v36 = vadd.f32 %v3460_v58, %v9692_v41  ;;  %7166 = vmatpush1.bf16.msra.mxu1 %v12113_v4  ;;  %7230 = vmatpush1.bf16.msra.mxu0 %v11980_v53  ;;  %v3532_v58 = vadd.f32 %v3531_v11, %v9703_v54  ;;  %v12119_v4 = vld [vmem:[#allocation149_spill] sm:$0xff] }
 0x7af   :  { %v5242_v52 = vmul.f32 -1.442695, %v3459_v5  ;;  %7168 = vmatprep.subr.bf16.mxu1 %v12114_v10  ;;  %7232 = vmatprep.subr.bf16.mxu0 %v11982_v30  ;;  %v12120_v5 = vld [vmem:[#allocation150_spill] sm:$0xff] }
 0x7b0   :  { %v5243_v12 = vmul.f32 -1.442695, %v3461_v36  ;;  %v3530_v36 = vadd.f32 %v3529_v15, %v11856_v25  ;;  %v12125_v15 = vld [vmem:[#allocation160_spill] sm:$0xff] }
 0x7b1   :  { %8303 = vpow2.f32 %v5242_v52  ;;  %v5244_v52 = vmul.f32 -1.442695, %v3532_v58  ;;  %v12126_v58 = vld [vmem:[#allocation161_spill] sm:$0xff] }
 0x7b2   :  { %8305 = vpow2.f32 %v5243_v12  ;;  %7170 = vmatpush1.bf16.msra.mxu1 %v12115_v46  ;;  %7234 = vmatpush1.bf16.msra.mxu0 %v12116_v59  ;;  %v12121_v12 = vld [vmem:[#allocation153_spill] sm:$0xff]  ;;  %v12122_v59 = vld [vmem:[#allocation154_spill] sm:$0xff]  ;;  %v12123_v46 = vld [vmem:[#allocation155_spill] sm:$0xff] }
 0x7b3   :  { %7172 = vmatprep.subr.bf16.mxu1 %v12117_v39  ;;  %7236 = vmatprep.subr.bf16.mxu0 %v12118_v42  ;;  %v12124_v42 = vld [vmem:[#allocation156_spill] sm:$0xff]  ;;  %8307 = vpow2.f32 %v5244_v52 }
 0x7b4   :  { %8309 = vtanh.f32 %v3530_v36 }
 0x7b6   :  { %7174 = vmatpush1.bf16.msra.mxu1 %v12119_v4  ;;  %7238 = vmatpush1.bf16.msra.mxu0 %v12120_v5 }
 0x7b7   :  { %7176 = vmatprep.subr.bf16.mxu1 %v11989_v28  ;;  %7240 = vmatprep.subr.bf16.mxu0 %v11855_v61 }
 0x7ba   :  { %7178 = vmatpush1.bf16.msra.mxu1 %v12121_v12  ;;  %7242 = vmatpush1.bf16.msra.mxu0 %v12122_v59 }
 0x7bb   :  { %v8304_v39 = vpop.eup %8303  ;;  %7180 = vmatprep.subr.bf16.mxu1 %v12123_v46  ;;  %7244 = vmatprep.subr.bf16.mxu0 %v12124_v42  ;;  %v12127_v46 = vld [vmem:[#allocation162_spill] sm:$0xff] }
 0x7bc   :  { %v8306_v11 = vpop.eup %8305  ;;  %v3537_v4 = vadd.f32 1.0, %v8304_v39 }
 0x7bd   :  { %v3543_v5 = vadd.f32 1.0, %v8306_v11  ;;  %v8308_v39 = vpop.eup %8307 }
 0x7be   :  { %8311 = vrcp.f32 %v3537_v4  ;;  %7182 = vmatpush1.bf16.msra.mxu1 %v11861_v18  ;;  %7246 = vmatpush1.bf16.msra.mxu0 %v11994_v19  ;;  %v12128_v4 = vld [vmem:[#allocation166_spill] sm:$0xff]  ;;  %v8310_v52 = vpop.eup %8309 }
 0x7bf   :  { %8313 = vrcp.f32 %v3543_v5  ;;  %7184 = vmatprep.subr.bf16.mxu1 %v11995_v31  ;;  %7248 = vmatprep.subr.bf16.mxu0 %v12125_v15 }
 0x7c2   :  { %7186 = vmatpush1.bf16.msra.mxu1 %v12126_v58  ;;  %7250 = vmatpush1.bf16.msra.mxu0 %v12127_v46  ;;  %v3550_v58 = vadd.f32 1.0, %v8308_v39 }
 0x7c3   :  { %7188 = vmatprep.subr.bf16.mxu1 %v11999_v1  ;;  %7252 = vmatprep.subr.bf16.mxu0 %v11868_v32 }
 0x7c4   :  { %8315 = vrcp.f32 %v3550_v58 }
 0x7c6   :  { %7190 = vmatpush1.bf16.msra.mxu1 %v11869_v45  ;;  %7254 = vmatpush1.bf16.msra.mxu0 %v12128_v4 }
 0x7c7   :  { %7192 = vmatprep.subr.bf16.mxu1 %v12000_v37  ;;  %7256 = vmatprep.subr.bf16.mxu0 %v12001_v40 }
 0x7c8   :  { %v8312_v5 = vpop.eup %8311 }
 0x7c9   :  { %v8314_v36 = vpop.eup %8313  ;;  %v3554_v11 = vmul.f32 %v8312_v5, %v8310_v52  ;;  %v12131_v5 = vld [vmem:[#allocation13_spill] sm:$0xff]  ;;  %v12137_v52 = vmov 0.0  }
 0x7ca   :  { %v3553_v46 = vmul.f32 %v8314_v36, %v10185_v2  ;;  %7194 = vmatpush1.bf16.msra.mxu1 %v11741_v6  ;;  %7258 = vmatpush1.bf16.msra.mxu0 %v11742_v51  ;;  %v12132_v36 = vld [vmem:[#allocation14_spill] sm:$0xff] }
 0x7cb   :  { %7196 = vmatprep.subr.bf16.mxu1 %v11743_v56  ;;  %7260 = vmatprep.subr.bf16.mxu0 %v11744_v60 }
 0x7cc   :  { %v3555_v4 = vadd.f32 %v3554_v11, %v3553_v46  ;;  %v12133_v11 = vld [vmem:[#allocation15_spill] sm:$0xff] }
 0x7ce   :  { %7198 = vmatpush1.bf16.msra.mxu1 %v11745_v62  ;;  %7262 = vmatpush1.bf16.msra.mxu0 %v11746_v9  ;;  %8317 = vtanh.f32 %v3555_v4  ;;  %v10405_v39 = vsel %vm622_vm12, %v3555_v4, %v10185_v2  ;;  %v8316_v46 = vpop.eup %8315 }
 0x7cf   :  { %7200 = vmatprep.subr.bf16.mxu1 %v9485_v16  ;;  %7264 = vmatprep.subr.bf16.mxu0 %v9487_v44 }
 0x7d2   :  { %7202 = vmatpush1.bf16.msra.mxu1 %v9491_v43  ;;  %7266 = vmatpush1.bf16.msra.mxu0 %v9493_v55 }
 0x7d3   :  { %7204 = vmatprep.subr.bf16.mxu1 %v9497_v24  ;;  %7268 = vmatprep.subr.bf16.mxu0 %v9499_v17 }
 0x7d6   :  { %7206 = vmatpush1.bf16.msra.mxu1 %v9503_v8  ;;  %7270 = vmatpush1.bf16.msra.mxu0 %v9505_v23 }
 0x7d7   :  { %7208 = vmatprep.subr.bf16.mxu1 %v9509_v34  ;;  %7272 = vmatprep.subr.bf16.mxu0 %v9511_v27  ;;  %v12166_v27 = vld [vmem:[#allocation49_spill] sm:$0xff] }
 0x7d8   :  { %v8318_v2 = vpop.eup %8317 }
 0x7d9   :  { %v3557_v58 = vmul.f32 %v8318_v2, %v8316_v46  ;;  %v12134_v46 = vld [vmem:[#allocation16_spill] sm:$0xff]  ;;  %v12135_v2 = vld [vmem:[#allocation17_spill] sm:$0xff] }
 0x7da   :  { %7210 = vmatpush1.bf16.msra.mxu1 %v9515_v7  ;;  %7274 = vmatpush1.bf16.msra.mxu0 %v9517_v33  ;;  %v12142_v33 = vld [vmem:[#allocation23_spill] sm:$0xff]  ;;  %v12147_v7 = vld [vmem:[#allocation28_spill] sm:$0xff] }
 0x7db   :  { %v10422_v4 = vsel %vm622_vm12, %v3557_v58, %v10202_v13  ;;  %7276 = vmatprep.subr.bf16.mxu1 %v12131_v5  ;;  %7308 = vmatprep.subr.bf16.mxu0 %v12132_v36  ;;  %v12136_v13 = vld [vmem:[#allocation18_spill] sm:$0xff]  ;;  %v12138_v58 = vld [vmem:[#allocation19_spill] sm:$0xff]  ;;  %v12139_v5 = vld [vmem:[#allocation20_spill] sm:$0xff] }
 0x7dc   :  { %12130 = vst [vmem:[#allocation118_spill] sm:$0xff] %v10422_v4  ;;  %3965 = vmatprep.mubr.f32.mxu1 %v10422_v4  ;;  %4036 = vmatprep.mubr.f32.mxu0 %v10422_v4  ;;  %v12140_v36 = vld [vmem:[#allocation21_spill] sm:$0xff]  ;;  %v12141_v4 = vld [vmem:[#allocation22_spill] sm:$0xff] }
 0x7dd   :  { %3966 = vmatmul.mubr.f32.vlgmr.msra.gmra.mrb[36].mxu1 %v10341_v3  ;;  %4037 = vmatmul.mubr.f32.vlgmr.msra.gmra.mrb[44].mxu0 %v10341_v3 }
 0x7de   :  { %7278 = vmatpush1.bf16.msra.mxu1 %v12133_v11  ;;  %7310 = vmatpush1.bf16.msra.mxu0 %v12134_v46  ;;  %v12143_v11 = vld [vmem:[#allocation24_spill] sm:$0xff]  ;;  %v12144_v46 = vld [vmem:[#allocation25_spill] sm:$0xff] }
 0x7df   :  { %7280 = vmatprep.subr.bf16.mxu1 %v12135_v2  ;;  %7312 = vmatprep.subr.bf16.mxu0 %v12136_v13  ;;  %v12145_v2 = vld [vmem:[#allocation26_spill] sm:$0xff]  ;;  %v12146_v13 = vld [vmem:[#allocation27_spill] sm:$0xff] }
 0x7e0   :  { %4138 = vmatprep.mubr.f32.mxu1 %v12137_v52  ;;  %4209 = vmatprep.mubr.f32.mxu0 %v12137_v52  ;;  %v12148_v52 = vld [vmem:[#allocation29_spill] sm:$0xff] }
 0x7e2   :  { %7282 = vmatpush1.bf16.msra.mxu1 %v12138_v58  ;;  %7314 = vmatpush1.bf16.msra.mxu0 %v12139_v5  ;;  %v12149_v58 = vld [vmem:[#allocation30_spill] sm:$0xff]  ;;  %v12150_v5 = vld [vmem:[#allocation31_spill] sm:$0xff] }
 0x7e3   :  { %7284 = vmatprep.subr.bf16.mxu1 %v12140_v36  ;;  %7316 = vmatprep.subr.bf16.mxu0 %v12141_v4  ;;  %v12151_v36 = vld [vmem:[#allocation32_spill] sm:$0xff]  ;;  %v12152_v4 = vld [vmem:[#allocation33_spill] sm:$0xff] }
 0x7e6   :  { %7286 = vmatpush1.bf16.msra.mxu1 %v12142_v33  ;;  %7318 = vmatpush1.bf16.msra.mxu0 %v12143_v11  ;;  %v12153_v33 = vld [vmem:[#allocation34_spill] sm:$0xff]  ;;  %v12154_v11 = vld [vmem:[#allocation35_spill] sm:$0xff] }
 0x7e7   :  { %7288 = vmatprep.subr.bf16.mxu1 %v12144_v46  ;;  %7320 = vmatprep.subr.bf16.mxu0 %v12145_v2  ;;  %v12155_v46 = vld [vmem:[#allocation36_spill] sm:$0xff]  ;;  %v12156_v2 = vld [vmem:[#allocation37_spill] sm:$0xff] }
 0x7ea   :  { %7290 = vmatpush1.bf16.msra.mxu1 %v12146_v13  ;;  %7322 = vmatpush1.bf16.msra.mxu0 %v12147_v7  ;;  %v12157_v13 = vld [vmem:[#allocation38_spill] sm:$0xff]  ;;  %v12158_v7 = vld [vmem:[#allocation39_spill] sm:$0xff] }
 0x7eb   :  { %7292 = vmatprep.subr.bf16.mxu1 %v12148_v52  ;;  %7324 = vmatprep.subr.bf16.mxu0 %v12149_v58  ;;  %v12159_v52 = vld [vmem:[#allocation40_spill] sm:$0xff]  ;;  %v12160_v58 = vld [vmem:[#allocation41_spill] sm:$0xff] }
 0x7ee   :  { %7294 = vmatpush1.bf16.msra.mxu1 %v12150_v5  ;;  %7326 = vmatpush1.bf16.msra.mxu0 %v12151_v36  ;;  %v12161_v5 = vld [vmem:[#allocation42_spill] sm:$0xff]  ;;  %v12162_v36 = vld [vmem:[#allocation43_spill] sm:$0xff] }
 0x7ef   :  { %7296 = vmatprep.subr.bf16.mxu1 %v12152_v4  ;;  %7328 = vmatprep.subr.bf16.mxu0 %v12153_v33  ;;  %v12163_v4 = vld [vmem:[#allocation44_spill] sm:$0xff]  ;;  %v12164_v33 = vld [vmem:[#allocation45_spill] sm:$0xff] }
 0x7f2   :  { %7298 = vmatpush1.bf16.msra.mxu1 %v12154_v11  ;;  %7330 = vmatpush1.bf16.msra.mxu0 %v12155_v46  ;;  %v12165_v11 = vld [vmem:[#allocation46_spill] sm:$0xff] }
 0x7f3   :  { %7300 = vmatprep.subr.bf16.mxu1 %v12156_v2  ;;  %7332 = vmatprep.subr.bf16.mxu0 %v12157_v13 }
 0x7f6   :  { %7302 = vmatpush1.bf16.msra.mxu1 %v12158_v7  ;;  %7334 = vmatpush1.bf16.msra.mxu0 %v12159_v52 }
 0x7f7   :  { %7304 = vmatprep.subr.bf16.mxu1 %v12160_v58  ;;  %7336 = vmatprep.subr.bf16.mxu0 %v12161_v5 }
 0x7fa   :  { %7306 = vmatpush1.bf16.msra.mxu1 %v12162_v36  ;;  %7338 = vmatpush1.bf16.msra.mxu0 %v12163_v4 }
 0x7fb   :  { %7340 = vmatprep.subr.bf16.mxu1 %v12164_v33  ;;  %7404 = vmatprep.subr.bf16.mxu0 %v12165_v11 }
 0x82c   :  { %v3631_v46 = vpop.f32.mrb[12].mxu1  ;;  %v3702_v2 = vpop.f32.mrb[20].mxu0 }
 0x82d   :  { %v8015_v13 = vadd.f32 %v3631_v46, %v12166_v27  ;;  %v3633_v34 = vpop.f32.mrb[13].mxu1  ;;  %v3704_v7 = vpop.f32.mrb[21].mxu0  ;;  %v8031_v4 = vadd.f32 %v3702_v2, %v11622_v0  ;;  %v12171_v2 = vld [vmem:[#allocation61_spill] sm:$0xff] }
 0x82e   :  { %v8016_v52 = vadd.f32 %v3633_v34, %v8945_v26  ;;  %v8032_v5 = vadd.f32 %v3704_v7, %v8952_v50 }
 0x82f   :  { %v5245_v23 = vmul.f32 -1.442695, %v8015_v13 }
 0x830   :  { %v5246_v58 = vmul.f32 -1.442695, %v8016_v52  ;;  %v5247_v36 = vmul.f32 -1.442695, %v8032_v5 }
 0x831   :  { %8319 = vpow2.f32 %v5245_v23 }
 0x832   :  { %8321 = vpow2.f32 %v5246_v58  ;;  %v10468_v58 = vpop.permute.xlu0 %638 }
 0x833   :  { %8323 = vpow2.f32 %v5247_v36  ;;  %12167 = vst [vmem:[#allocation152_spill] sm:$0xff] %v10468_v58  ;;  %vm640_vm15 = vcmp.eq.s32.totalorder %v10468_v58, 1  ;;  %v12173_v36 = vld [vmem:[#allocation63_spill] sm:$0xff] }
 0x834   :  { %8325 = vtanh.f32 %v8031_v4  ;;  %v12174_v4 = vld [vmem:[#allocation64_spill] sm:$0xff] }
 0x83b   :  { %v8320_v33 = vpop.eup %8319 }
 0x83c   :  { %v8322_v8 = vpop.eup %8321  ;;  %v3710_v11 = vadd.f32 1.0, %v8320_v33 }
 0x83d   :  { %v3716_v17 = vadd.f32 1.0, %v8322_v8  ;;  %v8324_v46 = vpop.eup %8323 }
 0x83e   :  { %8327 = vrcp.f32 %v3710_v11  ;;  %v8326_v27 = vpop.eup %8325  ;;  %v3723_v23 = vadd.f32 1.0, %v8324_v46  ;;  %v12175_v46 = vld [vmem:[#allocation65_spill] sm:$0xff] }
 0x83f   :  { %8329 = vrcp.f32 %v3716_v17 }
 0x840   :  { %8331 = vrcp.f32 %v3723_v23  ;;  %v12179_v23 = vld [vmem:[#allocation69_spill] sm:$0xff] }
 0x848   :  { %v8328_v34 = vpop.eup %8327 }
 0x849   :  { %v8330_v13 = vpop.eup %8329  ;;  %v3727_v52 = vmul.f32 %v8328_v34, %v8326_v27  ;;  %v12176_v34 = vld [vmem:[#allocation66_spill] sm:$0xff] }
 0x84a   :  { %v3726_v7 = vmul.f32 %v8330_v13, %v10255_v49  ;;  %v8332_v17 = vpop.eup %8331  ;;  %v12177_v13 = vld [vmem:[#allocation67_spill] sm:$0xff] }
 0x84c   :  { %v3728_v5 = vadd.f32 %v3727_v52, %v3726_v7  ;;  %v12178_v52 = vld [vmem:[#allocation68_spill] sm:$0xff]  ;;  %v12180_v7 = vld [vmem:[#allocation70_spill] sm:$0xff] }
 0x84e   :  { %8333 = vtanh.f32 %v3728_v5  ;;  %v10475_v8 = vsel %vm640_vm15, %v3728_v5, %v10255_v49  ;;  %v12170_v49 = vld [vmem:[#allocation60_spill] sm:$0xff]  ;;  %v12181_v5 = vld [vmem:[#allocation71_spill] sm:$0xff] }
 0x84f   :  { %12168 = vst [vmem:[#allocation157_spill] sm:$0xff] %v10475_v8 }
 0x858   :  { %v8334_v33 = vpop.eup %8333 }
 0x859   :  { %v3730_v11 = vmul.f32 %v8334_v33, %v8332_v17  ;;  %v12182_v17 = vld [vmem:[#allocation72_spill] sm:$0xff]  ;;  %v12183_v33 = vld [vmem:[#allocation73_spill] sm:$0xff] }
 0x85b   :  { %v10480_v27 = vsel %vm640_vm15, %v3730_v11, %v10260_v14  ;;  %v12172_v14 = vld [vmem:[#allocation62_spill] sm:$0xff] }
 0x85c   :  { %12169 = vst [vmem:[#allocation164_spill] sm:$0xff] %v10480_v27  ;;  %4139 = vmatmul.mubr.f32.vlgmr.msra.gmra.mrb[14].mxu1 %v10480_v27  ;;  %4210 = vmatmul.mubr.f32.vlgmr.msra.gmra.mrb[22].mxu0 %v10480_v27  ;;  %v12184_v11 = vld [vmem:[#allocation74_spill] sm:$0xff] }
 0x85d   :  { %7342 = vmatpush1.bf16.msra.mxu1 %v11625_v35  ;;  %7406 = vmatpush1.bf16.msra.mxu0 %v11761_v20 }
 0x85e   :  { %7344 = vmatprep.subr.bf16.mxu1 %v11762_v48  ;;  %7408 = vmatprep.subr.bf16.mxu0 %v11897_v47 }
 0x861   :  { %7346 = vmatpush1.bf16.msra.mxu1 %v12032_v29  ;;  %7410 = vmatpush1.bf16.msra.mxu0 %v12170_v49 }
 0x862   :  { %7348 = vmatprep.subr.bf16.mxu1 %v12171_v2  ;;  %7412 = vmatprep.subr.bf16.mxu0 %v12172_v14 }
 0x865   :  { %7350 = vmatpush1.bf16.msra.mxu1 %v12173_v36  ;;  %7414 = vmatpush1.bf16.msra.mxu0 %v12174_v4 }
 0x866   :  { %7352 = vmatprep.subr.bf16.mxu1 %v12175_v46  ;;  %7416 = vmatprep.subr.bf16.mxu0 %v12176_v34  ;;  %v12188_v34 = vld [vmem:[#allocation77_spill] sm:$0xff]  ;;  %v12191_v46 = vld [vmem:[#allocation80_spill] sm:$0xff] }
 0x869   :  { %7354 = vmatpush1.bf16.msra.mxu1 %v12177_v13  ;;  %7418 = vmatpush1.bf16.msra.mxu0 %v12178_v52  ;;  %v12185_v13 = vld [vmem:[#allocation75_spill] sm:$0xff]  ;;  %v12186_v52 = vld [vmem:[#allocation76_spill] sm:$0xff] }
 0x86a   :  { %7356 = vmatprep.subr.bf16.mxu1 %v12179_v23  ;;  %7420 = vmatprep.subr.bf16.mxu0 %v12180_v7  ;;  %v12187_v23 = vld [vmem:[#allocation120_spill] sm:$0xff] }
 0x86d   :  { %7358 = vmatpush1.bf16.msra.mxu1 %v12181_v5  ;;  %7422 = vmatpush1.bf16.msra.mxu0 %v12182_v17  ;;  %v12189_v5 = vld [vmem:[#allocation78_spill] sm:$0xff] }
 0x86e   :  { %7360 = vmatprep.subr.bf16.mxu1 %v12183_v33  ;;  %7424 = vmatprep.subr.bf16.mxu0 %v12184_v11  ;;  %v12190_v11 = vld [vmem:[#allocation79_spill] sm:$0xff] }
 0x870   :  { %v3799_v58 = vpop.f32.mrb[34].mxu1  ;;  %v3870_v8 = vpop.f32.mrb[42].mxu0 }
 0x871   :  { %v3800_v0 = vadd.f32 %v3799_v58, %v12048_v63  ;;  %v3801_v50 = vpop.f32.mrb[35].mxu1  ;;  %v3872_v26 = vpop.f32.mrb[43].mxu0  ;;  %7362 = vmatpush1.bf16.msra.mxu1 %v12185_v13  ;;  %7426 = vmatpush1.bf16.msra.mxu0 %v12186_v52  ;;  %v12192_v58 = vld [vmem:[#allocation81_spill] sm:$0xff]  ;;  %v12193_v63 = vld [vmem:[#allocation82_spill] sm:$0xff]  ;;  %v12194_v13 = vld [vmem:[#allocation83_spill] sm:$0xff] }
 0x872   :  { %v3802_v7 = vadd.f32 %v3801_v50, %v12187_v23  ;;  %7364 = vmatprep.subr.bf16.mxu1 %v12188_v34  ;;  %7428 = vmatprep.subr.bf16.mxu0 %v12189_v5  ;;  %v3873_v52 = vadd.f32 %v3872_v26, %v12056_v38  ;;  %v12195_v50 = vld [vmem:[#allocation84_spill] sm:$0xff]  ;;  %v12196_v23 = vld [vmem:[#allocation85_spill] sm:$0xff] }
 0x873   :  { %v5248_v17 = vmul.f32 -1.442695, %v3800_v0 }
 0x874   :  { %v5249_v33 = vmul.f32 -1.442695, %v3802_v7  ;;  %v5250_v0 = vmul.f32 -1.442695, %v3873_v52  ;;  %v12197_v7 = vld [vmem:[#allocation122_spill] sm:$0xff] }
 0x875   :  { %8335 = vpow2.f32 %v5248_v17  ;;  %7366 = vmatpush1.bf16.msra.mxu1 %v12190_v11  ;;  %7430 = vmatpush1.bf16.msra.mxu0 %v12191_v46  ;;  %v3871_v17 = vadd.f32 %v3870_v8, %v12197_v7  ;;  %v12198_v11 = vld [vmem:[#allocation87_spill] sm:$0xff]  ;;  %v12204_v8 = vld [vmem:[#allocation93_spill] sm:$0xff]  ;;  %v12205_v52 = vld [vmem:[#allocation94_spill] sm:$0xff] }
 0x876   :  { %8337 = vpow2.f32 %v5249_v33  ;;  %7368 = vmatprep.subr.bf16.mxu1 %v12192_v58  ;;  %7432 = vmatprep.subr.bf16.mxu0 %v12193_v63  ;;  %v12199_v33 = vld [vmem:[#allocation88_spill] sm:$0xff]  ;;  %v12200_v58 = vld [vmem:[#allocation89_spill] sm:$0xff]  ;;  %v12201_v63 = vld [vmem:[#allocation90_spill] sm:$0xff] }
 0x877   :  { %8339 = vpow2.f32 %v5250_v0  ;;  %v12206_v7 = vld [vmem:[#allocation95_spill] sm:$0xff] }
 0x878   :  { %8341 = vtanh.f32 %v3871_v17  ;;  %v12210_v0 = vld [vmem:[#allocation99_spill] sm:$0xff] }
 0x879   :  { %7370 = vmatpush1.bf16.msra.mxu1 %v12194_v13  ;;  %7434 = vmatpush1.bf16.msra.mxu0 %v12195_v50 }
 0x87a   :  { %7372 = vmatprep.subr.bf16.mxu1 %v12196_v23  ;;  %7436 = vmatprep.subr.bf16.mxu0 %v12060_v57  ;;  %v12202_v23 = vld [vmem:[#allocation91_spill] sm:$0xff]  ;;  %v12203_v57 = vld [vmem:[#allocation92_spill] sm:$0xff] }
 0x87d   :  { %7374 = vmatpush1.bf16.msra.mxu1 %v12198_v11  ;;  %7438 = vmatpush1.bf16.msra.mxu0 %v12199_v33  ;;  %v12216_v33 = vld [vmem:[#allocation105_spill] sm:$0xff] }
 0x87e   :  { %7376 = vmatprep.subr.bf16.mxu1 %v12200_v58  ;;  %7440 = vmatprep.subr.bf16.mxu0 %v12201_v63  ;;  %v12207_v58 = vld [vmem:[#allocation96_spill] sm:$0xff]  ;;  %v12208_v63 = vld [vmem:[#allocation97_spill] sm:$0xff] }
 0x87f   :  { %v8336_v26 = vpop.eup %8335  ;;  %v12220_v11 = vld [vmem:[#allocation109_spill] sm:$0xff] }
 0x880   :  { %v8338_v38 = vpop.eup %8337  ;;  %v3878_v13 = vadd.f32 1.0, %v8336_v26  ;;  %v12209_v26 = vld [vmem:[#allocation98_spill] sm:$0xff] }
 0x881   :  { %v3884_v50 = vadd.f32 1.0, %v8338_v38  ;;  %7378 = vmatpush1.bf16.msra.mxu1 %v12202_v23  ;;  %7442 = vmatpush1.bf16.msra.mxu0 %v12203_v57  ;;  %v12211_v38 = vld [vmem:[#allocation100_spill] sm:$0xff]  ;;  %v8340_v17 = vpop.eup %8339  ;;  %v12212_v57 = vld [vmem:[#allocation101_spill] sm:$0xff] }
 0x882   :  { %8343 = vrcp.f32 %v3878_v13  ;;  %7380 = vmatprep.subr.bf16.mxu1 %v12204_v8  ;;  %7444 = vmatprep.subr.bf16.mxu0 %v12205_v52  ;;  %v12213_v13 = vld [vmem:[#allocation102_spill] sm:$0xff]  ;;  %v8342_v8 = vpop.eup %8341 }
 0x883   :  { %8345 = vrcp.f32 %v3884_v50 }
 0x885   :  { %7382 = vmatpush1.bf16.msra.mxu1 %v12206_v7  ;;  %7446 = vmatpush1.bf16.msra.mxu0 %v12207_v58  ;;  %v3891_v7 = vadd.f32 1.0, %v8340_v17  ;;  %v12214_v58 = vld [vmem:[#allocation104_spill] sm:$0xff] }
 0x886   :  { %7384 = vmatprep.subr.bf16.mxu1 %v12208_v63  ;;  %7448 = vmatprep.subr.bf16.mxu0 %v12209_v26  ;;  %v12215_v63 = vld [vmem:[#allocation57_spill] sm:$0xff] }
 0x887   :  { %8347 = vrcp.f32 %v3891_v7  ;;  %v12227_v7 = vld [vmem:[#allocation114_spill] sm:$0xff] }
 0x889   :  { %7386 = vmatpush1.bf16.msra.mxu1 %v12210_v0  ;;  %7450 = vmatpush1.bf16.msra.mxu0 %v12211_v38  ;;  %v12217_v0 = vld [vmem:[#allocation106_spill] sm:$0xff] }
 0x88a   :  { %7388 = vmatprep.subr.bf16.mxu1 %v12212_v57  ;;  %7452 = vmatprep.subr.bf16.mxu0 %v12213_v13  ;;  %v12218_v57 = vld [vmem:[#allocation107_spill] sm:$0xff]  ;;  %v12219_v13 = vld [vmem:[#allocation108_spill] sm:$0xff] }
 0x88c   :  { %v8344_v52 = vpop.eup %8343 }
 0x88d   :  { %v8346_v50 = vpop.eup %8345  ;;  %v3895_v23 = vmul.f32 %v8344_v52, %v8342_v8  ;;  %7390 = vmatpush1.bf16.msra.mxu1 %v12078_v22  ;;  %7454 = vmatpush1.bf16.msra.mxu0 %v12214_v58  ;;  %v12221_v8 = vld [vmem:[#allocation110_spill] sm:$0xff]  ;;  %v12239_v52 = vld [vmem:[#allocation132_spill] sm:$0xff] }
 0x88e   :  { %v3894_v26 = vmul.f32 %v8346_v50, %v12215_v63  ;;  %7392 = vmatprep.subr.bf16.mxu1 %v12216_v33  ;;  %7456 = vmatprep.subr.bf16.mxu0 %v12217_v0  ;;  %v12224_v50 = vld [vmem:[#allocation111_spill] sm:$0xff]  ;;  %v12225_v33 = vld [vmem:[#allocation112_spill] sm:$0xff] }
 0x890   :  { %v3896_v38 = vadd.f32 %v3895_v23, %v3894_v26  ;;  %v12226_v23 = vld [vmem:[#allocation113_spill] sm:$0xff]  ;;  %v12228_v26 = vld [vmem:[#allocation115_spill] sm:$0xff] }
 0x891   :  { %7394 = vmatpush1.bf16.msra.mxu1 %v12218_v57  ;;  %7458 = vmatpush1.bf16.msra.mxu0 %v12219_v13  ;;  %v12229_v13 = vld [vmem:[#allocation116_spill] sm:$0xff]  ;;  %v8348_v57 = vpop.eup %8347 }
 0x892   :  { %8349 = vtanh.f32 %v3896_v38  ;;  %7396 = vmatprep.subr.bf16.mxu1 %v12220_v11  ;;  %7460 = vmatprep.subr.bf16.mxu0 %v12221_v8  ;;  %v10548_v17 = vsel %vm634_vm14, %v3896_v38, %v12215_v63  ;;  %v12230_v11 = vld [vmem:[#allocation123_spill] sm:$0xff]  ;;  %v12231_v8 = vld [vmem:[#allocation124_spill] sm:$0xff] }
 0x893   :  { %12223 = vst [vmem:[#allocation165_spill] sm:$0xff] %v10548_v17  ;;  %v12232_v17 = vld [vmem:[#allocation125_spill] sm:$0xff] }
 0x895   :  { %7398 = vmatpush1.bf16.msra.mxu1 %v12224_v50  ;;  %7462 = vmatpush1.bf16.msra.mxu0 %v12225_v33 }
 0x896   :  { %7400 = vmatprep.subr.bf16.mxu1 %v12226_v23  ;;  %7464 = vmatprep.subr.bf16.mxu0 %v12227_v7  ;;  %v12248_v23 = vld [vmem:[#allocation141_spill] sm:$0xff] }
 0x899   :  { %7402 = vmatpush1.bf16.msra.mxu1 %v12228_v26  ;;  %7466 = vmatpush1.bf16.msra.mxu0 %v12229_v13  ;;  %v12240_v13 = vld [vmem:[#allocation133_spill] sm:$0xff]  ;;  %v12241_v26 = vld [vmem:[#allocation134_spill] sm:$0xff] }
 0x89a   :  { %7468 = vmatprep.subr.bf16.mxu1 %v12230_v11  ;;  %7532 = vmatprep.subr.bf16.mxu0 %v12231_v8  ;;  %v12233_v11 = vld [vmem:[#allocation126_spill] sm:$0xff]  ;;  %v12234_v8 = vld [vmem:[#allocation127_spill] sm:$0xff] }
 0x89c   :  { %v8350_v0 = vpop.eup %8349 }
 0x89d   :  { %v3898_v63 = vmul.f32 %v8350_v0, %v8348_v57  ;;  %v12235_v57 = vld [vmem:[#allocation128_spill] sm:$0xff]  ;;  %v12236_v0 = vld [vmem:[#allocation129_spill] sm:$0xff] }
 0x89f   :  { %v10561_v38 = vsel %vm634_vm14, %v3898_v63, %v10341_v3  ;;  %v12237_v3 = vld [vmem:[#allocation130_spill] sm:$0xff]  ;;  %v12238_v63 = vld [vmem:[#allocation131_spill] sm:$0xff] }
 0x8a0   :  { %4305 = vmatprep.mubr.f32.mxu1 %v10561_v38  ;;  %4376 = vmatprep.mubr.f32.mxu0 %v10561_v38 }
 0x8a1   :  { %4306 = vmatmul.mubr.f32.vlgmr.msra.gmra.mrb[38].mxu1 %v10480_v27  ;;  %4377 = vmatmul.mubr.f32.vlgmr.msra.gmra.mrb[46].mxu0 %v10480_v27  ;;  %v12247_v27 = vld [vmem:[#allocation55_spill] sm:$0xff] }
 0x8a2   :  { %7470 = vmatpush1.bf16.msra.mxu1 %v12232_v17  ;;  %7534 = vmatpush1.bf16.msra.mxu0 %v12233_v11  ;;  %v12242_v17 = vld [vmem:[#allocation136_spill] sm:$0xff]  ;;  %v12243_v11 = vld [vmem:[#allocation137_spill] sm:$0xff] }
 0x8a3   :  { %7472 = vmatprep.subr.bf16.mxu1 %v12234_v8  ;;  %7536 = vmatprep.subr.bf16.mxu0 %v12235_v57  ;;  %v12244_v8 = vld [vmem:[#allocation138_spill] sm:$0xff]  ;;  %v12245_v57 = vld [vmem:[#allocation139_spill] sm:$0xff] }
 0x8a6   :  { %7474 = vmatpush1.bf16.msra.mxu1 %v12236_v0  ;;  %7538 = vmatpush1.bf16.msra.mxu0 %v12237_v3  ;;  %v12246_v0 = vld [vmem:[#allocation140_spill] sm:$0xff] }
 0x8a7   :  { %7476 = vmatprep.subr.bf16.mxu1 %v12238_v63  ;;  %7540 = vmatprep.subr.bf16.mxu0 %v12239_v52 }
 0x8aa   :  { %7478 = vmatpush1.bf16.msra.mxu1 %v12240_v13  ;;  %7542 = vmatpush1.bf16.msra.mxu0 %v12241_v26 }
 0x8ab   :  { %7480 = vmatprep.subr.bf16.mxu1 %v12106_v21  ;;  %7544 = vmatprep.subr.bf16.mxu0 %v12242_v17 }
 0x8ae   :  { %7482 = vmatpush1.bf16.msra.mxu1 %v12243_v11  ;;  %7546 = vmatpush1.bf16.msra.mxu0 %v12244_v8  ;;  %v12250_v8 = vld [vmem:[#allocation146_spill] sm:$0xff] }
 0x8af   :  { %7484 = vmatprep.subr.bf16.mxu1 %v12245_v57  ;;  %7548 = vmatprep.subr.bf16.mxu0 %v12246_v0  ;;  %v12249_v0 = vld [vmem:[#allocation145_spill] sm:$0xff] }
 0x8b0   :  { %v3967_v3 = vpop.f32.mrb[36].mxu1  ;;  %v4038_v63 = vpop.f32.mrb[44].mxu0 }
 0x8b1   :  { %v3968_v52 = vadd.f32 %v3967_v3, %v12247_v27  ;;  %v3969_v7 = vpop.f32.mrb[37].mxu1  ;;  %v4040_v13 = vpop.f32.mrb[45].mxu0  ;;  %v12251_v3 = vld [vmem:[#allocation147_spill] sm:$0xff]  ;;  %v12252_v27 = vld [vmem:[#allocation148_spill] sm:$0xff] }
 0x8b2   :  { %v3970_v26 = vadd.f32 %v3969_v7, %v9692_v41  ;;  %7486 = vmatpush1.bf16.msra.mxu1 %v12248_v23  ;;  %7550 = vmatpush1.bf16.msra.mxu0 %v11980_v53  ;;  %v4041_v7 = vadd.f32 %v4040_v13, %v9703_v54  ;;  %v12253_v23 = vld [vmem:[#allocation149_spill] sm:$0xff] }
 0x8b3   :  { %v5251_v17 = vmul.f32 -1.442695, %v3968_v52  ;;  %7488 = vmatprep.subr.bf16.mxu1 %v12114_v10  ;;  %7552 = vmatprep.subr.bf16.mxu0 %v11982_v30  ;;  %v12254_v52 = vld [vmem:[#allocation150_spill] sm:$0xff] }
 0x8b4   :  { %v5252_v57 = vmul.f32 -1.442695, %v3970_v26  ;;  %v4039_v26 = vadd.f32 %v4038_v63, %v11856_v25  ;;  %v12256_v63 = vld [vmem:[#allocation161_spill] sm:$0xff] }
 0x8b5   :  { %8351 = vpow2.f32 %v5251_v17  ;;  %v5253_v17 = vmul.f32 -1.442695, %v4041_v7  ;;  %v12257_v7 = vld [vmem:[#allocation162_spill] sm:$0xff] }
 0x8b6   :  { %8353 = vpow2.f32 %v5252_v57  ;;  %7490 = vmatpush1.bf16.msra.mxu1 %v12249_v0  ;;  %7554 = vmatpush1.bf16.msra.mxu0 %v12250_v8 }
 0x8b7   :  { %7492 = vmatprep.subr.bf16.mxu1 %v12251_v3  ;;  %7556 = vmatprep.subr.bf16.mxu0 %v12252_v27  ;;  %v12255_v3 = vld [vmem:[#allocation155_spill] sm:$0xff]  ;;  %8355 = vpow2.f32 %v5253_v17 }
 0x8b8   :  { %8357 = vtanh.f32 %v4039_v26 }
 0x8ba   :  { %7494 = vmatpush1.bf16.msra.mxu1 %v12253_v23  ;;  %7558 = vmatpush1.bf16.msra.mxu0 %v12254_v52 }
 0x8bb   :  { %7496 = vmatprep.subr.bf16.mxu1 %v11989_v28  ;;  %7560 = vmatprep.subr.bf16.mxu0 %v11855_v61 }
 0x8be   :  { %7498 = vmatpush1.bf16.msra.mxu1 %v12121_v12  ;;  %7562 = vmatpush1.bf16.msra.mxu0 %v12122_v59 }
 0x8bf   :  { %v8352_v57 = vpop.eup %8351  ;;  %7500 = vmatprep.subr.bf16.mxu1 %v12255_v3  ;;  %7564 = vmatprep.subr.bf16.mxu0 %v12124_v42 }
 0x8c0   :  { %v8354_v13 = vpop.eup %8353  ;;  %v4046_v23 = vadd.f32 1.0, %v8352_v57 }
 0x8c1   :  { %v4052_v52 = vadd.f32 1.0, %v8354_v13  ;;  %v8356_v17 = vpop.eup %8355 }
 0x8c2   :  { %8359 = vrcp.f32 %v4046_v23  ;;  %7502 = vmatpush1.bf16.msra.mxu1 %v11861_v18  ;;  %7566 = vmatpush1.bf16.msra.mxu0 %v11994_v19  ;;  %v12258_v23 = vld [vmem:[#allocation166_spill] sm:$0xff]  ;;  %v8358_v26 = vpop.eup %8357 }
 0x8c3   :  { %8361 = vrcp.f32 %v4052_v52  ;;  %7504 = vmatprep.subr.bf16.mxu1 %v11995_v31  ;;  %7568 = vmatprep.subr.bf16.mxu0 %v12125_v15 }
 0x8c6   :  { %7506 = vmatpush1.bf16.msra.mxu1 %v12256_v63  ;;  %7570 = vmatpush1.bf16.msra.mxu0 %v12257_v7  ;;  %v4059_v63 = vadd.f32 1.0, %v8356_v17 }
 0x8c7   :  { %7508 = vmatprep.subr.bf16.mxu1 %v11999_v1  ;;  %7572 = vmatprep.subr.bf16.mxu0 %v11868_v32 }
 0x8c8   :  { %8363 = vrcp.f32 %v4059_v63  ;;  %v12260_v63 = vld [vmem:[#allocation180_spill] sm:$0xff] }
 0x8ca   :  { %7510 = vmatpush1.bf16.msra.mxu1 %v11869_v45  ;;  %7574 = vmatpush1.bf16.msra.mxu0 %v12258_v23 }
 0x8cb   :  { %7512 = vmatprep.subr.bf16.mxu1 %v12000_v37  ;;  %7576 = vmatprep.subr.bf16.mxu0 %v12001_v40 }
 0x8cc   :  { %v8360_v52 = vpop.eup %8359 }
 0x8cd   :  { %v8362_v57 = vpop.eup %8361  ;;  %v4063_v13 = vmul.f32 %v8360_v52, %v8358_v26  ;;  %v12262_v52 = vld [vmem:[#allocation182_spill] sm:$0xff]  ;;  %v12282_v26 = vld [vmem:[#allocation79_spill] sm:$0xff] }
 0x8ce   :  { %v4062_v7 = vmul.f32 %v8362_v57, %v10405_v39  ;;  %7514 = vmatpush1.bf16.msra.mxu1 %v11741_v6  ;;  %7578 = vmatpush1.bf16.msra.mxu0 %v11742_v51 }
 0x8cf   :  { %7516 = vmatprep.subr.bf16.mxu1 %v11743_v56  ;;  %7580 = vmatprep.subr.bf16.mxu0 %v11744_v60 }
 0x8d0   :  { %v4064_v23 = vadd.f32 %v4063_v13, %v4062_v7  ;;  %v12261_v7 = vld [vmem:[#allocation181_spill] sm:$0xff]  ;;  %v12263_v13 = vld [vmem:[#allocation183_spill] sm:$0xff] }
 0x8d2   :  { %7518 = vmatpush1.bf16.msra.mxu1 %v11745_v62  ;;  %7582 = vmatpush1.bf16.msra.mxu0 %v11746_v9  ;;  %8365 = vtanh.f32 %v4064_v23  ;;  %v10625_v17 = vsel %vm628_vm13, %v4064_v23, %v10405_v39  ;;  %v8364_v57 = vpop.eup %8363  ;;  %v12264_v39 = vld [vmem:[#allocation184_spill] sm:$0xff] }
 0x8d3   :  { %7520 = vmatprep.subr.bf16.mxu1 %v9485_v16  ;;  %7584 = vmatprep.subr.bf16.mxu0 %v9487_v44  ;;  %v12265_v44 = vld [vmem:[#allocation185_spill] sm:$0xff] }
 0x8d6   :  { %7522 = vmatpush1.bf16.msra.mxu1 %v9491_v43  ;;  %7586 = vmatpush1.bf16.msra.mxu0 %v9493_v55  ;;  %v12266_v43 = vld [vmem:[#allocation186_spill] sm:$0xff] }
 0x8d7   :  { %7524 = vmatprep.subr.bf16.mxu1 %v9497_v24  ;;  %7588 = vmatprep.subr.bf16.mxu0 %v12260_v63  ;;  %v12267_v55 = vld [vmem:[#allocation118_spill] sm:$0xff]  ;;  %v12268_v63 = vld [vmem:[#allocation45_spill] sm:$0xff] }
 0x8da   :  { %7526 = vmatpush1.bf16.msra.mxu1 %v12261_v7  ;;  %7590 = vmatpush1.bf16.msra.mxu0 %v12262_v52  ;;  %v12269_v7 = vld [vmem:[#allocation46_spill] sm:$0xff] }
 0x8db   :  { %7528 = vmatprep.subr.bf16.mxu1 %v12263_v13  ;;  %7592 = vmatprep.subr.bf16.mxu0 %v12264_v39 }
 0x8dc   :  { %v8366_v23 = vpop.eup %8365 }
 0x8dd   :  { %v4066_v16 = vmul.f32 %v8366_v23, %v8364_v57  ;;  %v12285_v57 = vld [vmem:[#allocation83_spill] sm:$0xff]  ;;  %v12286_v23 = vld [vmem:[#allocation84_spill] sm:$0xff] }
 0x8de   :  { %7530 = vmatpush1.bf16.msra.mxu1 %v12265_v44  ;;  %7594 = vmatpush1.bf16.msra.mxu0 %v12266_v43 }
 0x8df   :  { %v10642_v24 = vsel %vm628_vm13, %v4066_v16, %v12267_v55  ;;  %7596 = vmatprep.subr.bf16.mxu1 %v12268_v63  ;;  %7660 = vmatprep.subr.bf16.mxu0 %v12269_v7  ;;  %v12270_v16 = vld [vmem:[#allocation65_spill] sm:$0xff]  ;;  %v12271_v55 = vld [vmem:[#allocation66_spill] sm:$0xff] }
 0x8e0   :  { %4473 = vmatprep.mubr.f32.mxu1 %v10642_v24  ;;  %4544 = vmatprep.mubr.f32.mxu0 %v10642_v24  ;;  %v12283_v63 = vld [vmem:[#allocation81_spill] sm:$0xff]  ;;  %v12284_v7 = vld [vmem:[#allocation82_spill] sm:$0xff] }
 0x8e1   :  { %4474 = vmatmul.mubr.f32.vlgmr.msra.gmra.mrb[40].mxu1 %v10561_v38  ;;  %4545 = vmatmul.mubr.f32.vlgmr.msra.gmra.mrb[48].mxu0 %v10561_v38 }
 0x8e2   :  { %7598 = vmatpush1.bf16.msra.mxu1 %v11625_v35  ;;  %7662 = vmatpush1.bf16.msra.mxu0 %v11761_v20  ;;  %v12272_v35 = vld [vmem:[#allocation67_spill] sm:$0xff]  ;;  %v12273_v20 = vld [vmem:[#allocation68_spill] sm:$0xff] }
 0x8e3   :  { %7600 = vmatprep.subr.bf16.mxu1 %v11762_v48  ;;  %7664 = vmatprep.subr.bf16.mxu0 %v11897_v47  ;;  %v12274_v48 = vld [vmem:[#allocation69_spill] sm:$0xff]  ;;  %v12275_v47 = vld [vmem:[#allocation70_spill] sm:$0xff] }
 0x8e6   :  { %7602 = vmatpush1.bf16.msra.mxu1 %v12032_v29  ;;  %7666 = vmatpush1.bf16.msra.mxu0 %v12170_v49  ;;  %v12276_v29 = vld [vmem:[#allocation71_spill] sm:$0xff]  ;;  %v12277_v49 = vld [vmem:[#allocation72_spill] sm:$0xff] }
 0x8e7   :  { %7604 = vmatprep.subr.bf16.mxu1 %v12171_v2  ;;  %7668 = vmatprep.subr.bf16.mxu0 %v12172_v14  ;;  %v12278_v2 = vld [vmem:[#allocation73_spill] sm:$0xff]  ;;  %v12279_v14 = vld [vmem:[#allocation74_spill] sm:$0xff] }
 0x8ea   :  { %7606 = vmatpush1.bf16.msra.mxu1 %v12173_v36  ;;  %7670 = vmatpush1.bf16.msra.mxu0 %v12174_v4  ;;  %v12280_v36 = vld [vmem:[#allocation75_spill] sm:$0xff]  ;;  %v12281_v4 = vld [vmem:[#allocation76_spill] sm:$0xff] }
 0x8eb   :  { %7608 = vmatprep.subr.bf16.mxu1 %v12270_v16  ;;  %7672 = vmatprep.subr.bf16.mxu0 %v12271_v55  ;;  %v12287_v16 = vld [vmem:[#allocation85_spill] sm:$0xff]  ;;  %v12288_v55 = vld [vmem:[#allocation86_spill] sm:$0xff] }
 0x8ee   :  { %7610 = vmatpush1.bf16.msra.mxu1 %v12272_v35  ;;  %7674 = vmatpush1.bf16.msra.mxu0 %v12273_v20  ;;  %v12289_v35 = vld [vmem:[#allocation87_spill] sm:$0xff]  ;;  %v12292_v20 = vld [vmem:[#allocation90_spill] sm:$0xff] }
 0x8ef   :  { %7612 = vmatprep.subr.bf16.mxu1 %v12274_v48  ;;  %7676 = vmatprep.subr.bf16.mxu0 %v12275_v47  ;;  %v12294_v48 = vld [vmem:[#allocation92_spill] sm:$0xff]  ;;  %v12295_v47 = vld [vmem:[#allocation93_spill] sm:$0xff] }
 0x8f2   :  { %7614 = vmatpush1.bf16.msra.mxu1 %v12276_v29  ;;  %7678 = vmatpush1.bf16.msra.mxu0 %v12277_v49  ;;  %v12296_v29 = vld [vmem:[#allocation94_spill] sm:$0xff]  ;;  %v12297_v49 = vld [vmem:[#allocation95_spill] sm:$0xff] }
 0x8f3   :  { %7616 = vmatprep.subr.bf16.mxu1 %v12278_v2  ;;  %7680 = vmatprep.subr.bf16.mxu0 %v12279_v14  ;;  %v12298_v2 = vld [vmem:[#allocation96_spill] sm:$0xff]  ;;  %v12299_v14 = vld [vmem:[#allocation97_spill] sm:$0xff] }
 0x8f6   :  { %7618 = vmatpush1.bf16.msra.mxu1 %v12280_v36  ;;  %7682 = vmatpush1.bf16.msra.mxu0 %v12281_v4  ;;  %v12300_v36 = vld [vmem:[#allocation98_spill] sm:$0xff]  ;;  %v12301_v4 = vld [vmem:[#allocation99_spill] sm:$0xff] }
 0x8f7   :  { %7620 = vmatprep.subr.bf16.mxu1 %v12188_v34  ;;  %7684 = vmatprep.subr.bf16.mxu0 %v12189_v5  ;;  %v12290_v34 = vld [vmem:[#allocation88_spill] sm:$0xff]  ;;  %v12291_v5 = vld [vmem:[#allocation89_spill] sm:$0xff] }
 0x8fa   :  { %7622 = vmatpush1.bf16.msra.mxu1 %v12282_v26  ;;  %7686 = vmatpush1.bf16.msra.mxu0 %v12191_v46  ;;  %v12293_v46 = vld [vmem:[#allocation91_spill] sm:$0xff]  ;;  %v12302_v26 = vld [vmem:[#allocation100_spill] sm:$0xff] }
 0x8fb   :  { %7624 = vmatprep.subr.bf16.mxu1 %v12283_v63  ;;  %7688 = vmatprep.subr.bf16.mxu0 %v12284_v7  ;;  %v12303_v63 = vld [vmem:[#allocation101_spill] sm:$0xff]  ;;  %v12304_v7 = vld [vmem:[#allocation102_spill] sm:$0xff] }
 0x8fe   :  { %7626 = vmatpush1.bf16.msra.mxu1 %v12285_v57  ;;  %7690 = vmatpush1.bf16.msra.mxu0 %v12286_v23  ;;  %v12305_v57 = vld [vmem:[#allocation105_spill] sm:$0xff]  ;;  %v12306_v23 = vld [vmem:[#allocation106_spill] sm:$0xff] }
 0x8ff   :  { %7628 = vmatprep.subr.bf16.mxu1 %v12287_v16  ;;  %7692 = vmatprep.subr.bf16.mxu0 %v12288_v55  ;;  %v12307_v16 = vld [vmem:[#allocation107_spill] sm:$0xff]  ;;  %v12308_v55 = vld [vmem:[#allocation108_spill] sm:$0xff] }
 0x902   :  { %7630 = vmatpush1.bf16.msra.mxu1 %v12289_v35  ;;  %7694 = vmatpush1.bf16.msra.mxu0 %v12290_v34  ;;  %v12309_v35 = vld [vmem:[#allocation109_spill] sm:$0xff]  ;;  %v12310_v34 = vld [vmem:[#allocation110_spill] sm:$0xff] }
 0x903   :  { %7632 = vmatprep.subr.bf16.mxu1 %v12291_v5  ;;  %7696 = vmatprep.subr.bf16.mxu0 %v12292_v20  ;;  %v12311_v5 = vld [vmem:[#allocation113_spill] sm:$0xff]  ;;  %v12314_v20 = vld [vmem:[#allocation116_spill] sm:$0xff] }
 0x906   :  { %7634 = vmatpush1.bf16.msra.mxu1 %v12293_v46  ;;  %7698 = vmatpush1.bf16.msra.mxu0 %v12294_v48  ;;  %v12315_v46 = vld [vmem:[#allocation123_spill] sm:$0xff]  ;;  %v12316_v48 = vld [vmem:[#allocation124_spill] sm:$0xff] }
 0x907   :  { %7636 = vmatprep.subr.bf16.mxu1 %v12295_v47  ;;  %7700 = vmatprep.subr.bf16.mxu0 %v12296_v29 }
 0x90a   :  { %7638 = vmatpush1.bf16.msra.mxu1 %v12297_v49  ;;  %7702 = vmatpush1.bf16.msra.mxu0 %v12298_v2  ;;  %v12317_v49 = vld [vmem:[#allocation49_spill] sm:$0xff] }
 0x90b   :  { %7640 = vmatprep.subr.bf16.mxu1 %v12299_v14  ;;  %7704 = vmatprep.subr.bf16.mxu0 %v12300_v36  ;;  %v12318_v36 = vld [vmem:[#allocation50_spill] sm:$0xff] }
 0x90e   :  { %7642 = vmatpush1.bf16.msra.mxu1 %v12301_v4  ;;  %7706 = vmatpush1.bf16.msra.mxu0 %v12302_v26 }
 0x90f   :  { %7644 = vmatprep.subr.bf16.mxu1 %v12303_v63  ;;  %7708 = vmatprep.subr.bf16.mxu0 %v12304_v7  ;;  %v12319_v63 = vld [vmem:[#allocation52_spill] sm:$0xff] }
 0x912   :  { %7646 = vmatpush1.bf16.msra.mxu1 %v12078_v22  ;;  %7710 = vmatpush1.bf16.msra.mxu0 %v12214_v58  ;;  %v12312_v22 = vld [vmem:[#allocation114_spill] sm:$0xff]  ;;  %v12313_v58 = vld [vmem:[#allocation115_spill] sm:$0xff] }
 0x913   :  { %7648 = vmatprep.subr.bf16.mxu1 %v12305_v57  ;;  %7712 = vmatprep.subr.bf16.mxu0 %v12306_v23  ;;  %v12320_v23 = vld [vmem:[#allocation54_spill] sm:$0xff] }
 0x916   :  { %7650 = vmatpush1.bf16.msra.mxu1 %v12307_v16  ;;  %7714 = vmatpush1.bf16.msra.mxu0 %v12308_v55 }
 0x917   :  { %7652 = vmatprep.subr.bf16.mxu1 %v12309_v35  ;;  %7716 = vmatprep.subr.bf16.mxu0 %v12310_v34 }
 0x91a   :  { %7654 = vmatpush1.bf16.msra.mxu1 %v12224_v50  ;;  %7718 = vmatpush1.bf16.msra.mxu0 %v12225_v33 }
 0x91b   :  { %7656 = vmatprep.subr.bf16.mxu1 %v12311_v5  ;;  %7720 = vmatprep.subr.bf16.mxu0 %v12312_v22 }
 0x91e   :  { %7658 = vmatpush1.bf16.msra.mxu1 %v12313_v58  ;;  %7722 = vmatpush1.bf16.msra.mxu0 %v12314_v20 }
 0x91f   :  { %7724 = vmatprep.subr.bf16.mxu1 %v12315_v46  ;;  %7788 = vmatprep.subr.bf16.mxu0 %v12316_v48 }
 0x92f   :  { %v4140_v47 = vpop.f32.mrb[14].mxu1  ;;  %v4211_v29 = vpop.f32.mrb[22].mxu0 }
 0x930   :  { %v8017_v2 = vadd.f32 %v4140_v47, %v12317_v49  ;;  %v4142_v14 = vpop.f32.mrb[15].mxu1  ;;  %v4213_v50 = vpop.f32.mrb[23].mxu0  ;;  %v8033_v16 = vadd.f32 %v4211_v29, %v12320_v23 }
 0x931   :  { %v8018_v33 = vadd.f32 %v4142_v14, %v12318_v36  ;;  %v8034_v7 = vadd.f32 %v4213_v50, %v12319_v63  ;;  %v12321_v14 = vld [vmem:[#allocation157_spill] sm:$0xff] }
 0x932   :  { %v5254_v4 = vmul.f32 -1.442695, %v8017_v2 }
 0x933   :  { %v5255_v26 = vmul.f32 -1.442695, %v8018_v33  ;;  %v5256_v57 = vmul.f32 -1.442695, %v8034_v7  ;;  %v12322_v7 = vld [vmem:[#allocation119_spill] sm:$0xff] }
 0x934   :  { %8367 = vpow2.f32 %v5254_v4 }
 0x935   :  { %8369 = vpow2.f32 %v5255_v26 }
 0x936   :  { %8371 = vpow2.f32 %v5256_v57 }
 0x937   :  { %8373 = vtanh.f32 %v8033_v16 }
 0x93e   :  { %v8368_v55 = vpop.eup %8367 }
 0x93f   :  { %v8370_v35 = vpop.eup %8369  ;;  %v4219_v34 = vadd.f32 1.0, %v8368_v55  ;;  %v12323_v55 = vld [vmem:[#allocation120_spill] sm:$0xff] }
 0x940   :  { %v4225_v5 = vadd.f32 1.0, %v8370_v35  ;;  %v8372_v22 = vpop.eup %8371 }
 0x941   :  { %8375 = vrcp.f32 %v4219_v34  ;;  %v8374_v58 = vpop.eup %8373  ;;  %v4232_v2 = vadd.f32 1.0, %v8372_v22  ;;  %v12324_v22 = vld [vmem:[#allocation121_spill] sm:$0xff] }
 0x942   :  { %8377 = vrcp.f32 %v4225_v5 }
 0x943   :  { %8379 = vrcp.f32 %v4232_v2 }
 0x94b   :  { %v8376_v20 = vpop.eup %8375 }
 0x94c   :  { %v8378_v47 = vpop.eup %8377  ;;  %v4236_v49 = vmul.f32 %v8376_v20, %v8374_v58 }
 0x94d   :  { %v4235_v36 = vmul.f32 %v8378_v47, %v12321_v14  ;;  %v8380_v29 = vpop.eup %8379  ;;  %v12325_v47 = vld [vmem:[#allocation122_spill] sm:$0xff] }
 0x94f   :  { %v4237_v50 = vadd.f32 %v4236_v49, %v4235_v36 }
 0x951   :  { %8381 = vtanh.f32 %v4237_v50 }
 0x95b   :  { %v8382_v33 = vpop.eup %8381 }
 0x95c   :  { %v4239_v4 = vmul.f32 %v8382_v33, %v8380_v29 }
 0x974   :  { %v4307_v26 = vpop.f32.mrb[38].mxu1  ;;  %v4378_v63 = vpop.f32.mrb[46].mxu0 }
 0x975   :  { %v4308_v57 = vadd.f32 %v4307_v26, %v12322_v7  ;;  %v4309_v23 = vpop.f32.mrb[39].mxu1  ;;  %v4380_v16 = vpop.f32.mrb[47].mxu0  ;;  %v4379_v49 = vadd.f32 %v4378_v63, %v12325_v47  ;;  %v12345_v63 = vld [vmem:[#allocation55_spill] sm:$0xff]  ;;  %v12346_v7 = vld [vmem:[#allocation141_spill] sm:$0xff] }
 0x976   :  { %v4310_v35 = vadd.f32 %v4309_v23, %v12323_v55  ;;  %v4381_v58 = vadd.f32 %v4380_v16, %v12324_v22 }
 0x977   :  { %v5257_v34 = vmul.f32 -1.442695, %v4308_v57 }
 0x978   :  { %v5258_v5 = vmul.f32 -1.442695, %v4310_v35  ;;  %v5259_v20 = vmul.f32 -1.442695, %v4381_v58 }
 0x979   :  { %8383 = vpow2.f32 %v5257_v34  ;;  %v12326_v34 = vld [vmem:[#allocation165_spill] sm:$0xff] }
 0x97a   :  { %8385 = vpow2.f32 %v5258_v5 }
 0x97b   :  { %8387 = vpow2.f32 %v5259_v20 }
 0x97c   :  { %8389 = vtanh.f32 %v4379_v49 }
 0x983   :  { %v8384_v2 = vpop.eup %8383 }
 0x984   :  { %v8386_v14 = vpop.eup %8385  ;;  %v4386_v36 = vadd.f32 1.0, %v8384_v2  ;;  %v10729_v2 = vpop.permute.xlu1 %644 }
 0x985   :  { %v4392_v50 = vadd.f32 1.0, %v8386_v14  ;;  %v8388_v29 = vpop.eup %8387  ;;  %12329 = vst [vmem:[#allocation58_spill] sm:$0xff] %v10729_v2  ;;  %vm646_vm0 = vcmp.eq.s32.totalorder %v10729_v2, 1 }
 0x986   :  { %8391 = vrcp.f32 %v4386_v36  ;;  %v8390_v33 = vpop.eup %8389  ;;  %v4399_v35 = vadd.f32 1.0, %v8388_v29 }
 0x987   :  { %8393 = vrcp.f32 %v4392_v50  ;;  %v12330_v50 = vld [vmem:[#allocation164_spill] sm:$0xff] }
 0x988   :  { %8395 = vrcp.f32 %v4399_v35  ;;  %v4240_v29 = vsel %vm646_vm0, %v4239_v4, %v12330_v50  ;;  %v12336_v35 = vld [vmem:[#allocation130_spill] sm:$0xff]  ;;  %v12344_v50 = vld [vmem:[#allocation140_spill] sm:$0xff] }
 0x989   :  { %v12340_v4 = vld [vmem:[#allocation134_spill] sm:$0xff] }
 0x990   :  { %v8392_v26 = vpop.eup %8391 }
 0x991   :  { %v8394_v57 = vpop.eup %8393  ;;  %v4403_v23 = vmul.f32 %v8392_v26, %v8390_v33  ;;  %v12331_v33 = vld [vmem:[#allocation125_spill] sm:$0xff]  ;;  %v12332_v26 = vld [vmem:[#allocation126_spill] sm:$0xff] }
 0x992   :  { %v4402_v5 = vmul.f32 %v8394_v57, %v12326_v34  ;;  %v8396_v20 = vpop.eup %8395  ;;  %v12333_v57 = vld [vmem:[#allocation127_spill] sm:$0xff] }
 0x994   :  { %v4404_v16 = vadd.f32 %v4403_v23, %v4402_v5  ;;  %v12334_v23 = vld [vmem:[#allocation128_spill] sm:$0xff] }
 0x995   :  { %v12338_v5 = vld [vmem:[#allocation132_spill] sm:$0xff] }
 0x996   :  { %8397 = vtanh.f32 %v4404_v16  ;;  %v10727_v58 = vsel %vm640_vm15, %v4404_v16, %v12326_v34  ;;  %v12337_v34 = vld [vmem:[#allocation131_spill] sm:$0xff]  ;;  %v12339_v16 = vld [vmem:[#allocation133_spill] sm:$0xff] }
 0x997   :  { %12328 = vst [vmem:[#allocation117_spill] sm:$0xff] %v10727_v58 }
 0x9a0   :  { %v8398_v49 = vpop.eup %8397 }
 0x9a1   :  { %v4406_v14 = vmul.f32 %v8398_v49, %v8396_v20  ;;  %v12341_v20 = vld [vmem:[#allocation136_spill] sm:$0xff]  ;;  %v12342_v49 = vld [vmem:[#allocation138_spill] sm:$0xff] }
 0x9a3   :  { %v10735_v36 = vsel %vm640_vm15, %v4406_v14, %v10561_v38  ;;  %v12335_v38 = vld [vmem:[#allocation129_spill] sm:$0xff]  ;;  %v12343_v14 = vld [vmem:[#allocation139_spill] sm:$0xff] }
 0x9a4   :  { %4641 = vmatprep.mubr.f32.mxu1 %v10735_v36  ;;  %4712 = vmatprep.mubr.f32.mxu0 %v10735_v36 }
 0x9a5   :  { %4642 = vmatmul.mubr.f32.vlgmr.msra.gmra.mrb[42].mxu1 %v4240_v29  ;;  %4713 = vmatmul.mubr.f32.vlgmr.msra.gmra.mrb[50].mxu0 %v4240_v29 }
 0x9a6   :  { %7726 = vmatpush1.bf16.msra.mxu1 %v12331_v33  ;;  %7790 = vmatpush1.bf16.msra.mxu0 %v12332_v26 }
 0x9a7   :  { %7728 = vmatprep.subr.bf16.mxu1 %v12333_v57  ;;  %7792 = vmatprep.subr.bf16.mxu0 %v12334_v23 }
 0x9aa   :  { %7730 = vmatpush1.bf16.msra.mxu1 %v12335_v38  ;;  %7794 = vmatpush1.bf16.msra.mxu0 %v12336_v35 }
 0x9ab   :  { %7732 = vmatprep.subr.bf16.mxu1 %v12337_v34  ;;  %7796 = vmatprep.subr.bf16.mxu0 %v12338_v5 }
 0x9ae   :  { %7734 = vmatpush1.bf16.msra.mxu1 %v12339_v16  ;;  %7798 = vmatpush1.bf16.msra.mxu0 %v12340_v4 }
 0x9af   :  { %7736 = vmatprep.subr.bf16.mxu1 %v12106_v21  ;;  %7800 = vmatprep.subr.bf16.mxu0 %v12341_v20 }
 0x9b2   :  { %7738 = vmatpush1.bf16.msra.mxu1 %v12243_v11  ;;  %7802 = vmatpush1.bf16.msra.mxu0 %v12342_v49 }
 0x9b3   :  { %7740 = vmatprep.subr.bf16.mxu1 %v12343_v14  ;;  %7804 = vmatprep.subr.bf16.mxu0 %v12344_v50 }
 0x9b4   :  { %v4475_v29 = vpop.f32.mrb[40].mxu1  ;;  %v4546_v2 = vpop.f32.mrb[48].mxu0 }
 0x9b5   :  { %v4476_v58 = vadd.f32 %v4475_v29, %v12345_v63  ;;  %v4477_v47 = vpop.f32.mrb[41].mxu1  ;;  %v4548_v22 = vpop.f32.mrb[49].mxu0  ;;  %v12347_v29 = vld [vmem:[#allocation147_spill] sm:$0xff] }
 0x9b6   :  { %v4478_v55 = vadd.f32 %v4477_v47, %v9692_v41  ;;  %7742 = vmatpush1.bf16.msra.mxu1 %v12346_v7  ;;  %7806 = vmatpush1.bf16.msra.mxu0 %v11980_v53  ;;  %v4549_v47 = vadd.f32 %v4548_v22, %v9703_v54  ;;  %v12348_v41 = vld [vmem:[#allocation149_spill] sm:$0xff] }
 0x9b7   :  { %v5260_v20 = vmul.f32 -1.442695, %v4476_v58  ;;  %7744 = vmatprep.subr.bf16.mxu1 %v12114_v10  ;;  %7808 = vmatprep.subr.bf16.mxu0 %v11982_v30  ;;  %v12349_v58 = vld [vmem:[#allocation150_spill] sm:$0xff] }
 0x9b8   :  { %v5261_v14 = vmul.f32 -1.442695, %v4478_v55  ;;  %v5262_v55 = vmul.f32 -1.442695, %v4549_v47  ;;  %v12351_v47 = vld [vmem:[#allocation162_spill] sm:$0xff] }
 0x9b9   :  { %8399 = vpow2.f32 %v5260_v20  ;;  %v4547_v20 = vadd.f32 %v4546_v2, %v11856_v25  ;;  %v12350_v2 = vld [vmem:[#allocation161_spill] sm:$0xff] }
 0x9ba   :  { %8401 = vpow2.f32 %v5261_v14  ;;  %7746 = vmatpush1.bf16.msra.mxu1 %v12249_v0  ;;  %7810 = vmatpush1.bf16.msra.mxu0 %v12250_v8 }
 0x9bb   :  { %7748 = vmatprep.subr.bf16.mxu1 %v12347_v29  ;;  %7812 = vmatprep.subr.bf16.mxu0 %v12252_v27  ;;  %8403 = vpow2.f32 %v5262_v55 }
 0x9bc   :  { %8405 = vtanh.f32 %v4547_v20 }
 0x9be   :  { %7750 = vmatpush1.bf16.msra.mxu1 %v12348_v41  ;;  %7814 = vmatpush1.bf16.msra.mxu0 %v12349_v58 }
 0x9bf   :  { %7752 = vmatprep.subr.bf16.mxu1 %v11989_v28  ;;  %7816 = vmatprep.subr.bf16.mxu0 %v11855_v61 }
 0x9c2   :  { %7754 = vmatpush1.bf16.msra.mxu1 %v12121_v12  ;;  %7818 = vmatpush1.bf16.msra.mxu0 %v12122_v59 }
 0x9c3   :  { %v8400_v14 = vpop.eup %8399  ;;  %7756 = vmatprep.subr.bf16.mxu1 %v12255_v3  ;;  %7820 = vmatprep.subr.bf16.mxu0 %v12124_v42 }
 0x9c4   :  { %v8402_v22 = vpop.eup %8401  ;;  %v4554_v54 = vadd.f32 1.0, %v8400_v14 }
 0x9c5   :  { %v4560_v63 = vadd.f32 1.0, %v8402_v22  ;;  %v8404_v55 = vpop.eup %8403 }
 0x9c6   :  { %8407 = vrcp.f32 %v4554_v54  ;;  %7758 = vmatpush1.bf16.msra.mxu1 %v11861_v18  ;;  %7822 = vmatpush1.bf16.msra.mxu0 %v11994_v19  ;;  %v12352_v54 = vld [vmem:[#allocation166_spill] sm:$0xff]  ;;  %v8406_v20 = vpop.eup %8405  ;;  %v4567_v25 = vadd.f32 1.0, %v8404_v55 }
 0x9c7   :  { %8409 = vrcp.f32 %v4560_v63  ;;  %7760 = vmatprep.subr.bf16.mxu1 %v11995_v31  ;;  %7824 = vmatprep.subr.bf16.mxu0 %v12125_v15 }
 0x9c8   :  { %8411 = vrcp.f32 %v4567_v25  ;;  %v12360_v25 = vld [vmem:[#allocation180_spill] sm:$0xff] }
 0x9ca   :  { %7762 = vmatpush1.bf16.msra.mxu1 %v12350_v2  ;;  %7826 = vmatpush1.bf16.msra.mxu0 %v12351_v47 }
 0x9cb   :  { %7764 = vmatprep.subr.bf16.mxu1 %v11999_v1  ;;  %7828 = vmatprep.subr.bf16.mxu0 %v11868_v32 }
 0x9ce   :  { %7766 = vmatpush1.bf16.msra.mxu1 %v11869_v45  ;;  %7830 = vmatpush1.bf16.msra.mxu0 %v12352_v54 }
 0x9cf   :  { %7768 = vmatprep.subr.bf16.mxu1 %v12000_v37  ;;  %7832 = vmatprep.subr.bf16.mxu0 %v12001_v40 }
 0x9d0   :  { %v8408_v63 = vpop.eup %8407 }
 0x9d1   :  { %v8410_v14 = vpop.eup %8409  ;;  %v4571_v22 = vmul.f32 %v8408_v63, %v8406_v20  ;;  %v12355_v63 = vld [vmem:[#allocation175_spill] sm:$0xff] }
 0x9d2   :  { %v4570_v47 = vmul.f32 %v8410_v14, %v10625_v17  ;;  %7770 = vmatpush1.bf16.msra.mxu1 %v11741_v6  ;;  %7834 = vmatpush1.bf16.msra.mxu0 %v11742_v51  ;;  %v12356_v14 = vld [vmem:[#allocation176_spill] sm:$0xff]  ;;  %v12357_v51 = vld [vmem:[#allocation177_spill] sm:$0xff] }
 0x9d3   :  { %7772 = vmatprep.subr.bf16.mxu1 %v11743_v56  ;;  %7836 = vmatprep.subr.bf16.mxu0 %v11744_v60  ;;  %v12358_v56 = vld [vmem:[#allocation178_spill] sm:$0xff] }
 0x9d4   :  { %v4572_v54 = vadd.f32 %v4571_v22, %v4570_v47  ;;  %v12359_v47 = vld [vmem:[#allocation179_spill] sm:$0xff]  ;;  %v12361_v22 = vld [vmem:[#allocation181_spill] sm:$0xff] }
 0x9d6   :  { %7774 = vmatpush1.bf16.msra.mxu1 %v11745_v62  ;;  %7838 = vmatpush1.bf16.msra.mxu0 %v11746_v9  ;;  %8413 = vtanh.f32 %v4572_v54  ;;  %v10800_v55 = vsel %vm634_vm14, %v4572_v54, %v10625_v17  ;;  %v8412_v9 = vpop.eup %8411 }
 0x9d7   :  { %12354 = vst [vmem:[#allocation169_spill] sm:$0xff] %v10800_v55  ;;  %7776 = vmatprep.subr.bf16.mxu1 %v12355_v63  ;;  %7840 = vmatprep.subr.bf16.mxu0 %v12356_v14 }
 0x9da   :  { %7778 = vmatpush1.bf16.msra.mxu1 %v12357_v51  ;;  %7842 = vmatpush1.bf16.msra.mxu0 %v12358_v56 }
 0x9db   :  { %7780 = vmatprep.subr.bf16.mxu1 %v12359_v47  ;;  %7844 = vmatprep.subr.bf16.mxu0 %v12360_v25 }
 0x9de   :  { %7782 = vmatpush1.bf16.msra.mxu1 %v12361_v22  ;;  %7846 = vmatpush1.bf16.msra.mxu0 %v12262_v52 }
 0x9df   :  { %7784 = vmatprep.subr.bf16.mxu1 %v12263_v13  ;;  %7848 = vmatprep.subr.bf16.mxu0 %v12264_v39 }
 0x9e0   :  { %v8414_v17 = vpop.eup %8413 }
 0x9e1   :  { %v4574_v54 = vmul.f32 %v8414_v17, %v8412_v9  ;;  %v12363_v9 = vld [vmem:[#allocation139_spill] sm:$0xff] }
 0x9e2   :  { %7786 = vmatpush1.bf16.msra.mxu1 %v12265_v44  ;;  %7850 = vmatpush1.bf16.msra.mxu0 %v12266_v43 }
 0x9e3   :  { %v10817_v55 = vsel %vm634_vm14, %v4574_v54, %v10642_v24  ;;  %7852 = vmatprep.subr.bf16.mxu1 %v12315_v46  ;;  %7916 = vmatprep.subr.bf16.mxu0 %v12316_v48  ;;  %v12362_v24 = vld [vmem:[#allocation136_spill] sm:$0xff] }
 0x9e4   :  { %4808 = vmatprep.mubr.f32.mxu1 %v10817_v55  ;;  %4879 = vmatprep.mubr.f32.mxu0 %v10817_v55 }
 0x9e5   :  { %4809 = vmatmul.mubr.f32.vlgmr.msra.gmra.mrb[44].mxu1 %v10735_v36  ;;  %4880 = vmatmul.mubr.f32.vlgmr.msra.gmra.mrb[52].mxu0 %v10735_v36 }
 0x9e6   :  { %7854 = vmatpush1.bf16.msra.mxu1 %v12331_v33  ;;  %7918 = vmatpush1.bf16.msra.mxu0 %v12332_v26  ;;  %v12374_v26 = vld [vmem:[#allocation55_spill] sm:$0xff] }
 0x9e7   :  { %7856 = vmatprep.subr.bf16.mxu1 %v12333_v57  ;;  %7920 = vmatprep.subr.bf16.mxu0 %v12334_v23 }
 0x9ea   :  { %7858 = vmatpush1.bf16.msra.mxu1 %v12335_v38  ;;  %7922 = vmatpush1.bf16.msra.mxu0 %v12336_v35  ;;  %v12375_v35 = vld [vmem:[#allocation47_spill] sm:$0xff] }
 0x9eb   :  { %7860 = vmatprep.subr.bf16.mxu1 %v12337_v34  ;;  %7924 = vmatprep.subr.bf16.mxu0 %v12338_v5 }
 0x9ee   :  { %7862 = vmatpush1.bf16.msra.mxu1 %v12339_v16  ;;  %7926 = vmatpush1.bf16.msra.mxu0 %v12340_v4  ;;  %v12376_v4 = vld [vmem:[#allocation48_spill] sm:$0xff] }
 0x9ef   :  { %7864 = vmatprep.subr.bf16.mxu1 %v12106_v21  ;;  %7928 = vmatprep.subr.bf16.mxu0 %v12362_v24 }
 0x9f2   :  { %7866 = vmatpush1.bf16.msra.mxu1 %v12243_v11  ;;  %7930 = vmatpush1.bf16.msra.mxu0 %v12342_v49 }
 0x9f3   :  { %7868 = vmatprep.subr.bf16.mxu1 %v12363_v9  ;;  %7932 = vmatprep.subr.bf16.mxu0 %v12344_v50  ;;  %v12378_v9 = vld [vmem:[#allocation169_spill] sm:$0xff] }
 0x9f6   :  { %7870 = vmatpush1.bf16.msra.mxu1 %v12346_v7  ;;  %7934 = vmatpush1.bf16.msra.mxu0 %v11980_v53  ;;  %v12368_v53 = vld [vmem:[#allocation174_spill] sm:$0xff] }
 0x9f7   :  { %7872 = vmatprep.subr.bf16.mxu1 %v12114_v10  ;;  %7936 = vmatprep.subr.bf16.mxu0 %v11982_v30 }
 0x9fa   :  { %7874 = vmatpush1.bf16.msra.mxu1 %v12249_v0  ;;  %7938 = vmatpush1.bf16.msra.mxu0 %v12250_v8 }
 0x9fb   :  { %7876 = vmatprep.subr.bf16.mxu1 %v12347_v29  ;;  %7940 = vmatprep.subr.bf16.mxu0 %v12252_v27  ;;  %v12377_v29 = vld [vmem:[#allocation51_spill] sm:$0xff] }
 0x9fe   :  { %7878 = vmatpush1.bf16.msra.mxu1 %v12348_v41  ;;  %7942 = vmatpush1.bf16.msra.mxu0 %v12349_v58  ;;  %v12364_v41 = vld [vmem:[#allocation162_spill] sm:$0xff] }
 0x9ff   :  { %7880 = vmatprep.subr.bf16.mxu1 %v11989_v28  ;;  %7944 = vmatprep.subr.bf16.mxu0 %v11855_v61  ;;  %v12365_v61 = vld [vmem:[#allocation166_spill] sm:$0xff]  ;;  %v12367_v28 = vld [vmem:[#allocation171_spill] sm:$0xff] }
 0xa02   :  { %7882 = vmatpush1.bf16.msra.mxu1 %v12121_v12  ;;  %7946 = vmatpush1.bf16.msra.mxu0 %v12122_v59 }
 0xa03   :  { %7884 = vmatprep.subr.bf16.mxu1 %v12255_v3  ;;  %7948 = vmatprep.subr.bf16.mxu0 %v12124_v42  ;;  %v12372_v42 = vld [vmem:[#allocation122_spill] sm:$0xff]  ;;  %v12373_v3 = vld [vmem:[#allocation117_spill] sm:$0xff] }
 0xa06   :  { %7886 = vmatpush1.bf16.msra.mxu1 %v11861_v18  ;;  %7950 = vmatpush1.bf16.msra.mxu0 %v11994_v19  ;;  %v12366_v18 = vld [vmem:[#allocation170_spill] sm:$0xff] }
 0xa07   :  { %7888 = vmatprep.subr.bf16.mxu1 %v11995_v31  ;;  %7952 = vmatprep.subr.bf16.mxu0 %v12125_v15  ;;  %v12371_v31 = vld [vmem:[#allocation121_spill] sm:$0xff] }
 0xa0a   :  { %7890 = vmatpush1.bf16.msra.mxu1 %v12350_v2  ;;  %7954 = vmatpush1.bf16.msra.mxu0 %v12364_v41 }
 0xa0b   :  { %7892 = vmatprep.subr.bf16.mxu1 %v11999_v1  ;;  %7956 = vmatprep.subr.bf16.mxu0 %v11868_v32 }
 0xa0e   :  { %7894 = vmatpush1.bf16.msra.mxu1 %v11869_v45  ;;  %7958 = vmatpush1.bf16.msra.mxu0 %v12365_v61  ;;  %v12370_v45 = vld [vmem:[#allocation120_spill] sm:$0xff] }
 0xa0f   :  { %7896 = vmatprep.subr.bf16.mxu1 %v12000_v37  ;;  %7960 = vmatprep.subr.bf16.mxu0 %v12001_v40 }
 0xa12   :  { %7898 = vmatpush1.bf16.msra.mxu1 %v11741_v6  ;;  %7962 = vmatpush1.bf16.msra.mxu0 %v12366_v18 }
 0xa13   :  { %7900 = vmatprep.subr.bf16.mxu1 %v12367_v28  ;;  %7964 = vmatprep.subr.bf16.mxu0 %v11744_v60 }
 0xa16   :  { %7902 = vmatpush1.bf16.msra.mxu1 %v11745_v62  ;;  %7966 = vmatpush1.bf16.msra.mxu0 %v12368_v53 }
 0xa17   :  { %7904 = vmatprep.subr.bf16.mxu1 %v12355_v63  ;;  %7968 = vmatprep.subr.bf16.mxu0 %v12356_v14 }
 0xa1a   :  { %7906 = vmatpush1.bf16.msra.mxu1 %v12357_v51  ;;  %7970 = vmatpush1.bf16.msra.mxu0 %v12358_v56  ;;  %v12369_v51 = vld [vmem:[#allocation119_spill] sm:$0xff] }
 0xa1b   :  { %7908 = vmatprep.subr.bf16.mxu1 %v12359_v47  ;;  %7972 = vmatprep.subr.bf16.mxu0 %v12360_v25 }
 0xa1e   :  { %7910 = vmatpush1.bf16.msra.mxu1 %v12361_v22  ;;  %7974 = vmatpush1.bf16.msra.mxu0 %v12262_v52 }
 0xa1f   :  { %7912 = vmatprep.subr.bf16.mxu1 %v12263_v13  ;;  %7976 = vmatprep.subr.bf16.mxu0 %v12264_v39 }
 0xa22   :  { %7914 = vmatpush1.bf16.msra.mxu1 %v12265_v44  ;;  %7978 = vmatpush1.bf16.msra.mxu0 %v12266_v43 }
 0xa78   :  { %v4643_v60 = vpop.f32.mrb[42].mxu1  ;;  %v4714_v6 = vpop.f32.mrb[50].mxu0 }
 0xa79   :  { %v4644_v62 = vadd.f32 %v4643_v60, %v12369_v51  ;;  %v4645_v56 = vpop.f32.mrb[43].mxu1  ;;  %v4716_v32 = vpop.f32.mrb[51].mxu0  ;;  %v4715_v10 = vadd.f32 %v4714_v6, %v12372_v42  ;;  %v5085_v42 = vld [vmem:[%s10986_s11 + $0x30] sm:$0xff] }
 0xa7a   :  { %v4646_v30 = vadd.f32 %v4645_v56, %v12370_v45  ;;  %v4717_v37 = vadd.f32 %v4716_v32, %v12371_v31  ;;  %v5079_v32 = vld [vmem:[%s10986_s11] sm:$0xff]  ;;  %v5080_v45 = vld [vmem:[%s10986_s11 + $0x8] sm:$0xff] }
 0xa7b   :  { %v5263_v1 = vmul.f32 -1.442695, %v4644_v62  ;;  %v5083_v31 = vld [vmem:[%s10986_s11 + $0x20] sm:$0xff] }
 0xa7c   :  { %v5264_v19 = vmul.f32 -1.442695, %v4646_v30  ;;  %v5265_v40 = vmul.f32 -1.442695, %v4717_v37  ;;  %v8566_v30 = vmov 0.0|0.0   ;;  %v5084_v37 = vld [vmem:[%s10986_s11 + $0x28] sm:$0xff] }
 0xa7d   :  { %8415 = vpow2.f32 %v5263_v1  ;;  %7979 = vmatprep.subr.bf16.mxu1 %v8566_v30  ;;  %v5081_v1 = vld [vmem:[%s10986_s11 + $0x10] sm:$0xff] }
 0xa7e   :  { %8417 = vpow2.f32 %v5264_v19 }
 0xa7f   :  { %8419 = vpow2.f32 %v5265_v40  ;;  %v7986_v40 = vpack.c.bf16 %v5084_v37, %v5083_v31 }
 0xa80   :  { %8421 = vtanh.f32 %v4715_v10  ;;  %v5086_v10 = vld [vmem:[%s10986_s11 + $0x38] sm:$0xff] }
 0xa87   :  { %v8416_v44 = vpop.eup %8415 }
 0xa88   :  { %v8418_v21 = vpop.eup %8417  ;;  %v4722_v43 = vadd.f32 1.0, %v8416_v44  ;;  %v7989_v44 = vpack.c.bf16 %v5086_v10, %v5085_v42 }
 0xa89   :  { %v4728_v59 = vadd.f32 1.0, %v8418_v21  ;;  %v8420_v12 = vpop.eup %8419  ;;  %v5087_v21 = vld [vmem:[%s10986_s11 + $0x40] sm:$0xff] }
 0xa8a   :  { %8423 = vrcp.f32 %v4722_v43  ;;  %v8422_v15 = vpop.eup %8421  ;;  %v4735_v0 = vadd.f32 1.0, %v8420_v12  ;;  %v5088_v43 = vld [vmem:[%s10986_s11 + $0x48] sm:$0xff]  ;;  %v5089_v12 = vld [vmem:[%s10986_s11 + $0x50] sm:$0xff] }
 0xa8b   :  { %8425 = vrcp.f32 %v4728_v59  ;;  %v7992_v59 = vpack.c.bf16 %v5088_v43, %v5087_v21 }
 0xa8c   :  { %8427 = vrcp.f32 %v4735_v0  ;;  %v12381_v0 = vmov 0.0  }
 0xa94   :  { %v8424_v27 = vpop.eup %8423 }
 0xa95   :  { %v8426_v11 = vpop.eup %8425  ;;  %v4739_v8 = vmul.f32 %v8424_v27, %v8422_v15  ;;  %v5090_v15 = vld [vmem:[%s10986_s11 + $0x58] sm:$0xff] }
 0xa96   :  { %v4738_v52 = vmul.f32 %v8426_v11, %v12373_v3  ;;  %v8428_v39 = vpop.eup %8427  ;;  %v7995_v27 = vpack.c.bf16 %v5090_v15, %v5089_v12  ;;  %v5091_v11 = vld [vmem:[%s10986_s11 + $0x60] sm:$0xff] }
 0xa98   :  { %v4740_v13 = vadd.f32 %v4739_v8, %v4738_v52  ;;  %v5092_v8 = vld [vmem:[%s10986_s11 + $0x68] sm:$0xff]  ;;  %v5093_v52 = vld [vmem:[%s10986_s11 + $0x70] sm:$0xff] }
 0xa99   :  { %v7998_v3 = vpack.c.bf16 %v5092_v8, %v5091_v11 }
 0xa9a   :  { %8429 = vtanh.f32 %v4740_v13  ;;  %v5094_v13 = vld [vmem:[%s10986_s11 + $0x78] sm:$0xff] }
 0xaa4   :  { %v8430_v46 = vpop.eup %8429 }
 0xaa5   :  { %v4742_v48 = vmul.f32 %v8430_v46, %v8428_v39  ;;  %v8001_v39 = vpack.c.bf16 %v5094_v13, %v5093_v52 }
 0xaa7   :  { %v4743_v56 = vsel %vm646_vm0, %v4742_v48, %v10735_v36  ;;  %v5082_v36 = vld [vmem:[%s10986_s11 + $0x18] sm:$0xff] }
 0xaa8   :  { %v7983_v19 = vpack.c.bf16 %v5082_v36, %v5081_v1 }
 0xab8   :  { %v4810_v7 = vpop.f32.mrb[44].mxu1  ;;  %v4881_v33 = vpop.f32.mrb[52].mxu0 }
 0xab9   :  { %v4811_v57 = vadd.f32 %v4810_v7, %v12374_v26  ;;  %v4812_v23 = vpop.f32.mrb[45].mxu1  ;;  %v4883_v38 = vpop.f32.mrb[53].mxu0  ;;  %v4882_v58 = vadd.f32 %v4881_v33, %v12377_v29 }
 0xaba   :  { %v4813_v34 = vadd.f32 %v4812_v23, %v12375_v35  ;;  %v4884_v49 = vadd.f32 %v4883_v38, %v12376_v4 }
 0xabb   :  { %v5266_v5 = vmul.f32 -1.442695, %v4811_v57 }
 0xabc   :  { %v5267_v16 = vmul.f32 -1.442695, %v4813_v34  ;;  %v5268_v50 = vmul.f32 -1.442695, %v4884_v49 }
 0xabd   :  { %8431 = vpow2.f32 %v5266_v5 }
 0xabe   :  { %8433 = vpow2.f32 %v5267_v16 }
 0xabf   :  { %8435 = vpow2.f32 %v5268_v50 }
 0xac0   :  { %8437 = vtanh.f32 %v4882_v58 }
 0xac7   :  { %v8432_v2 = vpop.eup %8431 }
 0xac8   :  { %v8434_v20 = vpop.eup %8433  ;;  %v4889_v63 = vadd.f32 1.0, %v8432_v2 }
 0xac9   :  { %v4895_v14 = vadd.f32 1.0, %v8434_v20  ;;  %v8436_v47 = vpop.eup %8435 }
 0xaca   :  { %8439 = vrcp.f32 %v4889_v63  ;;  %v8438_v25 = vpop.eup %8437  ;;  %v4902_v24 = vadd.f32 1.0, %v8436_v47 }
 0xacb   :  { %8441 = vrcp.f32 %v4895_v14 }
 0xacc   :  { %8443 = vrcp.f32 %v4902_v24 }
 0xad4   :  { %v8440_v22 = vpop.eup %8439 }
 0xad5   :  { %v8442_v17 = vpop.eup %8441  ;;  %v4906_v54 = vmul.f32 %v8440_v22, %v8438_v25 }
 0xad6   :  { %v4905_v41 = vmul.f32 %v8442_v17, %v12378_v9  ;;  %v8444_v53 = vpop.eup %8443 }
 0xad8   :  { %v4907_v61 = vadd.f32 %v4906_v54, %v4905_v41 }
 0xada   :  { %8445 = vtanh.f32 %v4907_v61  ;;  %v10900_v28 = vsel %vm640_vm15, %v4907_v61, %v12378_v9  ;;  %v5272_v9 = vld [vmem:[%s10987_s12] ss:$0 sm:$0xff] }
 0xae4   :  { %v8446_v60 = vpop.eup %8445 }
 0xae5   :  { %v4909_v6 = vmul.f32 %v8446_v60, %v8444_v53 }
 0xae7   :  { %v10905_v51 = vsel %vm640_vm15, %v4909_v6, %v10817_v55  ;;  %v7980_v55 = vpack.c.bf16 %v5080_v45, %v5079_v32 }
 0xae8   :  { %4976 = vmatprep.mubr.f32.mxu1 %v10905_v51  ;;  %5047 = vmatprep.mubr.f32.mxu0 %v10905_v51 }
 0xae9   :  { %4977 = vmatmul.mubr.f32.vlgmr.msra.gmra.mrb[46].mxu1 %v4743_v56  ;;  %5048 = vmatmul.mubr.f32.vlgmr.msra.gmra.mrb[54].mxu0 %v4743_v56 }
 0xaea   :  { %7981 = vmatpush3.bf16.msra.mxu1 %v7980_v55  ;;  %5348 = vmatprep.mubr.msk.f32.mxu1 %vm8567_vm1, %v12381_v0 }
 0xaeb   :  { %7982 = vmatprep.subr.bf16.mxu1 %v8566_v30 }
 0xaee   :  { %7984 = vmatpush3.bf16.msra.mxu1 %v7983_v19 }
 0xaef   :  { %7985 = vmatprep.subr.bf16.mxu1 %v8566_v30 }
 0xaf2   :  { %7987 = vmatpush3.bf16.msra.mxu1 %v7986_v40 }
 0xaf3   :  { %7988 = vmatprep.subr.bf16.mxu1 %v8566_v30 }
 0xaf6   :  { %7990 = vmatpush3.bf16.msra.mxu1 %v7989_v44 }
 0xaf7   :  { %7991 = vmatprep.subr.bf16.mxu1 %v8566_v30 }
 0xafa   :  { %7993 = vmatpush3.bf16.msra.mxu1 %v7992_v59 }
 0xafb   :  { %7994 = vmatprep.subr.bf16.mxu1 %v8566_v30 }
 0xafe   :  { %7996 = vmatpush3.bf16.msra.mxu1 %v7995_v27 }
 0xaff   :  { %7997 = vmatprep.subr.bf16.mxu1 %v8566_v30 }
 0xb02   :  { %7999 = vmatpush3.bf16.msra.mxu1 %v7998_v3 }
 0xb03   :  { %8000 = vmatprep.subr.bf16.mxu1 %v8566_v30 }
 0xb06   :  { %8002 = vmatpush3.bf16.msra.mxu1 %v8001_v39 }
 0xbbc   :  { %v4978_v46 = vpop.f32.mrb[46].mxu1  ;;  %v5049_v48 = vpop.f32.mrb[54].mxu0 }
 0xbbd   :  { %v4979_v7 = vadd.f32 %v4978_v46, %v12374_v26  ;;  %v4980_v33 = vpop.f32.mrb[47].mxu1  ;;  %v5051_v57 = vpop.f32.mrb[55].mxu0  ;;  %v5050_v49 = vadd.f32 %v5049_v48, %v12377_v29 }
 0xbbe   :  { %v4981_v23 = vadd.f32 %v4980_v33, %v12375_v35  ;;  %v5052_v5 = vadd.f32 %v5051_v57, %v12376_v4 }
 0xbbf   :  { %v5269_v38 = vmul.f32 -1.442695, %v4979_v7 }
 0xbc0   :  { %v5270_v34 = vmul.f32 -1.442695, %v4981_v23  ;;  %v5271_v16 = vmul.f32 -1.442695, %v5052_v5 }
 0xbc1   :  { %8447 = vpow2.f32 %v5269_v38 }
 0xbc2   :  { %8449 = vpow2.f32 %v5270_v34 }
 0xbc3   :  { %8451 = vpow2.f32 %v5271_v16 }
 0xbc4   :  { %8453 = vtanh.f32 %v5050_v49 }
 0xbcb   :  { %v8448_v50 = vpop.eup %8447 }
 0xbcc   :  { %v8450_v58 = vpop.eup %8449  ;;  %v5057_v2 = vadd.f32 1.0, %v8448_v50 }
 0xbcd   :  { %v5063_v20 = vadd.f32 1.0, %v8450_v58  ;;  %v8452_v26 = vpop.eup %8451 }
 0xbce   :  { %8455 = vrcp.f32 %v5057_v2  ;;  %v8454_v63 = vpop.eup %8453  ;;  %v5070_v25 = vadd.f32 1.0, %v8452_v26 }
 0xbcf   :  { %8457 = vrcp.f32 %v5063_v20 }
 0xbd0   :  { %8459 = vrcp.f32 %v5070_v25 }
 0xbd8   :  { %v8456_v35 = vpop.eup %8455 }
 0xbd9   :  { %v8458_v14 = vpop.eup %8457  ;;  %v5074_v47 = vmul.f32 %v8456_v35, %v8454_v63 }
 0xbda   :  { %v5073_v22 = vmul.f32 %v8458_v14, %v10900_v28  ;;  %v8460_v29 = vpop.eup %8459 }
 0xbdc   :  { %v5075_v4 = vadd.f32 %v5074_v47, %v5073_v22 }
 0xbde   :  { %8461 = vtanh.f32 %v5075_v4 }
 0xbe8   :  { %v8462_v17 = vpop.eup %8461 }
 0xbe9   :  { %v5077_v54 = vmul.f32 %v8462_v17, %v8460_v29 }
 0xbeb   :  { %v5078_v24 = vsel %vm646_vm0, %v5077_v54, %v10905_v51 }
 0xbec   :  { %5349 = vmatmul.mubr.f32.vlgmr.msra.gmra.mrb[48].mxu1 %v5078_v24 }
 0xcbf   :  { %v5168_v41 = vpop.f32.mrb[48].mxu1 }
 0xcc0   :  { %v5169_v61 = vadd.f32 %v5272_v9, %v5168_v41  ;;  %v5350_v18 = vpop.f32.mrb[49].mxu1 }
 0xcc2   :  { %5173 = vst.msk [vmem:[%s10988_s13] sm:$0xff] %vm5172_vm2, %v5169_v61 }
 0xcc3   :  { %5178 = vsyncpa [#allocation4], 1 }
 0xcc4   :  { %5179 = vsyncpa [#allocation6], 1 }
 0xcc5   :  { %5180 = vsyncpa [#allocation9], 1 }

</bundles_post_ra>
